<compile_context>
chip_gen: v7x
topology: tpu7x:2x2x1
jax: 0.10.0
libtpu: 0.0.40
codegen_flags: <defaults>
</compile_context>

<pallas_src>
import functools

import jax
import jax.numpy as jnp
from jax.experimental import pallas as pl
from jax.experimental.pallas import tpu as pltpu


def _round_up(x, m):
    return ((x + m - 1) // m) * m


_BIG = 1e30
_VMEM_LIMIT = 64 * 1024 * 1024   # explicit scoped-VMEM budget (v7x: 64 MiB physical)


def _compiler_params():
    return pltpu.CompilerParams(dimension_semantics=("parallel",),
                                vmem_limit_bytes=_VMEM_LIMIT)


def _choose_tiling(M):
    """Pick (tm, Mp).  Prefer the largest row tile (per-grid-step overhead ~0.35us,
    small tiles waste MXU rows); only split into >=2 grid tiles -- which only helps
    the 2-TensorCore v7x -- when every tile still has >= 256 rows."""
    for tm in (1024, 512, 256):
        if M % tm == 0 and M // tm >= 2:
            return tm, M
    if M <= 2048:
        Mp = _round_up(M, 8)
        return Mp, Mp                       # one big tile (v5e/v6e have 1 TC anyway)
    tm = 512
    return tm, _round_up(M, tm)


def _pad_rows(a, Mp):
    M = a.shape[0]
    if Mp == M:
        return a
    return jnp.pad(a, ((0, Mp - M), (0, 0)))


# --------------------------------------------------------------------------
# Pallas kernel 1: matmul + bias (+ optional fused ReLU) - conv hot path
# bf16 operands, f32 accumulation, bf16 (or f32 for the final layer) store.
# --------------------------------------------------------------------------
def _mm_bias_kernel(a_ref, b_ref, bias_ref, o_ref, *, relu):
    acc = jnp.dot(a_ref[...], b_ref[...], preferred_element_type=jnp.float32)
    acc = acc + bias_ref[...]
    if relu:
        acc = jnp.maximum(acc, 0.0)
    o_ref[...] = acc.astype(o_ref.dtype)


def pallas_matmul_bias(a, w, bias, relu=False, out_dtype=jnp.bfloat16):
    """a: (M, K) bf16; w: (K, N) bf16; bias: (1, N) f32. -> (M, N) out_dtype."""
    M, K = a.shape
    Kw, N = w.shape
    assert K == Kw and N % 128 == 0, (K, N)
    tm, Mp = _choose_tiling(M)
    a = _pad_rows(a, Mp)
    out = pl.pallas_call(
        functools.partial(_mm_bias_kernel, relu=relu),
        out_shape=jax.ShapeDtypeStruct((Mp, N), out_dtype),
        grid=(Mp // tm,),
        in_specs=[
            pl.BlockSpec((tm, K), lambda i: (i, 0)),
            pl.BlockSpec((K, N), lambda i: (0, 0)),      # grid-invariant weight
            pl.BlockSpec((1, N), lambda i: (0, 0)),
        ],
        out_specs=pl.BlockSpec((tm, N), lambda i: (i, 0)),
        compiler_params=_compiler_params(),
    )(a, w, bias)
    return out if Mp == M else out[:M]


# --------------------------------------------------------------------------
# Pallas kernel 2: fused residual layer  out = x + conv1x1(relu(conv3x3(relu(x))))
# Patches of the *raw* x are built outside; the leading ReLU, both MXU dots and the
# residual add are fused here.  bf16 in / bf16 out, f32 accumulation.
# --------------------------------------------------------------------------
def _res_layer_kernel(p_ref, w1_ref, w2_ref, x_ref, o_ref, *, final_relu):
    p = jnp.maximum(p_ref[...], 0).astype(jnp.bfloat16)          # leading ReLU in-kernel
    h = jnp.dot(p, w1_ref[...], preferred_element_type=jnp.float32)
    h = jnp.maximum(h, 0.0)
    h = jnp.dot(h.astype(jnp.bfloat16), w2_ref[...], preferred_element_type=jnp.float32)
    out = x_ref[...].astype(jnp.float32) + h
    if final_relu:                                               # final F.relu of the stack
        out = jnp.maximum(out, 0.0)
    o_ref[...] = out.astype(o_ref.dtype)


# --------------------------------------------------------------------------
# Pallas kernel 3: fused pre-quantization 1x1 conv + vector quantization.
# Emits z_q (bf16), int32 indices (exact-width column) and per-tile partial sums
# (per-code counts + SSE) that a tiny JAX reduction turns into loss / perplexity.
# --------------------------------------------------------------------------
def _prequant_vq_kernel(h_ref, wq_ref, bq_ref, et_ref, e_ref, esq_ref,
                        zq_ref, idx_ref, part_ref, *, tm, m_real):
    # fused 1x1 pre-quant conv: z_e never round-trips HBM
    z = jnp.dot(h_ref[...], wq_ref[...], preferred_element_type=jnp.float32)
    z = z + bq_ref[...]                                           # (tm, Dp) f32
    # distances: ||z||^2 dropped (constant per row); codebook bf16, acc f32,
    # ||e||^2 kept f32 (padded codes carry a huge ||e||^2 so they never win).
    d = esq_ref[...] - 2.0 * jnp.dot(z.astype(jnp.bfloat16), et_ref[...],
                                     preferred_element_type=jnp.float32)   # (tm, Ne_p)
    col = jax.lax.broadcasted_iota(jnp.int32, d.shape, 1)
    d_min = jnp.min(d, axis=1, keepdims=True)
    # first-occurrence argmin (matches torch.argmin)
    idx = jnp.min(jnp.where(d <= d_min, col, jnp.int32(2 ** 30)), axis=1, keepdims=True)
    one_hot = (col == idx).astype(jnp.bfloat16)                   # exactly 0/1 in bf16
    z_q = jnp.dot(one_hot, e_ref[...], preferred_element_type=jnp.float32)

    zq_ref[...] = z_q.astype(zq_ref.dtype)
    idx_ref[...] = idx                                            # (tm, 1) int32, exact bytes

    # masked per-tile partial reductions (rows >= m_real are padding)
    row_g = jax.lax.broadcasted_iota(jnp.int32, (tm, 1), 0) + pl.program_id(0) * tm
    valid = (row_g < m_real).astype(jnp.float32)
    counts = jnp.sum(one_hot.astype(jnp.float32) * valid, axis=0, keepdims=True)
    diff = (z_q - z) * valid
    sse = jnp.sum(diff * diff)
    rsel = jax.lax.broadcasted_iota(jnp.int32, part_ref.shape, 0)  # (8, Ne_p)
    part_ref[...] = jnp.where(rsel == 0, counts, jnp.where(rsel == 1, sse, 0.0))


def prequant_vector_quantize(h_flat, wq, bq, e_t, e_pad, e_sq, beta, n_e, d_dim):
    """h_flat: (M, Cp) bf16 encoder output. Returns loss, z_q(M,Cp) bf16, perplexity, idx(M,1)."""
    M, Cp = h_flat.shape
    Ne_p = e_pad.shape[0]
    tm, Mp = _choose_tiling(M)
    nt = Mp // tm
    h_in = _pad_rows(h_flat, Mp)
    zq, idx, partials = pl.pallas_call(
        functools.partial(_prequant_vq_kernel, tm=tm, m_real=M),
        out_shape=(
            jax.ShapeDtypeStruct((Mp, Cp), jnp.bfloat16),
            jax.ShapeDtypeStruct((Mp, 1), jnp.int32),
            jax.ShapeDtypeStruct((nt * 8, Ne_p), jnp.float32),
        ),
        grid=(nt,),
        in_specs=[
            pl.BlockSpec((tm, Cp), lambda i: (i, 0)),
            pl.BlockSpec((Cp, Cp), lambda i: (0, 0)),      # pre-quant 1x1 weight
            pl.BlockSpec((1, Cp), lambda i: (0, 0)),       # pre-quant bias
            pl.BlockSpec((Cp, Ne_p), lambda i: (0, 0)),    # codebook^T (bf16, resident)
            pl.BlockSpec((Ne_p, Cp), lambda i: (0, 0)),    # codebook   (bf16, resident)
            pl.BlockSpec((1, Ne_p), lambda i: (0, 0)),     # ||e||^2 row (f32, hoisted)
        ],
        out_specs=(
            pl.BlockSpec((tm, Cp), lambda i: (i, 0)),
            pl.BlockSpec((tm, 1), lambda i: (i, 0)),
            pl.BlockSpec((8, Ne_p), lambda i: (i, 0)),
        ),
        compiler_params=_compiler_params(),
    )(h_in, wq, bq, e_t, e_pad, e_sq)

    parts = partials.reshape(nt, 8, Ne_p)
    counts = jnp.sum(parts[:, 0, :n_e], axis=0)            # per-code usage
    sse = jnp.sum(parts[:, 1, 0])                           # sum of squared error
    mse = sse / (M * d_dim)
    loss = mse + beta * mse                                 # forward value of the VQ loss
    e_mean = counts / M
    perplexity = jnp.exp(-jnp.sum(e_mean * jnp.log(e_mean + 1e-10)))
    zq = zq if Mp == M else zq[:M]
    idx = idx if Mp == M else idx[:M]
    return loss, zq, perplexity, idx


# --------------------------------------------------------------------------
# NHWC im2col (bf16, on pre-padded channels) + layer wrappers
# TODO(synk): move im2col into the kernels (implicit GEMM with halo DMA) to remove
# the remaining patch-buffer HBM traffic; currently it runs in XLA on bf16 data.
# --------------------------------------------------------------------------
def _im2col_nhwc(x, kh, kw, stride, pad):
    # x: (B, H, W, C) bf16 -> patches (B*Ho*Wo, kh*kw*C), ordering (kh, kw, C) row-major
    B, H, W, C = x.shape
    xp = jnp.pad(x, ((0, 0), (pad, pad), (pad, pad), (0, 0)))
    Ho = (H + 2 * pad - kh) // stride + 1
    Wo = (W + 2 * pad - kw) // stride + 1
    cols = []
    for i in range(kh):
        for j in range(kw):
            cols.append(xp[:, i:i + stride * Ho:stride, j:j + stride * Wo:stride, :])
    patches = jnp.stack(cols, axis=3)                       # (B, Ho, Wo, kh*kw, C)
    return patches.reshape(B * Ho * Wo, kh * kw * C), Ho, Wo


def conv_nhwc(x_act, w_mat, b_row, kh, kw, stride, pad, relu=False, out_dtype=jnp.bfloat16):
    B = x_act.shape[0]
    patches, Ho, Wo = _im2col_nhwc(x_act, kh, kw, stride, pad)
    out = pallas_matmul_bias(patches, w_mat, b_row, relu=relu, out_dtype=out_dtype)
    return out.reshape(B, Ho, Wo, w_mat.shape[1])


def residual_layer(x_act, w1, w2, final_relu):
    # x_act: (B, H, W, Cpad) bf16 -> same shape (bf16). Leading ReLU applied in-kernel.
    B, H, W, Cp = x_act.shape
    M = B * H * W
    patches, _, _ = _im2col_nhwc(x_act, 3, 3, 1, 1)          # raw-x patches
    K = patches.shape[1]
    Rp = w1.shape[1]
    tm, Mp = _choose_tiling(M)
    p_b = _pad_rows(patches, Mp)
    x_flat = _pad_rows(x_act.reshape(M, Cp), Mp)
    out = pl.pallas_call(
        functools.partial(_res_layer_kernel, final_relu=final_relu),
        out_shape=jax.ShapeDtypeStruct((Mp, Cp), jnp.bfloat16),
        grid=(Mp // tm,),
        in_specs=[
            pl.BlockSpec((tm, K), lambda i: (i, 0)),
            pl.BlockSpec((K, Rp), lambda i: (0, 0)),
            pl.BlockSpec((Rp, Cp), lambda i: (0, 0)),
            pl.BlockSpec((tm, Cp), lambda i: (i, 0)),
        ],
        out_specs=pl.BlockSpec((tm, Cp), lambda i: (i, 0)),
        compiler_params=_compiler_params(),
    )(p_b, w1, w2, x_flat)
    out = out if Mp == M else out[:M]
    return out.reshape(B, H, W, Cp)


def conv_transpose_s2(x_act, w_mat, b_row, relu=False, out_dtype=jnp.bfloat16):
    """ConvTranspose2d(k=4, s=2, p=1) via sub-pixel decomposition: one 3x3-window matmul
    producing 4 phase outputs per input pixel + pixel shuffle (no zero-inserted input)."""
    B, H, W, _ = x_act.shape
    cp_each = w_mat.shape[1] // 4
    patches, _, _ = _im2col_nhwc(x_act, 3, 3, 1, 1)
    y = pallas_matmul_bias(patches, w_mat, b_row, relu=relu, out_dtype=out_dtype)
    # TODO(synk): fold this pixel shuffle into phase-major in-kernel stores
    # (output laid out as (B,H,2,W,2,cp)); it currently runs in XLA on bf16 data.
    y = y.reshape(B, H, W, 2, 2, cp_each)
    y = jnp.transpose(y, (0, 1, 3, 2, 4, 5)).reshape(B, 2 * H, 2 * W, cp_each)
    return y


# --------------------------------------------------------------------------
# One-time parameter preparation: padded bf16 matmul weights, f32 bias rows
# --------------------------------------------------------------------------
def _conv_weight_matrix(w, cin_pad, cout_pad):
    O, C, kh, kw = w.shape
    wt = jnp.transpose(w, (2, 3, 1, 0))                    # (kh, kw, C, O)
    wt = jnp.pad(wt, ((0, 0), (0, 0), (0, cin_pad - C), (0, cout_pad - O)))
    return wt.reshape(kh * kw * cin_pad, cout_pad).astype(jnp.bfloat16)


def _conv1x1_weight_matrix(w, cin_pad, cout_pad):
    O, C = w.shape[0], w.shape[1]
    m = jnp.zeros((cin_pad, cout_pad), jnp.float32).at[:C, :O].set(w[:, :, 0, 0].T)
    return m.astype(jnp.bfloat16)


def _bias_row(b, cout_pad):
    return jnp.zeros((1, cout_pad), jnp.float32).at[0, :b.shape[0]].set(b.astype(jnp.float32))


def _convT_s2_weight_matrix(w, b, cin_pad, cp_each):
    # ConvTranspose2d(k=4, s=2, p=1) == 3x3 conv on the (pad=1) input emitting 4 phases.
    Cin, Cout, kh, kw = w.shape
    assert kh == 4 and kw == 4
    taps = {0: ((0, 3), (1, 1)), 1: ((1, 2), (2, 0))}      # phase -> ((window_pos, kernel_idx), ..)
    eff = jnp.zeros((3, 3, cin_pad, 2, 2, cp_each), jnp.float32)
    for ry in range(2):
        for rx in range(2):
            for di, i in taps[ry]:
                for dj, j in taps[rx]:
                    eff = eff.at[di, dj, :Cin, ry, rx, :Cout].set(w[:, :, i, j])
    wm = eff.reshape(9 * cin_pad, 4 * cp_each).astype(jnp.bfloat16)
    bm = jnp.zeros((2, 2, cp_each), jnp.float32).at[:, :, :Cout].set(
        jnp.broadcast_to(b.astype(jnp.float32), (2, 2, Cout)))
    return wm, bm.reshape(1, 4 * cp_each)


def prepare_params(p, n_embeddings, embedding_dim):
    h_dim = p["enc_w2"].shape[0]
    res_h_dim = p["enc_r1_w"].shape[0]
    in_ch = p["enc_w1"].shape[1]
    cp = _round_up(max(h_dim, res_h_dim, embedding_dim), 128)   # padded channel width
    in_cp = max(8, _round_up(in_ch, 8))                          # 4*4*in_cp % 128 == 0
    ne_p = _round_up(n_embeddings, 128)

    pp = {}
    pp["enc1_w"] = _conv_weight_matrix(p["enc_w1"], in_cp, cp); pp["enc1_b"] = _bias_row(p["enc_b1"], cp)
    pp["enc2_w"] = _conv_weight_matrix(p["enc_w2"], cp, cp);    pp["enc2_b"] = _bias_row(p["enc_b2"], cp)
    pp["enc3_w"] = _conv_weight_matrix(p["enc_w3"], cp, cp);    pp["enc3_b"] = _bias_row(p["enc_b3"], cp)
    pp["enc_r1_w"] = _conv_weight_matrix(p["enc_r1_w"], cp, cp)          # 3x3, no bias
    pp["enc_r2_w"] = _conv1x1_weight_matrix(p["enc_r2_w"], cp, cp)       # 1x1, no bias
    pp["pq_w"] = _conv1x1_weight_matrix(p["pq_w"], cp, cp);     pp["pq_b"] = _bias_row(p["pq_b"], cp)

    # codebook: bf16 operands for the MXU dots; ||e||^2 stays f32 for argmin robustness.
    e = p["codebook"].astype(jnp.float32)
    e_pad = jnp.zeros((ne_p, cp), jnp.float32).at[:n_embeddings, :embedding_dim].set(e)
    pp["e"] = e_pad.astype(jnp.bfloat16)
    pp["e_t"] = e_pad.T.astype(jnp.bfloat16)
    pp["e_sq"] = jnp.full((1, ne_p), _BIG, jnp.float32).at[0, :n_embeddings].set(jnp.sum(e * e, axis=1))

    # ConvT(k=3, s=1, p=1) == conv with flipped / channel-swapped weight, pad = 1
    w_conv = jnp.flip(p["dec_wt1"], (2, 3)).transpose(1, 0, 2, 3)
    pp["dec1_w"] = _conv_weight_matrix(w_conv, cp, cp);        pp["dec1_b"] = _bias_row(p["dec_bt1"], cp)
    pp["dec_r1_w"] = _conv_weight_matrix(p["dec_r1_w"], cp, cp)
    pp["dec_r2_w"] = _conv1x1_weight_matrix(p["dec_r2_w"], cp, cp)
    pp["dec2_w"], pp["dec2_b"] = _convT_s2_weight_matrix(p["dec_wt2"], p["dec_bt2"], cp, cp)
    # final ConvT has Cout=1: cp_each=32 -> N=128 (lane-dense, no 512-wide zero padding)
    pp["dec3_w"], pp["dec3_b"] = _convT_s2_weight_matrix(p["dec_wt3"], p["dec_bt3"], cp, 32)
    return pp


# --------------------------------------------------------------------------
# Raw (PyTorch-layout) parameter init + forward
# --------------------------------------------------------------------------
def init_params(key, h_dim, res_h_dim, n_embeddings, embedding_dim):
    ks = jax.random.split(key, 19)
    u = lambda k, shape, s=0.05: (jax.random.uniform(k, shape, jnp.float32) * 2 - 1) * s
    p = {}
    p["enc_w1"] = u(ks[0], (h_dim // 2, 1, 4, 4));          p["enc_b1"] = u(ks[1], (h_dim // 2,))
    p["enc_w2"] = u(ks[2], (h_dim, h_dim // 2, 4, 4));      p["enc_b2"] = u(ks[3], (h_dim,))
    p["enc_w3"] = u(ks[4], (h_dim, h_dim, 3, 3));           p["enc_b3"] = u(ks[5], (h_dim,))
    p["enc_r1_w"] = u(ks[6], (res_h_dim, h_dim, 3, 3))       # bias=False
    p["enc_r2_w"] = u(ks[7], (h_dim, res_h_dim, 1, 1))       # bias=False
    p["pq_w"] = u(ks[8], (embedding_dim, h_dim, 1, 1));     p["pq_b"] = u(ks[9], (embedding_dim,))
    p["codebook"] = u(ks[10], (n_embeddings, embedding_dim), 1.0 / n_embeddings)
    p["dec_wt1"] = u(ks[11], (embedding_dim, h_dim, 3, 3));  p["dec_bt1"] = u(ks[12], (h_dim,))
    p["dec_r1_w"] = u(ks[13], (res_h_dim, h_dim, 3, 3))
    p["dec_r2_w"] = u(ks[14], (h_dim, res_h_dim, 1, 1))
    p["dec_wt2"] = u(ks[15], (h_dim, h_dim // 2, 4, 4));     p["dec_bt2"] = u(ks[16], (h_dim // 2,))
    p["dec_wt3"] = u(ks[17], (h_dim // 2, 1, 4, 4));         p["dec_bt3"] = u(ks[18], (1,))
    return p


def vqvae1_forward(pp, x, *, beta, n_res_layers, n_embeddings, embedding_dim):
    B = x.shape[0]
    in_cp = pp["enc1_w"].shape[0] // 16          # 4*4*in_cp
    cp = pp["enc2_w"].shape[1]
    # ---- NCHW f32 -> padded channels-last bf16 (API boundary only) ----
    xh = jnp.transpose(x, (0, 2, 3, 1))
    xh = jnp.pad(xh, ((0, 0), (0, 0), (0, 0), (0, in_cp - xh.shape[3]))).astype(jnp.bfloat16)
    # ---- Encoder (all bf16 activations) ----
    h = conv_nhwc(xh, pp["enc1_w"], pp["enc1_b"], 4, 4, 2, 1, relu=True)
    h = conv_nhwc(h, pp["enc2_w"], pp["enc2_b"], 4, 4, 2, 1, relu=True)
    h = conv_nhwc(h, pp["enc3_w"], pp["enc3_b"], 3, 3, 1, 1, relu=False)
    for li in range(n_res_layers):               # ResidualStack uses shared weights
        h = residual_layer(h, pp["enc_r1_w"], pp["enc_r2_w"],
                           final_relu=(li == n_res_layers - 1))
    # ---- fused pre-quantization 1x1 conv + vector quantization ----
    _, Hl, Wl, _ = h.shape
    embedding_loss, zq_flat, perplexity, embedding_indices = prequant_vector_quantize(
        h.reshape(-1, cp), pp["pq_w"], pp["pq_b"], pp["e_t"], pp["e"], pp["e_sq"],
        beta, n_embeddings, embedding_dim)
    zq = zq_flat.reshape(B, Hl, Wl, cp)
    # ---- Decoder ----
    d = conv_nhwc(zq, pp["dec1_w"], pp["dec1_b"], 3, 3, 1, 1, relu=False)
    for li in range(n_res_layers):
        d = residual_layer(d, pp["dec_r1_w"], pp["dec_r2_w"],
                           final_relu=(li == n_res_layers - 1))
    d = conv_transpose_s2(d, pp["dec2_w"], pp["dec2_b"], relu=True)
    d = conv_transpose_s2(d, pp["dec3_w"], pp["dec3_b"], relu=False, out_dtype=jnp.float32)
    x_hat = jnp.transpose(d[..., :1], (0, 3, 1, 2))          # back to NCHW (1 channel)
    return embedding_loss, x_hat, perplexity, embedding_indices


# TODO(synk): reconstruct_from_indices / huffman_encode / huffman_decode are host-side
# Python string manipulation (no Pallas equivalent); not part of the forward pass.

if __name__ == "__main__":
    h_dim, res_h_dim, n_res_layers = 32, 16, 2
    n_embeddings, embedding_dim, beta = 16, 8, 0.25

    key = jax.random.PRNGKey(0)
    k_param, k_x = jax.random.split(key)
    raw_params = init_params(k_param, h_dim, res_h_dim, n_embeddings, embedding_dim)
    params = prepare_params(raw_params, n_embeddings, embedding_dim)   # one-time prep
    x = jax.random.normal(k_x, (2, 1, 16, 16), jnp.float32)            # NCHW, 1 channel

    fwd = jax.jit(functools.partial(
        vqvae1_forward, beta=beta, n_res_layers=n_res_layers,
        n_embeddings=n_embeddings, embedding_dim=embedding_dim))
    embedding_loss, x_hat, perplexity, embedding_indices = fwd(params, x)
    jax.block_until_ready((embedding_loss, x_hat, perplexity, embedding_indices))

    assert x_hat.shape == x.shape, x_hat.shape
    assert embedding_indices.shape == (2 * 4 * 4, 1), embedding_indices.shape
    assert bool(jnp.isfinite(embedding_loss)) and bool(jnp.isfinite(perplexity))
    print("KERNEL_OK")
</pallas_src>

<mosaic_0001>
module attributes {stable_mosaic.version = 11 : i64} {
  func.func @_mm_bias_kernel(%arg0: i32, %arg1: memref<128x128xbf16, #tpu.memory_space<vmem>>, %arg2: memref<128x128xbf16, #tpu.memory_space<vmem>>, %arg3: memref<1x128xf32, #tpu.memory_space<vmem>>, %arg4: memref<128x128xbf16, #tpu.memory_space<vmem>>) attributes {dimension_semantics = [#tpu.dimension_semantics<parallel>], iteration_bounds = array<i64: 1>, scalar_prefetch = 0 : i64, scratch_operands = 0 : i64, tpu.core_type = #tpu.core_type<tc>, window_params = [{transform_indices = @transform_0, window_bounds = array<i64: 128, 128>}, {pipeline_mode = #tpu.pipeline_mode<synchronous>, transform_indices = @transform_1, window_bounds = array<i64: 128, 128>}, {pipeline_mode = #tpu.pipeline_mode<synchronous>, transform_indices = @transform_2, window_bounds = array<i64: 1, 128>}, {transform_indices = @transform_3, window_bounds = array<i64: 128, 128>}]} {
    %c0 = arith.constant 0 : index
    %c0_0 = arith.constant 0 : index
    %0 = vector.load %arg1[%c0, %c0_0] : memref<128x128xbf16, #tpu.memory_space<vmem>>, vector<128x128xbf16>
    %c0_1 = arith.constant 0 : index
    %c0_2 = arith.constant 0 : index
    %1 = vector.load %arg2[%c0_1, %c0_2] : memref<128x128xbf16, #tpu.memory_space<vmem>>, vector<128x128xbf16>
    %cst = arith.constant dense<0.000000e+00> : vector<128x128xf32>
    %2 = tpu.matmul %0, %1, %cst {dimension_numbers = #tpu.dot_dimension_numbers<[1], [0], [0], [1], [0, 0, 1, 1], [], []>} : vector<128x128xbf16>, vector<128x128xbf16>, vector<128x128xf32> -> vector<128x128xf32>
    %c0_3 = arith.constant 0 : index
    %c0_4 = arith.constant 0 : index
    %3 = vector.load %arg3[%c0_3, %c0_4] : memref<1x128xf32, #tpu.memory_space<vmem>>, vector<1x128xf32>
    %4 = vector.broadcast %3 : vector<1x128xf32> to vector<128x128xf32>
    %5 = arith.addf %2, %4 : vector<128x128xf32>
    %cst_5 = arith.constant 0.000000e+00 : f32
    %6 = vector.broadcast %cst_5 : f32 to vector<128x128xf32>
    %7 = arith.maximumf %5, %6 : vector<128x128xf32>
    %8 = arith.truncf %7 : vector<128x128xf32> to vector<128x128xbf16>
    %c0_6 = arith.constant 0 : index
    %c0_7 = arith.constant 0 : index
    %9 = vector.load %arg4[%c0_6, %c0_7] : memref<128x128xbf16, #tpu.memory_space<vmem>>, vector<128x128xbf16>
    tpu.vector_store %arg4[%c0_6, %c0_7], %8 {strides = array<i32>} : memref<128x128xbf16, #tpu.memory_space<vmem>>, vector<128x128xbf16>,
    return
  }
  func.func @transform_0(%arg0: i32) -> (i32, i32) {
    %c0_i32 = arith.constant 0 : i32
    %c0_i32_0 = arith.constant 0 : i32
    return %arg0, %c0_i32 : i32, i32
  }
  func.func @transform_1(%arg0: i32) -> (i32, i32) {
    %c0_i32 = arith.constant 0 : i32
    %c0_i32_0 = arith.constant 0 : i32
    %c0_i32_1 = arith.constant 0 : i32
    return %c0_i32, %c0_i32_0 : i32, i32
  }
  func.func @transform_2(%arg0: i32) -> (i32, i32) {
    %c0_i32 = arith.constant 0 : i32
    %c0_i32_0 = arith.constant 0 : i32
    %c0_i32_1 = arith.constant 0 : i32
    return %c0_i32, %c0_i32_0 : i32, i32
  }
  func.func @transform_3(%arg0: i32) -> (i32, i32) {
    %c0_i32 = arith.constant 0 : i32
    %c0_i32_0 = arith.constant 0 : i32
    return %arg0, %c0_i32 : i32, i32
  }
}

module attributes {stable_mosaic.version = 11 : i64} {
  func.func @_mm_bias_kernel(%arg0: i32, %arg1: memref<32x2048xbf16, #tpu.memory_space<vmem>>, %arg2: memref<2048x128xbf16, #tpu.memory_space<vmem>>, %arg3: memref<1x128xf32, #tpu.memory_space<vmem>>, %arg4: memref<32x128xbf16, #tpu.memory_space<vmem>>) attributes {dimension_semantics = [#tpu.dimension_semantics<parallel>], iteration_bounds = array<i64: 1>, scalar_prefetch = 0 : i64, scratch_operands = 0 : i64, tpu.core_type = #tpu.core_type<tc>, window_params = [{transform_indices = @transform_0, window_bounds = array<i64: 32, 2048>}, {pipeline_mode = #tpu.pipeline_mode<synchronous>, transform_indices = @transform_1, window_bounds = array<i64: 2048, 128>}, {pipeline_mode = #tpu.pipeline_mode<synchronous>, transform_indices = @transform_2, window_bounds = array<i64: 1, 128>}, {transform_indices = @transform_3, window_bounds = array<i64: 32, 128>}]} {
    %c0 = arith.constant 0 : index
    %c0_0 = arith.constant 0 : index
    %0 = vector.load %arg1[%c0, %c0_0] : memref<32x2048xbf16, #tpu.memory_space<vmem>>, vector<32x2048xbf16>
    %c0_1 = arith.constant 0 : index
    %c0_2 = arith.constant 0 : index
    %1 = vector.load %arg2[%c0_1, %c0_2] : memref<2048x128xbf16, #tpu.memory_space<vmem>>, vector<2048x128xbf16>
    %cst = arith.constant dense<0.000000e+00> : vector<32x128xf32>
    %2 = tpu.matmul %0, %1, %cst {dimension_numbers = #tpu.dot_dimension_numbers<[1], [0], [0], [1], [0, 0, 1, 1], [], []>} : vector<32x2048xbf16>, vector<2048x128xbf16>, vector<32x128xf32> -> vector<32x128xf32>
    %c0_3 = arith.constant 0 : index
    %c0_4 = arith.constant 0 : index
    %3 = vector.load %arg3[%c0_3, %c0_4] : memref<1x128xf32, #tpu.memory_space<vmem>>, vector<1x128xf32>
    %4 = vector.broadcast %3 : vector<1x128xf32> to vector<32x128xf32>
    %5 = arith.addf %2, %4 : vector<32x128xf32>
    %cst_5 = arith.constant 0.000000e+00 : f32
    %6 = vector.broadcast %cst_5 : f32 to vector<32x128xf32>
    %7 = arith.maximumf %5, %6 : vector<32x128xf32>
    %8 = arith.truncf %7 : vector<32x128xf32> to vector<32x128xbf16>
    %c0_6 = arith.constant 0 : index
    %c0_7 = arith.constant 0 : index
    %9 = vector.load %arg4[%c0_6, %c0_7] : memref<32x128xbf16, #tpu.memory_space<vmem>>, vector<32x128xbf16>
    tpu.vector_store %arg4[%c0_6, %c0_7], %8 {strides = array<i32>} : memref<32x128xbf16, #tpu.memory_space<vmem>>, vector<32x128xbf16>,
    return
  }
  func.func @transform_0(%arg0: i32) -> (i32, i32) {
    %c0_i32 = arith.constant 0 : i32
    %c0_i32_0 = arith.constant 0 : i32
    return %arg0, %c0_i32 : i32, i32
  }
  func.func @transform_1(%arg0: i32) -> (i32, i32) {
    %c0_i32 = arith.constant 0 : i32
    %c0_i32_0 = arith.constant 0 : i32
    %c0_i32_1 = arith.constant 0 : i32
    return %c0_i32, %c0_i32_0 : i32, i32
  }
  func.func @transform_2(%arg0: i32) -> (i32, i32) {
    %c0_i32 = arith.constant 0 : i32
    %c0_i32_0 = arith.constant 0 : i32
    %c0_i32_1 = arith.constant 0 : i32
    return %c0_i32, %c0_i32_0 : i32, i32
  }
  func.func @transform_3(%arg0: i32) -> (i32, i32) {
    %c0_i32 = arith.constant 0 : i32
    %c0_i32_0 = arith.constant 0 : i32
    return %arg0, %c0_i32 : i32, i32
  }
}

module attributes {stable_mosaic.version = 11 : i64} {
  func.func @_mm_bias_kernel(%arg0: i32, %arg1: memref<32x1152xbf16, #tpu.memory_space<vmem>>, %arg2: memref<1152x128xbf16, #tpu.memory_space<vmem>>, %arg3: memref<1x128xf32, #tpu.memory_space<vmem>>, %arg4: memref<32x128xbf16, #tpu.memory_space<vmem>>) attributes {dimension_semantics = [#tpu.dimension_semantics<parallel>], iteration_bounds = array<i64: 1>, scalar_prefetch = 0 : i64, scratch_operands = 0 : i64, tpu.core_type = #tpu.core_type<tc>, window_params = [{transform_indices = @transform_0, window_bounds = array<i64: 32, 1152>}, {pipeline_mode = #tpu.pipeline_mode<synchronous>, transform_indices = @transform_1, window_bounds = array<i64: 1152, 128>}, {pipeline_mode = #tpu.pipeline_mode<synchronous>, transform_indices = @transform_2, window_bounds = array<i64: 1, 128>}, {transform_indices = @transform_3, window_bounds = array<i64: 32, 128>}]} {
    %c0 = arith.constant 0 : index
    %c0_0 = arith.constant 0 : index
    %0 = vector.load %arg1[%c0, %c0_0] : memref<32x1152xbf16, #tpu.memory_space<vmem>>, vector<32x1152xbf16>
    %c0_1 = arith.constant 0 : index
    %c0_2 = arith.constant 0 : index
    %1 = vector.load %arg2[%c0_1, %c0_2] : memref<1152x128xbf16, #tpu.memory_space<vmem>>, vector<1152x128xbf16>
    %cst = arith.constant dense<0.000000e+00> : vector<32x128xf32>
    %2 = tpu.matmul %0, %1, %cst {dimension_numbers = #tpu.dot_dimension_numbers<[1], [0], [0], [1], [0, 0, 1, 1], [], []>} : vector<32x1152xbf16>, vector<1152x128xbf16>, vector<32x128xf32> -> vector<32x128xf32>
    %c0_3 = arith.constant 0 : index
    %c0_4 = arith.constant 0 : index
    %3 = vector.load %arg3[%c0_3, %c0_4] : memref<1x128xf32, #tpu.memory_space<vmem>>, vector<1x128xf32>
    %4 = vector.broadcast %3 : vector<1x128xf32> to vector<32x128xf32>
    %5 = arith.addf %2, %4 : vector<32x128xf32>
    %6 = arith.truncf %5 : vector<32x128xf32> to vector<32x128xbf16>
    %c0_5 = arith.constant 0 : index
    %c0_6 = arith.constant 0 : index
    %7 = vector.load %arg4[%c0_5, %c0_6] : memref<32x128xbf16, #tpu.memory_space<vmem>>, vector<32x128xbf16>
    tpu.vector_store %arg4[%c0_5, %c0_6], %6 {strides = array<i32>} : memref<32x128xbf16, #tpu.memory_space<vmem>>, vector<32x128xbf16>,
    return
  }
  func.func @transform_0(%arg0: i32) -> (i32, i32) {
    %c0_i32 = arith.constant 0 : i32
    %c0_i32_0 = arith.constant 0 : i32
    return %arg0, %c0_i32 : i32, i32
  }
  func.func @transform_1(%arg0: i32) -> (i32, i32) {
    %c0_i32 = arith.constant 0 : i32
    %c0_i32_0 = arith.constant 0 : i32
    %c0_i32_1 = arith.constant 0 : i32
    return %c0_i32, %c0_i32_0 : i32, i32
  }
  func.func @transform_2(%arg0: i32) -> (i32, i32) {
    %c0_i32 = arith.constant 0 : i32
    %c0_i32_0 = arith.constant 0 : i32
    %c0_i32_1 = arith.constant 0 : i32
    return %c0_i32, %c0_i32_0 : i32, i32
  }
  func.func @transform_3(%arg0: i32) -> (i32, i32) {
    %c0_i32 = arith.constant 0 : i32
    %c0_i32_0 = arith.constant 0 : i32
    return %arg0, %c0_i32 : i32, i32
  }
}

module attributes {stable_mosaic.version = 11 : i64} {
  func.func @_res_layer_kernel(%arg0: i32, %arg1: memref<32x1152xbf16, #tpu.memory_space<vmem>>, %arg2: memref<1152x128xbf16, #tpu.memory_space<vmem>>, %arg3: memref<128x128xbf16, #tpu.memory_space<vmem>>, %arg4: memref<32x128xbf16, #tpu.memory_space<vmem>>, %arg5: memref<32x128xbf16, #tpu.memory_space<vmem>>) attributes {dimension_semantics = [#tpu.dimension_semantics<parallel>], iteration_bounds = array<i64: 1>, scalar_prefetch = 0 : i64, scratch_operands = 0 : i64, tpu.core_type = #tpu.core_type<tc>, window_params = [{transform_indices = @transform_0, window_bounds = array<i64: 32, 1152>}, {pipeline_mode = #tpu.pipeline_mode<synchronous>, transform_indices = @transform_1, window_bounds = array<i64: 1152, 128>}, {pipeline_mode = #tpu.pipeline_mode<synchronous>, transform_indices = @transform_2, window_bounds = array<i64: 128, 128>}, {transform_indices = @transform_3, window_bounds = array<i64: 32, 128>}, {transform_indices = @transform_4, window_bounds = array<i64: 32, 128>}]} {
    %c0 = arith.constant 0 : index
    %c0_0 = arith.constant 0 : index
    %0 = vector.load %arg1[%c0, %c0_0] : memref<32x1152xbf16, #tpu.memory_space<vmem>>, vector<32x1152xbf16>
    %cst = arith.constant 0.000000e+00 : bf16
    %1 = vector.broadcast %cst : bf16 to vector<32x1152xbf16>
    %2 = arith.maximumf %0, %1 : vector<32x1152xbf16>
    %c0_1 = arith.constant 0 : index
    %c0_2 = arith.constant 0 : index
    %3 = vector.load %arg2[%c0_1, %c0_2] : memref<1152x128xbf16, #tpu.memory_space<vmem>>, vector<1152x128xbf16>
    %cst_3 = arith.constant dense<0.000000e+00> : vector<32x128xf32>
    %4 = tpu.matmul %2, %3, %cst_3 {dimension_numbers = #tpu.dot_dimension_numbers<[1], [0], [0], [1], [0, 0, 1, 1], [], []>} : vector<32x1152xbf16>, vector<1152x128xbf16>, vector<32x128xf32> -> vector<32x128xf32>
    %cst_4 = arith.constant 0.000000e+00 : f32
    %5 = vector.broadcast %cst_4 : f32 to vector<32x128xf32>
    %6 = arith.maximumf %4, %5 : vector<32x128xf32>
    %7 = arith.truncf %6 : vector<32x128xf32> to vector<32x128xbf16>
    %c0_5 = arith.constant 0 : index
    %c0_6 = arith.constant 0 : index
    %8 = vector.load %arg3[%c0_5, %c0_6] : memref<128x128xbf16, #tpu.memory_space<vmem>>, vector<128x128xbf16>
    %cst_7 = arith.constant dense<0.000000e+00> : vector<32x128xf32>
    %9 = tpu.matmul %7, %8, %cst_7 {dimension_numbers = #tpu.dot_dimension_numbers<[1], [0], [0], [1], [0, 0, 1, 1], [], []>} : vector<32x128xbf16>, vector<128x128xbf16>, vector<32x128xf32> -> vector<32x128xf32>
    %c0_8 = arith.constant 0 : index
    %c0_9 = arith.constant 0 : index
    %10 = vector.load %arg4[%c0_8, %c0_9] : memref<32x128xbf16, #tpu.memory_space<vmem>>, vector<32x128xbf16>
    %11 = arith.extf %10 : vector<32x128xbf16> to vector<32x128xf32>
    %12 = arith.addf %11, %9 : vector<32x128xf32>
    %13 = arith.truncf %12 : vector<32x128xf32> to vector<32x128xbf16>
    %c0_10 = arith.constant 0 : index
    %c0_11 = arith.constant 0 : index
    %14 = vector.load %arg5[%c0_10, %c0_11] : memref<32x128xbf16, #tpu.memory_space<vmem>>, vector<32x128xbf16>
    tpu.vector_store %arg5[%c0_10, %c0_11], %13 {strides = array<i32>} : memref<32x128xbf16, #tpu.memory_space<vmem>>, vector<32x128xbf16>,
    return
  }
  func.func @transform_0(%arg0: i32) -> (i32, i32) {
    %c0_i32 = arith.constant 0 : i32
    %c0_i32_0 = arith.constant 0 : i32
    return %arg0, %c0_i32 : i32, i32
  }
  func.func @transform_1(%arg0: i32) -> (i32, i32) {
    %c0_i32 = arith.constant 0 : i32
    %c0_i32_0 = arith.constant 0 : i32
    %c0_i32_1 = arith.constant 0 : i32
    return %c0_i32, %c0_i32_0 : i32, i32
  }
  func.func @transform_2(%arg0: i32) -> (i32, i32) {
    %c0_i32 = arith.constant 0 : i32
    %c0_i32_0 = arith.constant 0 : i32
    %c0_i32_1 = arith.constant 0 : i32
    return %c0_i32, %c0_i32_0 : i32, i32
  }
  func.func @transform_3(%arg0: i32) -> (i32, i32) {
    %c0_i32 = arith.constant 0 : i32
    %c0_i32_0 = arith.constant 0 : i32
    return %arg0, %c0_i32 : i32, i32
  }
  func.func @transform_4(%arg0: i32) -> (i32, i32) {
    %c0_i32 = arith.constant 0 : i32
    %c0_i32_0 = arith.constant 0 : i32
    return %arg0, %c0_i32 : i32, i32
  }
}

module attributes {stable_mosaic.version = 11 : i64} {
  func.func @_res_layer_kernel(%arg0: i32, %arg1: memref<32x1152xbf16, #tpu.memory_space<vmem>>, %arg2: memref<1152x128xbf16, #tpu.memory_space<vmem>>, %arg3: memref<128x128xbf16, #tpu.memory_space<vmem>>, %arg4: memref<32x128xbf16, #tpu.memory_space<vmem>>, %arg5: memref<32x128xbf16, #tpu.memory_space<vmem>>) attributes {dimension_semantics = [#tpu.dimension_semantics<parallel>], iteration_bounds = array<i64: 1>, scalar_prefetch = 0 : i64, scratch_operands = 0 : i64, tpu.core_type = #tpu.core_type<tc>, window_params = [{transform_indices = @transform_0, window_bounds = array<i64: 32, 1152>}, {pipeline_mode = #tpu.pipeline_mode<synchronous>, transform_indices = @transform_1, window_bounds = array<i64: 1152, 128>}, {pipeline_mode = #tpu.pipeline_mode<synchronous>, transform_indices = @transform_2, window_bounds = array<i64: 128, 128>}, {transform_indices = @transform_3, window_bounds = array<i64: 32, 128>}, {transform_indices = @transform_4, window_bounds = array<i64: 32, 128>}]} {
    %c0 = arith.constant 0 : index
    %c0_0 = arith.constant 0 : index
    %0 = vector.load %arg1[%c0, %c0_0] : memref<32x1152xbf16, #tpu.memory_space<vmem>>, vector<32x1152xbf16>
    %cst = arith.constant 0.000000e+00 : bf16
    %1 = vector.broadcast %cst : bf16 to vector<32x1152xbf16>
    %2 = arith.maximumf %0, %1 : vector<32x1152xbf16>
    %c0_1 = arith.constant 0 : index
    %c0_2 = arith.constant 0 : index
    %3 = vector.load %arg2[%c0_1, %c0_2] : memref<1152x128xbf16, #tpu.memory_space<vmem>>, vector<1152x128xbf16>
    %cst_3 = arith.constant dense<0.000000e+00> : vector<32x128xf32>
    %4 = tpu.matmul %2, %3, %cst_3 {dimension_numbers = #tpu.dot_dimension_numbers<[1], [0], [0], [1], [0, 0, 1, 1], [], []>} : vector<32x1152xbf16>, vector<1152x128xbf16>, vector<32x128xf32> -> vector<32x128xf32>
    %cst_4 = arith.constant 0.000000e+00 : f32
    %5 = vector.broadcast %cst_4 : f32 to vector<32x128xf32>
    %6 = arith.maximumf %4, %5 : vector<32x128xf32>
    %7 = arith.truncf %6 : vector<32x128xf32> to vector<32x128xbf16>
    %c0_5 = arith.constant 0 : index
    %c0_6 = arith.constant 0 : index
    %8 = vector.load %arg3[%c0_5, %c0_6] : memref<128x128xbf16, #tpu.memory_space<vmem>>, vector<128x128xbf16>
    %cst_7 = arith.constant dense<0.000000e+00> : vector<32x128xf32>
    %9 = tpu.matmul %7, %8, %cst_7 {dimension_numbers = #tpu.dot_dimension_numbers<[1], [0], [0], [1], [0, 0, 1, 1], [], []>} : vector<32x128xbf16>, vector<128x128xbf16>, vector<32x128xf32> -> vector<32x128xf32>
    %c0_8 = arith.constant 0 : index
    %c0_9 = arith.constant 0 : index
    %10 = vector.load %arg4[%c0_8, %c0_9] : memref<32x128xbf16, #tpu.memory_space<vmem>>, vector<32x128xbf16>
    %11 = arith.extf %10 : vector<32x128xbf16> to vector<32x128xf32>
    %12 = arith.addf %11, %9 : vector<32x128xf32>
    %cst_10 = arith.constant 0.000000e+00 : f32
    %13 = vector.broadcast %cst_10 : f32 to vector<32x128xf32>
    %14 = arith.maximumf %12, %13 : vector<32x128xf32>
    %15 = arith.truncf %14 : vector<32x128xf32> to vector<32x128xbf16>
    %c0_11 = arith.constant 0 : index
    %c0_12 = arith.constant 0 : index
    %16 = vector.load %arg5[%c0_11, %c0_12] : memref<32x128xbf16, #tpu.memory_space<vmem>>, vector<32x128xbf16>
    tpu.vector_store %arg5[%c0_11, %c0_12], %15 {strides = array<i32>} : memref<32x128xbf16, #tpu.memory_space<vmem>>, vector<32x128xbf16>,
    return
  }
  func.func @transform_0(%arg0: i32) -> (i32, i32) {
    %c0_i32 = arith.constant 0 : i32
    %c0_i32_0 = arith.constant 0 : i32
    return %arg0, %c0_i32 : i32, i32
  }
  func.func @transform_1(%arg0: i32) -> (i32, i32) {
    %c0_i32 = arith.constant 0 : i32
    %c0_i32_0 = arith.constant 0 : i32
    %c0_i32_1 = arith.constant 0 : i32
    return %c0_i32, %c0_i32_0 : i32, i32
  }
  func.func @transform_2(%arg0: i32) -> (i32, i32) {
    %c0_i32 = arith.constant 0 : i32
    %c0_i32_0 = arith.constant 0 : i32
    %c0_i32_1 = arith.constant 0 : i32
    return %c0_i32, %c0_i32_0 : i32, i32
  }
  func.func @transform_3(%arg0: i32) -> (i32, i32) {
    %c0_i32 = arith.constant 0 : i32
    %c0_i32_0 = arith.constant 0 : i32
    return %arg0, %c0_i32 : i32, i32
  }
  func.func @transform_4(%arg0: i32) -> (i32, i32) {
    %c0_i32 = arith.constant 0 : i32
    %c0_i32_0 = arith.constant 0 : i32
    return %arg0, %c0_i32 : i32, i32
  }
}

module attributes {stable_mosaic.version = 11 : i64} {
  func.func @_prequant_vq_kernel(%arg0: i32, %arg1: memref<32x128xbf16, #tpu.memory_space<vmem>>, %arg2: memref<128x128xbf16, #tpu.memory_space<vmem>>, %arg3: memref<1x128xf32, #tpu.memory_space<vmem>>, %arg4: memref<128x128xbf16, #tpu.memory_space<vmem>>, %arg5: memref<128x128xbf16, #tpu.memory_space<vmem>>, %arg6: memref<1x128xf32, #tpu.memory_space<vmem>>, %arg7: memref<32x128xbf16, #tpu.memory_space<vmem>>, %arg8: memref<32x1xi32, #tpu.memory_space<vmem>>, %arg9: memref<8x128xf32, #tpu.memory_space<vmem>>) attributes {dimension_semantics = [#tpu.dimension_semantics<parallel>], iteration_bounds = array<i64: 1>, scalar_prefetch = 0 : i64, scratch_operands = 0 : i64, tpu.core_type = #tpu.core_type<tc>, window_params = [{transform_indices = @transform_0, window_bounds = array<i64: 32, 128>}, {pipeline_mode = #tpu.pipeline_mode<synchronous>, transform_indices = @transform_1, window_bounds = array<i64: 128, 128>}, {pipeline_mode = #tpu.pipeline_mode<synchronous>, transform_indices = @transform_2, window_bounds = array<i64: 1, 128>}, {pipeline_mode = #tpu.pipeline_mode<synchronous>, transform_indices = @transform_3, window_bounds = array<i64: 128, 128>}, {pipeline_mode = #tpu.pipeline_mode<synchronous>, transform_indices = @transform_4, window_bounds = array<i64: 128, 128>}, {pipeline_mode = #tpu.pipeline_mode<synchronous>, transform_indices = @transform_5, window_bounds = array<i64: 1, 128>}, {transform_indices = @transform_6, window_bounds = array<i64: 32, 128>}, {transform_indices = @transform_7, window_bounds = array<i64: 32, 1>}, {transform_indices = @transform_8, window_bounds = array<i64: 8, 128>}]} {
    %c0 = arith.constant 0 : index
    %c0_0 = arith.constant 0 : index
    %0 = vector.load %arg1[%c0, %c0_0] : memref<32x128xbf16, #tpu.memory_space<vmem>>, vector<32x128xbf16>
    %c0_1 = arith.constant 0 : index
    %c0_2 = arith.constant 0 : index
    %1 = vector.load %arg2[%c0_1, %c0_2] : memref<128x128xbf16, #tpu.memory_space<vmem>>, vector<128x128xbf16>
    %cst = arith.constant dense<0.000000e+00> : vector<32x128xf32>
    %2 = tpu.matmul %0, %1, %cst {dimension_numbers = #tpu.dot_dimension_numbers<[1], [0], [0], [1], [0, 0, 1, 1], [], []>} : vector<32x128xbf16>, vector<128x128xbf16>, vector<32x128xf32> -> vector<32x128xf32>
    %c0_3 = arith.constant 0 : index
    %c0_4 = arith.constant 0 : index
    %3 = vector.load %arg3[%c0_3, %c0_4] : memref<1x128xf32, #tpu.memory_space<vmem>>, vector<1x128xf32>
    %4 = vector.broadcast %3 : vector<1x128xf32> to vector<32x128xf32>
    %5 = arith.addf %2, %4 : vector<32x128xf32>
    %c0_5 = arith.constant 0 : index
    %c0_6 = arith.constant 0 : index
    %6 = vector.load %arg6[%c0_5, %c0_6] : memref<1x128xf32, #tpu.memory_space<vmem>>, vector<1x128xf32>
    %7 = arith.truncf %5 : vector<32x128xf32> to vector<32x128xbf16>
    %c0_7 = arith.constant 0 : index
    %c0_8 = arith.constant 0 : index
    %8 = vector.load %arg4[%c0_7, %c0_8] : memref<128x128xbf16, #tpu.memory_space<vmem>>, vector<128x128xbf16>
    %cst_9 = arith.constant dense<0.000000e+00> : vector<32x128xf32>
    %9 = tpu.matmul %7, %8, %cst_9 {dimension_numbers = #tpu.dot_dimension_numbers<[1], [0], [0], [1], [0, 0, 1, 1], [], []>} : vector<32x128xbf16>, vector<128x128xbf16>, vector<32x128xf32> -> vector<32x128xf32>
    %cst_10 = arith.constant 2.000000e+00 : f32
    %10 = vector.broadcast %cst_10 : f32 to vector<32x128xf32>
    %11 = arith.mulf %10, %9 : vector<32x128xf32>
    %12 = vector.broadcast %6 : vector<1x128xf32> to vector<32x128xf32>
    %13 = arith.subf %12, %11 : vector<32x128xf32>
    %14 = tpu.iota {dimensions = array<i32: 1>} : vector<32x128xi32>
    %cst_11 = arith.constant dense<0x7F800000> : vector<32xf32>
    %15 = vector.multi_reduction <minimumf>, %13, %cst_11 [1] : vector<32x128xf32> to vector<32xf32>
    %16 = vector.shape_cast %15 : vector<32xf32> to vector<32x1xf32>
    %17 = vector.broadcast %16 : vector<32x1xf32> to vector<32x128xf32>
    %18 = arith.cmpf ole, %13, %17 : vector<32x128xf32>
    %c1073741824_i32 = arith.constant 1073741824 : i32
    %19 = vector.broadcast %c1073741824_i32 : i32 to vector<32x128xi32>
    %20 = arith.select %18, %14, %19 : vector<32x128xi1>, vector<32x128xi32>
    %cst_12 = arith.constant dense<2147483647> : vector<32xi32>
    %21 = vector.multi_reduction <minsi>, %20, %cst_12 [1] : vector<32x128xi32> to vector<32xi32>
    %22 = vector.shape_cast %21 : vector<32xi32> to vector<32x1xi32>
    %23 = vector.broadcast %22 : vector<32x1xi32> to vector<32x128xi32>
    %24 = arith.cmpi eq, %14, %23 : vector<32x128xi32>
    %25 = arith.extui %24 : vector<32x128xi1> to vector<32x128xi32>
    %26 = arith.sitofp %25 : vector<32x128xi32> to vector<32x128xf32>
    %27 = arith.truncf %26 : vector<32x128xf32> to vector<32x128xbf16>
    %c0_13 = arith.constant 0 : index
    %c0_14 = arith.constant 0 : index
    %28 = vector.load %arg5[%c0_13, %c0_14] : memref<128x128xbf16, #tpu.memory_space<vmem>>, vector<128x128xbf16>
    %cst_15 = arith.constant dense<0.000000e+00> : vector<32x128xf32>
    %29 = tpu.matmul %27, %28, %cst_15 {dimension_numbers = #tpu.dot_dimension_numbers<[1], [0], [0], [1], [0, 0, 1, 1], [], []>} : vector<32x128xbf16>, vector<128x128xbf16>, vector<32x128xf32> -> vector<32x128xf32>
    %30 = arith.truncf %29 : vector<32x128xf32> to vector<32x128xbf16>
    %c0_16 = arith.constant 0 : index
    %c0_17 = arith.constant 0 : index
    %31 = vector.load %arg7[%c0_16, %c0_17] : memref<32x128xbf16, #tpu.memory_space<vmem>>, vector<32x128xbf16>
    tpu.vector_store %arg7[%c0_16, %c0_17], %30 {strides = array<i32>} : memref<32x128xbf16, #tpu.memory_space<vmem>>, vector<32x128xbf16>,
    %c0_18 = arith.constant 0 : index
    %c0_19 = arith.constant 0 : index
    %32 = vector.load %arg8[%c0_18, %c0_19] : memref<32x1xi32, #tpu.memory_space<vmem>>, vector<32x1xi32>
    tpu.vector_store %arg8[%c0_18, %c0_19], %22 {strides = array<i32>} : memref<32x1xi32, #tpu.memory_space<vmem>>, vector<32x1xi32>,
    %33 = tpu.iota {dimensions = array<i32: 0>} : vector<32x1xi32>
    %c32_i32 = arith.constant 32 : i32
    %34 = arith.muli %arg0, %c32_i32 : i32
    %35 = vector.broadcast %34 : i32 to vector<32x1xi32>
    %36 = arith.addi %33, %35 : vector<32x1xi32>
    %c32_i32_20 = arith.constant 32 : i32
    %37 = vector.broadcast %c32_i32_20 : i32 to vector<32x1xi32>
    %38 = arith.cmpi slt, %36, %37 : vector<32x1xi32>
    %39 = arith.extui %38 : vector<32x1xi1> to vector<32x1xi32>
    %40 = arith.sitofp %39 : vector<32x1xi32> to vector<32x1xf32>
    %41 = arith.extf %27 : vector<32x128xbf16> to vector<32x128xf32>
    %42 = vector.broadcast %40 : vector<32x1xf32> to vector<32x128xf32>
    %43 = arith.mulf %41, %42 : vector<32x128xf32>
    %cst_21 = arith.constant dense<0.000000e+00> : vector<128xf32>
    %44 = vector.multi_reduction <add>, %43, %cst_21 [0] : vector<32x128xf32> to vector<128xf32>
    %45 = vector.shape_cast %44 : vector<128xf32> to vector<1x128xf32>
    %46 = arith.subf %29, %5 : vector<32x128xf32>
    %47 = vector.broadcast %40 : vector<32x1xf32> to vector<32x128xf32>
    %48 = arith.mulf %46, %47 : vector<32x128xf32>
    %49 = arith.mulf %48, %48 : vector<32x128xf32>
    %50 = vector.shape_cast %49 : vector<32x128xf32> to vector<1x32x128xf32>
    %cst_22 = arith.constant dense<0.000000e+00> : vector<1xf32>
    %51 = vector.multi_reduction <add>, %50, %cst_22 [1, 2] : vector<1x32x128xf32> to vector<1xf32>
    %52 = vector.shape_cast %51 : vector<1xf32> to vector<1x1x1xf32>
    %53 = vector.extract %52[0, 0, 0] : f32 from vector<1x1x1xf32>
    %54 = tpu.iota {dimensions = array<i32: 0>} : vector<8x128xi32>
    %c0_i32 = arith.constant 0 : i32
    %55 = vector.broadcast %c0_i32 : i32 to vector<8x128xi32>
    %56 = arith.cmpi eq, %54, %55 : vector<8x128xi32>
    %c1_i32 = arith.constant 1 : i32
    %57 = vector.broadcast %c1_i32 : i32 to vector<8x128xi32>
    %58 = arith.cmpi eq, %54, %57 : vector<8x128xi32>
    %cst_23 = arith.constant 0.000000e+00 : f32
    %59 = vector.broadcast %53 : f32 to vector<8x128xf32>
    %60 = vector.broadcast %cst_23 : f32 to vector<8x128xf32>
    %61 = arith.select %58, %59, %60 : vector<8x128xi1>, vector<8x128xf32>
    %62 = vector.shape_cast %45 : vector<1x128xf32> to vector<1x128xf32>
    %63 = vector.broadcast %62 : vector<1x128xf32> to vector<8x128xf32>
    %64 = arith.select %56, %63, %61 : vector<8x128xi1>, vector<8x128xf32>
    %c0_24 = arith.constant 0 : index
    %c0_25 = arith.constant 0 : index
    %65 = vector.load %arg9[%c0_24, %c0_25] : memref<8x128xf32, #tpu.memory_space<vmem>>, vector<8x128xf32>
    tpu.vector_store %arg9[%c0_24, %c0_25], %64 {strides = array<i32>} : memref<8x128xf32, #tpu.memory_space<vmem>>, vector<8x128xf32>,
    return
  }
  func.func @transform_0(%arg0: i32) -> (i32, i32) {
    %c0_i32 = arith.constant 0 : i32
    %c0_i32_0 = arith.constant 0 : i32
    return %arg0, %c0_i32 : i32, i32
  }
  func.func @transform_1(%arg0: i32) -> (i32, i32) {
    %c0_i32 = arith.constant 0 : i32
    %c0_i32_0 = arith.constant 0 : i32
    %c0_i32_1 = arith.constant 0 : i32
    return %c0_i32, %c0_i32_0 : i32, i32
  }
  func.func @transform_2(%arg0: i32) -> (i32, i32) {
    %c0_i32 = arith.constant 0 : i32
    %c0_i32_0 = arith.constant 0 : i32
    %c0_i32_1 = arith.constant 0 : i32
    return %c0_i32, %c0_i32_0 : i32, i32
  }
  func.func @transform_3(%arg0: i32) -> (i32, i32) {
    %c0_i32 = arith.constant 0 : i32
    %c0_i32_0 = arith.constant 0 : i32
    %c0_i32_1 = arith.constant 0 : i32
    return %c0_i32, %c0_i32_0 : i32, i32
  }
  func.func @transform_4(%arg0: i32) -> (i32, i32) {
    %c0_i32 = arith.constant 0 : i32
    %c0_i32_0 = arith.constant 0 : i32
    %c0_i32_1 = arith.constant 0 : i32
    return %c0_i32, %c0_i32_0 : i32, i32
  }
  func.func @transform_5(%arg0: i32) -> (i32, i32) {
    %c0_i32 = arith.constant 0 : i32
    %c0_i32_0 = arith.constant 0 : i32
    %c0_i32_1 = arith.constant 0 : i32
    return %c0_i32, %c0_i32_0 : i32, i32
  }
  func.func @transform_6(%arg0: i32) -> (i32, i32) {
    %c0_i32 = arith.constant 0 : i32
    %c0_i32_0 = arith.constant 0 : i32
    return %arg0, %c0_i32 : i32, i32
  }
  func.func @transform_7(%arg0: i32) -> (i32, i32) {
    %c0_i32 = arith.constant 0 : i32
    %c0_i32_0 = arith.constant 0 : i32
    return %arg0, %c0_i32 : i32, i32
  }
  func.func @transform_8(%arg0: i32) -> (i32, i32) {
    %c0_i32 = arith.constant 0 : i32
    %c0_i32_0 = arith.constant 0 : i32
    return %arg0, %c0_i32 : i32, i32
  }
}

module attributes {stable_mosaic.version = 11 : i64} {
  func.func @_mm_bias_kernel(%arg0: i32, %arg1: memref<32x1152xbf16, #tpu.memory_space<vmem>>, %arg2: memref<1152x512xbf16, #tpu.memory_space<vmem>>, %arg3: memref<1x512xf32, #tpu.memory_space<vmem>>, %arg4: memref<32x512xbf16, #tpu.memory_space<vmem>>) attributes {dimension_semantics = [#tpu.dimension_semantics<parallel>], iteration_bounds = array<i64: 1>, scalar_prefetch = 0 : i64, scratch_operands = 0 : i64, tpu.core_type = #tpu.core_type<tc>, window_params = [{transform_indices = @transform_0, window_bounds = array<i64: 32, 1152>}, {pipeline_mode = #tpu.pipeline_mode<synchronous>, transform_indices = @transform_1, window_bounds = array<i64: 1152, 512>}, {pipeline_mode = #tpu.pipeline_mode<synchronous>, transform_indices = @transform_2, window_bounds = array<i64: 1, 512>}, {transform_indices = @transform_3, window_bounds = array<i64: 32, 512>}]} {
    %c0 = arith.constant 0 : index
    %c0_0 = arith.constant 0 : index
    %0 = vector.load %arg1[%c0, %c0_0] : memref<32x1152xbf16, #tpu.memory_space<vmem>>, vector<32x1152xbf16>
    %c0_1 = arith.constant 0 : index
    %c0_2 = arith.constant 0 : index
    %1 = vector.load %arg2[%c0_1, %c0_2] : memref<1152x512xbf16, #tpu.memory_space<vmem>>, vector<1152x512xbf16>
    %cst = arith.constant dense<0.000000e+00> : vector<32x512xf32>
    %2 = tpu.matmul %0, %1, %cst {dimension_numbers = #tpu.dot_dimension_numbers<[1], [0], [0], [1], [0, 0, 1, 1], [], []>} : vector<32x1152xbf16>, vector<1152x512xbf16>, vector<32x512xf32> -> vector<32x512xf32>
    %c0_3 = arith.constant 0 : index
    %c0_4 = arith.constant 0 : index
    %3 = vector.load %arg3[%c0_3, %c0_4] : memref<1x512xf32, #tpu.memory_space<vmem>>, vector<1x512xf32>
    %4 = vector.broadcast %3 : vector<1x512xf32> to vector<32x512xf32>
    %5 = arith.addf %2, %4 : vector<32x512xf32>
    %cst_5 = arith.constant 0.000000e+00 : f32
    %6 = vector.broadcast %cst_5 : f32 to vector<32x512xf32>
    %7 = arith.maximumf %5, %6 : vector<32x512xf32>
    %8 = arith.truncf %7 : vector<32x512xf32> to vector<32x512xbf16>
    %c0_6 = arith.constant 0 : index
    %c0_7 = arith.constant 0 : index
    %9 = vector.load %arg4[%c0_6, %c0_7] : memref<32x512xbf16, #tpu.memory_space<vmem>>, vector<32x512xbf16>
    tpu.vector_store %arg4[%c0_6, %c0_7], %8 {strides = array<i32>} : memref<32x512xbf16, #tpu.memory_space<vmem>>, vector<32x512xbf16>,
    return
  }
  func.func @transform_0(%arg0: i32) -> (i32, i32) {
    %c0_i32 = arith.constant 0 : i32
    %c0_i32_0 = arith.constant 0 : i32
    return %arg0, %c0_i32 : i32, i32
  }
  func.func @transform_1(%arg0: i32) -> (i32, i32) {
    %c0_i32 = arith.constant 0 : i32
    %c0_i32_0 = arith.constant 0 : i32
    %c0_i32_1 = arith.constant 0 : i32
    return %c0_i32, %c0_i32_0 : i32, i32
  }
  func.func @transform_2(%arg0: i32) -> (i32, i32) {
    %c0_i32 = arith.constant 0 : i32
    %c0_i32_0 = arith.constant 0 : i32
    %c0_i32_1 = arith.constant 0 : i32
    return %c0_i32, %c0_i32_0 : i32, i32
  }
  func.func @transform_3(%arg0: i32) -> (i32, i32) {
    %c0_i32 = arith.constant 0 : i32
    %c0_i32_0 = arith.constant 0 : i32
    return %arg0, %c0_i32 : i32, i32
  }
}

module attributes {stable_mosaic.version = 11 : i64} {
  func.func @_mm_bias_kernel(%arg0: i32, %arg1: memref<128x1152xbf16, #tpu.memory_space<vmem>>, %arg2: memref<1152x128xbf16, #tpu.memory_space<vmem>>, %arg3: memref<1x128xf32, #tpu.memory_space<vmem>>, %arg4: memref<128x128xf32, #tpu.memory_space<vmem>>) attributes {dimension_semantics = [#tpu.dimension_semantics<parallel>], iteration_bounds = array<i64: 1>, scalar_prefetch = 0 : i64, scratch_operands = 0 : i64, tpu.core_type = #tpu.core_type<tc>, window_params = [{transform_indices = @transform_0, window_bounds = array<i64: 128, 1152>}, {pipeline_mode = #tpu.pipeline_mode<synchronous>, transform_indices = @transform_1, window_bounds = array<i64: 1152, 128>}, {pipeline_mode = #tpu.pipeline_mode<synchronous>, transform_indices = @transform_2, window_bounds = array<i64: 1, 128>}, {transform_indices = @transform_3, window_bounds = array<i64: 128, 128>}]} {
    %c0 = arith.constant 0 : index
    %c0_0 = arith.constant 0 : index
    %0 = vector.load %arg1[%c0, %c0_0] : memref<128x1152xbf16, #tpu.memory_space<vmem>>, vector<128x1152xbf16>
    %c0_1 = arith.constant 0 : index
    %c0_2 = arith.constant 0 : index
    %1 = vector.load %arg2[%c0_1, %c0_2] : memref<1152x128xbf16, #tpu.memory_space<vmem>>, vector<1152x128xbf16>
    %cst = arith.constant dense<0.000000e+00> : vector<128x128xf32>
    %2 = tpu.matmul %0, %1, %cst {dimension_numbers = #tpu.dot_dimension_numbers<[1], [0], [0], [1], [0, 0, 1, 1], [], []>} : vector<128x1152xbf16>, vector<1152x128xbf16>, vector<128x128xf32> -> vector<128x128xf32>
    %c0_3 = arith.constant 0 : index
    %c0_4 = arith.constant 0 : index
    %3 = vector.load %arg3[%c0_3, %c0_4] : memref<1x128xf32, #tpu.memory_space<vmem>>, vector<1x128xf32>
    %4 = vector.broadcast %3 : vector<1x128xf32> to vector<128x128xf32>
    %5 = arith.addf %2, %4 : vector<128x128xf32>
    %c0_5 = arith.constant 0 : index
    %c0_6 = arith.constant 0 : index
    %6 = vector.load %arg4[%c0_5, %c0_6] : memref<128x128xf32, #tpu.memory_space<vmem>>, vector<128x128xf32>
    tpu.vector_store %arg4[%c0_5, %c0_6], %5 {strides = array<i32>} : memref<128x128xf32, #tpu.memory_space<vmem>>, vector<128x128xf32>,
    return
  }
  func.func @transform_0(%arg0: i32) -> (i32, i32) {
    %c0_i32 = arith.constant 0 : i32
    %c0_i32_0 = arith.constant 0 : i32
    return %arg0, %c0_i32 : i32, i32
  }
  func.func @transform_1(%arg0: i32) -> (i32, i32) {
    %c0_i32 = arith.constant 0 : i32
    %c0_i32_0 = arith.constant 0 : i32
    %c0_i32_1 = arith.constant 0 : i32
    return %c0_i32, %c0_i32_0 : i32, i32
  }
  func.func @transform_2(%arg0: i32) -> (i32, i32) {
    %c0_i32 = arith.constant 0 : i32
    %c0_i32_0 = arith.constant 0 : i32
    %c0_i32_1 = arith.constant 0 : i32
    return %c0_i32, %c0_i32_0 : i32, i32
  }
  func.func @transform_3(%arg0: i32) -> (i32, i32) {
    %c0_i32 = arith.constant 0 : i32
    %c0_i32_0 = arith.constant 0 : i32
    return %arg0, %c0_i32 : i32, i32
  }
}

</mosaic_0001>

<bundles_post_ra>
// kernel: vqvae1_forward.11
= control target key start
LH: loop header
LB: loop body
LE: loop exit
PB: predicated region body
PF: predicated region fallthrough
CT: control target
= control target key end

     0   :  { %8 = vsyncpa [#allocation3], 0  ;;  %s767_s0 = inlined_call_operand.hbm [shape: bf16[128,128], index: 0, kind: input, shape index: {}]   ;;  %s768_s1 = inlined_call_operand.hbm [shape: bf16[128,128], index: 1, kind: input, shape index: {}]   ;;  %s769_s2 = inlined_call_operand.hbm [shape: f32[1,128], index: 2, kind: input, shape index: {}]   ;;  %s770_s3 = inlined_call_operand.hbm [shape: bf16[128,128], index: 3, kind: output, shape index: {}]  }
   0x1   :  { %9 = vsyncpa [#allocation6], 0 }
   0x2   :  { %10 = vsyncpa [#allocation4], 0  ;;  %s677_s12 = smov [#allocation5]   ;;  %s678_s14 = smov [#allocation2]  }
   0x3   :  { %s28_s13 = sshll.u32 %s677_s12, 4  ;;  %s16_s15 = sshll.u32 %s678_s14, 4  ;;  %s29_s13 = int_to_ptr.vmem [resolvable:$true] %s28_s13  ;;  %s703_s15 = int_to_ptr.vmem [resolvable:$true] %s16_s15 }
   0x4   :  { %s583_s18 = scalar_lea.hbm %s768_s1, 1024 }
   0x5   :  { %p584_p0 = scmp.ne.s32.totalorder %s768_s1, %s583_s18  ;;  %p587_p1 = scmp.lt.u32.totalorder %s583_s18, %s768_s1 }
   0x7   :  { %p589_p2 = pnand %p587_p1, %p584_p0 }
   0x9   :  { %592 = shalt.err (!%p589_p2)
}
   0xa   :  { %s593_s23 = scalar_lea.vmem %s29_s13, 1024  ;;  %p598_p4 = scmp.lt.s32.totalorder %s29_s13, %s29_s13 }
   0xb   :  { %p594_p3 = scmp.ne.s32.totalorder %s29_s13, %s593_s23  ;;  %p599_p5 = scmp.lt.s32.totalorder %s593_s23, %s593_s23 }
   0xd   :  { %p600_p6 = por %p599_p5, %p598_p4 }
   0xf   :  { %p601_p7 = pnand %p600_p6, %p594_p3 }
  0x11   :  { %604 = shalt.err (!%p601_p7)
}
  0x12   :  { %s679_s24 = smov 64   ;;  %s680_s25 = smov 4  }
  0x13   :  { %34 = dma.hbm_to_vmem [thread:$0]  %s768_s1, 1024, %s29_s13, [#allocation6], %s679_s24, %s679_s24, %s680_s25  }
  0x14   :  { %s605_s30 = scalar_lea.hbm %s767_s0, 1024 }
  0x15   :  { %p606_p8 = scmp.ne.s32.totalorder %s767_s0, %s605_s30  ;;  %p609_p9 = scmp.lt.u32.totalorder %s605_s30, %s767_s0 }
  0x17   :  { %p611_p10 = pnand %p609_p9, %p606_p8 }
  0x19   :  { %614 = shalt.err (!%p611_p10)
}
  0x1a   :  { %s615_s8 = scalar_lea.vmem %s703_s15, 1024  ;;  %p620_p12 = scmp.lt.s32.totalorder %s703_s15, %s703_s15 }
  0x1b   :  { %p616_p11 = scmp.ne.s32.totalorder %s703_s15, %s615_s8  ;;  %p621_p13 = scmp.lt.s32.totalorder %s615_s8, %s615_s8 }
  0x1d   :  { %p622_p0 = por %p621_p13, %p620_p12 }
  0x1f   :  { %p623_p1 = pnand %p622_p0, %p616_p11 }
  0x21   :  { %626 = shalt.err (!%p623_p1)
}
  0x22   :  { %22 = dma.hbm_to_vmem [thread:$0]  %s767_s0, 1024, %s703_s15, [#allocation3], %s679_s24, %s679_s24, %s680_s25  }
  0x23   :  { %s681_s10 = smov [#allocation7]   ;;  %s627_s14 = scalar_lea.hbm %s769_s2, 16 }
  0x24   :  { %s41_s11 = sshll.u32 %s681_s10, 4  ;;  %p628_p2 = scmp.ne.s32.totalorder %s769_s2, %s627_s14  ;;  %s42_s11 = int_to_ptr.vmem [resolvable:$true] %s41_s11 }
  0x25   :  { %p631_p3 = scmp.lt.u32.totalorder %s627_s14, %s769_s2 }
  0x27   :  { %p633_p4 = pnand %p631_p3, %p628_p2 }
  0x29   :  { %636 = shalt.err (!%p633_p4)
}
  0x2a   :  { %s637_s20 = scalar_lea.vmem %s42_s11, 16  ;;  %s641_s0 = scalar_lea.vmem %s42_s11, 32 }
  0x2b   :  { %p638_p5 = scmp.ne.s32.totalorder %s42_s11, %s637_s20  ;;  %p642_p6 = scmp.lt.s32.totalorder %s42_s11, %s42_s11 }
  0x2c   :  { %p643_p7 = scmp.lt.s32.totalorder %s641_s0, %s637_s20 }
  0x2e   :  { %p644_p8 = por %p643_p7, %p642_p6 }
  0x30   :  { %p645_p9 = pnand %p644_p8, %p638_p5 }
  0x32   :  { %648 = shalt.err (!%p645_p9)
}
  0x33   :  { %44 = dma.hbm_to_vmem [thread:$0]  %s769_s2, 16, %s42_s11, [#allocation6]  }
  0x34   :  { %671 = dma.done.wait [#allocation3], 1024  }
  0x35   :  { %672 = vsyncadd [#allocation3], 4294966272 }
  0x36   :  { %673 = dma.done.wait [#allocation6], 1040  }
  0x37   :  { %674 = vsyncadd [#allocation6], 4294966256  ;;  %v567_v0 = vld [vmem:[#allocation5] sm:$0xff]   ;;  %v568_v1 = vld [vmem:[#allocation5 + $0x8] sm:$0xff]   ;;  %s682_s2 = smov [#allocation8]  }
  0x38   :  { %513 = vmatprep.subr.bf16.mxu0 %v567_v0  ;;  %545 = vmatprep.subr.bf16.mxu1 %v567_v0  ;;  %v569_v2 = vld [vmem:[#allocation5 + $0x10] sm:$0xff]   ;;  %v570_v3 = vld [vmem:[#allocation5 + $0x18] sm:$0xff]   ;;  %v575_v4 = vld [vmem:[#allocation2] sm:$0xff]   ;;  %s388_s22 = sshll.u32 %s682_s2, 4  ;;  %s389_s22 = int_to_ptr.vmem [resolvable:$true] %s388_s22 }
  0x39   :  { %514 = vmatpush3.bf16.msra.mxu0 %v567_v0  ;;  %553 = vmatpush3.bf16.msra.mxu1 %v567_v0  ;;  %v576_v5 = vld [vmem:[#allocation2 + $0x20] sm:$0xff]   ;;  %v572_v7 = vld [vmem:[#allocation5 + $0x28] sm:$0xff]   ;;  %v573_v8 = vld [vmem:[#allocation5 + $0x30] sm:$0xff]   ;;  %s649_s23 = scalar_lea.vmem %s389_s22, 1024  ;;  %p654_p11 = scmp.lt.s32.totalorder %s389_s22, %s389_s22 }
  0x3a   :  { %515 = vmatprep.subr.bf16.mxu0 %v568_v1  ;;  %546 = vmatprep.subr.bf16.mxu1 %v568_v1  ;;  %v571_v6 = vld [vmem:[#allocation5 + $0x20] sm:$0xff]   ;;  %v574_v9 = vld [vmem:[#allocation5 + $0x38] sm:$0xff]   ;;  %v577_v10 = vld [vmem:[#allocation2 + $0x8] sm:$0xff]   ;;  %p650_p10 = scmp.ne.s32.totalorder %s389_s22, %s649_s23  ;;  %p655_p12 = scmp.lt.s32.totalorder %s649_s23, %s649_s23 }
  0x3b   :  { %529 = vmatprep.mubr.bf16.mxu0 %v575_v4  ;;  %537 = vmatprep.mubr.bf16.mxu1 %v576_v5  ;;  %v578_v11 = vld [vmem:[#allocation2 + $0x28] sm:$0xff]   ;;  %v579_v12 = vld [vmem:[#allocation2 + $0x10] sm:$0xff]   ;;  %v581_v14 = vld [vmem:[#allocation2 + $0x18] sm:$0xff]  }
  0x3c   :  { %v580_v13 = vld [vmem:[#allocation2 + $0x30] sm:$0xff]   ;;  %v582_v15 = vld [vmem:[#allocation2 + $0x38] sm:$0xff]   ;;  %v401_v16 = vld [vmem:[#allocation7] ss:$0 sm:$0xff]  ;;  %p656_p13 = por %p655_p12, %p654_p11 }
  0x3d   :  { %516 = vmatpush3.bf16.msra.mxu0 %v568_v1  ;;  %554 = vmatpush3.bf16.msra.mxu1 %v568_v1 }
  0x3e   :  { %517 = vmatprep.subr.bf16.mxu0 %v569_v2  ;;  %547 = vmatprep.subr.bf16.mxu1 %v569_v2  ;;  %p657_p0 = pnand %p656_p13, %p650_p10 }
  0x41   :  { %518 = vmatpush3.bf16.msra.mxu0 %v569_v2  ;;  %555 = vmatpush3.bf16.msra.mxu1 %v569_v2 }
  0x42   :  { %519 = vmatprep.subr.bf16.mxu0 %v570_v3  ;;  %548 = vmatprep.subr.bf16.mxu1 %v570_v3 }
  0x45   :  { %520 = vmatpush3.bf16.msra.mxu0 %v570_v3  ;;  %556 = vmatpush3.bf16.msra.mxu1 %v570_v3 }
  0x46   :  { %521 = vmatprep.subr.bf16.mxu0 %v571_v6  ;;  %549 = vmatprep.subr.bf16.mxu1 %v571_v6 }
  0x49   :  { %522 = vmatpush3.bf16.msra.mxu0 %v571_v6  ;;  %557 = vmatpush3.bf16.msra.mxu1 %v571_v6 }
  0x4a   :  { %523 = vmatprep.subr.bf16.mxu0 %v572_v7  ;;  %550 = vmatprep.subr.bf16.mxu1 %v572_v7 }
  0x4d   :  { %524 = vmatpush3.bf16.msra.mxu0 %v572_v7  ;;  %558 = vmatpush3.bf16.msra.mxu1 %v572_v7 }
  0x4e   :  { %525 = vmatprep.subr.bf16.mxu0 %v573_v8  ;;  %551 = vmatprep.subr.bf16.mxu1 %v573_v8 }
  0x51   :  { %526 = vmatpush3.bf16.msra.mxu0 %v573_v8  ;;  %559 = vmatpush3.bf16.msra.mxu1 %v573_v8 }
  0x52   :  { %527 = vmatprep.subr.bf16.mxu0 %v574_v9  ;;  %552 = vmatprep.subr.bf16.mxu1 %v574_v9 }
  0x55   :  { %528 = vmatpush3.bf16.msra.mxu0 %v574_v9  ;;  %560 = vmatpush3.bf16.msra.mxu1 %v574_v9 }
  0x58   :  { %530 = vmatmul.mubr.bf16.vlgmr.msra.gmra.mrb[0].mxu0 %v577_v10  ;;  %538 = vmatmul.mubr.bf16.vlgmr.msra.gmra.mrb[0].mxu1 %v578_v11 }
  0x59   :  { %533 = vmatprep.mubr.bf16.mxu0 %v579_v12  ;;  %541 = vmatprep.mubr.bf16.mxu1 %v580_v13 }
  0x60   :  { %534 = vmatmul.mubr.bf16.gmra.mrb[4].mxu0 %v581_v14  ;;  %542 = vmatmul.mubr.bf16.gmra.mrb[4].mxu1 %v582_v15 }
 0x12b   :  { %v531_v17 = vpop.f32.mrb[0].mxu0  ;;  %v539_v18 = vpop.f32.mrb[0].mxu1 }
 0x12c   :  { %v233_v19 = vadd.f32 %v531_v17, %v401_v16  ;;  %v265_v20 = vadd.f32 %v539_v18, %v401_v16  ;;  %v224_v21 = vpop.f32.mrb[1].mxu0  ;;  %v256_v22 = vpop.f32.mrb[1].mxu1 }
 0x12d   :  { %v225_v23 = vadd.f32 %v401_v16, %v224_v21  ;;  %v257_v24 = vadd.f32 %v401_v16, %v256_v22  ;;  %v532_v25 = vpop.f32.mrb[2].mxu0  ;;  %v540_v26 = vpop.f32.mrb[2].mxu1 }
 0x12e   :  { %v236_v27 = vadd.f32 %v532_v25, %v401_v16  ;;  %v268_v28 = vadd.f32 %v540_v26, %v401_v16  ;;  %v227_v29 = vpop.f32.mrb[3].mxu0  ;;  %v259_v30 = vpop.f32.mrb[3].mxu1  ;;  %v289_v33 = vmax.f32 %v233_v19, 0.0  ;;  %v297_v34 = vmax.f32 %v265_v20, 0.0 }
 0x12f   :  { %v228_v31 = vadd.f32 %v401_v16, %v227_v29  ;;  %v260_v32 = vadd.f32 %v401_v16, %v259_v30  ;;  %v287_v37 = vmax.f32 %v225_v23, 0.0  ;;  %v295_v38 = vmax.f32 %v257_v24, 0.0 }
 0x130   :  { %v290_v35 = vmax.f32 %v236_v27, 0.0  ;;  %v298_v36 = vmax.f32 %v268_v28, 0.0 }
 0x131   :  { %v288_v39 = vmax.f32 %v228_v31, 0.0  ;;  %v296_v40 = vmax.f32 %v260_v32, 0.0 }
 0x132   :  { %v458_v41 = vpack.c.bf16 %v290_v35, %v289_v33  ;;  %v478_v42 = vpack.c.bf16 %v298_v36, %v297_v34 }
 0x133   :  { %v453_v43 = vpack.c.bf16 %v288_v39, %v287_v37  ;;  %v473_v44 = vpack.c.bf16 %v296_v40, %v295_v38  ;;  %v535_v45 = vpop.f32.mrb[4].mxu0  ;;  %v543_v46 = vpop.f32.mrb[4].mxu1 }
 0x134   :  { %490 = vst [vmem:[#allocation8 + $0x8] sm:$0xff] %v458_v41   ;;  %494 = vst [vmem:[#allocation8 + $0x28] sm:$0xff] %v478_v42   ;;  %v249_v47 = vadd.f32 %v535_v45, %v401_v16  ;;  %v281_v48 = vadd.f32 %v543_v46, %v401_v16  ;;  %v240_v49 = vpop.f32.mrb[5].mxu0  ;;  %v272_v50 = vpop.f32.mrb[5].mxu1 }
 0x135   :  { %454 = vst [vmem:[#allocation8] sm:$0xff] %v453_v43   ;;  %493 = vst [vmem:[#allocation8 + $0x20] sm:$0xff] %v473_v44   ;;  %v241_v51 = vadd.f32 %v401_v16, %v240_v49  ;;  %v273_v52 = vadd.f32 %v401_v16, %v272_v50  ;;  %v536_v53 = vpop.f32.mrb[6].mxu0  ;;  %v544_v54 = vpop.f32.mrb[6].mxu1 }
 0x136   :  { %v252_v55 = vadd.f32 %v536_v53, %v401_v16  ;;  %v284_v56 = vadd.f32 %v544_v54, %v401_v16  ;;  %v243_v57 = vpop.f32.mrb[7].mxu0  ;;  %v275_v58 = vpop.f32.mrb[7].mxu1  ;;  %v293_v61 = vmax.f32 %v249_v47, 0.0  ;;  %v301_v62 = vmax.f32 %v281_v48, 0.0 }
 0x137   :  { %v244_v59 = vadd.f32 %v401_v16, %v243_v57  ;;  %v276_v60 = vadd.f32 %v401_v16, %v275_v58  ;;  %v291_v1 = vmax.f32 %v241_v51, 0.0  ;;  %v299_v2 = vmax.f32 %v273_v52, 0.0 }
 0x138   :  { %v294_v63 = vmax.f32 %v252_v55, 0.0  ;;  %v302_v0 = vmax.f32 %v284_v56, 0.0 }
 0x139   :  { %v292_v3 = vmax.f32 %v244_v59, 0.0  ;;  %v300_v4 = vmax.f32 %v276_v60, 0.0 }
 0x13a   :  { %v468_v5 = vpack.c.bf16 %v294_v63, %v293_v61  ;;  %v488_v6 = vpack.c.bf16 %v302_v0, %v301_v62 }
 0x13b   :  { %v463_v7 = vpack.c.bf16 %v292_v3, %v291_v1  ;;  %v483_v8 = vpack.c.bf16 %v300_v4, %v299_v2 }
 0x13c   :  { %492 = vst [vmem:[#allocation8 + $0x18] sm:$0xff] %v468_v5   ;;  %496 = vst [vmem:[#allocation8 + $0x38] sm:$0xff] %v488_v6  }
 0x13d   :  { %491 = vst [vmem:[#allocation8 + $0x10] sm:$0xff] %v463_v7   ;;  %495 = vst [vmem:[#allocation8 + $0x30] sm:$0xff] %v483_v8  }
 0x13e   :  { %660 = shalt.err (!%p657_p0)
}
 0x13f   :  { %s661_s28 = scalar_lea.hbm %s770_s3, 1024 }
 0x140   :  { %p662_p1 = scmp.ne.s32.totalorder %s770_s3, %s661_s28  ;;  %p665_p2 = scmp.lt.u32.totalorder %s661_s28, %s770_s3 }
 0x142   :  { %p667_p3 = pnand %p665_p2, %p662_p1 }
 0x144   :  { %670 = shalt.err (!%p667_p3)
}
 0x145   :  { %394 = dma.vmem_to_hbm [thread:$0]  %s389_s22, 1024, %s770_s3, [#allocation4], %s679_s24, %s679_s24, %s680_s25  }
 0x146   :  { %675 = dma.done.wait [#allocation4], 1024  }
 0x147   :  { %676 = vsyncadd [#allocation4], 4294966272 }
 0x148   :  { %398 = vsyncpa [#allocation3], 1 }
 0x149   :  { %399 = vsyncpa [#allocation6], 1 }
 0x14a   :  { %400 = vsyncpa [#allocation4], 1 }

// kernel: vqvae1_forward.12
= control target key start
LH: loop header
LB: loop body
LE: loop exit
PB: predicated region body
PF: predicated region fallthrough
CT: control target
= control target key end

     0   :  { %8 = vsyncpa [#allocation3], 0  ;;  %s2427_s0 = inlined_call_operand.hbm [shape: bf16[32,2048], index: 0, kind: input, shape index: {}]   ;;  %s2428_s1 = inlined_call_operand.hbm [shape: bf16[2048,128], index: 1, kind: input, shape index: {}]   ;;  %s2429_s2 = inlined_call_operand.hbm [shape: f32[1,128], index: 2, kind: input, shape index: {}]   ;;  %s2430_s3 = inlined_call_operand.hbm [shape: bf16[32,128], index: 3, kind: output, shape index: {}]  }
   0x1   :  { %9 = vsyncpa [#allocation6], 0 }
   0x2   :  { %10 = vsyncpa [#allocation4], 0  ;;  %s2345_s12 = smov [#allocation5]   ;;  %s2251_s16 = scalar_lea.hbm %s2428_s1, 16384 }
   0x3   :  { %s28_s13 = sshll.u32 %s2345_s12, 4  ;;  %p2252_p0 = scmp.ne.s32.totalorder %s2428_s1, %s2251_s16  ;;  %s29_s13 = int_to_ptr.vmem [resolvable:$true] %s28_s13 }
   0x4   :  { %p2255_p1 = scmp.lt.u32.totalorder %s2251_s16, %s2428_s1 }
   0x6   :  { %p2257_p2 = pnand %p2255_p1, %p2252_p0 }
   0x8   :  { %2260 = shalt.err (!%p2257_p2)
}
   0x9   :  { %s2261_s21 = scalar_lea.vmem %s29_s13, 16384  ;;  %p2266_p4 = scmp.lt.s32.totalorder %s29_s13, %s29_s13 }
   0xa   :  { %p2262_p3 = scmp.ne.s32.totalorder %s29_s13, %s2261_s21  ;;  %p2267_p5 = scmp.lt.s32.totalorder %s2261_s21, %s2261_s21 }
   0xc   :  { %p2268_p6 = por %p2267_p5, %p2266_p4 }
   0xe   :  { %p2269_p7 = pnand %p2268_p6, %p2262_p3 }
  0x10   :  { %2272 = shalt.err (!%p2269_p7)
}
  0x11   :  { %s2346_s22 = smov 64   ;;  %s2347_s23 = smov 4  }
  0x12   :  { %34 = dma.hbm_to_vmem [thread:$0]  %s2428_s1, 16384, %s29_s13, [#allocation6], %s2346_s22, %s2346_s22, %s2347_s23  }
  0x13   :  { %s2348_s26 = smov [#allocation2]   ;;  %s2273_s30 = scalar_lea.hbm %s2427_s0, 4096 }
  0x14   :  { %s16_s27 = sshll.u32 %s2348_s26, 4  ;;  %p2274_p8 = scmp.ne.s32.totalorder %s2427_s0, %s2273_s30  ;;  %s17_s27 = int_to_ptr.vmem [resolvable:$true] %s16_s27 }
  0x15   :  { %p2277_p9 = scmp.lt.u32.totalorder %s2273_s30, %s2427_s0 }
  0x17   :  { %p2279_p10 = pnand %p2277_p9, %p2274_p8 }
  0x19   :  { %2282 = shalt.err (!%p2279_p10)
}
  0x1a   :  { %s2283_s8 = scalar_lea.vmem %s17_s27, 4096  ;;  %p2288_p12 = scmp.lt.s32.totalorder %s17_s27, %s17_s27 }
  0x1b   :  { %p2284_p11 = scmp.ne.s32.totalorder %s17_s27, %s2283_s8  ;;  %p2289_p13 = scmp.lt.s32.totalorder %s2283_s8, %s2283_s8 }
  0x1d   :  { %p2290_p0 = por %p2289_p13, %p2288_p12 }
  0x1f   :  { %p2291_p1 = pnand %p2290_p0, %p2284_p11 }
  0x21   :  { %2294 = shalt.err (!%p2291_p1)
}
  0x22   :  { %s2349_s1 = smov 1024   ;;  %s2350_s11 = smov [#allocation7]  }
  0x23   :  { %22 = dma.hbm_to_vmem [thread:$0]  %s2427_s0, 4096, %s17_s27, [#allocation3], %s2349_s1, %s2349_s1, %s2346_s22  }
  0x24   :  { %s41_s12 = sshll.u32 %s2350_s11, 4  ;;  %s2295_s15 = scalar_lea.hbm %s2429_s2, 16  ;;  %s42_s12 = int_to_ptr.vmem [resolvable:$true] %s41_s12 }
  0x25   :  { %p2296_p2 = scmp.ne.s32.totalorder %s2429_s2, %s2295_s15  ;;  %p2299_p3 = scmp.lt.u32.totalorder %s2295_s15, %s2429_s2 }
  0x27   :  { %p2301_p4 = pnand %p2299_p3, %p2296_p2 }
  0x29   :  { %2304 = shalt.err (!%p2301_p4)
}
  0x2a   :  { %s2305_s20 = scalar_lea.vmem %s42_s12, 16  ;;  %s2309_s0 = scalar_lea.vmem %s42_s12, 32 }
  0x2b   :  { %p2306_p5 = scmp.ne.s32.totalorder %s42_s12, %s2305_s20  ;;  %p2310_p6 = scmp.lt.s32.totalorder %s42_s12, %s42_s12 }
  0x2c   :  { %p2311_p7 = scmp.lt.s32.totalorder %s2309_s0, %s2305_s20 }
  0x2e   :  { %p2312_p8 = por %p2311_p7, %p2310_p6 }
  0x30   :  { %p2313_p9 = pnand %p2312_p8, %p2306_p5 }
  0x32   :  { %2316 = shalt.err (!%p2313_p9)
}
  0x33   :  { %44 = dma.hbm_to_vmem [thread:$0]  %s2429_s2, 16, %s42_s12, [#allocation6]  }
  0x34   :  { %2339 = dma.done.wait [#allocation3], 4096  }
  0x35   :  { %2340 = vsyncadd [#allocation3], 4294963200 }
  0x36   :  { %2341 = dma.done.wait [#allocation6], 16400  }
  0x37   :  { %2342 = vsyncadd [#allocation6], 4294950896  ;;  %v2123_v0 = vld [vmem:[#allocation5 + $0x40] sm:$0xff]   ;;  %v2127_v4 = vld [vmem:[#allocation5 + $0x48] sm:$0xff]   ;;  %s2351_s2 = smov [#allocation8]  }
  0x38   :  { %v2124_v1 = vld [vmem:[#allocation5 + $0xc0] sm:$0xff]   ;;  %1892 = vmatprep.subr.bf16.mxu0 %v2123_v0  ;;  %v2128_v5 = vld [vmem:[#allocation5 + $0xc8] sm:$0xff]   ;;  %v2131_v8 = vld [vmem:[#allocation5 + $0x50] sm:$0xff]   ;;  %s1699_s25 = sshll.u32 %s2351_s2, 4  ;;  %s1700_s25 = int_to_ptr.vmem [resolvable:$true] %s1699_s25 }
  0x39   :  { %v2125_v2 = vld [vmem:[#allocation5] sm:$0xff]   ;;  %1920 = vmatprep.subr.bf16.mxu1 %v2124_v1  ;;  %v2129_v6 = vld [vmem:[#allocation5 + $0x8] sm:$0xff]   ;;  %v2132_v9 = vld [vmem:[#allocation5 + $0xd0] sm:$0xff]   ;;  %s2317_s26 = scalar_lea.vmem %s1700_s25, 256  ;;  %p2322_p11 = scmp.lt.s32.totalorder %s1700_s25, %s1700_s25 }
  0x3a   :  { %v2126_v3 = vld [vmem:[#allocation5 + $0x80] sm:$0xff]   ;;  %1893 = vmatpush3.bf16.msra.mxu0 %v2125_v2  ;;  %v2130_v7 = vld [vmem:[#allocation5 + $0x88] sm:$0xff]   ;;  %v2133_v10 = vld [vmem:[#allocation5 + $0x10] sm:$0xff]   ;;  %p2318_p10 = scmp.ne.s32.totalorder %s1700_s25, %s2317_s26  ;;  %p2323_p12 = scmp.lt.s32.totalorder %s2317_s26, %s2317_s26 }
  0x3b   :  { %1921 = vmatpush3.bf16.msra.mxu1 %v2126_v3  ;;  %1894 = vmatprep.subr.bf16.mxu0 %v2127_v4  ;;  %v2134_v11 = vld [vmem:[#allocation5 + $0x90] sm:$0xff]   ;;  %v2135_v12 = vld [vmem:[#allocation5 + $0x58] sm:$0xff]   ;;  %v2139_v16 = vld [vmem:[#allocation5 + $0x60] sm:$0xff]  }
  0x3c   :  { %1922 = vmatprep.subr.bf16.mxu1 %v2128_v5  ;;  %v2136_v13 = vld [vmem:[#allocation5 + $0xd8] sm:$0xff]   ;;  %v2140_v17 = vld [vmem:[#allocation5 + $0xe0] sm:$0xff]   ;;  %v2143_v20 = vld [vmem:[#allocation5 + $0x68] sm:$0xff]   ;;  %p2324_p13 = por %p2323_p12, %p2322_p11 }
  0x3d   :  { %v2137_v14 = vld [vmem:[#allocation5 + $0x18] sm:$0xff]   ;;  %v2141_v18 = vld [vmem:[#allocation5 + $0x20] sm:$0xff]   ;;  %v2144_v21 = vld [vmem:[#allocation5 + $0xe8] sm:$0xff]  }
  0x3e   :  { %1895 = vmatpush3.bf16.msra.mxu0 %v2129_v6  ;;  %v2138_v15 = vld [vmem:[#allocation5 + $0x98] sm:$0xff]   ;;  %v2142_v19 = vld [vmem:[#allocation5 + $0xa0] sm:$0xff]   ;;  %v2145_v22 = vld [vmem:[#allocation5 + $0x28] sm:$0xff]   ;;  %p2325_p0 = pnand %p2324_p13, %p2318_p10 }
  0x3f   :  { %1923 = vmatpush3.bf16.msra.mxu1 %v2130_v7  ;;  %1896 = vmatprep.subr.bf16.mxu0 %v2131_v8  ;;  %v2146_v23 = vld [vmem:[#allocation5 + $0xa8] sm:$0xff]   ;;  %v2147_v24 = vld [vmem:[#allocation5 + $0x70] sm:$0xff]   ;;  %v2151_v28 = vld [vmem:[#allocation5 + $0x78] sm:$0xff]  }
  0x40   :  { %1924 = vmatprep.subr.bf16.mxu1 %v2132_v9  ;;  %v2148_v25 = vld [vmem:[#allocation5 + $0xf0] sm:$0xff]   ;;  %v2152_v29 = vld [vmem:[#allocation5 + $0xf8] sm:$0xff]   ;;  %v55_v32 = vld [vmem:[#allocation2] sm:$0xff] }
  0x41   :  { %v2149_v26 = vld [vmem:[#allocation5 + $0x30] sm:$0xff]   ;;  %v2153_v30 = vld [vmem:[#allocation5 + $0x38] sm:$0xff]   ;;  %v63_v33 = vld [vmem:[#allocation2 + $0x40] sm:$0xff] }
  0x42   :  { %1897 = vmatpush3.bf16.msra.mxu0 %v2133_v10  ;;  %v2150_v27 = vld [vmem:[#allocation5 + $0xb0] sm:$0xff]   ;;  %v2154_v31 = vld [vmem:[#allocation5 + $0xb8] sm:$0xff]   ;;  %v56_v34 = vld [vmem:[#allocation2 + $0x8] sm:$0xff]  ;;  %v1713_v35 = vcombine.low %v55_v32, %v63_v33  ;;  %v1714_v36 = vcombine.high %v55_v32, %v63_v33 }
  0x43   :  { %1925 = vmatpush3.bf16.msra.mxu1 %v2134_v11  ;;  %1898 = vmatprep.subr.bf16.mxu0 %v2135_v12  ;;  %v64_v37 = vld [vmem:[#allocation2 + $0x48] sm:$0xff]  ;;  %v2155_v40 = vld [vmem:[#allocation5 + $0x140] sm:$0xff]   ;;  %v2163_v48 = vld [vmem:[#allocation5 + $0x150] sm:$0xff]  }
  0x44   :  { %1926 = vmatprep.subr.bf16.mxu1 %v2136_v13  ;;  %v1715_v38 = vcombine.low %v56_v34, %v64_v37  ;;  %v1716_v39 = vcombine.high %v56_v34, %v64_v37  ;;  %1310 = vmatprep.mubr.bf16.mxu0 %v1714_v36  ;;  %v2156_v41 = vld [vmem:[#allocation5 + $0x1c0] sm:$0xff]   ;;  %v2159_v44 = vld [vmem:[#allocation5 + $0x148] sm:$0xff]   ;;  %v2164_v49 = vld [vmem:[#allocation5 + $0x1d0] sm:$0xff]  }
  0x45   :  { %v2157_v42 = vld [vmem:[#allocation5 + $0x100] sm:$0xff]   ;;  %v2160_v45 = vld [vmem:[#allocation5 + $0x1c8] sm:$0xff]   ;;  %v2165_v50 = vld [vmem:[#allocation5 + $0x110] sm:$0xff]  }
  0x46   :  { %1899 = vmatpush3.bf16.msra.mxu0 %v2137_v14  ;;  %1359 = vmatprep.mubr.bf16.mxu1 %v1716_v39  ;;  %v2158_v43 = vld [vmem:[#allocation5 + $0x180] sm:$0xff]   ;;  %v2161_v46 = vld [vmem:[#allocation5 + $0x108] sm:$0xff]   ;;  %v2166_v51 = vld [vmem:[#allocation5 + $0x190] sm:$0xff]  }
  0x47   :  { %1927 = vmatpush3.bf16.msra.mxu1 %v2138_v15  ;;  %1900 = vmatprep.subr.bf16.mxu0 %v2139_v16  ;;  %v2162_v47 = vld [vmem:[#allocation5 + $0x188] sm:$0xff]   ;;  %v2167_v52 = vld [vmem:[#allocation5 + $0x158] sm:$0xff]   ;;  %v2171_v56 = vld [vmem:[#allocation5 + $0x160] sm:$0xff]  }
  0x48   :  { %1928 = vmatprep.subr.bf16.mxu1 %v2140_v17  ;;  %v2168_v53 = vld [vmem:[#allocation5 + $0x1d8] sm:$0xff]   ;;  %v2172_v57 = vld [vmem:[#allocation5 + $0x1e0] sm:$0xff]   ;;  %v2175_v60 = vld [vmem:[#allocation5 + $0x168] sm:$0xff]  }
  0x49   :  { %v2169_v54 = vld [vmem:[#allocation5 + $0x118] sm:$0xff]   ;;  %v2173_v58 = vld [vmem:[#allocation5 + $0x120] sm:$0xff]   ;;  %v2176_v61 = vld [vmem:[#allocation5 + $0x1e8] sm:$0xff]  }
  0x4a   :  { %1901 = vmatpush3.bf16.msra.mxu0 %v2141_v18  ;;  %v2170_v55 = vld [vmem:[#allocation5 + $0x198] sm:$0xff]   ;;  %v2174_v59 = vld [vmem:[#allocation5 + $0x1a0] sm:$0xff]   ;;  %v2177_v1 = vld [vmem:[#allocation5 + $0x128] sm:$0xff]  }
  0x4b   :  { %1929 = vmatpush3.bf16.msra.mxu1 %v2142_v19  ;;  %1902 = vmatprep.subr.bf16.mxu0 %v2143_v20  ;;  %v71_v62 = vld [vmem:[#allocation2 + $0x80] sm:$0xff]  ;;  %v2178_v3 = vld [vmem:[#allocation5 + $0x1a8] sm:$0xff]   ;;  %v2179_v8 = vld [vmem:[#allocation5 + $0x170] sm:$0xff]  }
  0x4c   :  { %1930 = vmatprep.subr.bf16.mxu1 %v2144_v21  ;;  %v79_v63 = vld [vmem:[#allocation2 + $0xc0] sm:$0xff]  ;;  %v72_v4 = vld [vmem:[#allocation2 + $0x88] sm:$0xff]  ;;  %v2180_v9 = vld [vmem:[#allocation5 + $0x1f0] sm:$0xff]  }
  0x4d   :  { %v1730_v0 = vcombine.high %v71_v62, %v79_v63  ;;  %v1729_v2 = vcombine.low %v71_v62, %v79_v63  ;;  %v80_v5 = vld [vmem:[#allocation2 + $0xc8] sm:$0xff]  ;;  %v2181_v10 = vld [vmem:[#allocation5 + $0x130] sm:$0xff]   ;;  %v2183_v12 = vld [vmem:[#allocation5 + $0x178] sm:$0xff]  }
  0x4e   :  { %1903 = vmatpush3.bf16.msra.mxu0 %v2145_v22  ;;  %v1732_v6 = vcombine.high %v72_v4, %v80_v5  ;;  %v1731_v7 = vcombine.low %v72_v4, %v80_v5  ;;  %v2182_v11 = vld [vmem:[#allocation5 + $0x1b0] sm:$0xff]   ;;  %v2184_v13 = vld [vmem:[#allocation5 + $0x1f8] sm:$0xff]   ;;  %v60_v4 = vld [vmem:[#allocation2 + $0x28] sm:$0xff] }
  0x4f   :  { %1931 = vmatpush3.bf16.msra.mxu1 %v2146_v23  ;;  %1904 = vmatprep.subr.bf16.mxu0 %v2147_v24  ;;  %v2185_v14 = vld [vmem:[#allocation5 + $0x138] sm:$0xff]   ;;  %v57_v16 = vld [vmem:[#allocation2 + $0x10] sm:$0xff]  ;;  %v2187_v24 = vld [vmem:[#allocation5 + $0x240] sm:$0xff]  }
  0x50   :  { %1932 = vmatprep.subr.bf16.mxu1 %v2148_v25  ;;  %v2186_v15 = vld [vmem:[#allocation5 + $0x1b8] sm:$0xff]   ;;  %v65_v17 = vld [vmem:[#allocation2 + $0x50] sm:$0xff]  ;;  %v2188_v25 = vld [vmem:[#allocation5 + $0x2c0] sm:$0xff]  }
  0x51   :  { %v58_v18 = vld [vmem:[#allocation2 + $0x18] sm:$0xff]  ;;  %v1717_v20 = vcombine.low %v57_v16, %v65_v17  ;;  %v1718_v21 = vcombine.high %v57_v16, %v65_v17  ;;  %v73_v32 = vld [vmem:[#allocation2 + $0x90] sm:$0xff]  ;;  %v68_v5 = vld [vmem:[#allocation2 + $0x68] sm:$0xff] }
  0x52   :  { %1905 = vmatpush3.bf16.msra.mxu0 %v2149_v26  ;;  %v66_v19 = vld [vmem:[#allocation2 + $0x58] sm:$0xff]  ;;  %v2189_v26 = vld [vmem:[#allocation5 + $0x200] sm:$0xff]   ;;  %v81_v33 = vld [vmem:[#allocation2 + $0xd0] sm:$0xff] }
  0x53   :  { %1933 = vmatpush3.bf16.msra.mxu1 %v2150_v27  ;;  %1906 = vmatprep.subr.bf16.mxu0 %v2151_v28  ;;  %v1719_v22 = vcombine.low %v58_v18, %v66_v19  ;;  %v1720_v23 = vcombine.high %v58_v18, %v66_v19  ;;  %v2190_v27 = vld [vmem:[#allocation5 + $0x280] sm:$0xff]   ;;  %v2191_v28 = vld [vmem:[#allocation5 + $0x248] sm:$0xff]   ;;  %v1734_v34 = vcombine.high %v73_v32, %v81_v33  ;;  %v2195_v36 = vld [vmem:[#allocation5 + $0x250] sm:$0xff]  }
  0x54   :  { %1934 = vmatprep.subr.bf16.mxu1 %v2152_v29  ;;  %v2192_v29 = vld [vmem:[#allocation5 + $0x2c8] sm:$0xff]   ;;  %v2196_v37 = vld [vmem:[#allocation5 + $0x2d0] sm:$0xff]   ;;  %v82_v39 = vld [vmem:[#allocation2 + $0xd8] sm:$0xff] }
  0x55   :  { %v2217_v62 = vld [vmem:[#allocation5 + $0x238] sm:$0xff]   ;;  %v75_v16 = vld [vmem:[#allocation2 + $0xa0] sm:$0xff] }
  0x56   :  { %1907 = vmatpush3.bf16.msra.mxu0 %v2153_v30  ;;  %v2193_v30 = vld [vmem:[#allocation5 + $0x208] sm:$0xff]   ;;  %v2218_v63 = vld [vmem:[#allocation5 + $0x2b8] sm:$0xff]   ;;  %v83_v17 = vld [vmem:[#allocation2 + $0xe0] sm:$0xff] }
  0x57   :  { %1935 = vmatpush3.bf16.msra.mxu1 %v2154_v31  ;;  %1948 = vmatprep.subr.bf16.mxu0 %v2155_v40  ;;  %v2194_v31 = vld [vmem:[#allocation5 + $0x288] sm:$0xff]   ;;  %v1738_v18 = vcombine.high %v75_v16, %v83_v17  ;;  %v1737_v19 = vcombine.low %v75_v16, %v83_v17 }
  0x58   :  { %1976 = vmatprep.subr.bf16.mxu1 %v2156_v41  ;;  %v2197_v41 = vld [vmem:[#allocation5 + $0x210] sm:$0xff]  }
  0x59   :  { %1311 = vmatmul.mubr.bf16.vlgmr.msra.gmra.mrb[0].mxu0 %v1713_v35  ;;  %v1733_v35 = vcombine.low %v73_v32, %v81_v33  ;;  %v2235_v32 = vld [vmem:[#allocation5 + $0x360] sm:$0xff]  }
  0x5a   :  { %1360 = vmatmul.mubr.bf16.vlgmr.msra.gmra.mrb[0].mxu1 %v1715_v38  ;;  %1949 = vmatpush3.bf16.msra.mxu0 %v2157_v42  ;;  %v74_v38 = vld [vmem:[#allocation2 + $0x98] sm:$0xff]  ;;  %v2236_v33 = vld [vmem:[#allocation5 + $0x3e0] sm:$0xff]  }
  0x5b   :  { %1977 = vmatpush3.bf16.msra.mxu1 %v2158_v43  ;;  %1950 = vmatprep.subr.bf16.mxu0 %v2159_v44  ;;  %v1736_v40 = vcombine.high %v74_v38, %v82_v39  ;;  %v1735_v42 = vcombine.low %v74_v38, %v82_v39  ;;  %v2198_v43 = vld [vmem:[#allocation5 + $0x290] sm:$0xff]   ;;  %v2199_v44 = vld [vmem:[#allocation5 + $0x258] sm:$0xff]   ;;  %v2241_v38 = vld [vmem:[#allocation5 + $0x328] sm:$0xff]  }
  0x5c   :  { %1978 = vmatprep.subr.bf16.mxu1 %v2160_v45  ;;  %1318 = vmatprep.mubr.bf16.mxu0 %v1730_v0  ;;  %v2200_v45 = vld [vmem:[#allocation5 + $0x2d8] sm:$0xff]   ;;  %v59_v0 = vld [vmem:[#allocation2 + $0x20] sm:$0xff]  ;;  %v2242_v39 = vld [vmem:[#allocation5 + $0x3a8] sm:$0xff]  }
  0x5d   :  { %1367 = vmatprep.mubr.bf16.mxu1 %v1732_v6  ;;  %v1723_v6 = vcombine.low %v60_v4, %v68_v5 }
  0x5e   :  { %1951 = vmatpush3.bf16.msra.mxu0 %v2161_v46  ;;  %v2201_v46 = vld [vmem:[#allocation5 + $0x218] sm:$0xff]  }
  0x5f   :  { %1979 = vmatpush3.bf16.msra.mxu1 %v2162_v47  ;;  %1952 = vmatprep.subr.bf16.mxu0 %v2163_v48  ;;  %v2202_v47 = vld [vmem:[#allocation5 + $0x298] sm:$0xff]   ;;  %v2203_v48 = vld [vmem:[#allocation5 + $0x260] sm:$0xff]  }
  0x60   :  { %1980 = vmatprep.subr.bf16.mxu1 %v2164_v49  ;;  %v2204_v49 = vld [vmem:[#allocation5 + $0x2e0] sm:$0xff]  }
  0x61   :  { %1319 = vmatmul.mubr.bf16.gmra.mrb[4].mxu0 %v1729_v2 }
  0x62   :  { %1953 = vmatpush3.bf16.msra.mxu0 %v2165_v50  ;;  %1368 = vmatmul.mubr.bf16.gmra.mrb[4].mxu1 %v1731_v7  ;;  %v2205_v50 = vld [vmem:[#allocation5 + $0x220] sm:$0xff]   ;;  %v1724_v7 = vcombine.high %v60_v4, %v68_v5 }
  0x63   :  { %1981 = vmatpush3.bf16.msra.mxu1 %v2166_v51  ;;  %1954 = vmatprep.subr.bf16.mxu0 %v2167_v52  ;;  %v2206_v51 = vld [vmem:[#allocation5 + $0x2a0] sm:$0xff]   ;;  %v2207_v52 = vld [vmem:[#allocation5 + $0x268] sm:$0xff]  }
  0x64   :  { %1982 = vmatprep.subr.bf16.mxu1 %v2168_v53  ;;  %1408 = vmatprep.mubr.bf16.mxu0 %v1718_v21  ;;  %v2208_v53 = vld [vmem:[#allocation5 + $0x2e8] sm:$0xff]   ;;  %v2228_v21 = vld [vmem:[#allocation5 + $0x3d0] sm:$0xff]  }
  0x65   :  { %1457 = vmatprep.mubr.bf16.mxu1 %v1720_v23  ;;  %v84_v23 = vld [vmem:[#allocation2 + $0xe8] sm:$0xff] }
  0x66   :  { %1955 = vmatpush3.bf16.msra.mxu0 %v2169_v54  ;;  %v2209_v54 = vld [vmem:[#allocation5 + $0x228] sm:$0xff]  }
  0x67   :  { %1983 = vmatpush3.bf16.msra.mxu1 %v2170_v55  ;;  %1956 = vmatprep.subr.bf16.mxu0 %v2171_v56  ;;  %v2210_v55 = vld [vmem:[#allocation5 + $0x2a8] sm:$0xff]   ;;  %v2211_v56 = vld [vmem:[#allocation5 + $0x270] sm:$0xff]  }
  0x68   :  { %1984 = vmatprep.subr.bf16.mxu1 %v2172_v57  ;;  %v2212_v57 = vld [vmem:[#allocation5 + $0x2f0] sm:$0xff]  }
  0x6a   :  { %1957 = vmatpush3.bf16.msra.mxu0 %v2173_v58  ;;  %v2213_v58 = vld [vmem:[#allocation5 + $0x230] sm:$0xff]  }
  0x6b   :  { %1985 = vmatpush3.bf16.msra.mxu1 %v2174_v59  ;;  %1958 = vmatprep.subr.bf16.mxu0 %v2175_v60  ;;  %v2214_v59 = vld [vmem:[#allocation5 + $0x2b0] sm:$0xff]   ;;  %v2215_v60 = vld [vmem:[#allocation5 + $0x278] sm:$0xff]  }
  0x6c   :  { %1986 = vmatprep.subr.bf16.mxu1 %v2176_v61  ;;  %v2216_v61 = vld [vmem:[#allocation5 + $0x2f8] sm:$0xff]  }
  0x6e   :  { %1959 = vmatpush3.bf16.msra.mxu0 %v2177_v1  ;;  %v67_v1 = vld [vmem:[#allocation2 + $0x60] sm:$0xff] }
  0x6f   :  { %1987 = vmatpush3.bf16.msra.mxu1 %v2178_v3  ;;  %1960 = vmatprep.subr.bf16.mxu0 %v2179_v8  ;;  %v1721_v2 = vcombine.low %v59_v0, %v67_v1  ;;  %v1722_v3 = vcombine.high %v59_v0, %v67_v1  ;;  %v2219_v8 = vld [vmem:[#allocation5 + $0x340] sm:$0xff]  }
  0x70   :  { %1988 = vmatprep.subr.bf16.mxu1 %v2180_v9  ;;  %v2220_v9 = vld [vmem:[#allocation5 + $0x3c0] sm:$0xff]  }
  0x72   :  { %1961 = vmatpush3.bf16.msra.mxu0 %v2181_v10  ;;  %v2221_v10 = vld [vmem:[#allocation5 + $0x300] sm:$0xff]  }
  0x73   :  { %1989 = vmatpush3.bf16.msra.mxu1 %v2182_v11  ;;  %1962 = vmatprep.subr.bf16.mxu0 %v2183_v12  ;;  %v2222_v11 = vld [vmem:[#allocation5 + $0x380] sm:$0xff]   ;;  %v2223_v12 = vld [vmem:[#allocation5 + $0x348] sm:$0xff]  }
  0x74   :  { %1990 = vmatprep.subr.bf16.mxu1 %v2184_v13  ;;  %v2224_v13 = vld [vmem:[#allocation5 + $0x3c8] sm:$0xff]  }
  0x76   :  { %1963 = vmatpush3.bf16.msra.mxu0 %v2185_v14  ;;  %v2225_v14 = vld [vmem:[#allocation5 + $0x308] sm:$0xff]  }
  0x77   :  { %1991 = vmatpush3.bf16.msra.mxu1 %v2186_v15  ;;  %2004 = vmatprep.subr.bf16.mxu0 %v2187_v24  ;;  %v2226_v15 = vld [vmem:[#allocation5 + $0x388] sm:$0xff]  }
  0x78   :  { %2032 = vmatprep.subr.bf16.mxu1 %v2188_v25  ;;  %v2229_v25 = vld [vmem:[#allocation5 + $0x310] sm:$0xff]  }
  0x79   :  { %1409 = vmatmul.mubr.bf16.vlgmr.msra.gmra.mrb[8].mxu0 %v1717_v20  ;;  %v2227_v20 = vld [vmem:[#allocation5 + $0x350] sm:$0xff]  }
  0x7a   :  { %1458 = vmatmul.mubr.bf16.vlgmr.msra.gmra.mrb[8].mxu1 %v1719_v22  ;;  %2005 = vmatpush3.bf16.msra.mxu0 %v2189_v26  ;;  %v76_v22 = vld [vmem:[#allocation2 + $0xa8] sm:$0xff] }
  0x7b   :  { %2033 = vmatpush3.bf16.msra.mxu1 %v2190_v27  ;;  %2006 = vmatprep.subr.bf16.mxu0 %v2191_v28  ;;  %v1740_v24 = vcombine.high %v76_v22, %v84_v23  ;;  %v1739_v26 = vcombine.low %v76_v22, %v84_v23  ;;  %v2230_v27 = vld [vmem:[#allocation5 + $0x390] sm:$0xff]   ;;  %v2231_v28 = vld [vmem:[#allocation5 + $0x358] sm:$0xff]  }
  0x7c   :  { %2034 = vmatprep.subr.bf16.mxu1 %v2192_v29  ;;  %1416 = vmatprep.mubr.bf16.mxu0 %v1734_v34  ;;  %v2232_v29 = vld [vmem:[#allocation5 + $0x3d8] sm:$0xff]   ;;  %v2237_v34 = vld [vmem:[#allocation5 + $0x320] sm:$0xff]  }
  0x7d   :  { %1465 = vmatprep.mubr.bf16.mxu1 %v1736_v40  ;;  %v2243_v40 = vld [vmem:[#allocation5 + $0x370] sm:$0xff]  }
  0x7e   :  { %2007 = vmatpush3.bf16.msra.mxu0 %v2193_v30  ;;  %v2233_v30 = vld [vmem:[#allocation5 + $0x318] sm:$0xff]  }
  0x7f   :  { %2035 = vmatpush3.bf16.msra.mxu1 %v2194_v31  ;;  %2008 = vmatprep.subr.bf16.mxu0 %v2195_v36  ;;  %v2234_v31 = vld [vmem:[#allocation5 + $0x398] sm:$0xff]   ;;  %v2239_v36 = vld [vmem:[#allocation5 + $0x368] sm:$0xff]  }
  0x80   :  { %2036 = vmatprep.subr.bf16.mxu1 %v2196_v37  ;;  %v2240_v37 = vld [vmem:[#allocation5 + $0x3e8] sm:$0xff]  }
  0x81   :  { %1417 = vmatmul.mubr.bf16.gmra.mrb[12].mxu0 %v1733_v35  ;;  %v2238_v35 = vld [vmem:[#allocation5 + $0x3a0] sm:$0xff]  }
  0x82   :  { %2009 = vmatpush3.bf16.msra.mxu0 %v2197_v41  ;;  %1466 = vmatmul.mubr.bf16.gmra.mrb[12].mxu1 %v1735_v42  ;;  %v2244_v41 = vld [vmem:[#allocation5 + $0x3f0] sm:$0xff]  }
  0x83   :  { %2037 = vmatpush3.bf16.msra.mxu1 %v2198_v43  ;;  %2010 = vmatprep.subr.bf16.mxu0 %v2199_v44  ;;  %v2245_v42 = vld [vmem:[#allocation5 + $0x330] sm:$0xff]   ;;  %v2247_v44 = vld [vmem:[#allocation5 + $0x378] sm:$0xff]  }
  0x84   :  { %2038 = vmatprep.subr.bf16.mxu1 %v2200_v45  ;;  %1506 = vmatprep.mubr.bf16.mxu0 %v1722_v3  ;;  %v2246_v43 = vld [vmem:[#allocation5 + $0x3b0] sm:$0xff]   ;;  %v2248_v45 = vld [vmem:[#allocation5 + $0x3f8] sm:$0xff]  }
  0x85   :  { %1555 = vmatprep.mubr.bf16.mxu1 %v1724_v7 }
  0x86   :  { %2011 = vmatpush3.bf16.msra.mxu0 %v2201_v46  ;;  %v2249_v46 = vld [vmem:[#allocation5 + $0x338] sm:$0xff]  }
  0x87   :  { %2039 = vmatpush3.bf16.msra.mxu1 %v2202_v47  ;;  %2012 = vmatprep.subr.bf16.mxu0 %v2203_v48  ;;  %v2250_v47 = vld [vmem:[#allocation5 + $0x3b8] sm:$0xff]   ;;  %v61_v48 = vld [vmem:[#allocation2 + $0x30] sm:$0xff] }
  0x88   :  { %2040 = vmatprep.subr.bf16.mxu1 %v2204_v49  ;;  %v69_v49 = vld [vmem:[#allocation2 + $0x70] sm:$0xff] }
  0x8a   :  { %2013 = vmatpush3.bf16.msra.mxu0 %v2205_v50  ;;  %v62_v50 = vld [vmem:[#allocation2 + $0x38] sm:$0xff] }
  0x8b   :  { %2041 = vmatpush3.bf16.msra.mxu1 %v2206_v51  ;;  %2014 = vmatprep.subr.bf16.mxu0 %v2207_v52  ;;  %v1725_v51 = vcombine.low %v61_v48, %v69_v49  ;;  %v1726_v52 = vcombine.high %v61_v48, %v69_v49 }
  0x8c   :  { %2042 = vmatprep.subr.bf16.mxu1 %v2208_v53  ;;  %v70_v53 = vld [vmem:[#allocation2 + $0x78] sm:$0xff] }
  0x8e   :  { %2015 = vmatpush3.bf16.msra.mxu0 %v2209_v54  ;;  %v77_v54 = vld [vmem:[#allocation2 + $0xb0] sm:$0xff] }
  0x8f   :  { %2043 = vmatpush3.bf16.msra.mxu1 %v2210_v55  ;;  %2016 = vmatprep.subr.bf16.mxu0 %v2211_v56  ;;  %v85_v55 = vld [vmem:[#allocation2 + $0xf0] sm:$0xff]  ;;  %v1727_v56 = vcombine.low %v62_v50, %v70_v53 }
  0x90   :  { %2044 = vmatprep.subr.bf16.mxu1 %v2212_v57  ;;  %v1728_v57 = vcombine.high %v62_v50, %v70_v53 }
  0x92   :  { %2017 = vmatpush3.bf16.msra.mxu0 %v2213_v58  ;;  %v1742_v58 = vcombine.high %v77_v54, %v85_v55 }
  0x93   :  { %2045 = vmatpush3.bf16.msra.mxu1 %v2214_v59  ;;  %2018 = vmatprep.subr.bf16.mxu0 %v2215_v60  ;;  %v78_v59 = vld [vmem:[#allocation2 + $0xb8] sm:$0xff] }
  0x94   :  { %2046 = vmatprep.subr.bf16.mxu1 %v2216_v61  ;;  %v86_v60 = vld [vmem:[#allocation2 + $0xf8] sm:$0xff] }
  0x95   :  { %v1744_v61 = vcombine.high %v78_v59, %v86_v60 }
  0x96   :  { %2019 = vmatpush3.bf16.msra.mxu0 %v2217_v62  ;;  %v1741_v62 = vcombine.low %v77_v54, %v85_v55 }
  0x97   :  { %2047 = vmatpush3.bf16.msra.mxu1 %v2218_v63  ;;  %2060 = vmatprep.subr.bf16.mxu0 %v2219_v8  ;;  %v1743_v63 = vcombine.low %v78_v59, %v86_v60 }
  0x98   :  { %2088 = vmatprep.subr.bf16.mxu1 %v2220_v9 }
  0x99   :  { %1507 = vmatmul.mubr.bf16.vlgmr.msra.gmra.mrb[16].mxu0 %v1721_v2  ;;  %v1712_v2 = vld [vmem:[#allocation7] ss:$0 sm:$0xff] }
  0x9a   :  { %1556 = vmatmul.mubr.bf16.vlgmr.msra.gmra.mrb[16].mxu1 %v1723_v6  ;;  %2061 = vmatpush3.bf16.msra.mxu0 %v2221_v10 }
  0x9b   :  { %2089 = vmatpush3.bf16.msra.mxu1 %v2222_v11  ;;  %2062 = vmatprep.subr.bf16.mxu0 %v2223_v12 }
  0x9c   :  { %2090 = vmatprep.subr.bf16.mxu1 %v2224_v13  ;;  %1514 = vmatprep.mubr.bf16.mxu0 %v1738_v18 }
  0x9d   :  { %1563 = vmatprep.mubr.bf16.mxu1 %v1740_v24 }
  0x9e   :  { %2063 = vmatpush3.bf16.msra.mxu0 %v2225_v14 }
  0x9f   :  { %2091 = vmatpush3.bf16.msra.mxu1 %v2226_v15  ;;  %2064 = vmatprep.subr.bf16.mxu0 %v2227_v20 }
  0xa0   :  { %2092 = vmatprep.subr.bf16.mxu1 %v2228_v21 }
  0xa1   :  { %1515 = vmatmul.mubr.bf16.gmra.mrb[20].mxu0 %v1737_v19 }
  0xa2   :  { %2065 = vmatpush3.bf16.msra.mxu0 %v2229_v25  ;;  %1564 = vmatmul.mubr.bf16.gmra.mrb[20].mxu1 %v1739_v26 }
  0xa3   :  { %2093 = vmatpush3.bf16.msra.mxu1 %v2230_v27  ;;  %2066 = vmatprep.subr.bf16.mxu0 %v2231_v28 }
  0xa4   :  { %2094 = vmatprep.subr.bf16.mxu1 %v2232_v29  ;;  %1604 = vmatprep.mubr.bf16.mxu0 %v1726_v52 }
  0xa5   :  { %1653 = vmatprep.mubr.bf16.mxu1 %v1728_v57 }
  0xa6   :  { %2067 = vmatpush3.bf16.msra.mxu0 %v2233_v30 }
  0xa7   :  { %2095 = vmatpush3.bf16.msra.mxu1 %v2234_v31  ;;  %2068 = vmatprep.subr.bf16.mxu0 %v2235_v32 }
  0xa8   :  { %2096 = vmatprep.subr.bf16.mxu1 %v2236_v33 }
  0xaa   :  { %2069 = vmatpush3.bf16.msra.mxu0 %v2237_v34 }
  0xab   :  { %2097 = vmatpush3.bf16.msra.mxu1 %v2238_v35  ;;  %2070 = vmatprep.subr.bf16.mxu0 %v2239_v36 }
  0xac   :  { %2098 = vmatprep.subr.bf16.mxu1 %v2240_v37 }
  0xae   :  { %2071 = vmatpush3.bf16.msra.mxu0 %v2241_v38 }
  0xaf   :  { %2099 = vmatpush3.bf16.msra.mxu1 %v2242_v39  ;;  %2072 = vmatprep.subr.bf16.mxu0 %v2243_v40 }
  0xb0   :  { %2100 = vmatprep.subr.bf16.mxu1 %v2244_v41 }
  0xb2   :  { %2073 = vmatpush3.bf16.msra.mxu0 %v2245_v42 }
  0xb3   :  { %2101 = vmatpush3.bf16.msra.mxu1 %v2246_v43  ;;  %2074 = vmatprep.subr.bf16.mxu0 %v2247_v44 }
  0xb4   :  { %2102 = vmatprep.subr.bf16.mxu1 %v2248_v45 }
  0xb6   :  { %2075 = vmatpush3.bf16.msra.mxu0 %v2249_v46 }
  0xb7   :  { %2103 = vmatpush3.bf16.msra.mxu1 %v2250_v47 }
  0xb9   :  { %1605 = vmatmul.mubr.bf16.vlgmr.msra.gmra.mrb[24].mxu0 %v1725_v51 }
  0xba   :  { %1654 = vmatmul.mubr.bf16.vlgmr.msra.gmra.mrb[24].mxu1 %v1727_v56  ;;  %1612 = vmatprep.mubr.bf16.mxu0 %v1742_v58 }
  0xbb   :  { %1661 = vmatprep.mubr.bf16.mxu1 %v1744_v61 }
  0xc1   :  { %1613 = vmatmul.mubr.bf16.gmra.mrb[28].mxu0 %v1741_v62 }
  0xc2   :  { %1662 = vmatmul.mubr.bf16.gmra.mrb[28].mxu1 %v1743_v63 }
 0x12c   :  { %v1908_v0 = vpop.f32.mrb[0].mxu0 }
 0x12d   :  { %v1936_v1 = vpop.f32.mrb[0].mxu1  ;;  %v1909_v3 = vpop.f32.mrb[1].mxu0 }
 0x12e   :  { %v1910_v4 = vadd.f32 %v1909_v3, %v1908_v0  ;;  %v1937_v5 = vpop.f32.mrb[1].mxu1  ;;  %v1911_v6 = vpop.f32.mrb[2].mxu0 }
 0x12f   :  { %v1938_v7 = vadd.f32 %v1937_v5, %v1936_v1  ;;  %v1939_v8 = vpop.f32.mrb[2].mxu1  ;;  %v1912_v9 = vpop.f32.mrb[3].mxu0 }
 0x130   :  { %v1313_v10 = vadd.f32 %v1910_v4, %v1712_v2  ;;  %v1913_v11 = vadd.f32 %v1912_v9, %v1911_v6  ;;  %v1940_v12 = vpop.f32.mrb[3].mxu1 }
 0x131   :  { %v1941_v13 = vadd.f32 %v1940_v12, %v1939_v8 }
 0x132   :  { %v1362_v14 = vadd.f32 %v1938_v7, %v1313_v10  ;;  %v1316_v15 = vadd.f32 %v1913_v11, %v1712_v2 }
 0x134   :  { %v1365_v16 = vadd.f32 %v1941_v13, %v1316_v15  ;;  %v1914_v17 = vpop.f32.mrb[4].mxu0 }
 0x135   :  { %v1915_v18 = vpop.f32.mrb[5].mxu0  ;;  %v1942_v21 = vpop.f32.mrb[4].mxu1 }
 0x136   :  { %v1916_v19 = vadd.f32 %v1915_v18, %v1914_v17  ;;  %v1917_v20 = vpop.f32.mrb[6].mxu0  ;;  %v1943_v25 = vpop.f32.mrb[5].mxu1 }
 0x137   :  { %v1918_v22 = vpop.f32.mrb[7].mxu0  ;;  %v1944_v26 = vadd.f32 %v1943_v25, %v1942_v21  ;;  %v1945_v27 = vpop.f32.mrb[6].mxu1 }
 0x138   :  { %v1321_v23 = vadd.f32 %v1916_v19, %v1712_v2  ;;  %v1919_v24 = vadd.f32 %v1918_v22, %v1917_v20  ;;  %v1946_v29 = vpop.f32.mrb[7].mxu1 }
 0x139   :  { %v1947_v31 = vadd.f32 %v1946_v29, %v1945_v27 }
 0x13a   :  { %v1324_v28 = vadd.f32 %v1919_v24, %v1712_v2  ;;  %v1370_v30 = vadd.f32 %v1944_v26, %v1321_v23 }
 0x13c   :  { %v1373_v32 = vadd.f32 %v1947_v31, %v1324_v28 }
 0x14c   :  { %v1964_v33 = vpop.f32.mrb[8].mxu0 }
 0x14d   :  { %v1992_v34 = vpop.f32.mrb[8].mxu1  ;;  %v1965_v35 = vpop.f32.mrb[9].mxu0 }
 0x14e   :  { %v1993_v36 = vpop.f32.mrb[9].mxu1  ;;  %v1966_v37 = vadd.f32 %v1965_v35, %v1964_v33  ;;  %v1967_v39 = vpop.f32.mrb[10].mxu0 }
 0x14f   :  { %v1994_v38 = vadd.f32 %v1993_v36, %v1992_v34  ;;  %v1995_v40 = vpop.f32.mrb[10].mxu1  ;;  %v1968_v41 = vpop.f32.mrb[11].mxu0 }
 0x150   :  { %v1996_v42 = vpop.f32.mrb[11].mxu1  ;;  %v1411_v43 = vadd.f32 %v1966_v37, %v1362_v14  ;;  %v1969_v44 = vadd.f32 %v1968_v41, %v1967_v39 }
 0x151   :  { %v1997_v45 = vadd.f32 %v1996_v42, %v1995_v40 }
 0x152   :  { %v1460_v46 = vadd.f32 %v1994_v38, %v1411_v43  ;;  %v1414_v47 = vadd.f32 %v1969_v44, %v1365_v16 }
 0x154   :  { %v1463_v48 = vadd.f32 %v1997_v45, %v1414_v47  ;;  %v1970_v49 = vpop.f32.mrb[12].mxu0 }
 0x155   :  { %v1971_v50 = vpop.f32.mrb[13].mxu0  ;;  %v1998_v55 = vpop.f32.mrb[12].mxu1 }
 0x156   :  { %v1972_v51 = vadd.f32 %v1971_v50, %v1970_v49  ;;  %v1973_v52 = vpop.f32.mrb[14].mxu0  ;;  %v1999_v57 = vpop.f32.mrb[13].mxu1 }
 0x157   :  { %v1974_v53 = vpop.f32.mrb[15].mxu0  ;;  %v2000_v59 = vadd.f32 %v1999_v57, %v1998_v55  ;;  %v2001_v60 = vpop.f32.mrb[14].mxu1 }
 0x158   :  { %v1419_v54 = vadd.f32 %v1972_v51, %v1370_v30  ;;  %v1975_v56 = vadd.f32 %v1974_v53, %v1973_v52  ;;  %v2002_v61 = vpop.f32.mrb[15].mxu1 }
 0x159   :  { %v2003_v63 = vadd.f32 %v2002_v61, %v2001_v60 }
 0x15a   :  { %v1422_v58 = vadd.f32 %v1975_v56, %v1373_v32  ;;  %v1468_v62 = vadd.f32 %v2000_v59, %v1419_v54 }
 0x15c   :  { %v1471_v0 = vadd.f32 %v2003_v63, %v1422_v58 }
 0x16c   :  { %v2020_v1 = vpop.f32.mrb[16].mxu0 }
 0x16d   :  { %v2048_v2 = vpop.f32.mrb[16].mxu1  ;;  %v2021_v3 = vpop.f32.mrb[17].mxu0 }
 0x16e   :  { %v2022_v4 = vadd.f32 %v2021_v3, %v2020_v1  ;;  %v2049_v5 = vpop.f32.mrb[17].mxu1  ;;  %v2023_v6 = vpop.f32.mrb[18].mxu0 }
 0x16f   :  { %v2050_v7 = vadd.f32 %v2049_v5, %v2048_v2  ;;  %v2051_v8 = vpop.f32.mrb[18].mxu1  ;;  %v2024_v9 = vpop.f32.mrb[19].mxu0 }
 0x170   :  { %v1509_v10 = vadd.f32 %v2022_v4, %v1460_v46  ;;  %v2025_v11 = vadd.f32 %v2024_v9, %v2023_v6  ;;  %v2052_v12 = vpop.f32.mrb[19].mxu1 }
 0x171   :  { %v2053_v13 = vadd.f32 %v2052_v12, %v2051_v8 }
 0x172   :  { %v1558_v14 = vadd.f32 %v2050_v7, %v1509_v10  ;;  %v1512_v15 = vadd.f32 %v2025_v11, %v1463_v48 }
 0x174   :  { %v1561_v16 = vadd.f32 %v2053_v13, %v1512_v15  ;;  %v2026_v17 = vpop.f32.mrb[20].mxu0 }
 0x175   :  { %v2027_v18 = vpop.f32.mrb[21].mxu0  ;;  %v2054_v21 = vpop.f32.mrb[20].mxu1 }
 0x176   :  { %v2028_v19 = vadd.f32 %v2027_v18, %v2026_v17  ;;  %v2029_v20 = vpop.f32.mrb[22].mxu0  ;;  %v2055_v25 = vpop.f32.mrb[21].mxu1 }
 0x177   :  { %v2030_v22 = vpop.f32.mrb[23].mxu0  ;;  %v2056_v26 = vadd.f32 %v2055_v25, %v2054_v21  ;;  %v2057_v27 = vpop.f32.mrb[22].mxu1 }
 0x178   :  { %v1517_v23 = vadd.f32 %v2028_v19, %v1468_v62  ;;  %v2031_v24 = vadd.f32 %v2030_v22, %v2029_v20  ;;  %v2058_v29 = vpop.f32.mrb[23].mxu1 }
 0x179   :  { %v2059_v31 = vadd.f32 %v2058_v29, %v2057_v27 }
 0x17a   :  { %v1520_v28 = vadd.f32 %v2031_v24, %v1471_v0  ;;  %v1566_v30 = vadd.f32 %v2056_v26, %v1517_v23 }
 0x17c   :  { %v1569_v32 = vadd.f32 %v2059_v31, %v1520_v28 }
 0x18c   :  { %v2076_v33 = vpop.f32.mrb[24].mxu0 }
 0x18d   :  { %v2104_v34 = vpop.f32.mrb[24].mxu1  ;;  %v2077_v35 = vpop.f32.mrb[25].mxu0 }
 0x18e   :  { %v2078_v36 = vadd.f32 %v2077_v35, %v2076_v33  ;;  %v2105_v37 = vpop.f32.mrb[25].mxu1  ;;  %v2079_v38 = vpop.f32.mrb[26].mxu0 }
 0x18f   :  { %v2106_v39 = vadd.f32 %v2105_v37, %v2104_v34  ;;  %v2107_v40 = vpop.f32.mrb[26].mxu1  ;;  %v2080_v41 = vpop.f32.mrb[27].mxu0 }
 0x190   :  { %v1607_v42 = vadd.f32 %v2078_v36, %v1558_v14  ;;  %v2081_v43 = vadd.f32 %v2080_v41, %v2079_v38  ;;  %v2108_v44 = vpop.f32.mrb[27].mxu1 }
 0x191   :  { %v2109_v45 = vadd.f32 %v2108_v44, %v2107_v40 }
 0x192   :  { %v1656_v46 = vadd.f32 %v2106_v39, %v1607_v42  ;;  %v1610_v47 = vadd.f32 %v2081_v43, %v1561_v16 }
 0x194   :  { %v1659_v48 = vadd.f32 %v2109_v45, %v1610_v47  ;;  %v2082_v49 = vpop.f32.mrb[28].mxu0  ;;  %v1670_v52 = vmax.f32 %v1656_v46, 0.0 }
 0x195   :  { %v2110_v50 = vpop.f32.mrb[28].mxu1  ;;  %v2083_v51 = vpop.f32.mrb[29].mxu0 }
 0x196   :  { %v1671_v53 = vmax.f32 %v1659_v48, 0.0  ;;  %v2084_v54 = vadd.f32 %v2083_v51, %v2082_v49  ;;  %v2111_v55 = vpop.f32.mrb[29].mxu1  ;;  %v2085_v56 = vpop.f32.mrb[30].mxu0 }
 0x197   :  { %v2112_v57 = vadd.f32 %v2111_v55, %v2110_v50  ;;  %v2113_v58 = vpop.f32.mrb[30].mxu1  ;;  %v2086_v59 = vpop.f32.mrb[31].mxu0 }
 0x198   :  { %v1884_v60 = vpack.c.bf16 %v1671_v53, %v1670_v52  ;;  %v1615_v61 = vadd.f32 %v2084_v54, %v1566_v30  ;;  %v2087_v62 = vadd.f32 %v2086_v59, %v2085_v56  ;;  %v2114_v63 = vpop.f32.mrb[31].mxu1 }
 0x199   :  { %v2115_v0 = vadd.f32 %v2114_v63, %v2113_v58 }
 0x19a   :  { %1885 = vst [vmem:[#allocation8] sm:$0xff] %v1884_v60   ;;  %v1664_v1 = vadd.f32 %v2112_v57, %v1615_v61  ;;  %v1618_v2 = vadd.f32 %v2087_v62, %v1569_v32 }
 0x19c   :  { %v1667_v3 = vadd.f32 %v2115_v0, %v1618_v2  ;;  %v1672_v4 = vmax.f32 %v1664_v1, 0.0 }
 0x19e   :  { %v1673_v5 = vmax.f32 %v1667_v3, 0.0 }
 0x1a0   :  { %v1889_v6 = vpack.c.bf16 %v1673_v5, %v1672_v4 }
 0x1a2   :  { %1891 = vst [vmem:[#allocation8 + $0x8] sm:$0xff] %v1889_v6  }
 0x1a3   :  { %2328 = shalt.err (!%p2325_p0)
}
 0x1a4   :  { %s2329_s29 = scalar_lea.hbm %s2430_s3, 256 }
 0x1a5   :  { %p2330_p1 = scmp.ne.s32.totalorder %s2430_s3, %s2329_s29  ;;  %p2333_p2 = scmp.lt.u32.totalorder %s2329_s29, %s2430_s3 }
 0x1a7   :  { %p2335_p3 = pnand %p2333_p2, %p2330_p1 }
 0x1a9   :  { %2338 = shalt.err (!%p2335_p3)
}
 0x1aa   :  { %1705 = dma.vmem_to_hbm [thread:$0]  %s1700_s25, 256, %s2430_s3, [#allocation4], %s2346_s22, %s2346_s22, %s2347_s23  }
 0x1ab   :  { %2343 = dma.done.wait [#allocation4], 256  }
 0x1ac   :  { %2344 = vsyncadd [#allocation4], 4294967040 }
 0x1ad   :  { %1709 = vsyncpa [#allocation3], 1 }
 0x1ae   :  { %1710 = vsyncpa [#allocation6], 1 }
 0x1af   :  { %1711 = vsyncpa [#allocation4], 1 }

// kernel: vqvae1_forward.13
= control target key start
LH: loop header
LB: loop body
LE: loop exit
PB: predicated region body
PF: predicated region fallthrough
CT: control target
= control target key end

     0   :  { %8 = vsyncpa [#allocation3], 0  ;;  %s1567_s0 = inlined_call_operand.hbm [shape: bf16[32,1152], index: 0, kind: input, shape index: {}]   ;;  %s1568_s1 = inlined_call_operand.hbm [shape: bf16[1152,128], index: 1, kind: input, shape index: {}]   ;;  %s1569_s2 = inlined_call_operand.hbm [shape: f32[1,128], index: 2, kind: input, shape index: {}]   ;;  %s1570_s3 = inlined_call_operand.hbm [shape: bf16[32,128], index: 3, kind: output, shape index: {}]  }
   0x1   :  { %9 = vsyncpa [#allocation6], 0 }
   0x2   :  { %10 = vsyncpa [#allocation4], 0  ;;  %s1485_s12 = smov [#allocation5]   ;;  %s1391_s16 = scalar_lea.hbm %s1568_s1, 9216 }
   0x3   :  { %s28_s13 = sshll.u32 %s1485_s12, 4  ;;  %p1392_p0 = scmp.ne.s32.totalorder %s1568_s1, %s1391_s16  ;;  %s29_s13 = int_to_ptr.vmem [resolvable:$true] %s28_s13 }
   0x4   :  { %p1395_p1 = scmp.lt.u32.totalorder %s1391_s16, %s1568_s1 }
   0x6   :  { %p1397_p2 = pnand %p1395_p1, %p1392_p0 }
   0x8   :  { %1400 = shalt.err (!%p1397_p2)
}
   0x9   :  { %s1401_s21 = scalar_lea.vmem %s29_s13, 9216  ;;  %p1406_p4 = scmp.lt.s32.totalorder %s29_s13, %s29_s13 }
   0xa   :  { %p1402_p3 = scmp.ne.s32.totalorder %s29_s13, %s1401_s21  ;;  %p1407_p5 = scmp.lt.s32.totalorder %s1401_s21, %s1401_s21 }
   0xc   :  { %p1408_p6 = por %p1407_p5, %p1406_p4 }
   0xe   :  { %p1409_p7 = pnand %p1408_p6, %p1402_p3 }
  0x10   :  { %1412 = shalt.err (!%p1409_p7)
}
  0x11   :  { %s1486_s22 = smov 64   ;;  %s1487_s23 = smov 4  }
  0x12   :  { %34 = dma.hbm_to_vmem [thread:$0]  %s1568_s1, 9216, %s29_s13, [#allocation6], %s1486_s22, %s1486_s22, %s1487_s23  }
  0x13   :  { %s1488_s26 = smov [#allocation2]   ;;  %s1413_s30 = scalar_lea.hbm %s1567_s0, 2304 }
  0x14   :  { %s16_s27 = sshll.u32 %s1488_s26, 4  ;;  %p1414_p8 = scmp.ne.s32.totalorder %s1567_s0, %s1413_s30  ;;  %s17_s27 = int_to_ptr.vmem [resolvable:$true] %s16_s27 }
  0x15   :  { %p1417_p9 = scmp.lt.u32.totalorder %s1413_s30, %s1567_s0 }
  0x17   :  { %p1419_p10 = pnand %p1417_p9, %p1414_p8 }
  0x19   :  { %1422 = shalt.err (!%p1419_p10)
}
  0x1a   :  { %s1423_s8 = scalar_lea.vmem %s17_s27, 2304  ;;  %p1428_p12 = scmp.lt.s32.totalorder %s17_s27, %s17_s27 }
  0x1b   :  { %p1424_p11 = scmp.ne.s32.totalorder %s17_s27, %s1423_s8  ;;  %p1429_p13 = scmp.lt.s32.totalorder %s1423_s8, %s1423_s8 }
  0x1d   :  { %p1430_p0 = por %p1429_p13, %p1428_p12 }
  0x1f   :  { %p1431_p1 = pnand %p1430_p0, %p1424_p11 }
  0x21   :  { %1434 = shalt.err (!%p1431_p1)
}
  0x22   :  { %s1489_s1 = smov 576   ;;  %s1490_s9 = smov 36  }
  0x23   :  { %22 = dma.hbm_to_vmem [thread:$0]  %s1567_s0, 2304, %s17_s27, [#allocation3], %s1489_s1, %s1489_s1, %s1490_s9  }
  0x24   :  { %s1491_s12 = smov [#allocation7]   ;;  %s1435_s16 = scalar_lea.hbm %s1569_s2, 16 }
  0x25   :  { %s41_s13 = sshll.u32 %s1491_s12, 4  ;;  %p1436_p2 = scmp.ne.s32.totalorder %s1569_s2, %s1435_s16  ;;  %s42_s13 = int_to_ptr.vmem [resolvable:$true] %s41_s13 }
  0x26   :  { %p1439_p3 = scmp.lt.u32.totalorder %s1435_s16, %s1569_s2 }
  0x28   :  { %p1441_p4 = pnand %p1439_p3, %p1436_p2 }
  0x2a   :  { %1444 = shalt.err (!%p1441_p4)
}
  0x2b   :  { %s1445_s21 = scalar_lea.vmem %s42_s13, 16  ;;  %s1449_s0 = scalar_lea.vmem %s42_s13, 32 }
  0x2c   :  { %p1446_p5 = scmp.ne.s32.totalorder %s42_s13, %s1445_s21  ;;  %p1450_p6 = scmp.lt.s32.totalorder %s42_s13, %s42_s13 }
  0x2d   :  { %p1451_p7 = scmp.lt.s32.totalorder %s1449_s0, %s1445_s21 }
  0x2f   :  { %p1452_p8 = por %p1451_p7, %p1450_p6 }
  0x31   :  { %p1453_p9 = pnand %p1452_p8, %p1446_p5 }
  0x33   :  { %1456 = shalt.err (!%p1453_p9)
}
  0x34   :  { %44 = dma.hbm_to_vmem [thread:$0]  %s1569_s2, 16, %s42_s13, [#allocation6]  }
  0x35   :  { %1479 = dma.done.wait [#allocation3], 2304  }
  0x36   :  { %1480 = vsyncadd [#allocation3], 4294964992 }
  0x37   :  { %1481 = dma.done.wait [#allocation6], 9232  }
  0x38   :  { %1482 = vsyncadd [#allocation6], 4294958064  ;;  %v1293_v0 = vld [vmem:[#allocation5 + $0x40] sm:$0xff]   ;;  %v1297_v4 = vld [vmem:[#allocation5 + $0x48] sm:$0xff]   ;;  %s1492_s2 = smov [#allocation8]  }
  0x39   :  { %v1294_v1 = vld [vmem:[#allocation5] sm:$0xff]   ;;  %1143 = vmatprep.subr.bf16.mxu0 %v1293_v0  ;;  %v1298_v5 = vld [vmem:[#allocation5 + $0x8] sm:$0xff]   ;;  %v1301_v8 = vld [vmem:[#allocation5 + $0x50] sm:$0xff]   ;;  %s1020_s26 = sshll.u32 %s1492_s2, 4  ;;  %s1021_s26 = int_to_ptr.vmem [resolvable:$true] %s1020_s26 }
  0x3a   :  { %v1295_v2 = vld [vmem:[#allocation5 + $0xc0] sm:$0xff]   ;;  %1144 = vmatpush3.bf16.msra.mxu0 %v1294_v1  ;;  %v1299_v6 = vld [vmem:[#allocation5 + $0xc8] sm:$0xff]   ;;  %v1302_v9 = vld [vmem:[#allocation5 + $0x10] sm:$0xff]   ;;  %s1457_s27 = scalar_lea.vmem %s1021_s26, 256  ;;  %p1462_p11 = scmp.lt.s32.totalorder %s1021_s26, %s1021_s26 }
  0x3b   :  { %v1296_v3 = vld [vmem:[#allocation5 + $0x80] sm:$0xff]   ;;  %1171 = vmatprep.subr.bf16.mxu1 %v1295_v2  ;;  %1145 = vmatprep.subr.bf16.mxu0 %v1297_v4  ;;  %v1300_v7 = vld [vmem:[#allocation5 + $0x88] sm:$0xff]   ;;  %v1303_v10 = vld [vmem:[#allocation5 + $0xd0] sm:$0xff]   ;;  %p1458_p10 = scmp.ne.s32.totalorder %s1021_s26, %s1457_s27  ;;  %p1463_p12 = scmp.lt.s32.totalorder %s1457_s27, %s1457_s27 }
  0x3c   :  { %1172 = vmatpush3.bf16.msra.mxu1 %v1296_v3  ;;  %v1304_v11 = vld [vmem:[#allocation5 + $0x90] sm:$0xff]   ;;  %v1305_v12 = vld [vmem:[#allocation5 + $0x58] sm:$0xff]   ;;  %v1309_v16 = vld [vmem:[#allocation5 + $0x60] sm:$0xff]  }
  0x3d   :  { %1173 = vmatprep.subr.bf16.mxu1 %v1299_v6  ;;  %v1306_v13 = vld [vmem:[#allocation5 + $0x18] sm:$0xff]   ;;  %v1310_v17 = vld [vmem:[#allocation5 + $0x20] sm:$0xff]   ;;  %v1313_v20 = vld [vmem:[#allocation5 + $0x68] sm:$0xff]   ;;  %p1464_p13 = por %p1463_p12, %p1462_p11 }
  0x3e   :  { %1146 = vmatpush3.bf16.msra.mxu0 %v1298_v5  ;;  %v1307_v14 = vld [vmem:[#allocation5 + $0xd8] sm:$0xff]   ;;  %v1311_v18 = vld [vmem:[#allocation5 + $0xe0] sm:$0xff]   ;;  %v1314_v21 = vld [vmem:[#allocation5 + $0x28] sm:$0xff]  }
  0x3f   :  { %1147 = vmatprep.subr.bf16.mxu0 %v1301_v8  ;;  %v1308_v15 = vld [vmem:[#allocation5 + $0x98] sm:$0xff]   ;;  %v1312_v19 = vld [vmem:[#allocation5 + $0xa0] sm:$0xff]   ;;  %v1315_v22 = vld [vmem:[#allocation5 + $0xe8] sm:$0xff]   ;;  %p1465_p0 = pnand %p1464_p13, %p1458_p10 }
  0x40   :  { %1174 = vmatpush3.bf16.msra.mxu1 %v1300_v7  ;;  %v1316_v23 = vld [vmem:[#allocation5 + $0xa8] sm:$0xff]   ;;  %v1317_v24 = vld [vmem:[#allocation5 + $0x70] sm:$0xff]   ;;  %v1321_v28 = vld [vmem:[#allocation5 + $0x78] sm:$0xff]  }
  0x41   :  { %1175 = vmatprep.subr.bf16.mxu1 %v1303_v10  ;;  %v1318_v25 = vld [vmem:[#allocation5 + $0x30] sm:$0xff]   ;;  %v1322_v29 = vld [vmem:[#allocation5 + $0x38] sm:$0xff]   ;;  %v1328_v34 = vld [vmem:[#allocation5 + $0x140] sm:$0xff]  }
  0x42   :  { %1148 = vmatpush3.bf16.msra.mxu0 %v1302_v9  ;;  %v1319_v26 = vld [vmem:[#allocation5 + $0xf0] sm:$0xff]   ;;  %v1323_v30 = vld [vmem:[#allocation5 + $0xf8] sm:$0xff]   ;;  %v1332_v37 = vld [vmem:[#allocation5 + $0x100] sm:$0xff]  }
  0x43   :  { %1149 = vmatprep.subr.bf16.mxu0 %v1305_v12  ;;  %v1320_v27 = vld [vmem:[#allocation5 + $0xb0] sm:$0xff]   ;;  %v1327_v33 = vld [vmem:[#allocation5 + $0xb8] sm:$0xff]   ;;  %v1333_v38 = vld [vmem:[#allocation5 + $0x1c0] sm:$0xff]  }
  0x44   :  { %1176 = vmatpush3.bf16.msra.mxu1 %v1304_v11  ;;  %v1324_v31 = vld [vmem:[#allocation2] ss:$36 sps:$4 sm:$0xff]   ;;  %v1329_v35 = vld [vmem:[#allocation2 + $0x8] ss:$36 sps:$4 sm:$0xff]   ;;  %v1334_v39 = vld [vmem:[#allocation5 + $0x180] sm:$0xff]  }
  0x45   :  { %1177 = vmatprep.subr.bf16.mxu1 %v1307_v14  ;;  %v1326_v32 = vld [vmem:[#allocation2 + $0x4] ss:$36 sps:$4 sm:$0xff]   ;;  %v1331_v36 = vld [vmem:[#allocation2 + $0xc] ss:$36 sps:$4 sm:$0xff]   ;;  %v1335_v40 = vld [vmem:[#allocation5 + $0x148] sm:$0xff]  }
  0x46   :  { %1150 = vmatpush3.bf16.msra.mxu0 %v1306_v13  ;;  %782 = vmatprep.mubr.bf16.mxu0 %v1326_v32  ;;  %v1336_v41 = vld [vmem:[#allocation5 + $0x108] sm:$0xff]   ;;  %v1339_v44 = vld [vmem:[#allocation5 + $0x150] sm:$0xff]   ;;  %v1343_v48 = vld [vmem:[#allocation5 + $0x158] sm:$0xff]  }
  0x47   :  { %1151 = vmatprep.subr.bf16.mxu0 %v1309_v16  ;;  %831 = vmatprep.mubr.bf16.mxu1 %v1331_v36  ;;  %v1337_v42 = vld [vmem:[#allocation5 + $0x1c8] sm:$0xff]   ;;  %v1340_v45 = vld [vmem:[#allocation5 + $0x110] sm:$0xff]   ;;  %v1344_v49 = vld [vmem:[#allocation5 + $0x118] sm:$0xff]  }
  0x48   :  { %1178 = vmatpush3.bf16.msra.mxu1 %v1308_v15  ;;  %v1338_v43 = vld [vmem:[#allocation5 + $0x188] sm:$0xff]   ;;  %v1341_v46 = vld [vmem:[#allocation5 + $0x1d0] sm:$0xff]   ;;  %v1345_v50 = vld [vmem:[#allocation5 + $0x1d8] sm:$0xff]  }
  0x49   :  { %1179 = vmatprep.subr.bf16.mxu1 %v1311_v18  ;;  %v1342_v47 = vld [vmem:[#allocation5 + $0x190] sm:$0xff]   ;;  %v1346_v51 = vld [vmem:[#allocation5 + $0x198] sm:$0xff]   ;;  %v1347_v52 = vld [vmem:[#allocation5 + $0x160] sm:$0xff]  }
  0x4a   :  { %1152 = vmatpush3.bf16.msra.mxu0 %v1310_v17  ;;  %v1348_v53 = vld [vmem:[#allocation5 + $0x120] sm:$0xff]   ;;  %v1351_v56 = vld [vmem:[#allocation5 + $0x168] sm:$0xff]   ;;  %v1355_v59 = vld [vmem:[#allocation2 + $0x48] ss:$36 sps:$4 sm:$0xff]  }
  0x4b   :  { %1153 = vmatprep.subr.bf16.mxu0 %v1313_v20  ;;  %v1349_v54 = vld [vmem:[#allocation5 + $0x1e0] sm:$0xff]   ;;  %v1354_v58 = vld [vmem:[#allocation5 + $0x128] sm:$0xff]   ;;  %v1361_v0 = vld [vmem:[#allocation5 + $0x170] sm:$0xff]  }
  0x4c   :  { %1180 = vmatpush3.bf16.msra.mxu1 %v1312_v19  ;;  %v1350_v55 = vld [vmem:[#allocation5 + $0x1a0] sm:$0xff]   ;;  %v1356_v60 = vld [vmem:[#allocation5 + $0x1e8] sm:$0xff]   ;;  %v1362_v1 = vld [vmem:[#allocation5 + $0x130] sm:$0xff]  }
  0x4d   :  { %1181 = vmatprep.subr.bf16.mxu1 %v1315_v22  ;;  %v1352_v57 = vld [vmem:[#allocation2 + $0x4c] ss:$36 sps:$4 sm:$0xff]   ;;  %v1357_v61 = vld [vmem:[#allocation2 + $0x54] ss:$36 sps:$4 sm:$0xff]   ;;  %v1363_v2 = vld [vmem:[#allocation5 + $0x1f0] sm:$0xff]  }
  0x4e   :  { %1154 = vmatpush3.bf16.msra.mxu0 %v1314_v21  ;;  %v1359_v62 = vld [vmem:[#allocation5 + $0x1a8] sm:$0xff]   ;;  %v1360_v63 = vld [vmem:[#allocation2 + $0x50] ss:$36 sps:$4 sm:$0xff]   ;;  %v1364_v3 = vld [vmem:[#allocation5 + $0x1b0] sm:$0xff]  }
  0x4f   :  { %1155 = vmatprep.subr.bf16.mxu0 %v1317_v24  ;;  %v1365_v4 = vld [vmem:[#allocation5 + $0x178] sm:$0xff]   ;;  %v1368_v7 = vld [vmem:[#allocation2 + $0x10] ss:$36 sps:$4 sm:$0xff]   ;;  %v1373_v11 = vld [vmem:[#allocation2 + $0x18] ss:$36 sps:$4 sm:$0xff]  }
  0x50   :  { %1182 = vmatpush3.bf16.msra.mxu1 %v1316_v23  ;;  %v1366_v5 = vld [vmem:[#allocation5 + $0x138] sm:$0xff]   ;;  %v1370_v8 = vld [vmem:[#allocation2 + $0x14] ss:$36 sps:$4 sm:$0xff]   ;;  %v1375_v12 = vld [vmem:[#allocation2 + $0x1c] ss:$36 sps:$4 sm:$0xff]  }
  0x51   :  { %1183 = vmatprep.subr.bf16.mxu1 %v1319_v26  ;;  %v1367_v6 = vld [vmem:[#allocation5 + $0x1f8] sm:$0xff]   ;;  %v1372_v10 = vld [vmem:[#allocation5 + $0x200] sm:$0xff]   ;;  %v1376_v13 = vld [vmem:[#allocation5 + $0x208] sm:$0xff]  }
  0x52   :  { %1156 = vmatpush3.bf16.msra.mxu0 %v1318_v25  ;;  %v1371_v9 = vld [vmem:[#allocation5 + $0x1b8] sm:$0xff]   ;;  %v1377_v14 = vld [vmem:[#allocation2 + $0x5c] ss:$36 sps:$4 sm:$0xff]   ;;  %v1385_v20 = vld [vmem:[#allocation5 + $0x220] sm:$0xff]  }
  0x53   :  { %1157 = vmatprep.subr.bf16.mxu0 %v1321_v28  ;;  %v1379_v15 = vld [vmem:[#allocation2 + $0x58] ss:$36 sps:$4 sm:$0xff]   ;;  %v1380_v16 = vld [vmem:[#allocation5 + $0x210] sm:$0xff]   ;;  %v1384_v19 = vld [vmem:[#allocation5 + $0x218] sm:$0xff]  }
  0x54   :  { %1184 = vmatpush3.bf16.msra.mxu1 %v1320_v27  ;;  %v1381_v17 = vld [vmem:[#allocation2 + $0x64] ss:$36 sps:$4 sm:$0xff]   ;;  %v1386_v22 = vld [vmem:[#allocation5 + $0x228] sm:$0xff]   ;;  %v1033_v27 = vld [vmem:[#allocation7] ss:$0 sm:$0xff] }
  0x55   :  { %1185 = vmatprep.subr.bf16.mxu1 %v1323_v30  ;;  %v1383_v18 = vld [vmem:[#allocation2 + $0x60] ss:$36 sps:$4 sm:$0xff]   ;;  %v1388_v24 = vld [vmem:[#allocation5 + $0x238] sm:$0xff]  }
  0x56   :  { %1158 = vmatpush3.bf16.msra.mxu0 %v1322_v29  ;;  %v1389_v21 = vld [vmem:[#allocation2 + $0x20] ss:$36 sps:$4 sm:$0xff]   ;;  %v1390_v25 = vld [vmem:[#allocation2 + $0x68] ss:$36 sps:$4 sm:$0xff]  }
  0x57   :  { %1199 = vmatprep.subr.bf16.mxu0 %v1328_v34  ;;  %v1387_v23 = vld [vmem:[#allocation5 + $0x230] sm:$0xff]  }
  0x58   :  { %1186 = vmatpush3.bf16.msra.mxu1 %v1327_v33 }
  0x59   :  { %783 = vmatmul.mubr.bf16.vlgmr.msra.gmra.mrb[0].mxu0 %v1324_v31  ;;  %1227 = vmatprep.subr.bf16.mxu1 %v1333_v38 }
  0x5a   :  { %1200 = vmatpush3.bf16.msra.mxu0 %v1332_v37  ;;  %790 = vmatprep.mubr.bf16.mxu0 %v1352_v57 }
  0x5b   :  { %832 = vmatmul.mubr.bf16.vlgmr.msra.gmra.mrb[0].mxu1 %v1329_v35  ;;  %1201 = vmatprep.subr.bf16.mxu0 %v1335_v40 }
  0x5c   :  { %1228 = vmatpush3.bf16.msra.mxu1 %v1334_v39  ;;  %839 = vmatprep.mubr.bf16.mxu1 %v1357_v61 }
  0x5d   :  { %1229 = vmatprep.subr.bf16.mxu1 %v1337_v42 }
  0x5e   :  { %1202 = vmatpush3.bf16.msra.mxu0 %v1336_v41 }
  0x5f   :  { %1203 = vmatprep.subr.bf16.mxu0 %v1339_v44 }
  0x60   :  { %1230 = vmatpush3.bf16.msra.mxu1 %v1338_v43 }
  0x61   :  { %1231 = vmatprep.subr.bf16.mxu1 %v1341_v46  ;;  %791 = vmatmul.mubr.bf16.gmra.mrb[4].mxu0 %v1355_v59 }
  0x62   :  { %1204 = vmatpush3.bf16.msra.mxu0 %v1340_v45  ;;  %880 = vmatprep.mubr.bf16.mxu0 %v1370_v8 }
  0x63   :  { %1205 = vmatprep.subr.bf16.mxu0 %v1343_v48  ;;  %840 = vmatmul.mubr.bf16.gmra.mrb[4].mxu1 %v1360_v63 }
  0x64   :  { %1232 = vmatpush3.bf16.msra.mxu1 %v1342_v47  ;;  %929 = vmatprep.mubr.bf16.mxu1 %v1375_v12 }
  0x65   :  { %1233 = vmatprep.subr.bf16.mxu1 %v1345_v50 }
  0x66   :  { %1206 = vmatpush3.bf16.msra.mxu0 %v1344_v49 }
  0x67   :  { %1207 = vmatprep.subr.bf16.mxu0 %v1347_v52 }
  0x68   :  { %1234 = vmatpush3.bf16.msra.mxu1 %v1346_v51 }
  0x69   :  { %1235 = vmatprep.subr.bf16.mxu1 %v1349_v54 }
  0x6a   :  { %1208 = vmatpush3.bf16.msra.mxu0 %v1348_v53 }
  0x6b   :  { %1209 = vmatprep.subr.bf16.mxu0 %v1351_v56 }
  0x6c   :  { %1236 = vmatpush3.bf16.msra.mxu1 %v1350_v55 }
  0x6d   :  { %1237 = vmatprep.subr.bf16.mxu1 %v1356_v60 }
  0x6e   :  { %1210 = vmatpush3.bf16.msra.mxu0 %v1354_v58 }
  0x6f   :  { %1211 = vmatprep.subr.bf16.mxu0 %v1361_v0 }
  0x70   :  { %1238 = vmatpush3.bf16.msra.mxu1 %v1359_v62 }
  0x71   :  { %1239 = vmatprep.subr.bf16.mxu1 %v1363_v2 }
  0x72   :  { %1212 = vmatpush3.bf16.msra.mxu0 %v1362_v1 }
  0x73   :  { %1213 = vmatprep.subr.bf16.mxu0 %v1365_v4 }
  0x74   :  { %1240 = vmatpush3.bf16.msra.mxu1 %v1364_v3 }
  0x75   :  { %1241 = vmatprep.subr.bf16.mxu1 %v1367_v6 }
  0x76   :  { %1214 = vmatpush3.bf16.msra.mxu0 %v1366_v5 }
  0x77   :  { %1265 = vmatprep.subr.bf16.mxu0 %v1372_v10 }
  0x78   :  { %1242 = vmatpush3.bf16.msra.mxu1 %v1371_v9 }
  0x79   :  { %881 = vmatmul.mubr.bf16.vlgmr.msra.gmra.mrb[8].mxu0 %v1368_v7 }
  0x7a   :  { %1266 = vmatpush3.bf16.msra.mxu0 %v1372_v10  ;;  %888 = vmatprep.mubr.bf16.mxu0 %v1377_v14 }
  0x7b   :  { %930 = vmatmul.mubr.bf16.vlgmr.msra.gmra.mrb[8].mxu1 %v1373_v11  ;;  %1267 = vmatprep.subr.bf16.mxu0 %v1376_v13 }
  0x7c   :  { %937 = vmatprep.mubr.bf16.mxu1 %v1381_v17 }
  0x7e   :  { %1268 = vmatpush3.bf16.msra.mxu0 %v1376_v13 }
  0x7f   :  { %1269 = vmatprep.subr.bf16.mxu0 %v1380_v16 }
  0x81   :  { %889 = vmatmul.mubr.bf16.gmra.mrb[12].mxu0 %v1379_v15 }
  0x82   :  { %1270 = vmatpush3.bf16.msra.mxu0 %v1380_v16  ;;  %1281 = vmatprep.mubr.bf16.mxu0 %v1389_v21 }
  0x83   :  { %938 = vmatmul.mubr.bf16.gmra.mrb[12].mxu1 %v1383_v18  ;;  %1271 = vmatprep.subr.bf16.mxu0 %v1384_v19 }
  0x86   :  { %1272 = vmatpush3.bf16.msra.mxu0 %v1384_v19 }
  0x87   :  { %1273 = vmatprep.subr.bf16.mxu0 %v1385_v20 }
  0x8a   :  { %1274 = vmatpush3.bf16.msra.mxu0 %v1385_v20 }
  0x8b   :  { %1275 = vmatprep.subr.bf16.mxu0 %v1386_v22 }
  0x8e   :  { %1276 = vmatpush3.bf16.msra.mxu0 %v1386_v22 }
  0x8f   :  { %1277 = vmatprep.subr.bf16.mxu0 %v1387_v23 }
  0x92   :  { %1278 = vmatpush3.bf16.msra.mxu0 %v1387_v23 }
  0x93   :  { %1279 = vmatprep.subr.bf16.mxu0 %v1388_v24 }
  0x96   :  { %1280 = vmatpush3.bf16.msra.mxu0 %v1388_v24 }
  0x99   :  { %1282 = vmatmul.mubr.bf16.vlgmr.msra.gmra.mrb[16].mxu0 %v1390_v25 }
 0x12c   :  { %v1159_v26 = vpop.f32.mrb[0].mxu0 }
 0x12d   :  { %v1160_v28 = vpop.f32.mrb[1].mxu0 }
 0x12e   :  { %v1161_v29 = vadd.f32 %v1160_v28, %v1159_v26  ;;  %v1162_v30 = vpop.f32.mrb[2].mxu0  ;;  %v1187_v31 = vpop.f32.mrb[0].mxu1 }
 0x12f   :  { %v1163_v32 = vpop.f32.mrb[3].mxu0  ;;  %v1188_v35 = vpop.f32.mrb[1].mxu1 }
 0x130   :  { %v785_v33 = vadd.f32 %v1161_v29, %v1033_v27  ;;  %v1164_v34 = vadd.f32 %v1163_v32, %v1162_v30  ;;  %v1189_v36 = vadd.f32 %v1188_v35, %v1187_v31  ;;  %v1190_v37 = vpop.f32.mrb[2].mxu1 }
 0x131   :  { %v1191_v39 = vpop.f32.mrb[3].mxu1 }
 0x132   :  { %v788_v38 = vadd.f32 %v1164_v34, %v1033_v27  ;;  %v834_v40 = vadd.f32 %v1189_v36, %v785_v33  ;;  %v1192_v41 = vadd.f32 %v1191_v39, %v1190_v37 }
 0x134   :  { %v837_v42 = vadd.f32 %v1192_v41, %v788_v38  ;;  %v1165_v43 = vpop.f32.mrb[4].mxu0 }
 0x135   :  { %v1166_v44 = vpop.f32.mrb[5].mxu0 }
 0x136   :  { %v1167_v45 = vadd.f32 %v1166_v44, %v1165_v43  ;;  %v1168_v46 = vpop.f32.mrb[6].mxu0  ;;  %v1193_v47 = vpop.f32.mrb[4].mxu1 }
 0x137   :  { %v1169_v48 = vpop.f32.mrb[7].mxu0  ;;  %v1194_v51 = vpop.f32.mrb[5].mxu1 }
 0x138   :  { %v793_v49 = vadd.f32 %v1167_v45, %v1033_v27  ;;  %v1170_v50 = vadd.f32 %v1169_v48, %v1168_v46  ;;  %v1195_v52 = vadd.f32 %v1194_v51, %v1193_v47  ;;  %v1196_v53 = vpop.f32.mrb[6].mxu1 }
 0x139   :  { %v1197_v55 = vpop.f32.mrb[7].mxu1 }
 0x13a   :  { %v796_v54 = vadd.f32 %v1170_v50, %v1033_v27  ;;  %v842_v56 = vadd.f32 %v1195_v52, %v793_v49  ;;  %v1198_v57 = vadd.f32 %v1197_v55, %v1196_v53 }
 0x13c   :  { %v845_v58 = vadd.f32 %v1198_v57, %v796_v54 }
 0x14c   :  { %v1215_v59 = vpop.f32.mrb[8].mxu0 }
 0x14d   :  { %v1216_v60 = vpop.f32.mrb[9].mxu0 }
 0x14e   :  { %v1217_v61 = vadd.f32 %v1216_v60, %v1215_v59  ;;  %v1218_v62 = vpop.f32.mrb[10].mxu0  ;;  %v1243_v63 = vpop.f32.mrb[8].mxu1 }
 0x14f   :  { %v1219_v0 = vpop.f32.mrb[11].mxu0  ;;  %v1244_v3 = vpop.f32.mrb[9].mxu1 }
 0x150   :  { %v883_v1 = vadd.f32 %v1217_v61, %v834_v40  ;;  %v1220_v2 = vadd.f32 %v1219_v0, %v1218_v62  ;;  %v1245_v4 = vadd.f32 %v1244_v3, %v1243_v63  ;;  %v1246_v5 = vpop.f32.mrb[10].mxu1 }
 0x151   :  { %v1247_v7 = vpop.f32.mrb[11].mxu1 }
 0x152   :  { %v886_v6 = vadd.f32 %v1220_v2, %v837_v42  ;;  %v1248_v8 = vadd.f32 %v1247_v7, %v1246_v5  ;;  %v932_v9 = vadd.f32 %v1245_v4, %v883_v1 }
 0x154   :  { %v1221_v10 = vpop.f32.mrb[12].mxu0  ;;  %v935_v12 = vadd.f32 %v1248_v8, %v886_v6 }
 0x155   :  { %v1222_v11 = vpop.f32.mrb[13].mxu0 }
 0x156   :  { %v1223_v13 = vadd.f32 %v1222_v11, %v1221_v10  ;;  %v1224_v14 = vpop.f32.mrb[14].mxu0  ;;  %v1249_v15 = vpop.f32.mrb[12].mxu1 }
 0x157   :  { %v1225_v16 = vpop.f32.mrb[15].mxu0  ;;  %v1250_v19 = vpop.f32.mrb[13].mxu1 }
 0x158   :  { %v891_v17 = vadd.f32 %v1223_v13, %v842_v56  ;;  %v1226_v18 = vadd.f32 %v1225_v16, %v1224_v14  ;;  %v1251_v20 = vadd.f32 %v1250_v19, %v1249_v15  ;;  %v1252_v21 = vpop.f32.mrb[14].mxu1 }
 0x159   :  { %v1253_v23 = vpop.f32.mrb[15].mxu1 }
 0x15a   :  { %v894_v22 = vadd.f32 %v1226_v18, %v845_v58  ;;  %v1254_v24 = vadd.f32 %v1253_v23, %v1252_v21  ;;  %v940_v25 = vadd.f32 %v1251_v20, %v891_v17 }
 0x15c   :  { %v943_v26 = vadd.f32 %v1254_v24, %v894_v22 }
 0x16c   :  { %v1283_v27 = vpop.f32.mrb[16].mxu0 }
 0x16d   :  { %v989_v28 = vadd.f32 %v1283_v27, %v940_v25  ;;  %v980_v29 = vpop.f32.mrb[17].mxu0 }
 0x16e   :  { %v981_v30 = vadd.f32 %v980_v29, %v932_v9  ;;  %v1284_v31 = vpop.f32.mrb[18].mxu0 }
 0x16f   :  { %v992_v32 = vadd.f32 %v1284_v31, %v943_v26  ;;  %v983_v33 = vpop.f32.mrb[19].mxu0 }
 0x170   :  { %v984_v34 = vadd.f32 %v983_v33, %v935_v12 }
 0x171   :  { %v1140_v35 = vpack.c.bf16 %v992_v32, %v989_v28 }
 0x172   :  { %v1135_v36 = vpack.c.bf16 %v984_v34, %v981_v30 }
 0x173   :  { %1142 = vst [vmem:[#allocation8 + $0x8] sm:$0xff] %v1140_v35  }
 0x174   :  { %1136 = vst [vmem:[#allocation8] sm:$0xff] %v1135_v36  }
 0x175   :  { %1468 = shalt.err (!%p1465_p0)
}
 0x176   :  { %s1469_s30 = scalar_lea.hbm %s1570_s3, 256 }
 0x177   :  { %p1470_p1 = scmp.ne.s32.totalorder %s1570_s3, %s1469_s30  ;;  %p1473_p2 = scmp.lt.u32.totalorder %s1469_s30, %s1570_s3 }
 0x179   :  { %p1475_p3 = pnand %p1473_p2, %p1470_p1 }
 0x17b   :  { %1478 = shalt.err (!%p1475_p3)
}
 0x17c   :  { %1026 = dma.vmem_to_hbm [thread:$0]  %s1021_s26, 256, %s1570_s3, [#allocation4], %s1486_s22, %s1486_s22, %s1487_s23  }
 0x17d   :  { %1483 = dma.done.wait [#allocation4], 256  }
 0x17e   :  { %1484 = vsyncadd [#allocation4], 4294967040 }
 0x17f   :  { %1030 = vsyncpa [#allocation3], 1 }
 0x180   :  { %1031 = vsyncpa [#allocation6], 1 }
 0x181   :  { %1032 = vsyncpa [#allocation4], 1 }

// kernel: vqvae1_forward.14
= control target key start
LH: loop header
LB: loop body
LE: loop exit
PB: predicated region body
PF: predicated region fallthrough
CT: control target
= control target key end

     0   :  { %9 = vsyncpa [#allocation3], 0  ;;  %s1837_s0 = inlined_call_operand.hbm [shape: bf16[32,1152], index: 0, kind: input, shape index: {}]   ;;  %s1838_s1 = inlined_call_operand.hbm [shape: bf16[1152,128], index: 1, kind: input, shape index: {}]   ;;  %s1839_s2 = inlined_call_operand.hbm [shape: bf16[128,128], index: 2, kind: input, shape index: {}]   ;;  %s1840_s3 = inlined_call_operand.hbm [shape: bf16[32,128], index: 3, kind: input, shape index: {}]   ;;  %s1841_s4 = inlined_call_operand.hbm [shape: bf16[32,128], index: 4, kind: output, shape index: {}]  }
   0x1   :  { %10 = vsyncpa [#allocation6], 0 }
   0x2   :  { %11 = vsyncpa [#allocation9], 0 }
   0x3   :  { %12 = vsyncpa [#allocation4], 0  ;;  %s1703_s15 = smov [#allocation5]   ;;  %s1585_s19 = scalar_lea.hbm %s1838_s1, 9216 }
   0x4   :  { %s30_s16 = sshll.u32 %s1703_s15, 4  ;;  %p1586_p0 = scmp.ne.s32.totalorder %s1838_s1, %s1585_s19  ;;  %s31_s16 = int_to_ptr.vmem [resolvable:$true] %s30_s16 }
   0x5   :  { %p1589_p1 = scmp.lt.u32.totalorder %s1585_s19, %s1838_s1 }
   0x7   :  { %p1591_p2 = pnand %p1589_p1, %p1586_p0 }
   0x9   :  { %1594 = shalt.err (!%p1591_p2)
}
   0xa   :  { %s1595_s24 = scalar_lea.vmem %s31_s16, 9216  ;;  %p1600_p4 = scmp.lt.s32.totalorder %s31_s16, %s31_s16 }
   0xb   :  { %p1596_p3 = scmp.ne.s32.totalorder %s31_s16, %s1595_s24  ;;  %p1601_p5 = scmp.lt.s32.totalorder %s1595_s24, %s1595_s24 }
   0xd   :  { %p1602_p6 = por %p1601_p5, %p1600_p4 }
   0xf   :  { %p1603_p7 = pnand %p1602_p6, %p1596_p3 }
  0x11   :  { %1606 = shalt.err (!%p1603_p7)
}
  0x12   :  { %s1704_s25 = smov 64   ;;  %s1705_s26 = smov 4  }
  0x13   :  { %36 = dma.hbm_to_vmem [thread:$0]  %s1838_s1, 9216, %s31_s16, [#allocation6], %s1704_s25, %s1704_s25, %s1705_s26  }
  0x14   :  { %s1706_s29 = smov [#allocation2]   ;;  %s1607_s7 = scalar_lea.hbm %s1837_s0, 2304 }
  0x15   :  { %s18_s30 = sshll.u32 %s1706_s29, 4  ;;  %p1608_p8 = scmp.ne.s32.totalorder %s1837_s0, %s1607_s7  ;;  %s19_s30 = int_to_ptr.vmem [resolvable:$true] %s18_s30 }
  0x16   :  { %p1611_p9 = scmp.lt.u32.totalorder %s1607_s7, %s1837_s0 }
  0x18   :  { %p1613_p10 = pnand %p1611_p9, %p1608_p8 }
  0x1a   :  { %1616 = shalt.err (!%p1613_p10)
}
  0x1b   :  { %s1617_s12 = scalar_lea.vmem %s19_s30, 2304  ;;  %p1622_p12 = scmp.lt.s32.totalorder %s19_s30, %s19_s30 }
  0x1c   :  { %p1618_p11 = scmp.ne.s32.totalorder %s19_s30, %s1617_s12  ;;  %p1623_p13 = scmp.lt.s32.totalorder %s1617_s12, %s1617_s12 }
  0x1e   :  { %p1624_p0 = por %p1623_p13, %p1622_p12 }
  0x20   :  { %p1625_p1 = pnand %p1624_p0, %p1618_p11 }
  0x22   :  { %1628 = shalt.err (!%p1625_p1)
}
  0x23   :  { %s1707_s1 = smov 576   ;;  %s1708_s13 = smov 36  }
  0x24   :  { %24 = dma.hbm_to_vmem [thread:$0]  %s1837_s0, 2304, %s19_s30, [#allocation3], %s1707_s1, %s1707_s1, %s1708_s13  }
  0x25   :  { %s1709_s16 = smov [#allocation7]   ;;  %s1710_s18 = smov [#allocation8]  }
  0x26   :  { %s42_s17 = sshll.u32 %s1709_s16, 4  ;;  %s54_s19 = sshll.u32 %s1710_s18, 4  ;;  %s43_s17 = int_to_ptr.vmem [resolvable:$true] %s42_s17  ;;  %s1765_s19 = int_to_ptr.vmem [resolvable:$true] %s54_s19 }
  0x27   :  { %s1629_s22 = scalar_lea.hbm %s1839_s2, 1024 }
  0x28   :  { %p1630_p2 = scmp.ne.s32.totalorder %s1839_s2, %s1629_s22  ;;  %p1633_p3 = scmp.lt.u32.totalorder %s1629_s22, %s1839_s2 }
  0x2a   :  { %p1635_p4 = pnand %p1633_p3, %p1630_p2 }
  0x2c   :  { %1638 = shalt.err (!%p1635_p4)
}
  0x2d   :  { %s1639_s0 = scalar_lea.vmem %s43_s17, 1024  ;;  %p1644_p6 = scmp.lt.s32.totalorder %s43_s17, %s43_s17 }
  0x2e   :  { %p1640_p5 = scmp.ne.s32.totalorder %s43_s17, %s1639_s0  ;;  %p1645_p7 = scmp.lt.s32.totalorder %s1639_s0, %s1639_s0 }
  0x30   :  { %p1646_p8 = por %p1645_p7, %p1644_p6 }
  0x32   :  { %p1647_p9 = pnand %p1646_p8, %p1640_p5 }
  0x34   :  { %1650 = shalt.err (!%p1647_p9)
}
  0x35   :  { %48 = dma.hbm_to_vmem [thread:$0]  %s1839_s2, 1024, %s43_s17, [#allocation6], %s1704_s25, %s1704_s25, %s1705_s26  }
  0x36   :  { %s1651_s7 = scalar_lea.hbm %s1840_s3, 256 }
  0x37   :  { %p1652_p10 = scmp.ne.s32.totalorder %s1840_s3, %s1651_s7  ;;  %p1655_p11 = scmp.lt.u32.totalorder %s1651_s7, %s1840_s3 }
  0x39   :  { %p1657_p12 = pnand %p1655_p11, %p1652_p10 }
  0x3b   :  { %1660 = shalt.err (!%p1657_p12)
}
  0x3c   :  { %s1661_s12 = scalar_lea.vmem %s1765_s19, 256  ;;  %p1666_p0 = scmp.lt.s32.totalorder %s1765_s19, %s1765_s19 }
  0x3d   :  { %p1662_p13 = scmp.ne.s32.totalorder %s1765_s19, %s1661_s12  ;;  %p1667_p1 = scmp.lt.s32.totalorder %s1661_s12, %s1661_s12 }
  0x3f   :  { %p1668_p2 = por %p1667_p1, %p1666_p0 }
  0x41   :  { %p1669_p3 = pnand %p1668_p2, %p1662_p13 }
  0x43   :  { %1672 = shalt.err (!%p1669_p3)
}
  0x44   :  { %60 = dma.hbm_to_vmem [thread:$0]  %s1840_s3, 256, %s1765_s19, [#allocation9], %s1704_s25, %s1704_s25, %s1705_s26  }
  0x45   :  { %1695 = dma.done.wait [#allocation3], 2304  }
  0x46   :  { %1696 = vsyncadd [#allocation3], 4294964992 }
  0x47   :  { %1697 = dma.done.wait [#allocation6], 10240  }
  0x48   :  { %1698 = vsyncadd [#allocation6], 4294957056 }
  0x49   :  { %1699 = dma.done.wait [#allocation9], 256  }
  0x4a   :  { %1700 = vsyncadd [#allocation9], 4294967040  ;;  %v1505_v0 = vld [vmem:[#allocation5 + $0x40] sm:$0xff]   ;;  %v1509_v4 = vld [vmem:[#allocation5 + $0x48] sm:$0xff]   ;;  %v1711_v35 = vmov 0   ;;  %s1712_s3 = smov [#allocation10]  }
  0x4b   :  { %v1506_v1 = vld [vmem:[#allocation5 + $0xc0] sm:$0xff]   ;;  %1323 = vmatprep.subr.bf16.mxu0 %v1505_v0  ;;  %v1510_v5 = vld [vmem:[#allocation5 + $0xc8] sm:$0xff]   ;;  %v1513_v8 = vld [vmem:[#allocation5 + $0x50] sm:$0xff]   ;;  %s1183_s13 = sshll.u32 %s1712_s3, 4  ;;  %s1184_s13 = int_to_ptr.vmem [resolvable:$true] %s1183_s13 }
  0x4c   :  { %v1507_v2 = vld [vmem:[#allocation5] sm:$0xff]   ;;  %1351 = vmatprep.subr.bf16.mxu1 %v1506_v1  ;;  %v1511_v6 = vld [vmem:[#allocation5 + $0x8] sm:$0xff]   ;;  %v1514_v9 = vld [vmem:[#allocation5 + $0xd0] sm:$0xff]   ;;  %s1673_s14 = scalar_lea.vmem %s1184_s13, 256  ;;  %p1678_p5 = scmp.lt.s32.totalorder %s1184_s13, %s1184_s13 }
  0x4d   :  { %v1508_v3 = vld [vmem:[#allocation5 + $0x80] sm:$0xff]   ;;  %1324 = vmatpush3.bf16.msra.mxu0 %v1507_v2  ;;  %v1512_v7 = vld [vmem:[#allocation5 + $0x88] sm:$0xff]   ;;  %v1515_v10 = vld [vmem:[#allocation5 + $0x10] sm:$0xff]   ;;  %p1674_p4 = scmp.ne.s32.totalorder %s1184_s13, %s1673_s14  ;;  %p1679_p6 = scmp.lt.s32.totalorder %s1673_s14, %s1673_s14 }
  0x4e   :  { %1352 = vmatpush3.bf16.msra.mxu1 %v1508_v3  ;;  %1325 = vmatprep.subr.bf16.mxu0 %v1509_v4  ;;  %v1516_v11 = vld [vmem:[#allocation5 + $0x90] sm:$0xff]   ;;  %v1517_v12 = vld [vmem:[#allocation5 + $0x58] sm:$0xff]   ;;  %v1521_v16 = vld [vmem:[#allocation5 + $0x60] sm:$0xff]  }
  0x4f   :  { %1353 = vmatprep.subr.bf16.mxu1 %v1510_v5  ;;  %v1518_v13 = vld [vmem:[#allocation5 + $0xd8] sm:$0xff]   ;;  %v1522_v17 = vld [vmem:[#allocation5 + $0xe0] sm:$0xff]   ;;  %v1525_v20 = vld [vmem:[#allocation5 + $0x68] sm:$0xff]   ;;  %p1680_p7 = por %p1679_p6, %p1678_p5 }
  0x50   :  { %v1519_v14 = vld [vmem:[#allocation5 + $0x18] sm:$0xff]   ;;  %v1523_v18 = vld [vmem:[#allocation5 + $0x20] sm:$0xff]   ;;  %v1526_v21 = vld [vmem:[#allocation5 + $0xe8] sm:$0xff]  }
  0x51   :  { %1326 = vmatpush3.bf16.msra.mxu0 %v1511_v6  ;;  %v1520_v15 = vld [vmem:[#allocation5 + $0x98] sm:$0xff]   ;;  %v1524_v19 = vld [vmem:[#allocation5 + $0xa0] sm:$0xff]   ;;  %v1527_v22 = vld [vmem:[#allocation5 + $0x28] sm:$0xff]   ;;  %p1681_p8 = pnand %p1680_p7, %p1674_p4 }
  0x52   :  { %1354 = vmatpush3.bf16.msra.mxu1 %v1512_v7  ;;  %1327 = vmatprep.subr.bf16.mxu0 %v1513_v8  ;;  %v1528_v23 = vld [vmem:[#allocation5 + $0xa8] sm:$0xff]   ;;  %v1529_v24 = vld [vmem:[#allocation5 + $0x70] sm:$0xff]   ;;  %v1533_v28 = vld [vmem:[#allocation5 + $0x78] sm:$0xff]  }
  0x53   :  { %1355 = vmatprep.subr.bf16.mxu1 %v1514_v9  ;;  %v1530_v25 = vld [vmem:[#allocation5 + $0xf0] sm:$0xff]   ;;  %v1534_v29 = vld [vmem:[#allocation5 + $0xf8] sm:$0xff]   ;;  %v1537_v41 = vld [vmem:[#allocation5 + $0x140] sm:$0xff]  }
  0x54   :  { %v1531_v26 = vld [vmem:[#allocation5 + $0x30] sm:$0xff]   ;;  %v1535_v30 = vld [vmem:[#allocation5 + $0x38] sm:$0xff]   ;;  %v1538_v44 = vld [vmem:[#allocation5 + $0x100] sm:$0xff]  }
  0x55   :  { %1328 = vmatpush3.bf16.msra.mxu0 %v1515_v10  ;;  %v1532_v27 = vld [vmem:[#allocation5 + $0xb0] sm:$0xff]   ;;  %v1536_v31 = vld [vmem:[#allocation5 + $0xb8] sm:$0xff]   ;;  %v1539_v47 = vld [vmem:[#allocation5 + $0x1c0] sm:$0xff]  }
  0x56   :  { %1356 = vmatpush3.bf16.msra.mxu1 %v1516_v11  ;;  %1329 = vmatprep.subr.bf16.mxu0 %v1517_v12  ;;  %v74_v32 = vld [vmem:[#allocation2] sm:$0xff]  ;;  %v75_v34 = vld [vmem:[#allocation2 + $0x8] sm:$0xff]  ;;  %v1540_v48 = vld [vmem:[#allocation5 + $0x180] sm:$0xff]  }
  0x57   :  { %1357 = vmatprep.subr.bf16.mxu1 %v1518_v13  ;;  %v79_v33 = vld [vmem:[#allocation2 + $0x24] sm:$0xff]  ;;  %v94_v36 = vmax.bf16 %v1711_v35, %v74_v32  ;;  %v80_v38 = vld [vmem:[#allocation2 + $0x2c] sm:$0xff]  ;;  %v95_v39 = vmax.bf16 %v1711_v35, %v75_v34  ;;  %v1541_v49 = vld [vmem:[#allocation5 + $0x148] sm:$0xff]  }
  0x58   :  { %v99_v37 = vmax.bf16 %v1711_v35, %v79_v33  ;;  %v100_v40 = vmax.bf16 %v1711_v35, %v80_v38  ;;  %v1542_v50 = vld [vmem:[#allocation5 + $0x108] sm:$0xff]   ;;  %v1545_v53 = vld [vmem:[#allocation5 + $0x150] sm:$0xff]   ;;  %v1549_v57 = vld [vmem:[#allocation5 + $0x158] sm:$0xff]  }
  0x59   :  { %1330 = vmatpush3.bf16.msra.mxu0 %v1519_v14  ;;  %v1543_v51 = vld [vmem:[#allocation5 + $0x1c8] sm:$0xff]   ;;  %v1546_v54 = vld [vmem:[#allocation5 + $0x110] sm:$0xff]   ;;  %v1550_v58 = vld [vmem:[#allocation5 + $0x118] sm:$0xff]  }
  0x5a   :  { %1358 = vmatpush3.bf16.msra.mxu1 %v1520_v15  ;;  %1331 = vmatprep.subr.bf16.mxu0 %v1521_v16  ;;  %v1198_v42 = vcombine.high %v94_v36, %v99_v37  ;;  %v1197_v43 = vcombine.low %v94_v36, %v99_v37  ;;  %v1200_v45 = vcombine.high %v95_v39, %v100_v40  ;;  %v1544_v52 = vld [vmem:[#allocation5 + $0x188] sm:$0xff]   ;;  %v1547_v55 = vld [vmem:[#allocation5 + $0x1d0] sm:$0xff]   ;;  %v1551_v59 = vld [vmem:[#allocation5 + $0x1d8] sm:$0xff]  }
  0x5b   :  { %1359 = vmatprep.subr.bf16.mxu1 %v1522_v17  ;;  %v1199_v46 = vcombine.low %v95_v39, %v100_v40  ;;  %v1548_v56 = vld [vmem:[#allocation5 + $0x190] sm:$0xff]   ;;  %v1552_v60 = vld [vmem:[#allocation5 + $0x198] sm:$0xff]   ;;  %v1553_v61 = vld [vmem:[#allocation5 + $0x160] sm:$0xff]  }
  0x5c   :  { %814 = vmatprep.mubr.bf16.mxu0 %v1198_v42  ;;  %863 = vmatprep.mubr.bf16.mxu1 %v1200_v45  ;;  %v1554_v62 = vld [vmem:[#allocation5 + $0x120] sm:$0xff]   ;;  %v1557_v1 = vld [vmem:[#allocation5 + $0x168] sm:$0xff]   ;;  %v84_v2 = vld [vmem:[#allocation2 + $0x48] sm:$0xff] }
  0x5d   :  { %1332 = vmatpush3.bf16.msra.mxu0 %v1523_v18  ;;  %v1555_v63 = vld [vmem:[#allocation5 + $0x1e0] sm:$0xff]   ;;  %v104_v4 = vmax.bf16 %v1711_v35, %v84_v2  ;;  %v1558_v10 = vld [vmem:[#allocation5 + $0x128] sm:$0xff]   ;;  %v1561_v17 = vld [vmem:[#allocation5 + $0x170] sm:$0xff]  }
  0x5e   :  { %1360 = vmatpush3.bf16.msra.mxu1 %v1524_v19  ;;  %1333 = vmatprep.subr.bf16.mxu0 %v1525_v20  ;;  %v1556_v0 = vld [vmem:[#allocation5 + $0x1a0] sm:$0xff]   ;;  %v1559_v13 = vld [vmem:[#allocation5 + $0x1e8] sm:$0xff]   ;;  %v1562_v18 = vld [vmem:[#allocation5 + $0x130] sm:$0xff]  }
  0x5f   :  { %1361 = vmatprep.subr.bf16.mxu1 %v1526_v21  ;;  %v89_v3 = vld [vmem:[#allocation2 + $0x6c] sm:$0xff]  ;;  %v90_v7 = vld [vmem:[#allocation2 + $0x74] sm:$0xff]  ;;  %v1563_v19 = vld [vmem:[#allocation5 + $0x1f0] sm:$0xff]  }
  0x60   :  { %v109_v5 = vmax.bf16 %v1711_v35, %v89_v3  ;;  %v85_v6 = vld [vmem:[#allocation2 + $0x50] sm:$0xff]  ;;  %v110_v9 = vmax.bf16 %v1711_v35, %v90_v7  ;;  %v1560_v16 = vld [vmem:[#allocation5 + $0x1a8] sm:$0xff]   ;;  %v1564_v20 = vld [vmem:[#allocation5 + $0x1b0] sm:$0xff]  }
  0x61   :  { %1334 = vmatpush3.bf16.msra.mxu0 %v1527_v22  ;;  %v105_v8 = vmax.bf16 %v1711_v35, %v85_v6  ;;  %v1565_v21 = vld [vmem:[#allocation5 + $0x178] sm:$0xff]   ;;  %v1570_v37 = vld [vmem:[#allocation5 + $0x208] sm:$0xff]   ;;  %v1579_v6 = vld [vmem:[#allocation7 + $0x10] sm:$0xff]  }
  0x62   :  { %1362 = vmatpush3.bf16.msra.mxu1 %v1528_v23  ;;  %1335 = vmatprep.subr.bf16.mxu0 %v1529_v24  ;;  %v1207_v11 = vcombine.high %v104_v4, %v109_v5  ;;  %v1206_v12 = vcombine.low %v104_v4, %v109_v5  ;;  %v1566_v22 = vld [vmem:[#allocation5 + $0x138] sm:$0xff]   ;;  %v76_v24 = vld [vmem:[#allocation2 + $0x10] sm:$0xff]  ;;  %v86_v38 = vld [vmem:[#allocation2 + $0x58] sm:$0xff] }
  0x63   :  { %1363 = vmatprep.subr.bf16.mxu1 %v1530_v25  ;;  %v1209_v14 = vcombine.high %v105_v8, %v110_v9  ;;  %v1208_v15 = vcombine.low %v105_v8, %v110_v9  ;;  %v1567_v23 = vld [vmem:[#allocation5 + $0x1f8] sm:$0xff]   ;;  %v81_v25 = vld [vmem:[#allocation2 + $0x34] sm:$0xff]  ;;  %v91_v39 = vld [vmem:[#allocation2 + $0x7c] sm:$0xff]  ;;  %v106_v42 = vmax.bf16 %v1711_v35, %v86_v38 }
  0x64   :  { %v92_v45 = vld [vmem:[#allocation2 + $0x84] sm:$0xff]  ;;  %v1577_v4 = vld [vmem:[#allocation7] sm:$0xff]   ;;  %v1578_v5 = vld [vmem:[#allocation7 + $0x8] sm:$0xff]  }
  0x65   :  { %1336 = vmatpush3.bf16.msra.mxu0 %v1531_v26  ;;  %v96_v26 = vmax.bf16 %v1711_v35, %v76_v24  ;;  %v1580_v7 = vld [vmem:[#allocation7 + $0x18] sm:$0xff]   ;;  %v1581_v8 = vld [vmem:[#allocation7 + $0x20] sm:$0xff]   ;;  %v1583_v9 = vld [vmem:[#allocation7 + $0x30] sm:$0xff]  }
  0x66   :  { %1364 = vmatpush3.bf16.msra.mxu1 %v1532_v27  ;;  %1337 = vmatprep.subr.bf16.mxu0 %v1533_v28  ;;  %v101_v27 = vmax.bf16 %v1711_v35, %v81_v25  ;;  %v1568_v28 = vld [vmem:[#allocation5 + $0x1b8] sm:$0xff]  }
  0x67   :  { %1365 = vmatprep.subr.bf16.mxu1 %v1534_v29  ;;  %v1569_v29 = vld [vmem:[#allocation5 + $0x200] sm:$0xff]  }
  0x68   :  { %v1201_v32 = vcombine.low %v96_v26, %v101_v27  ;;  %v1202_v33 = vcombine.high %v96_v26, %v101_v27 }
  0x69   :  { %1338 = vmatpush3.bf16.msra.mxu0 %v1535_v30  ;;  %v77_v30 = vld [vmem:[#allocation2 + $0x18] sm:$0xff] }
  0x6a   :  { %1366 = vmatpush3.bf16.msra.mxu1 %v1536_v31  ;;  %1379 = vmatprep.subr.bf16.mxu0 %v1537_v41  ;;  %v82_v31 = vld [vmem:[#allocation2 + $0x3c] sm:$0xff]  ;;  %v97_v34 = vmax.bf16 %v1711_v35, %v77_v30 }
  0x6b   :  { %1407 = vmatprep.subr.bf16.mxu1 %v1539_v47  ;;  %v102_v36 = vmax.bf16 %v1711_v35, %v82_v31 }
  0x6c   :  { %815 = vmatmul.mubr.bf16.vlgmr.msra.gmra.mrb[0].mxu0 %v1197_v43  ;;  %v111_v43 = vmax.bf16 %v1711_v35, %v91_v39 }
  0x6d   :  { %864 = vmatmul.mubr.bf16.vlgmr.msra.gmra.mrb[0].mxu1 %v1199_v46  ;;  %1380 = vmatpush3.bf16.msra.mxu0 %v1538_v44  ;;  %v1203_v40 = vcombine.low %v97_v34, %v102_v36  ;;  %v1204_v41 = vcombine.high %v97_v34, %v102_v36  ;;  %v87_v44 = vld [vmem:[#allocation2 + $0x60] sm:$0xff] }
  0x6e   :  { %1381 = vmatprep.subr.bf16.mxu0 %v1541_v49  ;;  %1408 = vmatpush3.bf16.msra.mxu1 %v1540_v48  ;;  %v107_v46 = vmax.bf16 %v1711_v35, %v87_v44  ;;  %v1211_v47 = vcombine.high %v106_v42, %v111_v43  ;;  %v112_v48 = vmax.bf16 %v1711_v35, %v92_v45  ;;  %v1571_v49 = vld [vmem:[#allocation5 + $0x210] sm:$0xff]  }
  0x6f   :  { %1409 = vmatprep.subr.bf16.mxu1 %v1543_v51  ;;  %822 = vmatprep.mubr.bf16.mxu0 %v1207_v11  ;;  %v1210_v51 = vcombine.low %v106_v42, %v111_v43 }
  0x70   :  { %871 = vmatprep.mubr.bf16.mxu1 %v1209_v14 }
  0x71   :  { %1382 = vmatpush3.bf16.msra.mxu0 %v1542_v50  ;;  %v1213_v50 = vcombine.high %v107_v46, %v112_v48 }
  0x72   :  { %1383 = vmatprep.subr.bf16.mxu0 %v1545_v53  ;;  %1410 = vmatpush3.bf16.msra.mxu1 %v1544_v52  ;;  %v78_v52 = vld [vmem:[#allocation2 + $0x20] sm:$0xf]  ;;  %v83_v53 = vld [vmem:[#allocation2 + $0x44] sm:$0xf] }
  0x73   :  { %1411 = vmatprep.subr.bf16.mxu1 %v1547_v55  ;;  %v1572_v55 = vld [vmem:[#allocation5 + $0x218] sm:$0xff]  }
  0x74   :  { %823 = vmatmul.mubr.bf16.gmra.mrb[4].mxu0 %v1206_v12 }
  0x75   :  { %1384 = vmatpush3.bf16.msra.mxu0 %v1546_v54  ;;  %872 = vmatmul.mubr.bf16.gmra.mrb[4].mxu1 %v1208_v15  ;;  %v1212_v54 = vcombine.low %v107_v46, %v112_v48 }
  0x76   :  { %1385 = vmatprep.subr.bf16.mxu0 %v1549_v57  ;;  %1412 = vmatpush3.bf16.msra.mxu1 %v1548_v56  ;;  %v98_v56 = vmax.bf16 %v1711_v35, %v78_v52  ;;  %v103_v57 = vmax.bf16 %v1711_v35, %v83_v53 }
  0x77   :  { %1413 = vmatprep.subr.bf16.mxu1 %v1551_v59  ;;  %912 = vmatprep.mubr.bf16.mxu0 %v1202_v33 }
  0x78   :  { %961 = vmatprep.mubr.bf16.mxu1 %v1204_v41  ;;  %v1205_v59 = vcombine.low %v98_v56, %v103_v57 }
  0x79   :  { %1386 = vmatpush3.bf16.msra.mxu0 %v1550_v58  ;;  %v1573_v58 = vld [vmem:[#allocation5 + $0x220] sm:$0xff]  }
  0x7a   :  { %1387 = vmatprep.subr.bf16.mxu0 %v1553_v61  ;;  %1414 = vmatpush3.bf16.msra.mxu1 %v1552_v60  ;;  %v1574_v60 = vld [vmem:[#allocation5 + $0x228] sm:$0xff]   ;;  %v1575_v61 = vld [vmem:[#allocation5 + $0x230] sm:$0xff]  }
  0x7b   :  { %1415 = vmatprep.subr.bf16.mxu1 %v1555_v63  ;;  %v93_v63 = vld [vmem:[#allocation2 + $0x8c] sm:$0xf] }
  0x7c   :  { %v113_v2 = vmax.bf16 %v1711_v35, %v93_v63 }
  0x7d   :  { %1388 = vmatpush3.bf16.msra.mxu0 %v1554_v62  ;;  %v88_v62 = vld [vmem:[#allocation2 + $0x68] sm:$0xf] }
  0x7e   :  { %1389 = vmatprep.subr.bf16.mxu0 %v1557_v1  ;;  %1416 = vmatpush3.bf16.msra.mxu1 %v1556_v0  ;;  %v1576_v0 = vld [vmem:[#allocation5 + $0x238] sm:$0xff]   ;;  %v108_v1 = vmax.bf16 %v1711_v35, %v88_v62  ;;  %v1582_v35 = vld [vmem:[#allocation7 + $0x28] sm:$0xff]  }
  0x7f   :  { %1417 = vmatprep.subr.bf16.mxu1 %v1559_v13 }
  0x80   :  { %v1214_v3 = vcombine.low %v108_v1, %v113_v2 }
  0x81   :  { %1390 = vmatpush3.bf16.msra.mxu0 %v1558_v10  ;;  %v1584_v10 = vld [vmem:[#allocation7 + $0x38] sm:$0xff]  }
  0x82   :  { %1418 = vmatpush3.bf16.msra.mxu1 %v1560_v16  ;;  %1391 = vmatprep.subr.bf16.mxu0 %v1561_v17 }
  0x83   :  { %1419 = vmatprep.subr.bf16.mxu1 %v1563_v19 }
  0x85   :  { %1392 = vmatpush3.bf16.msra.mxu0 %v1562_v18 }
  0x86   :  { %1393 = vmatprep.subr.bf16.mxu0 %v1565_v21  ;;  %1420 = vmatpush3.bf16.msra.mxu1 %v1564_v20 }
  0x87   :  { %1421 = vmatprep.subr.bf16.mxu1 %v1567_v23 }
  0x89   :  { %1394 = vmatpush3.bf16.msra.mxu0 %v1566_v22 }
  0x8a   :  { %1422 = vmatpush3.bf16.msra.mxu1 %v1568_v28  ;;  %1455 = vmatprep.subr.bf16.mxu0 %v1569_v29 }
  0x8b   :  { %1475 = vmatprep.subr.bf16.mxu1 %v1577_v4 }
  0x8c   :  { %913 = vmatmul.mubr.bf16.vlgmr.msra.gmra.mrb[8].mxu0 %v1201_v32 }
  0x8d   :  { %1456 = vmatpush3.bf16.msra.mxu0 %v1569_v29  ;;  %962 = vmatmul.mubr.bf16.vlgmr.msra.gmra.mrb[8].mxu1 %v1203_v40 }
  0x8e   :  { %1457 = vmatprep.subr.bf16.mxu0 %v1570_v37  ;;  %920 = vmatprep.mubr.bf16.mxu0 %v1211_v47 }
  0x8f   :  { %969 = vmatprep.mubr.bf16.mxu1 %v1213_v50  ;;  %1476 = vmatpush3.bf16.msra.mxu1 %v1577_v4 }
  0x90   :  { %1477 = vmatprep.subr.bf16.mxu1 %v1578_v5 }
  0x91   :  { %1458 = vmatpush3.bf16.msra.mxu0 %v1570_v37 }
  0x92   :  { %1459 = vmatprep.subr.bf16.mxu0 %v1571_v49 }
  0x93   :  { %1478 = vmatpush3.bf16.msra.mxu1 %v1578_v5 }
  0x94   :  { %921 = vmatmul.mubr.bf16.gmra.mrb[12].mxu0 %v1210_v51  ;;  %1479 = vmatprep.subr.bf16.mxu1 %v1579_v6 }
  0x95   :  { %1460 = vmatpush3.bf16.msra.mxu0 %v1571_v49  ;;  %970 = vmatmul.mubr.bf16.gmra.mrb[12].mxu1 %v1212_v54 }
  0x96   :  { %1461 = vmatprep.subr.bf16.mxu0 %v1572_v55  ;;  %1471 = vmatprep.mubr.bf16.mxu0 %v1205_v59 }
  0x97   :  { %1480 = vmatpush3.bf16.msra.mxu1 %v1579_v6 }
  0x98   :  { %1481 = vmatprep.subr.bf16.mxu1 %v1580_v7 }
  0x99   :  { %1462 = vmatpush3.bf16.msra.mxu0 %v1572_v55 }
  0x9a   :  { %1463 = vmatprep.subr.bf16.mxu0 %v1573_v58 }
  0x9b   :  { %1482 = vmatpush3.bf16.msra.mxu1 %v1580_v7 }
  0x9c   :  { %1483 = vmatprep.subr.bf16.mxu1 %v1581_v8 }
  0x9d   :  { %1464 = vmatpush3.bf16.msra.mxu0 %v1573_v58 }
  0x9e   :  { %1465 = vmatprep.subr.bf16.mxu0 %v1574_v60 }
  0x9f   :  { %1484 = vmatpush3.bf16.msra.mxu1 %v1581_v8 }
  0xa0   :  { %1485 = vmatprep.subr.bf16.mxu1 %v1582_v35 }
  0xa1   :  { %1466 = vmatpush3.bf16.msra.mxu0 %v1574_v60 }
  0xa2   :  { %1467 = vmatprep.subr.bf16.mxu0 %v1575_v61 }
  0xa3   :  { %1486 = vmatpush3.bf16.msra.mxu1 %v1582_v35 }
  0xa4   :  { %1487 = vmatprep.subr.bf16.mxu1 %v1583_v9 }
  0xa5   :  { %1468 = vmatpush3.bf16.msra.mxu0 %v1575_v61 }
  0xa6   :  { %1469 = vmatprep.subr.bf16.mxu0 %v1576_v0 }
  0xa7   :  { %1488 = vmatpush3.bf16.msra.mxu1 %v1583_v9 }
  0xa8   :  { %1489 = vmatprep.subr.bf16.mxu1 %v1584_v10 }
  0xa9   :  { %1470 = vmatpush3.bf16.msra.mxu0 %v1576_v0 }
  0xab   :  { %1490 = vmatpush3.bf16.msra.mxu1 %v1584_v10 }
  0xac   :  { %1472 = vmatmul.mubr.bf16.vlgmr.msra.gmra.mrb[16].mxu0 %v1214_v3 }
 0x13f   :  { %v1339_v11 = vpop.f32.mrb[0].mxu0 }
 0x140   :  { %v1367_v12 = vpop.f32.mrb[0].mxu1  ;;  %v1340_v13 = vpop.f32.mrb[1].mxu0 }
 0x141   :  { %v1341_v14 = vadd.f32 %v1340_v13, %v1339_v11  ;;  %v1368_v15 = vpop.f32.mrb[1].mxu1  ;;  %v1342_v16 = vpop.f32.mrb[2].mxu0 }
 0x142   :  { %v1369_v17 = vadd.f32 %v1368_v15, %v1367_v12  ;;  %v1370_v18 = vpop.f32.mrb[2].mxu1  ;;  %v1343_v19 = vpop.f32.mrb[3].mxu0 }
 0x143   :  { %v1344_v20 = vadd.f32 %v1343_v19, %v1342_v16  ;;  %v1371_v21 = vpop.f32.mrb[3].mxu1 }
 0x144   :  { %v866_v22 = vadd.f32 %v1369_v17, %v1341_v14  ;;  %v1372_v23 = vadd.f32 %v1371_v21, %v1370_v18  ;;  %v1321_v21 = vld [vmem:[#allocation8 + $0x8] sm:$0xff]  }
 0x146   :  { %v869_v24 = vadd.f32 %v1372_v23, %v1344_v20  ;;  %v1309_v23 = vunpack.c.l.bf16 %v1321_v21 }
 0x147   :  { %v1345_v25 = vpop.f32.mrb[4].mxu0 }
 0x148   :  { %v1373_v26 = vpop.f32.mrb[4].mxu1  ;;  %v1346_v27 = vpop.f32.mrb[5].mxu0 }
 0x149   :  { %v1347_v28 = vadd.f32 %v1346_v27, %v1345_v25  ;;  %v1374_v29 = vpop.f32.mrb[5].mxu1  ;;  %v1348_v30 = vpop.f32.mrb[6].mxu0 }
 0x14a   :  { %v1375_v31 = vadd.f32 %v1374_v29, %v1373_v26  ;;  %v1376_v32 = vpop.f32.mrb[6].mxu1  ;;  %v1349_v33 = vpop.f32.mrb[7].mxu0 }
 0x14b   :  { %v1350_v34 = vadd.f32 %v1349_v33, %v1348_v30  ;;  %v1377_v36 = vpop.f32.mrb[7].mxu1 }
 0x14c   :  { %v874_v37 = vadd.f32 %v1375_v31, %v1347_v28  ;;  %v1378_v38 = vadd.f32 %v1377_v36, %v1376_v32 }
 0x14e   :  { %v877_v39 = vadd.f32 %v1378_v38, %v1350_v34 }
 0x15f   :  { %v1395_v40 = vpop.f32.mrb[8].mxu0 }
 0x160   :  { %v1396_v41 = vpop.f32.mrb[9].mxu0  ;;  %v1423_v44 = vpop.f32.mrb[8].mxu1 }
 0x161   :  { %v1397_v42 = vadd.f32 %v1396_v41, %v1395_v40  ;;  %v1398_v43 = vpop.f32.mrb[10].mxu0  ;;  %v1424_v46 = vpop.f32.mrb[9].mxu1 }
 0x162   :  { %v1399_v45 = vpop.f32.mrb[11].mxu0  ;;  %v1425_v49 = vadd.f32 %v1424_v46, %v1423_v44  ;;  %v1426_v50 = vpop.f32.mrb[10].mxu1 }
 0x163   :  { %v915_v47 = vadd.f32 %v1397_v42, %v866_v22  ;;  %v1400_v48 = vadd.f32 %v1399_v45, %v1398_v43  ;;  %v1427_v51 = vpop.f32.mrb[11].mxu1  ;;  %v1304_v22 = vld [vmem:[#allocation8] sm:$0xff]  }
 0x164   :  { %v1428_v53 = vadd.f32 %v1427_v51, %v1426_v50  ;;  %v1305_v26 = vunpack.c.l.bf16 %v1304_v22  ;;  %v1306_v27 = vunpack.c.h.bf16 %v1304_v22 }
 0x165   :  { %v918_v52 = vadd.f32 %v1400_v48, %v869_v24  ;;  %v964_v54 = vadd.f32 %v1425_v49, %v915_v47  ;;  %v1310_v24 = vunpack.c.h.bf16 %v1321_v21 }
 0x167   :  { %v1401_v55 = vpop.f32.mrb[12].mxu0  ;;  %v967_v56 = vadd.f32 %v1428_v53, %v918_v52 }
 0x168   :  { %v1402_v57 = vpop.f32.mrb[13].mxu0  ;;  %v1429_v60 = vpop.f32.mrb[12].mxu1 }
 0x169   :  { %v1403_v58 = vadd.f32 %v1402_v57, %v1401_v55  ;;  %v1404_v59 = vpop.f32.mrb[14].mxu0  ;;  %v1430_v62 = vpop.f32.mrb[13].mxu1 }
 0x16a   :  { %v1405_v61 = vpop.f32.mrb[15].mxu0  ;;  %v1431_v1 = vadd.f32 %v1430_v62, %v1429_v60  ;;  %v1432_v2 = vpop.f32.mrb[14].mxu1 }
 0x16b   :  { %v923_v63 = vadd.f32 %v1403_v58, %v874_v37  ;;  %v1406_v0 = vadd.f32 %v1405_v61, %v1404_v59  ;;  %v1433_v3 = vpop.f32.mrb[15].mxu1 }
 0x16c   :  { %v1434_v5 = vadd.f32 %v1433_v3, %v1432_v2 }
 0x16d   :  { %v926_v4 = vadd.f32 %v1406_v0, %v877_v39  ;;  %v972_v6 = vadd.f32 %v1431_v1, %v923_v63 }
 0x16f   :  { %v975_v7 = vadd.f32 %v1434_v5, %v926_v4 }
 0x17f   :  { %v1473_v8 = vpop.f32.mrb[16].mxu0 }
 0x180   :  { %v1021_v35 = vadd.f32 %v1473_v8, %v972_v6  ;;  %v1012_v9 = vpop.f32.mrb[17].mxu0 }
 0x181   :  { %v1013_v10 = vadd.f32 %v1012_v9, %v964_v54  ;;  %v1474_v11 = vpop.f32.mrb[18].mxu0 }
 0x182   :  { %v1024_v12 = vadd.f32 %v1474_v11, %v975_v7  ;;  %v1015_v13 = vpop.f32.mrb[19].mxu0  ;;  %v1029_v15 = vmax.f32 %v1021_v35, 0.0 }
 0x183   :  { %v1016_v14 = vadd.f32 %v1015_v13, %v967_v56  ;;  %v1027_v17 = vmax.f32 %v1013_v10, 0.0 }
 0x184   :  { %v1030_v16 = vmax.f32 %v1024_v12, 0.0 }
 0x185   :  { %v1028_v18 = vmax.f32 %v1016_v14, 0.0 }
 0x186   :  { %v1032_v19 = vpack.c.bf16 %v1030_v16, %v1029_v15 }
 0x187   :  { %v1031_v20 = vpack.c.bf16 %v1028_v18, %v1027_v17 }
 0x189   :  { %1491 = vmatprep.mubr.bf16.mxu1 %v1031_v20 }
 0x18a   :  { %1492 = vmatmul.mubr.bf16.vlgmr.msra.gmra.mrb[16].mxu1 %v1032_v19 }
 0x25d   :  { %v1493_v25 = vpop.f32.mrb[16].mxu1 }
 0x25e   :  { %v1131_v28 = vpop.f32.mrb[17].mxu1  ;;  %v1156_v30 = vadd.f32 %v1493_v25, %v1309_v23 }
 0x25f   :  { %v1494_v29 = vpop.f32.mrb[18].mxu1  ;;  %v1154_v33 = vadd.f32 %v1305_v26, %v1131_v28 }
 0x260   :  { %v1157_v31 = vadd.f32 %v1494_v29, %v1310_v24  ;;  %v1134_v32 = vpop.f32.mrb[19].mxu1 }
 0x261   :  { %v1155_v34 = vadd.f32 %v1306_v27, %v1134_v32 }
 0x262   :  { %v1319_v36 = vpack.c.bf16 %v1157_v31, %v1156_v30 }
 0x263   :  { %v1314_v37 = vpack.c.bf16 %v1155_v34, %v1154_v33 }
 0x264   :  { %1322 = vst [vmem:[#allocation10 + $0x8] sm:$0xff] %v1319_v36  }
 0x265   :  { %1315 = vst [vmem:[#allocation10] sm:$0xff] %v1314_v37  }
 0x266   :  { %1684 = shalt.err (!%p1681_p8)
}
 0x267   :  { %s1685_s17 = scalar_lea.hbm %s1841_s4, 256 }
 0x268   :  { %p1686_p9 = scmp.ne.s32.totalorder %s1841_s4, %s1685_s17  ;;  %p1689_p10 = scmp.lt.u32.totalorder %s1685_s17, %s1841_s4 }
 0x26a   :  { %p1691_p11 = pnand %p1689_p10, %p1686_p9 }
 0x26c   :  { %1694 = shalt.err (!%p1691_p11)
}
 0x26d   :  { %1189 = dma.vmem_to_hbm [thread:$0]  %s1184_s13, 256, %s1841_s4, [#allocation4], %s1704_s25, %s1704_s25, %s1705_s26  }
 0x26e   :  { %1701 = dma.done.wait [#allocation4], 256  }
 0x26f   :  { %1702 = vsyncadd [#allocation4], 4294967040 }
 0x270   :  { %1193 = vsyncpa [#allocation3], 1 }
 0x271   :  { %1194 = vsyncpa [#allocation6], 1 }
 0x272   :  { %1195 = vsyncpa [#allocation9], 1 }
 0x273   :  { %1196 = vsyncpa [#allocation4], 1 }

// kernel: vqvae1_forward.15
= control target key start
LH: loop header
LB: loop body
LE: loop exit
PB: predicated region body
PF: predicated region fallthrough
CT: control target
= control target key end

     0   :  { %9 = vsyncpa [#allocation3], 0  ;;  %s1841_s0 = inlined_call_operand.hbm [shape: bf16[32,1152], index: 0, kind: input, shape index: {}]   ;;  %s1842_s1 = inlined_call_operand.hbm [shape: bf16[1152,128], index: 1, kind: input, shape index: {}]   ;;  %s1843_s2 = inlined_call_operand.hbm [shape: bf16[128,128], index: 2, kind: input, shape index: {}]   ;;  %s1844_s3 = inlined_call_operand.hbm [shape: bf16[32,128], index: 3, kind: input, shape index: {}]   ;;  %s1845_s4 = inlined_call_operand.hbm [shape: bf16[32,128], index: 4, kind: output, shape index: {}]  }
   0x1   :  { %10 = vsyncpa [#allocation6], 0 }
   0x2   :  { %11 = vsyncpa [#allocation9], 0 }
   0x3   :  { %12 = vsyncpa [#allocation4], 0  ;;  %s1707_s15 = smov [#allocation5]   ;;  %s1589_s19 = scalar_lea.hbm %s1842_s1, 9216 }
   0x4   :  { %s30_s16 = sshll.u32 %s1707_s15, 4  ;;  %p1590_p0 = scmp.ne.s32.totalorder %s1842_s1, %s1589_s19  ;;  %s31_s16 = int_to_ptr.vmem [resolvable:$true] %s30_s16 }
   0x5   :  { %p1593_p1 = scmp.lt.u32.totalorder %s1589_s19, %s1842_s1 }
   0x7   :  { %p1595_p2 = pnand %p1593_p1, %p1590_p0 }
   0x9   :  { %1598 = shalt.err (!%p1595_p2)
}
   0xa   :  { %s1599_s24 = scalar_lea.vmem %s31_s16, 9216  ;;  %p1604_p4 = scmp.lt.s32.totalorder %s31_s16, %s31_s16 }
   0xb   :  { %p1600_p3 = scmp.ne.s32.totalorder %s31_s16, %s1599_s24  ;;  %p1605_p5 = scmp.lt.s32.totalorder %s1599_s24, %s1599_s24 }
   0xd   :  { %p1606_p6 = por %p1605_p5, %p1604_p4 }
   0xf   :  { %p1607_p7 = pnand %p1606_p6, %p1600_p3 }
  0x11   :  { %1610 = shalt.err (!%p1607_p7)
}
  0x12   :  { %s1708_s25 = smov 64   ;;  %s1709_s26 = smov 4  }
  0x13   :  { %36 = dma.hbm_to_vmem [thread:$0]  %s1842_s1, 9216, %s31_s16, [#allocation6], %s1708_s25, %s1708_s25, %s1709_s26  }
  0x14   :  { %s1710_s29 = smov [#allocation2]   ;;  %s1611_s7 = scalar_lea.hbm %s1841_s0, 2304 }
  0x15   :  { %s18_s30 = sshll.u32 %s1710_s29, 4  ;;  %p1612_p8 = scmp.ne.s32.totalorder %s1841_s0, %s1611_s7  ;;  %s19_s30 = int_to_ptr.vmem [resolvable:$true] %s18_s30 }
  0x16   :  { %p1615_p9 = scmp.lt.u32.totalorder %s1611_s7, %s1841_s0 }
  0x18   :  { %p1617_p10 = pnand %p1615_p9, %p1612_p8 }
  0x1a   :  { %1620 = shalt.err (!%p1617_p10)
}
  0x1b   :  { %s1621_s12 = scalar_lea.vmem %s19_s30, 2304  ;;  %p1626_p12 = scmp.lt.s32.totalorder %s19_s30, %s19_s30 }
  0x1c   :  { %p1622_p11 = scmp.ne.s32.totalorder %s19_s30, %s1621_s12  ;;  %p1627_p13 = scmp.lt.s32.totalorder %s1621_s12, %s1621_s12 }
  0x1e   :  { %p1628_p0 = por %p1627_p13, %p1626_p12 }
  0x20   :  { %p1629_p1 = pnand %p1628_p0, %p1622_p11 }
  0x22   :  { %1632 = shalt.err (!%p1629_p1)
}
  0x23   :  { %s1711_s1 = smov 576   ;;  %s1712_s13 = smov 36  }
  0x24   :  { %24 = dma.hbm_to_vmem [thread:$0]  %s1841_s0, 2304, %s19_s30, [#allocation3], %s1711_s1, %s1711_s1, %s1712_s13  }
  0x25   :  { %s1713_s16 = smov [#allocation7]   ;;  %s1714_s18 = smov [#allocation8]  }
  0x26   :  { %s42_s17 = sshll.u32 %s1713_s16, 4  ;;  %s54_s19 = sshll.u32 %s1714_s18, 4  ;;  %s43_s17 = int_to_ptr.vmem [resolvable:$true] %s42_s17  ;;  %s1769_s19 = int_to_ptr.vmem [resolvable:$true] %s54_s19 }
  0x27   :  { %s1633_s22 = scalar_lea.hbm %s1843_s2, 1024 }
  0x28   :  { %p1634_p2 = scmp.ne.s32.totalorder %s1843_s2, %s1633_s22  ;;  %p1637_p3 = scmp.lt.u32.totalorder %s1633_s22, %s1843_s2 }
  0x2a   :  { %p1639_p4 = pnand %p1637_p3, %p1634_p2 }
  0x2c   :  { %1642 = shalt.err (!%p1639_p4)
}
  0x2d   :  { %s1643_s0 = scalar_lea.vmem %s43_s17, 1024  ;;  %p1648_p6 = scmp.lt.s32.totalorder %s43_s17, %s43_s17 }
  0x2e   :  { %p1644_p5 = scmp.ne.s32.totalorder %s43_s17, %s1643_s0  ;;  %p1649_p7 = scmp.lt.s32.totalorder %s1643_s0, %s1643_s0 }
  0x30   :  { %p1650_p8 = por %p1649_p7, %p1648_p6 }
  0x32   :  { %p1651_p9 = pnand %p1650_p8, %p1644_p5 }
  0x34   :  { %1654 = shalt.err (!%p1651_p9)
}
  0x35   :  { %48 = dma.hbm_to_vmem [thread:$0]  %s1843_s2, 1024, %s43_s17, [#allocation6], %s1708_s25, %s1708_s25, %s1709_s26  }
  0x36   :  { %s1655_s7 = scalar_lea.hbm %s1844_s3, 256 }
  0x37   :  { %p1656_p10 = scmp.ne.s32.totalorder %s1844_s3, %s1655_s7  ;;  %p1659_p11 = scmp.lt.u32.totalorder %s1655_s7, %s1844_s3 }
  0x39   :  { %p1661_p12 = pnand %p1659_p11, %p1656_p10 }
  0x3b   :  { %1664 = shalt.err (!%p1661_p12)
}
  0x3c   :  { %s1665_s12 = scalar_lea.vmem %s1769_s19, 256  ;;  %p1670_p0 = scmp.lt.s32.totalorder %s1769_s19, %s1769_s19 }
  0x3d   :  { %p1666_p13 = scmp.ne.s32.totalorder %s1769_s19, %s1665_s12  ;;  %p1671_p1 = scmp.lt.s32.totalorder %s1665_s12, %s1665_s12 }
  0x3f   :  { %p1672_p2 = por %p1671_p1, %p1670_p0 }
  0x41   :  { %p1673_p3 = pnand %p1672_p2, %p1666_p13 }
  0x43   :  { %1676 = shalt.err (!%p1673_p3)
}
  0x44   :  { %60 = dma.hbm_to_vmem [thread:$0]  %s1844_s3, 256, %s1769_s19, [#allocation9], %s1708_s25, %s1708_s25, %s1709_s26  }
  0x45   :  { %1699 = dma.done.wait [#allocation3], 2304  }
  0x46   :  { %1700 = vsyncadd [#allocation3], 4294964992 }
  0x47   :  { %1701 = dma.done.wait [#allocation6], 10240  }
  0x48   :  { %1702 = vsyncadd [#allocation6], 4294957056 }
  0x49   :  { %1703 = dma.done.wait [#allocation9], 256  }
  0x4a   :  { %1704 = vsyncadd [#allocation9], 4294967040  ;;  %v1509_v0 = vld [vmem:[#allocation5 + $0x40] sm:$0xff]   ;;  %v1513_v4 = vld [vmem:[#allocation5 + $0x48] sm:$0xff]   ;;  %v1715_v35 = vmov 0   ;;  %s1716_s3 = smov [#allocation10]  }
  0x4b   :  { %v1510_v1 = vld [vmem:[#allocation5 + $0xc0] sm:$0xff]   ;;  %1327 = vmatprep.subr.bf16.mxu0 %v1509_v0  ;;  %v1514_v5 = vld [vmem:[#allocation5 + $0xc8] sm:$0xff]   ;;  %v1517_v8 = vld [vmem:[#allocation5 + $0x50] sm:$0xff]   ;;  %s1187_s13 = sshll.u32 %s1716_s3, 4  ;;  %s1188_s13 = int_to_ptr.vmem [resolvable:$true] %s1187_s13 }
  0x4c   :  { %v1511_v2 = vld [vmem:[#allocation5] sm:$0xff]   ;;  %1355 = vmatprep.subr.bf16.mxu1 %v1510_v1  ;;  %v1515_v6 = vld [vmem:[#allocation5 + $0x8] sm:$0xff]   ;;  %v1518_v9 = vld [vmem:[#allocation5 + $0xd0] sm:$0xff]   ;;  %s1677_s14 = scalar_lea.vmem %s1188_s13, 256  ;;  %p1682_p5 = scmp.lt.s32.totalorder %s1188_s13, %s1188_s13 }
  0x4d   :  { %v1512_v3 = vld [vmem:[#allocation5 + $0x80] sm:$0xff]   ;;  %1328 = vmatpush3.bf16.msra.mxu0 %v1511_v2  ;;  %v1516_v7 = vld [vmem:[#allocation5 + $0x88] sm:$0xff]   ;;  %v1519_v10 = vld [vmem:[#allocation5 + $0x10] sm:$0xff]   ;;  %p1678_p4 = scmp.ne.s32.totalorder %s1188_s13, %s1677_s14  ;;  %p1683_p6 = scmp.lt.s32.totalorder %s1677_s14, %s1677_s14 }
  0x4e   :  { %1356 = vmatpush3.bf16.msra.mxu1 %v1512_v3  ;;  %1329 = vmatprep.subr.bf16.mxu0 %v1513_v4  ;;  %v1520_v11 = vld [vmem:[#allocation5 + $0x90] sm:$0xff]   ;;  %v1521_v12 = vld [vmem:[#allocation5 + $0x58] sm:$0xff]   ;;  %v1525_v16 = vld [vmem:[#allocation5 + $0x60] sm:$0xff]  }
  0x4f   :  { %1357 = vmatprep.subr.bf16.mxu1 %v1514_v5  ;;  %v1522_v13 = vld [vmem:[#allocation5 + $0xd8] sm:$0xff]   ;;  %v1526_v17 = vld [vmem:[#allocation5 + $0xe0] sm:$0xff]   ;;  %v1529_v20 = vld [vmem:[#allocation5 + $0x68] sm:$0xff]   ;;  %p1684_p7 = por %p1683_p6, %p1682_p5 }
  0x50   :  { %v1523_v14 = vld [vmem:[#allocation5 + $0x18] sm:$0xff]   ;;  %v1527_v18 = vld [vmem:[#allocation5 + $0x20] sm:$0xff]   ;;  %v1530_v21 = vld [vmem:[#allocation5 + $0xe8] sm:$0xff]  }
  0x51   :  { %1330 = vmatpush3.bf16.msra.mxu0 %v1515_v6  ;;  %v1524_v15 = vld [vmem:[#allocation5 + $0x98] sm:$0xff]   ;;  %v1528_v19 = vld [vmem:[#allocation5 + $0xa0] sm:$0xff]   ;;  %v1531_v22 = vld [vmem:[#allocation5 + $0x28] sm:$0xff]   ;;  %p1685_p8 = pnand %p1684_p7, %p1678_p4 }
  0x52   :  { %1358 = vmatpush3.bf16.msra.mxu1 %v1516_v7  ;;  %1331 = vmatprep.subr.bf16.mxu0 %v1517_v8  ;;  %v1532_v23 = vld [vmem:[#allocation5 + $0xa8] sm:$0xff]   ;;  %v1533_v24 = vld [vmem:[#allocation5 + $0x70] sm:$0xff]   ;;  %v1537_v28 = vld [vmem:[#allocation5 + $0x78] sm:$0xff]  }
  0x53   :  { %1359 = vmatprep.subr.bf16.mxu1 %v1518_v9  ;;  %v1534_v25 = vld [vmem:[#allocation5 + $0xf0] sm:$0xff]   ;;  %v1538_v29 = vld [vmem:[#allocation5 + $0xf8] sm:$0xff]   ;;  %v1541_v41 = vld [vmem:[#allocation5 + $0x140] sm:$0xff]  }
  0x54   :  { %v1535_v26 = vld [vmem:[#allocation5 + $0x30] sm:$0xff]   ;;  %v1539_v30 = vld [vmem:[#allocation5 + $0x38] sm:$0xff]   ;;  %v1542_v44 = vld [vmem:[#allocation5 + $0x100] sm:$0xff]  }
  0x55   :  { %1332 = vmatpush3.bf16.msra.mxu0 %v1519_v10  ;;  %v1536_v27 = vld [vmem:[#allocation5 + $0xb0] sm:$0xff]   ;;  %v1540_v31 = vld [vmem:[#allocation5 + $0xb8] sm:$0xff]   ;;  %v1543_v47 = vld [vmem:[#allocation5 + $0x1c0] sm:$0xff]  }
  0x56   :  { %1360 = vmatpush3.bf16.msra.mxu1 %v1520_v11  ;;  %1333 = vmatprep.subr.bf16.mxu0 %v1521_v12  ;;  %v74_v32 = vld [vmem:[#allocation2] sm:$0xff]  ;;  %v75_v34 = vld [vmem:[#allocation2 + $0x8] sm:$0xff]  ;;  %v1544_v48 = vld [vmem:[#allocation5 + $0x180] sm:$0xff]  }
  0x57   :  { %1361 = vmatprep.subr.bf16.mxu1 %v1522_v13  ;;  %v79_v33 = vld [vmem:[#allocation2 + $0x24] sm:$0xff]  ;;  %v94_v36 = vmax.bf16 %v1715_v35, %v74_v32  ;;  %v80_v38 = vld [vmem:[#allocation2 + $0x2c] sm:$0xff]  ;;  %v95_v39 = vmax.bf16 %v1715_v35, %v75_v34  ;;  %v1545_v49 = vld [vmem:[#allocation5 + $0x148] sm:$0xff]  }
  0x58   :  { %v99_v37 = vmax.bf16 %v1715_v35, %v79_v33  ;;  %v100_v40 = vmax.bf16 %v1715_v35, %v80_v38  ;;  %v1546_v50 = vld [vmem:[#allocation5 + $0x108] sm:$0xff]   ;;  %v1549_v53 = vld [vmem:[#allocation5 + $0x150] sm:$0xff]   ;;  %v1553_v57 = vld [vmem:[#allocation5 + $0x158] sm:$0xff]  }
  0x59   :  { %1334 = vmatpush3.bf16.msra.mxu0 %v1523_v14  ;;  %v1547_v51 = vld [vmem:[#allocation5 + $0x1c8] sm:$0xff]   ;;  %v1550_v54 = vld [vmem:[#allocation5 + $0x110] sm:$0xff]   ;;  %v1554_v58 = vld [vmem:[#allocation5 + $0x118] sm:$0xff]  }
  0x5a   :  { %1362 = vmatpush3.bf16.msra.mxu1 %v1524_v15  ;;  %1335 = vmatprep.subr.bf16.mxu0 %v1525_v16  ;;  %v1202_v42 = vcombine.high %v94_v36, %v99_v37  ;;  %v1201_v43 = vcombine.low %v94_v36, %v99_v37  ;;  %v1204_v45 = vcombine.high %v95_v39, %v100_v40  ;;  %v1548_v52 = vld [vmem:[#allocation5 + $0x188] sm:$0xff]   ;;  %v1551_v55 = vld [vmem:[#allocation5 + $0x1d0] sm:$0xff]   ;;  %v1555_v59 = vld [vmem:[#allocation5 + $0x1d8] sm:$0xff]  }
  0x5b   :  { %1363 = vmatprep.subr.bf16.mxu1 %v1526_v17  ;;  %v1203_v46 = vcombine.low %v95_v39, %v100_v40  ;;  %v1552_v56 = vld [vmem:[#allocation5 + $0x190] sm:$0xff]   ;;  %v1556_v60 = vld [vmem:[#allocation5 + $0x198] sm:$0xff]   ;;  %v1557_v61 = vld [vmem:[#allocation5 + $0x160] sm:$0xff]  }
  0x5c   :  { %814 = vmatprep.mubr.bf16.mxu0 %v1202_v42  ;;  %863 = vmatprep.mubr.bf16.mxu1 %v1204_v45  ;;  %v1558_v62 = vld [vmem:[#allocation5 + $0x120] sm:$0xff]   ;;  %v1561_v1 = vld [vmem:[#allocation5 + $0x168] sm:$0xff]   ;;  %v84_v2 = vld [vmem:[#allocation2 + $0x48] sm:$0xff] }
  0x5d   :  { %1336 = vmatpush3.bf16.msra.mxu0 %v1527_v18  ;;  %v1559_v63 = vld [vmem:[#allocation5 + $0x1e0] sm:$0xff]   ;;  %v104_v4 = vmax.bf16 %v1715_v35, %v84_v2  ;;  %v1562_v10 = vld [vmem:[#allocation5 + $0x128] sm:$0xff]   ;;  %v1565_v17 = vld [vmem:[#allocation5 + $0x170] sm:$0xff]  }
  0x5e   :  { %1364 = vmatpush3.bf16.msra.mxu1 %v1528_v19  ;;  %1337 = vmatprep.subr.bf16.mxu0 %v1529_v20  ;;  %v1560_v0 = vld [vmem:[#allocation5 + $0x1a0] sm:$0xff]   ;;  %v1563_v13 = vld [vmem:[#allocation5 + $0x1e8] sm:$0xff]   ;;  %v1566_v18 = vld [vmem:[#allocation5 + $0x130] sm:$0xff]  }
  0x5f   :  { %1365 = vmatprep.subr.bf16.mxu1 %v1530_v21  ;;  %v89_v3 = vld [vmem:[#allocation2 + $0x6c] sm:$0xff]  ;;  %v90_v7 = vld [vmem:[#allocation2 + $0x74] sm:$0xff]  ;;  %v1567_v19 = vld [vmem:[#allocation5 + $0x1f0] sm:$0xff]  }
  0x60   :  { %v109_v5 = vmax.bf16 %v1715_v35, %v89_v3  ;;  %v85_v6 = vld [vmem:[#allocation2 + $0x50] sm:$0xff]  ;;  %v110_v9 = vmax.bf16 %v1715_v35, %v90_v7  ;;  %v1564_v16 = vld [vmem:[#allocation5 + $0x1a8] sm:$0xff]   ;;  %v1568_v20 = vld [vmem:[#allocation5 + $0x1b0] sm:$0xff]  }
  0x61   :  { %1338 = vmatpush3.bf16.msra.mxu0 %v1531_v22  ;;  %v105_v8 = vmax.bf16 %v1715_v35, %v85_v6  ;;  %v1569_v21 = vld [vmem:[#allocation5 + $0x178] sm:$0xff]   ;;  %v1574_v37 = vld [vmem:[#allocation5 + $0x208] sm:$0xff]   ;;  %v1583_v6 = vld [vmem:[#allocation7 + $0x10] sm:$0xff]  }
  0x62   :  { %1366 = vmatpush3.bf16.msra.mxu1 %v1532_v23  ;;  %1339 = vmatprep.subr.bf16.mxu0 %v1533_v24  ;;  %v1211_v11 = vcombine.high %v104_v4, %v109_v5  ;;  %v1210_v12 = vcombine.low %v104_v4, %v109_v5  ;;  %v1570_v22 = vld [vmem:[#allocation5 + $0x138] sm:$0xff]   ;;  %v76_v24 = vld [vmem:[#allocation2 + $0x10] sm:$0xff]  ;;  %v86_v38 = vld [vmem:[#allocation2 + $0x58] sm:$0xff] }
  0x63   :  { %1367 = vmatprep.subr.bf16.mxu1 %v1534_v25  ;;  %v1213_v14 = vcombine.high %v105_v8, %v110_v9  ;;  %v1212_v15 = vcombine.low %v105_v8, %v110_v9  ;;  %v1571_v23 = vld [vmem:[#allocation5 + $0x1f8] sm:$0xff]   ;;  %v81_v25 = vld [vmem:[#allocation2 + $0x34] sm:$0xff]  ;;  %v91_v39 = vld [vmem:[#allocation2 + $0x7c] sm:$0xff]  ;;  %v106_v42 = vmax.bf16 %v1715_v35, %v86_v38 }
  0x64   :  { %v92_v45 = vld [vmem:[#allocation2 + $0x84] sm:$0xff]  ;;  %v1581_v4 = vld [vmem:[#allocation7] sm:$0xff]   ;;  %v1582_v5 = vld [vmem:[#allocation7 + $0x8] sm:$0xff]  }
  0x65   :  { %1340 = vmatpush3.bf16.msra.mxu0 %v1535_v26  ;;  %v96_v26 = vmax.bf16 %v1715_v35, %v76_v24  ;;  %v1584_v7 = vld [vmem:[#allocation7 + $0x18] sm:$0xff]   ;;  %v1585_v8 = vld [vmem:[#allocation7 + $0x20] sm:$0xff]   ;;  %v1587_v9 = vld [vmem:[#allocation7 + $0x30] sm:$0xff]  }
  0x66   :  { %1368 = vmatpush3.bf16.msra.mxu1 %v1536_v27  ;;  %1341 = vmatprep.subr.bf16.mxu0 %v1537_v28  ;;  %v101_v27 = vmax.bf16 %v1715_v35, %v81_v25  ;;  %v1572_v28 = vld [vmem:[#allocation5 + $0x1b8] sm:$0xff]  }
  0x67   :  { %1369 = vmatprep.subr.bf16.mxu1 %v1538_v29  ;;  %v1573_v29 = vld [vmem:[#allocation5 + $0x200] sm:$0xff]  }
  0x68   :  { %v1205_v32 = vcombine.low %v96_v26, %v101_v27  ;;  %v1206_v33 = vcombine.high %v96_v26, %v101_v27 }
  0x69   :  { %1342 = vmatpush3.bf16.msra.mxu0 %v1539_v30  ;;  %v77_v30 = vld [vmem:[#allocation2 + $0x18] sm:$0xff] }
  0x6a   :  { %1370 = vmatpush3.bf16.msra.mxu1 %v1540_v31  ;;  %1383 = vmatprep.subr.bf16.mxu0 %v1541_v41  ;;  %v82_v31 = vld [vmem:[#allocation2 + $0x3c] sm:$0xff]  ;;  %v97_v34 = vmax.bf16 %v1715_v35, %v77_v30 }
  0x6b   :  { %1411 = vmatprep.subr.bf16.mxu1 %v1543_v47  ;;  %v102_v36 = vmax.bf16 %v1715_v35, %v82_v31 }
  0x6c   :  { %815 = vmatmul.mubr.bf16.vlgmr.msra.gmra.mrb[0].mxu0 %v1201_v43  ;;  %v111_v43 = vmax.bf16 %v1715_v35, %v91_v39 }
  0x6d   :  { %864 = vmatmul.mubr.bf16.vlgmr.msra.gmra.mrb[0].mxu1 %v1203_v46  ;;  %1384 = vmatpush3.bf16.msra.mxu0 %v1542_v44  ;;  %v1207_v40 = vcombine.low %v97_v34, %v102_v36  ;;  %v1208_v41 = vcombine.high %v97_v34, %v102_v36  ;;  %v87_v44 = vld [vmem:[#allocation2 + $0x60] sm:$0xff] }
  0x6e   :  { %1385 = vmatprep.subr.bf16.mxu0 %v1545_v49  ;;  %1412 = vmatpush3.bf16.msra.mxu1 %v1544_v48  ;;  %v107_v46 = vmax.bf16 %v1715_v35, %v87_v44  ;;  %v1215_v47 = vcombine.high %v106_v42, %v111_v43  ;;  %v112_v48 = vmax.bf16 %v1715_v35, %v92_v45  ;;  %v1575_v49 = vld [vmem:[#allocation5 + $0x210] sm:$0xff]  }
  0x6f   :  { %1413 = vmatprep.subr.bf16.mxu1 %v1547_v51  ;;  %822 = vmatprep.mubr.bf16.mxu0 %v1211_v11  ;;  %v1214_v51 = vcombine.low %v106_v42, %v111_v43 }
  0x70   :  { %871 = vmatprep.mubr.bf16.mxu1 %v1213_v14 }
  0x71   :  { %1386 = vmatpush3.bf16.msra.mxu0 %v1546_v50  ;;  %v1217_v50 = vcombine.high %v107_v46, %v112_v48 }
  0x72   :  { %1387 = vmatprep.subr.bf16.mxu0 %v1549_v53  ;;  %1414 = vmatpush3.bf16.msra.mxu1 %v1548_v52  ;;  %v78_v52 = vld [vmem:[#allocation2 + $0x20] sm:$0xf]  ;;  %v83_v53 = vld [vmem:[#allocation2 + $0x44] sm:$0xf] }
  0x73   :  { %1415 = vmatprep.subr.bf16.mxu1 %v1551_v55  ;;  %v1576_v55 = vld [vmem:[#allocation5 + $0x218] sm:$0xff]  }
  0x74   :  { %823 = vmatmul.mubr.bf16.gmra.mrb[4].mxu0 %v1210_v12 }
  0x75   :  { %1388 = vmatpush3.bf16.msra.mxu0 %v1550_v54  ;;  %872 = vmatmul.mubr.bf16.gmra.mrb[4].mxu1 %v1212_v15  ;;  %v1216_v54 = vcombine.low %v107_v46, %v112_v48 }
  0x76   :  { %1389 = vmatprep.subr.bf16.mxu0 %v1553_v57  ;;  %1416 = vmatpush3.bf16.msra.mxu1 %v1552_v56  ;;  %v98_v56 = vmax.bf16 %v1715_v35, %v78_v52  ;;  %v103_v57 = vmax.bf16 %v1715_v35, %v83_v53 }
  0x77   :  { %1417 = vmatprep.subr.bf16.mxu1 %v1555_v59  ;;  %912 = vmatprep.mubr.bf16.mxu0 %v1206_v33 }
  0x78   :  { %961 = vmatprep.mubr.bf16.mxu1 %v1208_v41  ;;  %v1209_v59 = vcombine.low %v98_v56, %v103_v57 }
  0x79   :  { %1390 = vmatpush3.bf16.msra.mxu0 %v1554_v58  ;;  %v1577_v58 = vld [vmem:[#allocation5 + $0x220] sm:$0xff]  }
  0x7a   :  { %1391 = vmatprep.subr.bf16.mxu0 %v1557_v61  ;;  %1418 = vmatpush3.bf16.msra.mxu1 %v1556_v60  ;;  %v1578_v60 = vld [vmem:[#allocation5 + $0x228] sm:$0xff]   ;;  %v1579_v61 = vld [vmem:[#allocation5 + $0x230] sm:$0xff]  }
  0x7b   :  { %1419 = vmatprep.subr.bf16.mxu1 %v1559_v63  ;;  %v93_v63 = vld [vmem:[#allocation2 + $0x8c] sm:$0xf] }
  0x7c   :  { %v113_v2 = vmax.bf16 %v1715_v35, %v93_v63 }
  0x7d   :  { %1392 = vmatpush3.bf16.msra.mxu0 %v1558_v62  ;;  %v88_v62 = vld [vmem:[#allocation2 + $0x68] sm:$0xf] }
  0x7e   :  { %1393 = vmatprep.subr.bf16.mxu0 %v1561_v1  ;;  %1420 = vmatpush3.bf16.msra.mxu1 %v1560_v0  ;;  %v1580_v0 = vld [vmem:[#allocation5 + $0x238] sm:$0xff]   ;;  %v108_v1 = vmax.bf16 %v1715_v35, %v88_v62  ;;  %v1586_v35 = vld [vmem:[#allocation7 + $0x28] sm:$0xff]  }
  0x7f   :  { %1421 = vmatprep.subr.bf16.mxu1 %v1563_v13 }
  0x80   :  { %v1218_v3 = vcombine.low %v108_v1, %v113_v2 }
  0x81   :  { %1394 = vmatpush3.bf16.msra.mxu0 %v1562_v10  ;;  %v1588_v10 = vld [vmem:[#allocation7 + $0x38] sm:$0xff]  }
  0x82   :  { %1422 = vmatpush3.bf16.msra.mxu1 %v1564_v16  ;;  %1395 = vmatprep.subr.bf16.mxu0 %v1565_v17 }
  0x83   :  { %1423 = vmatprep.subr.bf16.mxu1 %v1567_v19 }
  0x85   :  { %1396 = vmatpush3.bf16.msra.mxu0 %v1566_v18 }
  0x86   :  { %1397 = vmatprep.subr.bf16.mxu0 %v1569_v21  ;;  %1424 = vmatpush3.bf16.msra.mxu1 %v1568_v20 }
  0x87   :  { %1425 = vmatprep.subr.bf16.mxu1 %v1571_v23 }
  0x89   :  { %1398 = vmatpush3.bf16.msra.mxu0 %v1570_v22 }
  0x8a   :  { %1426 = vmatpush3.bf16.msra.mxu1 %v1572_v28  ;;  %1459 = vmatprep.subr.bf16.mxu0 %v1573_v29 }
  0x8b   :  { %1479 = vmatprep.subr.bf16.mxu1 %v1581_v4 }
  0x8c   :  { %913 = vmatmul.mubr.bf16.vlgmr.msra.gmra.mrb[8].mxu0 %v1205_v32 }
  0x8d   :  { %1460 = vmatpush3.bf16.msra.mxu0 %v1573_v29  ;;  %962 = vmatmul.mubr.bf16.vlgmr.msra.gmra.mrb[8].mxu1 %v1207_v40 }
  0x8e   :  { %1461 = vmatprep.subr.bf16.mxu0 %v1574_v37  ;;  %920 = vmatprep.mubr.bf16.mxu0 %v1215_v47 }
  0x8f   :  { %969 = vmatprep.mubr.bf16.mxu1 %v1217_v50  ;;  %1480 = vmatpush3.bf16.msra.mxu1 %v1581_v4 }
  0x90   :  { %1481 = vmatprep.subr.bf16.mxu1 %v1582_v5 }
  0x91   :  { %1462 = vmatpush3.bf16.msra.mxu0 %v1574_v37 }
  0x92   :  { %1463 = vmatprep.subr.bf16.mxu0 %v1575_v49 }
  0x93   :  { %1482 = vmatpush3.bf16.msra.mxu1 %v1582_v5 }
  0x94   :  { %921 = vmatmul.mubr.bf16.gmra.mrb[12].mxu0 %v1214_v51  ;;  %1483 = vmatprep.subr.bf16.mxu1 %v1583_v6 }
  0x95   :  { %1464 = vmatpush3.bf16.msra.mxu0 %v1575_v49  ;;  %970 = vmatmul.mubr.bf16.gmra.mrb[12].mxu1 %v1216_v54 }
  0x96   :  { %1465 = vmatprep.subr.bf16.mxu0 %v1576_v55  ;;  %1475 = vmatprep.mubr.bf16.mxu0 %v1209_v59 }
  0x97   :  { %1484 = vmatpush3.bf16.msra.mxu1 %v1583_v6 }
  0x98   :  { %1485 = vmatprep.subr.bf16.mxu1 %v1584_v7 }
  0x99   :  { %1466 = vmatpush3.bf16.msra.mxu0 %v1576_v55 }
  0x9a   :  { %1467 = vmatprep.subr.bf16.mxu0 %v1577_v58 }
  0x9b   :  { %1486 = vmatpush3.bf16.msra.mxu1 %v1584_v7 }
  0x9c   :  { %1487 = vmatprep.subr.bf16.mxu1 %v1585_v8 }
  0x9d   :  { %1468 = vmatpush3.bf16.msra.mxu0 %v1577_v58 }
  0x9e   :  { %1469 = vmatprep.subr.bf16.mxu0 %v1578_v60 }
  0x9f   :  { %1488 = vmatpush3.bf16.msra.mxu1 %v1585_v8 }
  0xa0   :  { %1489 = vmatprep.subr.bf16.mxu1 %v1586_v35 }
  0xa1   :  { %1470 = vmatpush3.bf16.msra.mxu0 %v1578_v60 }
  0xa2   :  { %1471 = vmatprep.subr.bf16.mxu0 %v1579_v61 }
  0xa3   :  { %1490 = vmatpush3.bf16.msra.mxu1 %v1586_v35 }
  0xa4   :  { %1491 = vmatprep.subr.bf16.mxu1 %v1587_v9 }
  0xa5   :  { %1472 = vmatpush3.bf16.msra.mxu0 %v1579_v61 }
  0xa6   :  { %1473 = vmatprep.subr.bf16.mxu0 %v1580_v0 }
  0xa7   :  { %1492 = vmatpush3.bf16.msra.mxu1 %v1587_v9 }
  0xa8   :  { %1493 = vmatprep.subr.bf16.mxu1 %v1588_v10 }
  0xa9   :  { %1474 = vmatpush3.bf16.msra.mxu0 %v1580_v0 }
  0xab   :  { %1494 = vmatpush3.bf16.msra.mxu1 %v1588_v10 }
  0xac   :  { %1476 = vmatmul.mubr.bf16.vlgmr.msra.gmra.mrb[16].mxu0 %v1218_v3 }
 0x13f   :  { %v1343_v11 = vpop.f32.mrb[0].mxu0 }
 0x140   :  { %v1371_v12 = vpop.f32.mrb[0].mxu1  ;;  %v1344_v13 = vpop.f32.mrb[1].mxu0 }
 0x141   :  { %v1345_v14 = vadd.f32 %v1344_v13, %v1343_v11  ;;  %v1372_v15 = vpop.f32.mrb[1].mxu1  ;;  %v1346_v16 = vpop.f32.mrb[2].mxu0 }
 0x142   :  { %v1373_v17 = vadd.f32 %v1372_v15, %v1371_v12  ;;  %v1374_v18 = vpop.f32.mrb[2].mxu1  ;;  %v1347_v19 = vpop.f32.mrb[3].mxu0 }
 0x143   :  { %v1348_v20 = vadd.f32 %v1347_v19, %v1346_v16  ;;  %v1375_v21 = vpop.f32.mrb[3].mxu1 }
 0x144   :  { %v866_v22 = vadd.f32 %v1373_v17, %v1345_v14  ;;  %v1376_v23 = vadd.f32 %v1375_v21, %v1374_v18  ;;  %v1325_v21 = vld [vmem:[#allocation8 + $0x8] sm:$0xff]  }
 0x146   :  { %v869_v24 = vadd.f32 %v1376_v23, %v1348_v20  ;;  %v1313_v23 = vunpack.c.l.bf16 %v1325_v21 }
 0x147   :  { %v1349_v25 = vpop.f32.mrb[4].mxu0 }
 0x148   :  { %v1377_v26 = vpop.f32.mrb[4].mxu1  ;;  %v1350_v27 = vpop.f32.mrb[5].mxu0 }
 0x149   :  { %v1351_v28 = vadd.f32 %v1350_v27, %v1349_v25  ;;  %v1378_v29 = vpop.f32.mrb[5].mxu1  ;;  %v1352_v30 = vpop.f32.mrb[6].mxu0  ;;  %v1314_v25 = vunpack.c.h.bf16 %v1325_v21 }
 0x14a   :  { %v1379_v31 = vadd.f32 %v1378_v29, %v1377_v26  ;;  %v1380_v32 = vpop.f32.mrb[6].mxu1  ;;  %v1353_v33 = vpop.f32.mrb[7].mxu0 }
 0x14b   :  { %v1354_v34 = vadd.f32 %v1353_v33, %v1352_v30  ;;  %v1381_v36 = vpop.f32.mrb[7].mxu1 }
 0x14c   :  { %v874_v37 = vadd.f32 %v1379_v31, %v1351_v28  ;;  %v1382_v38 = vadd.f32 %v1381_v36, %v1380_v32 }
 0x14e   :  { %v877_v39 = vadd.f32 %v1382_v38, %v1354_v34 }
 0x15f   :  { %v1399_v40 = vpop.f32.mrb[8].mxu0 }
 0x160   :  { %v1400_v41 = vpop.f32.mrb[9].mxu0  ;;  %v1427_v44 = vpop.f32.mrb[8].mxu1 }
 0x161   :  { %v1401_v42 = vadd.f32 %v1400_v41, %v1399_v40  ;;  %v1402_v43 = vpop.f32.mrb[10].mxu0  ;;  %v1428_v46 = vpop.f32.mrb[9].mxu1 }
 0x162   :  { %v1403_v45 = vpop.f32.mrb[11].mxu0  ;;  %v1429_v49 = vadd.f32 %v1428_v46, %v1427_v44  ;;  %v1430_v50 = vpop.f32.mrb[10].mxu1 }
 0x163   :  { %v915_v47 = vadd.f32 %v1401_v42, %v866_v22  ;;  %v1404_v48 = vadd.f32 %v1403_v45, %v1402_v43  ;;  %v1431_v51 = vpop.f32.mrb[11].mxu1  ;;  %v1308_v22 = vld [vmem:[#allocation8] sm:$0xff]  }
 0x164   :  { %v1432_v53 = vadd.f32 %v1431_v51, %v1430_v50  ;;  %v1310_v27 = vunpack.c.h.bf16 %v1308_v22 }
 0x165   :  { %v918_v52 = vadd.f32 %v1404_v48, %v869_v24  ;;  %v964_v54 = vadd.f32 %v1429_v49, %v915_v47  ;;  %v1309_v24 = vunpack.c.l.bf16 %v1308_v22 }
 0x167   :  { %v1405_v55 = vpop.f32.mrb[12].mxu0  ;;  %v967_v56 = vadd.f32 %v1432_v53, %v918_v52 }
 0x168   :  { %v1406_v57 = vpop.f32.mrb[13].mxu0  ;;  %v1433_v60 = vpop.f32.mrb[12].mxu1 }
 0x169   :  { %v1407_v58 = vadd.f32 %v1406_v57, %v1405_v55  ;;  %v1408_v59 = vpop.f32.mrb[14].mxu0  ;;  %v1434_v62 = vpop.f32.mrb[13].mxu1 }
 0x16a   :  { %v1409_v61 = vpop.f32.mrb[15].mxu0  ;;  %v1435_v1 = vadd.f32 %v1434_v62, %v1433_v60  ;;  %v1436_v2 = vpop.f32.mrb[14].mxu1 }
 0x16b   :  { %v923_v63 = vadd.f32 %v1407_v58, %v874_v37  ;;  %v1410_v0 = vadd.f32 %v1409_v61, %v1408_v59  ;;  %v1437_v3 = vpop.f32.mrb[15].mxu1 }
 0x16c   :  { %v1438_v5 = vadd.f32 %v1437_v3, %v1436_v2 }
 0x16d   :  { %v926_v4 = vadd.f32 %v1410_v0, %v877_v39  ;;  %v972_v6 = vadd.f32 %v1435_v1, %v923_v63 }
 0x16f   :  { %v975_v7 = vadd.f32 %v1438_v5, %v926_v4 }
 0x17f   :  { %v1477_v8 = vpop.f32.mrb[16].mxu0 }
 0x180   :  { %v1021_v35 = vadd.f32 %v1477_v8, %v972_v6  ;;  %v1012_v9 = vpop.f32.mrb[17].mxu0 }
 0x181   :  { %v1013_v10 = vadd.f32 %v1012_v9, %v964_v54  ;;  %v1478_v11 = vpop.f32.mrb[18].mxu0 }
 0x182   :  { %v1024_v12 = vadd.f32 %v1478_v11, %v975_v7  ;;  %v1015_v13 = vpop.f32.mrb[19].mxu0  ;;  %v1029_v15 = vmax.f32 %v1021_v35, 0.0 }
 0x183   :  { %v1016_v14 = vadd.f32 %v1015_v13, %v967_v56  ;;  %v1027_v17 = vmax.f32 %v1013_v10, 0.0 }
 0x184   :  { %v1030_v16 = vmax.f32 %v1024_v12, 0.0 }
 0x185   :  { %v1028_v18 = vmax.f32 %v1016_v14, 0.0 }
 0x186   :  { %v1032_v19 = vpack.c.bf16 %v1030_v16, %v1029_v15 }
 0x187   :  { %v1031_v20 = vpack.c.bf16 %v1028_v18, %v1027_v17 }
 0x189   :  { %1495 = vmatprep.mubr.bf16.mxu1 %v1031_v20 }
 0x18a   :  { %1496 = vmatmul.mubr.bf16.vlgmr.msra.gmra.mrb[16].mxu1 %v1032_v19 }
 0x25d   :  { %v1497_v26 = vpop.f32.mrb[16].mxu1 }
 0x25e   :  { %v1156_v28 = vadd.f32 %v1497_v26, %v1313_v23  ;;  %v1131_v29 = vpop.f32.mrb[17].mxu1 }
 0x25f   :  { %v1154_v30 = vadd.f32 %v1309_v24, %v1131_v29  ;;  %v1498_v31 = vpop.f32.mrb[18].mxu1 }
 0x260   :  { %v1157_v32 = vadd.f32 %v1498_v31, %v1314_v25  ;;  %v1134_v33 = vpop.f32.mrb[19].mxu1  ;;  %v1160_v36 = vmax.f32 %v1156_v28, 0.0 }
 0x261   :  { %v1155_v34 = vadd.f32 %v1310_v27, %v1134_v33  ;;  %v1158_v38 = vmax.f32 %v1154_v30, 0.0 }
 0x262   :  { %v1161_v37 = vmax.f32 %v1157_v32, 0.0 }
 0x263   :  { %v1159_v39 = vmax.f32 %v1155_v34, 0.0 }
 0x264   :  { %v1323_v40 = vpack.c.bf16 %v1161_v37, %v1160_v36 }
 0x265   :  { %v1318_v41 = vpack.c.bf16 %v1159_v39, %v1158_v38 }
 0x266   :  { %1326 = vst [vmem:[#allocation10 + $0x8] sm:$0xff] %v1323_v40  }
 0x267   :  { %1319 = vst [vmem:[#allocation10] sm:$0xff] %v1318_v41  }
 0x268   :  { %1688 = shalt.err (!%p1685_p8)
}
 0x269   :  { %s1689_s17 = scalar_lea.hbm %s1845_s4, 256 }
 0x26a   :  { %p1690_p9 = scmp.ne.s32.totalorder %s1845_s4, %s1689_s17  ;;  %p1693_p10 = scmp.lt.u32.totalorder %s1689_s17, %s1845_s4 }
 0x26c   :  { %p1695_p11 = pnand %p1693_p10, %p1690_p9 }
 0x26e   :  { %1698 = shalt.err (!%p1695_p11)
}
 0x26f   :  { %1193 = dma.vmem_to_hbm [thread:$0]  %s1188_s13, 256, %s1845_s4, [#allocation4], %s1708_s25, %s1708_s25, %s1709_s26  }
 0x270   :  { %1705 = dma.done.wait [#allocation4], 256  }
 0x271   :  { %1706 = vsyncadd [#allocation4], 4294967040 }
 0x272   :  { %1197 = vsyncpa [#allocation3], 1 }
 0x273   :  { %1198 = vsyncpa [#allocation6], 1 }
 0x274   :  { %1199 = vsyncpa [#allocation9], 1 }
 0x275   :  { %1200 = vsyncpa [#allocation4], 1 }

// kernel: vqvae1_forward.16
= control target key start
LH: loop header
LB: loop body
LE: loop exit
PB: predicated region body
PF: predicated region fallthrough
CT: control target
= control target key end

     0   :  { %14 = vsyncpa [#allocation3], 0  ;;  %s1346_s0 = inlined_call_operand.hbm [shape: bf16[32,128], index: 0, kind: input, shape index: {}]   ;;  %s1347_s1 = inlined_call_operand.hbm [shape: bf16[128,128], index: 1, kind: input, shape index: {}]   ;;  %s1348_s2 = inlined_call_operand.hbm [shape: f32[1,128], index: 2, kind: input, shape index: {}]   ;;  %s1349_s3 = inlined_call_operand.hbm [shape: bf16[128,128], index: 3, kind: input, shape index: {}]   ;;  %s1350_s4 = inlined_call_operand.hbm [shape: bf16[128,128], index: 4, kind: input, shape index: {}]   ;;  %s1351_s5 = inlined_call_operand.hbm [shape: f32[1,128], index: 5, kind: input, shape index: {}]   ;;  %s1352_s6 = inlined_call_operand.hbm [shape: bf16[32,128], index: 6, kind: output, shape index: {0}]   ;;  %s1353_s7 = inlined_call_operand.hbm [shape: s32[32,1], index: 7, kind: output, shape index: {1}]   ;;  %s1354_s8 = inlined_call_operand.hbm [shape: f32[8,128], index: 8, kind: output, shape index: {2}]  }
   0x1   :  { %15 = vsyncpa [#allocation6], 0 }
   0x2   :  { %16 = vsyncpa [#allocation9], 0 }
   0x3   :  { %17 = vsyncpa [#allocation12], 0 }
   0x4   :  { %18 = vsyncpa [#allocation4], 0 }
   0x5   :  { %19 = vsyncpa [#allocation15], 0  ;;  %s1116_s27 = smov [#allocation5]   ;;  %s1117_s29 = smov [#allocation8]  }
   0x6   :  { %s37_s28 = sshll.u32 %s1116_s27, 4  ;;  %s59_s30 = sshll.u32 %s1117_s29, 4  ;;  %s38_s28 = int_to_ptr.vmem [resolvable:$true] %s37_s28  ;;  %s1176_s30 = int_to_ptr.vmem [resolvable:$true] %s59_s30 }
   0x7   :  { %s906_s11 = scalar_lea.hbm %s1347_s1, 1024 }
   0x8   :  { %p907_p0 = scmp.ne.s32.totalorder %s1347_s1, %s906_s11  ;;  %p910_p1 = scmp.lt.u32.totalorder %s906_s11, %s1347_s1 }
   0xa   :  { %p912_p2 = pnand %p910_p1, %p907_p0 }
   0xc   :  { %915 = shalt.err (!%p912_p2)
}
   0xd   :  { %s916_s16 = scalar_lea.vmem %s38_s28, 1024  ;;  %p921_p4 = scmp.lt.s32.totalorder %s38_s28, %s38_s28 }
   0xe   :  { %p917_p3 = scmp.ne.s32.totalorder %s38_s28, %s916_s16  ;;  %p922_p5 = scmp.lt.s32.totalorder %s916_s16, %s916_s16 }
  0x10   :  { %p923_p6 = por %p922_p5, %p921_p4 }
  0x12   :  { %p924_p7 = pnand %p923_p6, %p917_p3 }
  0x14   :  { %927 = shalt.err (!%p924_p7)
}
  0x15   :  { %s1118_s17 = smov 64   ;;  %s1119_s18 = smov 4  }
  0x16   :  { %43 = dma.hbm_to_vmem [thread:$0]  %s1347_s1, 1024, %s38_s28, [#allocation6], %s1118_s17, %s1118_s17, %s1119_s18  }
  0x17   :  { %s928_s23 = scalar_lea.hbm %s1349_s3, 1024 }
  0x18   :  { %p929_p8 = scmp.ne.s32.totalorder %s1349_s3, %s928_s23  ;;  %p932_p9 = scmp.lt.u32.totalorder %s928_s23, %s1349_s3 }
  0x1a   :  { %p934_p10 = pnand %p932_p9, %p929_p8 }
  0x1c   :  { %937 = shalt.err (!%p934_p10)
}
  0x1d   :  { %s938_s29 = scalar_lea.vmem %s1176_s30, 1024  ;;  %p943_p12 = scmp.lt.s32.totalorder %s1176_s30, %s1176_s30 }
  0x1e   :  { %p939_p11 = scmp.ne.s32.totalorder %s1176_s30, %s938_s29  ;;  %p944_p13 = scmp.lt.s32.totalorder %s938_s29, %s938_s29 }
  0x20   :  { %p945_p0 = por %p944_p13, %p943_p12 }
  0x22   :  { %p946_p1 = pnand %p945_p0, %p939_p11 }
  0x24   :  { %949 = shalt.err (!%p946_p1)
}
  0x25   :  { %65 = dma.hbm_to_vmem [thread:$0]  %s1349_s3, 1024, %s1176_s30, [#allocation9], %s1118_s17, %s1118_s17, %s1119_s18  }
  0x26   :  { %s1120_s9 = smov [#allocation2]   ;;  %s1121_s11 = smov [#allocation7]  }
  0x27   :  { %s25_s10 = sshll.u32 %s1120_s9, 4  ;;  %s50_s12 = sshll.u32 %s1121_s11, 4  ;;  %s26_s10 = int_to_ptr.vmem [resolvable:$true] %s25_s10  ;;  %s51_s12 = int_to_ptr.vmem [resolvable:$true] %s50_s12 }
  0x28   :  { %s950_s15 = scalar_lea.hbm %s1346_s0, 256 }
  0x29   :  { %p951_p2 = scmp.ne.s32.totalorder %s1346_s0, %s950_s15  ;;  %p954_p3 = scmp.lt.u32.totalorder %s950_s15, %s1346_s0 }
  0x2b   :  { %p956_p4 = pnand %p954_p3, %p951_p2 }
  0x2d   :  { %959 = shalt.err (!%p956_p4)
}
  0x2e   :  { %s960_s3 = scalar_lea.vmem %s26_s10, 256  ;;  %p965_p6 = scmp.lt.s32.totalorder %s26_s10, %s26_s10 }
  0x2f   :  { %p961_p5 = scmp.ne.s32.totalorder %s26_s10, %s960_s3  ;;  %p966_p7 = scmp.lt.s32.totalorder %s960_s3, %s960_s3 }
  0x31   :  { %p967_p8 = por %p966_p7, %p965_p6 }
  0x33   :  { %p968_p9 = pnand %p967_p8, %p961_p5 }
  0x35   :  { %971 = shalt.err (!%p968_p9)
}
  0x36   :  { %31 = dma.hbm_to_vmem [thread:$0]  %s1346_s0, 256, %s26_s10, [#allocation3], %s1118_s17, %s1118_s17, %s1119_s18  }
  0x37   :  { %s972_s25 = scalar_lea.hbm %s1348_s2, 16 }
  0x38   :  { %p973_p10 = scmp.ne.s32.totalorder %s1348_s2, %s972_s25  ;;  %p976_p11 = scmp.lt.u32.totalorder %s972_s25, %s1348_s2 }
  0x3a   :  { %p978_p12 = pnand %p976_p11, %p973_p10 }
  0x3c   :  { %981 = shalt.err (!%p978_p12)
}
  0x3d   :  { %s982_s28 = scalar_lea.vmem %s51_s12, 16  ;;  %s986_s9 = scalar_lea.vmem %s51_s12, 32 }
  0x3e   :  { %p983_p13 = scmp.ne.s32.totalorder %s51_s12, %s982_s28  ;;  %p987_p0 = scmp.lt.s32.totalorder %s51_s12, %s51_s12 }
  0x3f   :  { %p988_p1 = scmp.lt.s32.totalorder %s986_s9, %s982_s28 }
  0x41   :  { %p989_p2 = por %p988_p1, %p987_p0 }
  0x43   :  { %p990_p3 = pnand %p989_p2, %p983_p13 }
  0x45   :  { %993 = shalt.err (!%p990_p3)
}
  0x46   :  { %53 = dma.hbm_to_vmem [thread:$0]  %s1348_s2, 16, %s51_s12, [#allocation6]  }
  0x47   :  { %s1122_s11 = smov [#allocation10]   ;;  %s1123_s14 = smov [#allocation11]  }
  0x48   :  { %s71_s13 = sshll.u32 %s1122_s11, 4  ;;  %s84_s15 = sshll.u32 %s1123_s14, 4  ;;  %s72_s13 = int_to_ptr.vmem [resolvable:$true] %s71_s13  ;;  %s85_s15 = int_to_ptr.vmem [resolvable:$true] %s84_s15 }
  0x49   :  { %s994_s20 = scalar_lea.hbm %s1350_s4, 1024 }
  0x4a   :  { %p995_p4 = scmp.ne.s32.totalorder %s1350_s4, %s994_s20  ;;  %p998_p5 = scmp.lt.u32.totalorder %s994_s20, %s1350_s4 }
  0x4c   :  { %p1000_p6 = pnand %p998_p5, %p995_p4 }
  0x4e   :  { %1003 = shalt.err (!%p1000_p6)
}
  0x4f   :  { %s1004_s2 = scalar_lea.vmem %s72_s13, 1024  ;;  %p1009_p8 = scmp.lt.s32.totalorder %s72_s13, %s72_s13 }
  0x50   :  { %p1005_p7 = scmp.ne.s32.totalorder %s72_s13, %s1004_s2  ;;  %p1010_p9 = scmp.lt.s32.totalorder %s1004_s2, %s1004_s2 }
  0x52   :  { %p1011_p10 = por %p1010_p9, %p1009_p8 }
  0x54   :  { %p1012_p11 = pnand %p1011_p10, %p1005_p7 }
  0x56   :  { %1015 = shalt.err (!%p1012_p11)
}
  0x57   :  { %77 = dma.hbm_to_vmem [thread:$0]  %s1350_s4, 1024, %s72_s13, [#allocation9], %s1118_s17, %s1118_s17, %s1119_s18  }
  0x58   :  { %s1016_s26 = scalar_lea.hbm %s1351_s5, 16 }
  0x59   :  { %p1017_p12 = scmp.ne.s32.totalorder %s1351_s5, %s1016_s26  ;;  %p1020_p13 = scmp.lt.u32.totalorder %s1016_s26, %s1351_s5 }
  0x5b   :  { %p1022_p0 = pnand %p1020_p13, %p1017_p12 }
  0x5d   :  { %1025 = shalt.err (!%p1022_p0)
}
  0x5e   :  { %s1026_s9 = scalar_lea.vmem %s85_s15, 16  ;;  %s1030_s0 = scalar_lea.vmem %s85_s15, 32 }
  0x5f   :  { %p1027_p1 = scmp.ne.s32.totalorder %s85_s15, %s1026_s9  ;;  %p1031_p2 = scmp.lt.s32.totalorder %s85_s15, %s85_s15 }
  0x60   :  { %p1032_p3 = scmp.lt.s32.totalorder %s1030_s0, %s1026_s9 }
  0x62   :  { %p1033_p4 = por %p1032_p3, %p1031_p2 }
  0x64   :  { %p1034_p5 = pnand %p1033_p4, %p1027_p1 }
  0x66   :  { %1037 = shalt.err (!%p1034_p5)
}
  0x67   :  { %87 = dma.hbm_to_vmem [thread:$0]  %s1351_s5, 16, %s85_s15, [#allocation12]  }
  0x68   :  { %1104 = dma.done.wait [#allocation3], 256  }
  0x69   :  { %1105 = vsyncadd [#allocation3], 4294967040 }
  0x6a   :  { %1106 = dma.done.wait [#allocation6], 1040  }
  0x6b   :  { %1107 = vsyncadd [#allocation6], 4294966256 }
  0x6c   :  { %1108 = dma.done.wait [#allocation9], 2048  }
  0x6d   :  { %1109 = vsyncadd [#allocation9], 4294965248 }
  0x6e   :  { %1110 = dma.done.wait [#allocation12], 16  }
  0x6f   :  { %1111 = vsyncadd [#allocation12], 4294967280  ;;  %v880_v0 = vld [vmem:[#allocation5] sm:$0xff]   ;;  %v881_v1 = vld [vmem:[#allocation5 + $0x8] sm:$0xff]   ;;  %v373_v42 = vlaneseq  ;;  %vm594_vm8 = vcmask 7168   ;;  %s1126_s5 = smov [#allocation14]  }
  0x70   :  { %803 = vmatprep.subr.bf16.mxu0 %v880_v0  ;;  %v882_v2 = vld [vmem:[#allocation5 + $0x10] sm:$0xff]   ;;  %v883_v3 = vld [vmem:[#allocation5 + $0x18] sm:$0xff]   ;;  %v890_v5 = vld [vmem:[#allocation8] sm:$0xff]   ;;  %s686_s11 = sshll.u32 %s1126_s5, 4  ;;  %s1127_s13 = smov [#allocation13]   ;;  %s687_s11 = int_to_ptr.vmem [resolvable:$true] %s686_s11 }
  0x71   :  { %804 = vmatpush3.bf16.msra.mxu0 %v880_v0  ;;  %v888_v4 = vld [vmem:[#allocation2] sm:$0xff]   ;;  %v884_v7 = vld [vmem:[#allocation5 + $0x20] sm:$0xff]   ;;  %823 = vmatprep.subr.bf16.mxu1 %v890_v5  ;;  %v885_v9 = vld [vmem:[#allocation5 + $0x28] sm:$0xff]   ;;  %v1280_v43 = vand.u32 127, %v373_v42  ;;  %s674_s14 = sshll.u32 %s1127_s13, 4  ;;  %s1038_s15 = scalar_lea.vmem %s687_s11, 512  ;;  %s675_s14 = int_to_ptr.vmem [resolvable:$true] %s674_s14 }
  0x72   :  { %805 = vmatprep.subr.bf16.mxu0 %v881_v1  ;;  %819 = vmatprep.mubr.bf16.mxu0 %v888_v4  ;;  %v891_v6 = vld [vmem:[#allocation8 + $0x8] sm:$0xff]   ;;  %v892_v8 = vld [vmem:[#allocation8 + $0x10] sm:$0xff]   ;;  %v893_v10 = vld [vmem:[#allocation8 + $0x18] sm:$0xff]   ;;  %p1039_p6 = scmp.ne.s32.totalorder %s687_s11, %s1038_s15  ;;  %p1043_p7 = scmp.lt.s32.totalorder %s687_s11, %s687_s11 }
  0x73   :  { %824 = vmatpush3.bf16.msra.mxu1 %v890_v5  ;;  %v886_v11 = vld [vmem:[#allocation5 + $0x30] sm:$0xff]   ;;  %v894_v12 = vld [vmem:[#allocation8 + $0x20] sm:$0xff]   ;;  %v887_v13 = vld [vmem:[#allocation5 + $0x38] sm:$0xff]   ;;  %p1044_p8 = scmp.lt.s32.totalorder %s1038_s15, %s1038_s15 }
  0x74   :  { %825 = vmatprep.subr.bf16.mxu1 %v891_v6  ;;  %v895_v14 = vld [vmem:[#allocation8 + $0x28] sm:$0xff]   ;;  %v889_v15 = vld [vmem:[#allocation2 + $0x8] sm:$0xff]   ;;  %v718_v19 = vld [vmem:[#allocation7] ss:$0 sm:$0xff] }
  0x75   :  { %806 = vmatpush3.bf16.msra.mxu0 %v881_v1  ;;  %v896_v16 = vld [vmem:[#allocation8 + $0x30] sm:$0xff]   ;;  %v897_v17 = vld [vmem:[#allocation8 + $0x38] sm:$0xff]   ;;  %v737_v30 = vld [vmem:[#allocation11] ss:$0 sm:$0xff]  ;;  %p1045_p9 = por %p1044_p8, %p1043_p7 }
  0x76   :  { %807 = vmatprep.subr.bf16.mxu0 %v882_v2  ;;  %v898_v60 = vld [vmem:[#allocation10] sm:$0xff]   ;;  %v899_v61 = vld [vmem:[#allocation10 + $0x8] sm:$0xff]   ;;  %v900_v62 = vld [vmem:[#allocation10 + $0x10] sm:$0xff]  }
  0x77   :  { %826 = vmatpush3.bf16.msra.mxu1 %v891_v6  ;;  %v901_v63 = vld [vmem:[#allocation10 + $0x18] sm:$0xff]   ;;  %v902_v0 = vld [vmem:[#allocation10 + $0x20] sm:$0xff]   ;;  %p1046_p10 = pnand %p1045_p9, %p1039_p6 }
  0x78   :  { %827 = vmatprep.subr.bf16.mxu1 %v892_v8 }
  0x79   :  { %808 = vmatpush3.bf16.msra.mxu0 %v882_v2 }
  0x7a   :  { %809 = vmatprep.subr.bf16.mxu0 %v883_v3 }
  0x7b   :  { %828 = vmatpush3.bf16.msra.mxu1 %v892_v8 }
  0x7c   :  { %829 = vmatprep.subr.bf16.mxu1 %v893_v10 }
  0x7d   :  { %810 = vmatpush3.bf16.msra.mxu0 %v883_v3 }
  0x7e   :  { %811 = vmatprep.subr.bf16.mxu0 %v884_v7 }
  0x7f   :  { %830 = vmatpush3.bf16.msra.mxu1 %v893_v10 }
  0x80   :  { %831 = vmatprep.subr.bf16.mxu1 %v894_v12 }
  0x81   :  { %812 = vmatpush3.bf16.msra.mxu0 %v884_v7 }
  0x82   :  { %813 = vmatprep.subr.bf16.mxu0 %v885_v9 }
  0x83   :  { %832 = vmatpush3.bf16.msra.mxu1 %v894_v12 }
  0x84   :  { %833 = vmatprep.subr.bf16.mxu1 %v895_v14 }
  0x85   :  { %814 = vmatpush3.bf16.msra.mxu0 %v885_v9 }
  0x86   :  { %815 = vmatprep.subr.bf16.mxu0 %v886_v11 }
  0x87   :  { %834 = vmatpush3.bf16.msra.mxu1 %v895_v14 }
  0x88   :  { %835 = vmatprep.subr.bf16.mxu1 %v896_v16 }
  0x89   :  { %816 = vmatpush3.bf16.msra.mxu0 %v886_v11 }
  0x8a   :  { %817 = vmatprep.subr.bf16.mxu0 %v887_v13 }
  0x8b   :  { %836 = vmatpush3.bf16.msra.mxu1 %v896_v16 }
  0x8c   :  { %837 = vmatprep.subr.bf16.mxu1 %v897_v17 }
  0x8d   :  { %818 = vmatpush3.bf16.msra.mxu0 %v887_v13 }
  0x8e   :  { %843 = vmatprep.subr.bf16.mxu0 %v898_v60 }
  0x8f   :  { %838 = vmatpush3.bf16.msra.mxu1 %v897_v17  ;;  %v903_v17 = vld [vmem:[#allocation10 + $0x28] sm:$0xff]  }
  0x90   :  { %820 = vmatmul.mubr.bf16.vlgmr.msra.gmra.mrb[0].mxu0 %v889_v15 }
  0x91   :  { %844 = vmatpush3.bf16.msra.mxu0 %v898_v60 }
  0x92   :  { %845 = vmatprep.subr.bf16.mxu0 %v899_v61 }
  0x95   :  { %846 = vmatpush3.bf16.msra.mxu0 %v899_v61 }
  0x96   :  { %847 = vmatprep.subr.bf16.mxu0 %v900_v62 }
  0x99   :  { %848 = vmatpush3.bf16.msra.mxu0 %v900_v62 }
  0x9a   :  { %849 = vmatprep.subr.bf16.mxu0 %v901_v63 }
  0x9d   :  { %850 = vmatpush3.bf16.msra.mxu0 %v901_v63 }
  0x9e   :  { %851 = vmatprep.subr.bf16.mxu0 %v902_v0 }
  0xa1   :  { %852 = vmatpush3.bf16.msra.mxu0 %v902_v0 }
  0xa2   :  { %853 = vmatprep.subr.bf16.mxu0 %v903_v17 }
  0xa5   :  { %854 = vmatpush3.bf16.msra.mxu0 %v903_v17 }
 0x163   :  { %v821_v18 = vpop.f32.mrb[0].mxu0 }
 0x164   :  { %v228_v20 = vpop.f32.mrb[1].mxu0  ;;  %v1273_v26 = vadd.f32 %v821_v18, %v718_v19  ;;  %v904_v18 = vld [vmem:[#allocation10 + $0x30] sm:$0xff]  }
 0x165   :  { %v822_v21 = vpop.f32.mrb[2].mxu0  ;;  %v1269_v24 = vadd.f32 %v718_v19, %v228_v20  ;;  %855 = vmatprep.subr.bf16.mxu0 %v904_v18 }
 0x166   :  { %v1267_v22 = vadd.f32 %v822_v21, %v718_v19  ;;  %v231_v23 = vpop.f32.mrb[3].mxu0  ;;  %856 = vmatpush3.bf16.msra.mxu0 %v904_v18 }
 0x167   :  { %v1271_v25 = vadd.f32 %v718_v19, %v231_v23  ;;  %v905_v19 = vld [vmem:[#allocation10 + $0x38] sm:$0xff]  }
 0x168   :  { %v245_v28 = vpack.c.bf16 %v1267_v22, %v1273_v26  ;;  %857 = vmatprep.subr.bf16.mxu0 %v905_v19 }
 0x169   :  { %v244_v27 = vpack.c.bf16 %v1271_v25, %v1269_v24 }
 0x16a   :  { %858 = vmatpush3.bf16.msra.mxu0 %v905_v19 }
 0x16b   :  { %839 = vmatprep.mubr.bf16.mxu1 %v244_v27 }
 0x16c   :  { %840 = vmatmul.mubr.bf16.vlgmr.msra.gmra.mrb[0].mxu1 %v245_v28 }
 0x23f   :  { %v841_v29 = vpop.f32.mrb[0].mxu1 }
 0x240   :  { %v361_v31 = vmul.f32 2.0, %v841_v29  ;;  %v344_v32 = vpop.f32.mrb[1].mxu1 }
 0x241   :  { %v359_v33 = vmul.f32 2.0, %v344_v32  ;;  %v842_v34 = vpop.f32.mrb[2].mxu1 }
 0x242   :  { %v362_v35 = vmul.f32 2.0, %v842_v34  ;;  %v347_v36 = vpop.f32.mrb[3].mxu1  ;;  %v371_v37 = vsub.f32 %v737_v30, %v361_v31 }
 0x243   :  { %v360_v38 = vmul.f32 2.0, %v347_v36  ;;  %v369_v39 = vsub.f32 %v737_v30, %v359_v33 }
 0x244   :  { %379 = vmin.xlane.f32.xlu1 %v371_v37  ;;  %v372_v40 = vsub.f32 %v737_v30, %v362_v35 }
 0x245   :  { %375 = vmin.xlane.f32.xlu0 %v369_v39  ;;  %v370_v41 = vsub.f32 %v737_v30, %v360_v38 }
 0x248   :  { %381 = vmin.xlane.f32.xlu1 %v372_v40 }
 0x249   :  { %377 = vmin.xlane.f32.xlu0 %v370_v41 }
 0x2d1   :  { %v380_v44 = vpop.xlane.xlu1 %379 }
 0x2d2   :  { %vm385_vm0 = vcmp.le.f32.partialorder %v371_v37, %v380_v44  ;;  %v376_v45 = vpop.xlane.xlu0 %375 }
 0x2d3   :  { %vm383_vm1 = vcmp.le.f32.partialorder %v369_v39, %v376_v45  ;;  %v389_v46 = vsel %vm385_vm0, %v1280_v43, 1073741824  ;;  %v1124_v45 = vmov 0.0  }
 0x2d4   :  { %v387_v47 = vsel %vm383_vm1, %v1280_v43, 1073741824  ;;  %v420_v52 = vshra.s32 %v389_v46, 16  ;;  %v419_v2 = vand.u32 65535, %v389_v46 }
 0x2d5   :  { %v382_v48 = vpop.xlane.xlu1 %381  ;;  %v392_v49 = vshra.s32 %v387_v47, 16  ;;  %v391_v1 = vand.u32 65535, %v387_v47 }
 0x2d6   :  { %vm386_vm2 = vcmp.le.f32.partialorder %v372_v40, %v382_v48  ;;  %v378_v50 = vpop.xlane.xlu0 %377  ;;  %v422_v56 = vcvt.s32.f32 %v420_v52  ;;  %v421_v11 = vcvt.s32.f32 %v419_v2 }
 0x2d7   :  { %vm384_vm3 = vcmp.le.f32.partialorder %v370_v41, %v378_v50  ;;  %v394_v51 = vcvt.s32.f32 %v392_v49  ;;  %v390_v53 = vsel %vm386_vm2, %v1280_v43, 1073741824  ;;  %v393_v5 = vcvt.s32.f32 %v391_v1 }
 0x2d8   :  { %v388_v54 = vsel %vm384_vm3, %v1280_v43, 1073741824  ;;  %v434_v58 = vshra.s32 %v390_v53, 16  ;;  %v433_v7 = vand.u32 65535, %v390_v53  ;;  %v1125_v49 = vmov 1.0|1.0  }
 0x2d9   :  { %395 = vmin.xlane.f32.xlu0 %v394_v51  ;;  %v406_v55 = vshra.s32 %v388_v54, 16  ;;  %v405_v3 = vand.u32 65535, %v388_v54 }
 0x2da   :  { %v436_v59 = vcvt.s32.f32 %v434_v58  ;;  %v435_v15 = vcvt.s32.f32 %v433_v7 }
 0x2db   :  { %v408_v57 = vcvt.s32.f32 %v406_v55  ;;  %v407_v10 = vcvt.s32.f32 %v405_v3 }
 0x2dd   :  { %423 = vmin.xlane.f32.xlu0 %v422_v56  ;;  %409 = vmin.xlane.f32.xlu1 %v408_v57 }
 0x2e1   :  { %437 = vmin.xlane.f32.xlu1 %v436_v59 }
 0x366   :  { %v396_v4 = vpop.xlane.xlu0 %395 }
 0x367   :  { %vm397_vm4 = vcmp.eq.f32.partialorder %v394_v51, %v396_v4  ;;  %v402_v20 = vcvt.f32.s32 %v396_v4 }
 0x368   :  { %v398_v6 = vsel %vm397_vm4, %v393_v5, inf }
 0x369   :  { %399 = vmin.xlane.f32.xlu0 %v398_v6  ;;  %v403_v27 = vshll.u32 %v402_v20, 16 }
 0x36a   :  { %v410_v8 = vpop.xlane.xlu1 %409  ;;  %v424_v9 = vpop.xlane.xlu0 %423 }
 0x36b   :  { %vm411_vm5 = vcmp.eq.f32.partialorder %v408_v57, %v410_v8  ;;  %vm425_vm6 = vcmp.eq.f32.partialorder %v422_v56, %v424_v9  ;;  %v416_v21 = vcvt.f32.s32 %v410_v8  ;;  %v430_v28 = vcvt.f32.s32 %v424_v9 }
 0x36c   :  { %v412_v12 = vsel %vm411_vm5, %v407_v10, inf  ;;  %v426_v13 = vsel %vm425_vm6, %v421_v11, inf }
 0x36d   :  { %413 = vmin.xlane.f32.xlu1 %v412_v12  ;;  %427 = vmin.xlane.f32.xlu0 %v426_v13  ;;  %v417_v31 = vshll.u32 %v416_v21, 16  ;;  %v431_v34 = vshll.u32 %v430_v28, 16 }
 0x36e   :  { %v438_v14 = vpop.xlane.xlu1 %437 }
 0x36f   :  { %vm439_vm7 = vcmp.eq.f32.partialorder %v436_v59, %v438_v14  ;;  %v444_v35 = vcvt.f32.s32 %v438_v14 }
 0x370   :  { %v440_v16 = vsel %vm439_vm7, %v435_v15, inf }
 0x371   :  { %441 = vmin.xlane.f32.xlu1 %v440_v16  ;;  %v445_v41 = vshll.u32 %v444_v35, 16 }
 0x3f6   :  { %v400_v23 = vpop.xlane.xlu0 %399 }
 0x3f7   :  { %v401_v29 = vcvt.f32.s32 %v400_v23 }
 0x3f9   :  { %v404_v30 = vadd.s32 %v403_v27, %v401_v29 }
 0x3fa   :  { %v414_v32 = vpop.xlane.xlu1 %413  ;;  %v428_v33 = vpop.xlane.xlu0 %427 }
 0x3fb   :  { %595 = vst.msk [vmem:[#allocation14] sm:$0xff] %vm594_vm8, %v404_v30  ;;  %v415_v36 = vcvt.f32.s32 %v414_v32  ;;  %v429_v37 = vcvt.f32.s32 %v428_v33  ;;  %vm447_vm9 = vcmp.eq.s32.totalorder %v1280_v43, %v404_v30 }
 0x3fc   :  { %v738_v46 = vsel %vm447_vm9, 1.0, %v1124_v45 }
 0x3fd   :  { %v418_v38 = vadd.s32 %v417_v31, %v415_v36  ;;  %v432_v39 = vadd.s32 %v431_v34, %v429_v37 }
 0x3fe   :  { %v442_v40 = vpop.xlane.xlu1 %441 }
 0x3ff   :  { %596 = vst.msk [vmem:[#allocation14 + $0x8] sm:$0xff] %vm594_vm8, %v418_v38  ;;  %vm449_vm10 = vcmp.eq.s32.totalorder %v1280_v43, %v432_v39  ;;  %597 = vst.msk [vmem:[#allocation14 + $0x10] sm:$0xff] %vm594_vm8, %v432_v39  ;;  %v443_v44 = vcvt.f32.s32 %v442_v40  ;;  %vm448_vm11 = vcmp.eq.s32.totalorder %v1280_v43, %v418_v38 }
 0x400   :  { %v739_v47 = vsel %vm448_vm11, 1.0, %v1124_v45  ;;  %vm750_vm12 = vmpackc.low %vm448_vm11, %vm447_vm9  ;;  %v740_v51 = vsel %vm449_vm10, 1.0, %v1124_v45 }
 0x401   :  { %v446_v48 = vadd.s32 %v445_v41, %v443_v44  ;;  %859 = vmatprep.mubr.msk.bf16.mxu0 %vm750_vm12, %v1125_v49  ;;  %v630_v50 = vadd.f32 %v739_v47, %v738_v46 }
 0x403   :  { %vm450_vm13 = vcmp.eq.s32.totalorder %v1280_v43, %v446_v48  ;;  %598 = vst.msk [vmem:[#allocation14 + $0x18] sm:$0xff] %vm594_vm8, %v446_v48  ;;  %v631_v52 = vadd.f32 %v740_v51, %v630_v50 }
 0x404   :  { %v741_v53 = vsel %vm450_vm13, 1.0, %v1124_v45  ;;  %vm752_vm14 = vmpackc.low %vm450_vm13, %vm449_vm10 }
 0x405   :  { %v1298_v54 = vadd.f32 %v741_v53, %v631_v52  ;;  %860 = vmatmul.mubr.msk.bf16.vlgmr.msra.gmra.mrb[4].mxu0 %vm752_vm14, %v1125_v49 }
 0x4d8   :  { %v861_v55 = vpop.f32.mrb[4].mxu0 }
 0x4d9   :  { %v559_v56 = vpop.f32.mrb[5].mxu0  ;;  %v641_v61 = vsub.f32 %v861_v55, %v1273_v26 }
 0x4da   :  { %v639_v57 = vsub.f32 %v559_v56, %v1269_v24  ;;  %v862_v58 = vpop.f32.mrb[6].mxu0 }
 0x4db   :  { %v770_v59 = vpack.c.bf16 %v862_v58, %v861_v55  ;;  %v562_v60 = vpop.f32.mrb[7].mxu0  ;;  %v642_v43 = vsub.f32 %v862_v58, %v1267_v22  ;;  %v649_v2 = vmul.f32 %v641_v61, %v641_v61 }
 0x4dc   :  { %v765_v62 = vpack.c.bf16 %v562_v60, %v559_v56  ;;  %v640_v63 = vsub.f32 %v562_v60, %v1271_v25  ;;  %v647_v0 = vmul.f32 %v639_v57, %v639_v57 }
 0x4dd   :  { %772 = vst [vmem:[#allocation13 + $0x8] sm:$0xff] %v770_v59   ;;  %v650_v4 = vmul.f32 %v642_v43, %v642_v43 }
 0x4de   :  { %766 = vst [vmem:[#allocation13] sm:$0xff] %v765_v62   ;;  %v648_v1 = vmul.f32 %v640_v63, %v640_v63 }
 0x4e0   :  { %v651_v3 = vadd.f32 %v648_v1, %v647_v0 }
 0x4e2   :  { %v652_v5 = vadd.f32 %v651_v3, %v649_v2 }
 0x4e4   :  { %v653_v6 = vadd.f32 %v652_v5, %v650_v4 }
 0x4e6   :  { %654 = vadd.xlane.f32.xlu0 %v653_v6 }
 0x4e7   :  { %1049 = shalt.err (!%p1046_p10)
}
 0x4e8   :  { %s1050_s20 = scalar_lea.hbm %s1353_s7, 512 }
 0x4e9   :  { %p1051_p11 = scmp.ne.s32.totalorder %s1353_s7, %s1050_s20  ;;  %p1054_p12 = scmp.lt.u32.totalorder %s1050_s20, %s1353_s7 }
 0x4eb   :  { %p1056_p13 = pnand %p1054_p12, %p1051_p11 }
 0x4ed   :  { %1059 = shalt.err (!%p1056_p13)
}
 0x4ee   :  { %s1128_s2 = smov 128   ;;  %s1129_s12 = smov 8  }
 0x4ef   :  { %692 = dma.vmem_to_hbm [thread:$0]  %s687_s11, 512, %s1353_s7, [#allocation15], %s1128_s2, %s1128_s2, %s1129_s12  }
 0x4f0   :  { %s1060_s25 = scalar_lea.vmem %s675_s14, 256  ;;  %p1065_p1 = scmp.lt.s32.totalorder %s675_s14, %s675_s14 }
 0x4f1   :  { %p1061_p0 = scmp.ne.s32.totalorder %s675_s14, %s1060_s25  ;;  %p1066_p2 = scmp.lt.s32.totalorder %s1060_s25, %s1060_s25 }
 0x4f3   :  { %p1067_p3 = por %p1066_p2, %p1065_p1 }
 0x4f5   :  { %p1068_p4 = pnand %p1067_p3, %p1061_p0 }
 0x4f7   :  { %1071 = shalt.err (!%p1068_p4)
}
 0x4f8   :  { %s1072_s29 = scalar_lea.hbm %s1352_s6, 256 }
 0x4f9   :  { %p1073_p5 = scmp.ne.s32.totalorder %s1352_s6, %s1072_s29  ;;  %p1076_p6 = scmp.lt.u32.totalorder %s1072_s29, %s1352_s6 }
 0x4fb   :  { %p1078_p7 = pnand %p1076_p6, %p1073_p5 }
 0x4fd   :  { %1081 = shalt.err (!%p1078_p7)
}
 0x4fe   :  { %680 = dma.vmem_to_hbm [thread:$0]  %s675_s14, 256, %s1352_s6, [#allocation4], %s1118_s17, %s1118_s17, %s1119_s18   ;;  %v633_v10 = vrot.slane %v1298_v54, 4  ;;  %v600_v14 = vshrl.u32 %v373_v42, 7 }
 0x4ff   :  { %s1130_s10 = smov [#allocation16]  }
 0x500   :  { %v634_v11 = vadd.f32 %v633_v10, %v1298_v54  ;;  %vm664_vm15 = vcmp.eq.s32.totalorder %v600_v14, 1  ;;  %s699_s6 = sshll.u32 %s1130_s10, 4  ;;  %vm663_vm0 = vcmp.eq.s32.totalorder %v600_v14, 0  ;;  %s700_s6 = int_to_ptr.vmem [resolvable:$true] %s699_s6 }
 0x501   :  { %s1082_s18 = scalar_lea.vmem %s700_s6, 128  ;;  %p1087_p9 = scmp.lt.s32.totalorder %s700_s6, %s700_s6 }
 0x502   :  { %v635_v12 = vrot.slane %v634_v11, 2  ;;  %p1083_p8 = scmp.ne.s32.totalorder %s700_s6, %s1082_s18  ;;  %p1088_p10 = scmp.lt.s32.totalorder %s1082_s18, %s1082_s18 }
 0x504   :  { %v636_v13 = vadd.f32 %v635_v12, %v634_v11  ;;  %p1089_p11 = por %p1088_p10, %p1087_p9 }
 0x506   :  { %v637_v15 = vrot.slane %v636_v13, 1  ;;  %p1090_p12 = pnand %p1089_p11, %p1083_p8 }
 0x508   :  { %v638_v16 = vadd.f32 %v637_v15, %v636_v13 }
 0x573   :  { %v655_v22 = vpop.xlane.xlu0 %654 }
 0x574   :  { %v656_v24 = vrot.slane %v655_v22, 4 }
 0x576   :  { %v657_v25 = vadd.f32 %v656_v24, %v655_v22 }
 0x578   :  { %v658_v26 = vrot.slane %v657_v25, 2 }
 0x57a   :  { %v659_v7 = vadd.f32 %v658_v26, %v657_v25 }
 0x57c   :  { %v660_v8 = vrot.slane %v659_v7, 1 }
 0x57e   :  { %v661_v9 = vadd.f32 %v660_v8, %v659_v7 }
 0x580   :  { %863 = vpush %v661_v9 }
 0x5b1   :  { %s864_s17 = spop %863 }
 0x5b2   :  { %v665_v17 = vstv %s864_s17 }
 0x5b3   :  { %v666_v18 = vsel %vm664_vm15, %v665_v17, 0.0 }
 0x5b4   :  { %v667_v19 = vsel %vm663_vm0, %v638_v16, %v666_v18 }
 0x5b5   :  { %668 = vst [vmem:[#allocation16] sm:$0xff] %v667_v19 }
 0x5b6   :  { %1093 = shalt.err (!%p1090_p12)
}
 0x5b7   :  { %s1094_s13 = scalar_lea.hbm %s1354_s8, 128 }
 0x5b8   :  { %p1095_p13 = scmp.ne.s32.totalorder %s1354_s8, %s1094_s13  ;;  %p1098_p0 = scmp.lt.u32.totalorder %s1094_s13, %s1354_s8 }
 0x5ba   :  { %p1100_p1 = pnand %p1098_p0, %p1095_p13 }
 0x5bc   :  { %1103 = shalt.err (!%p1100_p1)
}
 0x5bd   :  { %702 = dma.vmem_to_hbm [thread:$0]  %s700_s6, 128, %s1354_s8, [#allocation15]  }
 0x5be   :  { %1112 = dma.done.wait [#allocation4], 256  }
 0x5bf   :  { %1113 = vsyncadd [#allocation4], 4294967040 }
 0x5c0   :  { %1114 = dma.done.wait [#allocation15], 640  }
 0x5c1   :  { %1115 = vsyncadd [#allocation15], 4294966656 }
 0x5c2   :  { %712 = vsyncpa [#allocation3], 1 }
 0x5c3   :  { %713 = vsyncpa [#allocation6], 1 }
 0x5c4   :  { %714 = vsyncpa [#allocation9], 1 }
 0x5c5   :  { %715 = vsyncpa [#allocation12], 1 }
 0x5c6   :  { %716 = vsyncpa [#allocation4], 1 }
 0x5c7   :  { %717 = vsyncpa [#allocation15], 1 }

// kernel: vqvae1_forward.20
= control target key start
LH: loop header
LB: loop body
LE: loop exit
PB: predicated region body
PF: predicated region fallthrough
CT: control target
= control target key end

     0   :  { %8 = vsyncpa [#allocation3], 0  ;;  %s3583_s0 = inlined_call_operand.hbm [shape: bf16[32,1152], index: 0, kind: input, shape index: {}]   ;;  %s3584_s1 = inlined_call_operand.hbm [shape: bf16[1152,512], index: 1, kind: input, shape index: {}]   ;;  %s3585_s2 = inlined_call_operand.hbm [shape: f32[1,512], index: 2, kind: input, shape index: {}]   ;;  %s3586_s3 = inlined_call_operand.hbm [shape: bf16[32,512], index: 3, kind: output, shape index: {}]  }
   0x1   :  { %9 = vsyncpa [#allocation6], 0 }
   0x2   :  { %10 = vsyncpa [#allocation4], 0  ;;  %s3500_s12 = smov [#allocation5]   ;;  %s3406_s16 = scalar_lea.hbm %s3584_s1, 36864 }
   0x3   :  { %s28_s13 = sshll.u32 %s3500_s12, 4  ;;  %p3407_p0 = scmp.ne.s32.totalorder %s3584_s1, %s3406_s16  ;;  %s29_s13 = int_to_ptr.vmem [resolvable:$true] %s28_s13 }
   0x4   :  { %p3410_p1 = scmp.lt.u32.totalorder %s3406_s16, %s3584_s1 }
   0x6   :  { %p3412_p2 = pnand %p3410_p1, %p3407_p0 }
   0x8   :  { %3415 = shalt.err (!%p3412_p2)
}
   0x9   :  { %s3416_s21 = scalar_lea.vmem %s29_s13, 36864  ;;  %p3421_p4 = scmp.lt.s32.totalorder %s29_s13, %s29_s13 }
   0xa   :  { %p3417_p3 = scmp.ne.s32.totalorder %s29_s13, %s3416_s21  ;;  %p3422_p5 = scmp.lt.s32.totalorder %s3416_s21, %s3416_s21 }
   0xc   :  { %p3423_p6 = por %p3422_p5, %p3421_p4 }
   0xe   :  { %p3424_p7 = pnand %p3423_p6, %p3417_p3 }
  0x10   :  { %3427 = shalt.err (!%p3424_p7)
}
  0x11   :  { %s3501_s22 = smov 256   ;;  %s3502_s23 = smov 16  }
  0x12   :  { %34 = dma.hbm_to_vmem [thread:$0]  %s3584_s1, 36864, %s29_s13, [#allocation6], %s3501_s22, %s3501_s22, %s3502_s23  }
  0x13   :  { %s3503_s26 = smov [#allocation2]   ;;  %s3428_s30 = scalar_lea.hbm %s3583_s0, 2304 }
  0x14   :  { %s16_s27 = sshll.u32 %s3503_s26, 4  ;;  %p3429_p8 = scmp.ne.s32.totalorder %s3583_s0, %s3428_s30  ;;  %s17_s27 = int_to_ptr.vmem [resolvable:$true] %s16_s27 }
  0x15   :  { %p3432_p9 = scmp.lt.u32.totalorder %s3428_s30, %s3583_s0 }
  0x17   :  { %p3434_p10 = pnand %p3432_p9, %p3429_p8 }
  0x19   :  { %3437 = shalt.err (!%p3434_p10)
}
  0x1a   :  { %s3438_s8 = scalar_lea.vmem %s17_s27, 2304  ;;  %p3443_p12 = scmp.lt.s32.totalorder %s17_s27, %s17_s27 }
  0x1b   :  { %p3439_p11 = scmp.ne.s32.totalorder %s17_s27, %s3438_s8  ;;  %p3444_p13 = scmp.lt.s32.totalorder %s3438_s8, %s3438_s8 }
  0x1d   :  { %p3445_p0 = por %p3444_p13, %p3443_p12 }
  0x1f   :  { %p3446_p1 = pnand %p3445_p0, %p3439_p11 }
  0x21   :  { %3449 = shalt.err (!%p3446_p1)
}
  0x22   :  { %s3504_s1 = smov 576   ;;  %s3505_s9 = smov 36  }
  0x23   :  { %22 = dma.hbm_to_vmem [thread:$0]  %s3583_s0, 2304, %s17_s27, [#allocation3], %s3504_s1, %s3504_s1, %s3505_s9  }
  0x24   :  { %s3506_s12 = smov [#allocation7]   ;;  %s3450_s16 = scalar_lea.hbm %s3585_s2, 64 }
  0x25   :  { %s41_s13 = sshll.u32 %s3506_s12, 4  ;;  %p3451_p2 = scmp.ne.s32.totalorder %s3585_s2, %s3450_s16  ;;  %s42_s13 = int_to_ptr.vmem [resolvable:$true] %s41_s13 }
  0x26   :  { %p3454_p3 = scmp.lt.u32.totalorder %s3450_s16, %s3585_s2 }
  0x28   :  { %p3456_p4 = pnand %p3454_p3, %p3451_p2 }
  0x2a   :  { %3459 = shalt.err (!%p3456_p4)
}
  0x2b   :  { %s3460_s21 = scalar_lea.vmem %s42_s13, 64  ;;  %p3465_p6 = scmp.lt.s32.totalorder %s42_s13, %s42_s13 }
  0x2c   :  { %p3461_p5 = scmp.ne.s32.totalorder %s42_s13, %s3460_s21  ;;  %p3466_p7 = scmp.lt.s32.totalorder %s3460_s21, %s3460_s21 }
  0x2e   :  { %p3467_p8 = por %p3466_p7, %p3465_p6 }
  0x30   :  { %p3468_p9 = pnand %p3467_p8, %p3461_p5 }
  0x32   :  { %3471 = shalt.err (!%p3468_p9)
}
  0x33   :  { %44 = dma.hbm_to_vmem [thread:$0]  %s3585_s2, 64, %s42_s13, [#allocation6]  }
  0x34   :  { %3494 = dma.done.wait [#allocation3], 2304  }
  0x35   :  { %3495 = vsyncadd [#allocation3], 4294964992 }
  0x36   :  { %3496 = dma.done.wait [#allocation6], 36928  }
  0x37   :  { %3497 = vsyncadd [#allocation6], 4294930368  ;;  %v2948_v0 = vld [vmem:[#allocation5 + $0x4] ss:$16 sps:$4 sm:$0xff]   ;;  %v2950_v1 = vld [vmem:[#allocation5 + $0xc] ss:$16 sps:$4 sm:$0xff]  }
  0x38   :  { %1917 = vmatprep.subr.bf16.mxu0 %v2948_v0  ;;  %v2952_v2 = vld [vmem:[#allocation5] ss:$16 sps:$4 sm:$0xff]   ;;  %v2953_v3 = vld [vmem:[#allocation5 + $0x8] ss:$16 sps:$4 sm:$0xff]   ;;  %2182 = vmatprep.subr.bf16.mxu1 %v2950_v1  ;;  %v2954_v4 = vld [vmem:[#allocation5 + $0x24] ss:$16 sps:$4 sm:$0xff]  }
  0x39   :  { %1918 = vmatpush1.bf16.msra.mxu0 %v2952_v2  ;;  %2183 = vmatpush1.bf16.msra.mxu1 %v2953_v3  ;;  %v2956_v5 = vld [vmem:[#allocation5 + $0x2c] ss:$16 sps:$4 sm:$0xff]   ;;  %v2958_v6 = vld [vmem:[#allocation5 + $0x20] ss:$16 sps:$4 sm:$0xff]   ;;  %v2959_v7 = vld [vmem:[#allocation5 + $0x28] ss:$16 sps:$4 sm:$0xff]  }
  0x3a   :  { %1919 = vmatprep.subr.bf16.mxu0 %v2954_v4  ;;  %2184 = vmatprep.subr.bf16.mxu1 %v2956_v5  ;;  %v2960_v8 = vld [vmem:[#allocation5 + $0x44] ss:$16 sps:$4 sm:$0xff]   ;;  %v2962_v9 = vld [vmem:[#allocation5 + $0x4c] ss:$16 sps:$4 sm:$0xff]   ;;  %v2964_v10 = vld [vmem:[#allocation5 + $0x40] ss:$16 sps:$4 sm:$0xff]  }
  0x3b   :  { %v2965_v11 = vld [vmem:[#allocation5 + $0x48] ss:$16 sps:$4 sm:$0xff]   ;;  %v2966_v12 = vld [vmem:[#allocation5 + $0x64] ss:$16 sps:$4 sm:$0xff]   ;;  %v2968_v13 = vld [vmem:[#allocation5 + $0x6c] ss:$16 sps:$4 sm:$0xff]  }
  0x3c   :  { %v2970_v14 = vld [vmem:[#allocation5 + $0x60] ss:$16 sps:$4 sm:$0xff]   ;;  %v2971_v15 = vld [vmem:[#allocation5 + $0x68] ss:$16 sps:$4 sm:$0xff]   ;;  %v2972_v16 = vld [vmem:[#allocation5 + $0x84] ss:$16 sps:$4 sm:$0xff]  }
  0x3d   :  { %1920 = vmatpush1.bf16.msra.mxu0 %v2958_v6  ;;  %2185 = vmatpush1.bf16.msra.mxu1 %v2959_v7  ;;  %v2974_v17 = vld [vmem:[#allocation5 + $0x8c] ss:$16 sps:$4 sm:$0xff]   ;;  %v2976_v18 = vld [vmem:[#allocation5 + $0x80] ss:$16 sps:$4 sm:$0xff]   ;;  %v2977_v19 = vld [vmem:[#allocation5 + $0x88] ss:$16 sps:$4 sm:$0xff]  }
  0x3e   :  { %1921 = vmatprep.subr.bf16.mxu0 %v2960_v8  ;;  %2186 = vmatprep.subr.bf16.mxu1 %v2962_v9  ;;  %v2978_v20 = vld [vmem:[#allocation5 + $0xa4] ss:$16 sps:$4 sm:$0xff]   ;;  %v2980_v21 = vld [vmem:[#allocation5 + $0xac] ss:$16 sps:$4 sm:$0xff]   ;;  %v2982_v22 = vld [vmem:[#allocation5 + $0xa0] ss:$16 sps:$4 sm:$0xff]  }
  0x3f   :  { %v2983_v23 = vld [vmem:[#allocation5 + $0xa8] ss:$16 sps:$4 sm:$0xff]   ;;  %v2984_v24 = vld [vmem:[#allocation5 + $0xc4] ss:$16 sps:$4 sm:$0xff]   ;;  %v2986_v25 = vld [vmem:[#allocation5 + $0xcc] ss:$16 sps:$4 sm:$0xff]  }
  0x40   :  { %v2988_v26 = vld [vmem:[#allocation5 + $0xc0] ss:$16 sps:$4 sm:$0xff]   ;;  %v2989_v27 = vld [vmem:[#allocation5 + $0xc8] ss:$16 sps:$4 sm:$0xff]   ;;  %v2990_v28 = vld [vmem:[#allocation5 + $0xe4] ss:$16 sps:$4 sm:$0xff]  }
  0x41   :  { %1922 = vmatpush1.bf16.msra.mxu0 %v2964_v10  ;;  %2187 = vmatpush1.bf16.msra.mxu1 %v2965_v11  ;;  %v2992_v29 = vld [vmem:[#allocation5 + $0xec] ss:$16 sps:$4 sm:$0xff]   ;;  %v2994_v30 = vld [vmem:[#allocation5 + $0xe0] ss:$16 sps:$4 sm:$0xff]   ;;  %v2995_v31 = vld [vmem:[#allocation5 + $0xe8] ss:$16 sps:$4 sm:$0xff]  }
  0x42   :  { %1923 = vmatprep.subr.bf16.mxu0 %v2966_v12  ;;  %2188 = vmatprep.subr.bf16.mxu1 %v2968_v13  ;;  %v2996_v32 = vld [vmem:[#allocation5 + $0x104] ss:$16 sps:$4 sm:$0xff]   ;;  %v2998_v33 = vld [vmem:[#allocation5 + $0x10c] ss:$16 sps:$4 sm:$0xff]   ;;  %v3000_v34 = vld [vmem:[#allocation5 + $0x100] ss:$16 sps:$4 sm:$0xff]  }
  0x43   :  { %v3001_v35 = vld [vmem:[#allocation5 + $0x108] ss:$16 sps:$4 sm:$0xff]   ;;  %v3002_v36 = vld [vmem:[#allocation5 + $0x124] ss:$16 sps:$4 sm:$0xff]   ;;  %v3004_v37 = vld [vmem:[#allocation5 + $0x12c] ss:$16 sps:$4 sm:$0xff]  }
  0x44   :  { %v3006_v38 = vld [vmem:[#allocation5 + $0x120] ss:$16 sps:$4 sm:$0xff]   ;;  %v3007_v39 = vld [vmem:[#allocation5 + $0x128] ss:$16 sps:$4 sm:$0xff]   ;;  %v3008_v40 = vld [vmem:[#allocation5 + $0x144] ss:$16 sps:$4 sm:$0xff]  }
  0x45   :  { %1924 = vmatpush1.bf16.msra.mxu0 %v2970_v14  ;;  %2189 = vmatpush1.bf16.msra.mxu1 %v2971_v15  ;;  %v3010_v41 = vld [vmem:[#allocation5 + $0x14c] ss:$16 sps:$4 sm:$0xff]   ;;  %v3012_v42 = vld [vmem:[#allocation5 + $0x140] ss:$16 sps:$4 sm:$0xff]   ;;  %v3013_v43 = vld [vmem:[#allocation5 + $0x148] ss:$16 sps:$4 sm:$0xff]  }
  0x46   :  { %1925 = vmatprep.subr.bf16.mxu0 %v2972_v16  ;;  %2190 = vmatprep.subr.bf16.mxu1 %v2974_v17  ;;  %v3014_v44 = vld [vmem:[#allocation5 + $0x164] ss:$16 sps:$4 sm:$0xff]   ;;  %v3016_v45 = vld [vmem:[#allocation5 + $0x16c] ss:$16 sps:$4 sm:$0xff]   ;;  %v3018_v46 = vld [vmem:[#allocation5 + $0x160] ss:$16 sps:$4 sm:$0xff]  }
  0x47   :  { %v3019_v47 = vld [vmem:[#allocation5 + $0x168] ss:$16 sps:$4 sm:$0xff]   ;;  %v3020_v49 = vld [vmem:[#allocation5 + $0x184] ss:$16 sps:$4 sm:$0xff]   ;;  %v3022_v50 = vld [vmem:[#allocation5 + $0x18c] ss:$16 sps:$4 sm:$0xff]  }
  0x48   :  { %v3046_v48 = vld [vmem:[#allocation2 + $0x4] ss:$36 sps:$4 sm:$0xff]   ;;  %v3024_v51 = vld [vmem:[#allocation5 + $0x180] ss:$16 sps:$4 sm:$0xff]   ;;  %v3028_v54 = vld [vmem:[#allocation5 + $0x1ac] ss:$16 sps:$4 sm:$0xff]  }
  0x49   :  { %1926 = vmatpush1.bf16.msra.mxu0 %v2976_v18  ;;  %2191 = vmatpush1.bf16.msra.mxu1 %v2977_v19  ;;  %v3025_v52 = vld [vmem:[#allocation5 + $0x188] ss:$16 sps:$4 sm:$0xff]   ;;  %v3026_v53 = vld [vmem:[#allocation5 + $0x1a4] ss:$16 sps:$4 sm:$0xff]   ;;  %v3030_v55 = vld [vmem:[#allocation5 + $0x1a0] ss:$16 sps:$4 sm:$0xff]  }
  0x4a   :  { %1927 = vmatprep.subr.bf16.mxu0 %v2978_v20  ;;  %2192 = vmatprep.subr.bf16.mxu1 %v2980_v21  ;;  %v3031_v56 = vld [vmem:[#allocation5 + $0x1a8] ss:$16 sps:$4 sm:$0xff]   ;;  %v3032_v57 = vld [vmem:[#allocation5 + $0x1c4] ss:$16 sps:$4 sm:$0xff]   ;;  %v3034_v58 = vld [vmem:[#allocation5 + $0x1cc] ss:$16 sps:$4 sm:$0xff]  }
  0x4b   :  { %1949 = vmatprep.mubr.bf16.mxu0 %v3046_v48  ;;  %2214 = vmatprep.mubr.bf16.mxu1 %v3046_v48  ;;  %v3036_v59 = vld [vmem:[#allocation5 + $0x1c0] ss:$16 sps:$4 sm:$0xff]   ;;  %v3037_v60 = vld [vmem:[#allocation5 + $0x1c8] ss:$16 sps:$4 sm:$0xff]   ;;  %v3038_v61 = vld [vmem:[#allocation5 + $0x1e4] ss:$16 sps:$4 sm:$0xff]  }
  0x4c   :  { %v3040_v62 = vld [vmem:[#allocation5 + $0x1ec] ss:$16 sps:$4 sm:$0xff]   ;;  %v3042_v63 = vld [vmem:[#allocation5 + $0x1e0] ss:$16 sps:$4 sm:$0xff]   ;;  %v3043_v0 = vld [vmem:[#allocation5 + $0x1e8] ss:$16 sps:$4 sm:$0xff]  }
  0x4d   :  { %1928 = vmatpush1.bf16.msra.mxu0 %v2982_v22  ;;  %2193 = vmatpush1.bf16.msra.mxu1 %v2983_v23  ;;  %v3049_v1 = vld [vmem:[#allocation5 + $0x204] ss:$16 sps:$4 sm:$0xff]   ;;  %v3052_v2 = vld [vmem:[#allocation5 + $0x20c] ss:$16 sps:$4 sm:$0xff]   ;;  %v3047_v4 = vld [vmem:[#allocation5 + $0x200] ss:$16 sps:$4 sm:$0xff]  }
  0x4e   :  { %1929 = vmatprep.subr.bf16.mxu0 %v2984_v24  ;;  %2194 = vmatprep.subr.bf16.mxu1 %v2986_v25  ;;  %v3044_v3 = vld [vmem:[#allocation2] ss:$36 sps:$4 sm:$0xff]   ;;  %v3050_v5 = vld [vmem:[#allocation5 + $0x208] ss:$16 sps:$4 sm:$0xff]   ;;  %v3058_v7 = vld [vmem:[#allocation5 + $0x22c] ss:$16 sps:$4 sm:$0xff]  }
  0x4f   :  { %v3055_v6 = vld [vmem:[#allocation5 + $0x224] ss:$16 sps:$4 sm:$0xff]   ;;  %v3053_v8 = vld [vmem:[#allocation5 + $0x220] ss:$16 sps:$4 sm:$0xff]   ;;  %v3056_v9 = vld [vmem:[#allocation5 + $0x228] ss:$16 sps:$4 sm:$0xff]  }
  0x50   :  { %v3061_v10 = vld [vmem:[#allocation5 + $0x244] ss:$16 sps:$4 sm:$0xff]   ;;  %v3064_v11 = vld [vmem:[#allocation5 + $0x24c] ss:$16 sps:$4 sm:$0xff]   ;;  %v3059_v12 = vld [vmem:[#allocation5 + $0x240] ss:$16 sps:$4 sm:$0xff]  }
  0x51   :  { %1930 = vmatpush1.bf16.msra.mxu0 %v2988_v26  ;;  %2195 = vmatpush1.bf16.msra.mxu1 %v2989_v27  ;;  %v3062_v13 = vld [vmem:[#allocation5 + $0x248] ss:$16 sps:$4 sm:$0xff]   ;;  %v3067_v14 = vld [vmem:[#allocation5 + $0x264] ss:$16 sps:$4 sm:$0xff]   ;;  %v3070_v15 = vld [vmem:[#allocation5 + $0x26c] ss:$16 sps:$4 sm:$0xff]  }
  0x52   :  { %1931 = vmatprep.subr.bf16.mxu0 %v2990_v28  ;;  %2196 = vmatprep.subr.bf16.mxu1 %v2992_v29  ;;  %v3065_v16 = vld [vmem:[#allocation5 + $0x260] ss:$16 sps:$4 sm:$0xff]   ;;  %v3068_v17 = vld [vmem:[#allocation5 + $0x268] ss:$16 sps:$4 sm:$0xff]   ;;  %v3073_v18 = vld [vmem:[#allocation5 + $0x284] ss:$16 sps:$4 sm:$0xff]  }
  0x53   :  { %v3076_v19 = vld [vmem:[#allocation5 + $0x28c] ss:$16 sps:$4 sm:$0xff]   ;;  %v3071_v20 = vld [vmem:[#allocation5 + $0x280] ss:$16 sps:$4 sm:$0xff]   ;;  %v3074_v21 = vld [vmem:[#allocation5 + $0x288] ss:$16 sps:$4 sm:$0xff]  }
  0x54   :  { %v3079_v22 = vld [vmem:[#allocation5 + $0x2a4] ss:$16 sps:$4 sm:$0xff]   ;;  %v3082_v23 = vld [vmem:[#allocation5 + $0x2ac] ss:$16 sps:$4 sm:$0xff]   ;;  %v3077_v25 = vld [vmem:[#allocation5 + $0x2a0] ss:$16 sps:$4 sm:$0xff]  }
  0x55   :  { %1932 = vmatpush1.bf16.msra.mxu0 %v2994_v30  ;;  %2197 = vmatpush1.bf16.msra.mxu1 %v2995_v31  ;;  %v3131_v24 = vld [vmem:[#allocation2 + $0x4c] ss:$36 sps:$4 sm:$0xff]   ;;  %v3080_v26 = vld [vmem:[#allocation5 + $0x2a8] ss:$16 sps:$4 sm:$0xff]   ;;  %v3085_v27 = vld [vmem:[#allocation5 + $0x2c4] ss:$16 sps:$4 sm:$0xff]  }
  0x56   :  { %1933 = vmatprep.subr.bf16.mxu0 %v2996_v32  ;;  %2198 = vmatprep.subr.bf16.mxu1 %v2998_v33  ;;  %v3088_v28 = vld [vmem:[#allocation5 + $0x2cc] ss:$16 sps:$4 sm:$0xff]   ;;  %v3083_v30 = vld [vmem:[#allocation5 + $0x2c0] ss:$16 sps:$4 sm:$0xff]   ;;  %v3086_v31 = vld [vmem:[#allocation5 + $0x2c8] ss:$16 sps:$4 sm:$0xff]  }
  0x57   :  { %v3139_v29 = vld [vmem:[#allocation2 + $0x48] ss:$36 sps:$4 sm:$0xff]   ;;  %v3091_v32 = vld [vmem:[#allocation5 + $0x2e4] ss:$16 sps:$4 sm:$0xff]   ;;  %s3508_s2 = smov [#allocation8]  }
  0x58   :  { %v3094_v33 = vld [vmem:[#allocation5 + $0x2ec] ss:$16 sps:$4 sm:$0xff]   ;;  %v3110_v48 = vld [vmem:[#allocation5 + $0x348] ss:$16 sps:$4 sm:$0xff]   ;;  %s2524_s25 = sshll.u32 %s3508_s2, 4  ;;  %s2525_s25 = int_to_ptr.vmem [resolvable:$true] %s2524_s25 }
  0x59   :  { %1934 = vmatpush1.bf16.msra.mxu0 %v3000_v34  ;;  %2199 = vmatpush1.bf16.msra.mxu1 %v3001_v35  ;;  %v3148_v34 = vld [vmem:[#allocation2 + $0xc] ss:$36 sps:$4 sm:$0xff]   ;;  %s3472_s26 = scalar_lea.vmem %s2525_s25, 1024  ;;  %p3477_p11 = scmp.lt.s32.totalorder %s2525_s25, %s2525_s25 }
  0x5a   :  { %1935 = vmatprep.subr.bf16.mxu0 %v3002_v36  ;;  %2200 = vmatprep.subr.bf16.mxu1 %v3004_v37  ;;  %v3089_v35 = vld [vmem:[#allocation5 + $0x2e0] ss:$16 sps:$4 sm:$0xff]   ;;  %v3092_v36 = vld [vmem:[#allocation5 + $0x2e8] ss:$16 sps:$4 sm:$0xff]   ;;  %v3097_v37 = vld [vmem:[#allocation5 + $0x304] ss:$16 sps:$4 sm:$0xff]   ;;  %p3473_p10 = scmp.ne.s32.totalorder %s2525_s25, %s3472_s26  ;;  %p3478_p12 = scmp.lt.s32.totalorder %s3472_s26, %s3472_s26 }
  0x5c   :  { %p3479_p13 = por %p3478_p12, %p3477_p11 }
  0x5d   :  { %1936 = vmatpush1.bf16.msra.mxu0 %v3006_v38  ;;  %2201 = vmatpush1.bf16.msra.mxu1 %v3007_v39  ;;  %v3100_v38 = vld [vmem:[#allocation5 + $0x30c] ss:$16 sps:$4 sm:$0xff]   ;;  %v3095_v39 = vld [vmem:[#allocation5 + $0x300] ss:$16 sps:$4 sm:$0xff]  }
  0x5e   :  { %1937 = vmatprep.subr.bf16.mxu0 %v3008_v40  ;;  %2202 = vmatprep.subr.bf16.mxu1 %v3010_v41  ;;  %v3098_v40 = vld [vmem:[#allocation5 + $0x308] ss:$16 sps:$4 sm:$0xff]   ;;  %v3103_v41 = vld [vmem:[#allocation5 + $0x324] ss:$16 sps:$4 sm:$0xff]   ;;  %p3480_p0 = pnand %p3479_p13, %p3473_p10 }
  0x61   :  { %1938 = vmatpush1.bf16.msra.mxu0 %v3012_v42  ;;  %2203 = vmatpush1.bf16.msra.mxu1 %v3013_v43  ;;  %v3106_v42 = vld [vmem:[#allocation5 + $0x32c] ss:$16 sps:$4 sm:$0xff]   ;;  %v3101_v43 = vld [vmem:[#allocation5 + $0x320] ss:$16 sps:$4 sm:$0xff]  }
  0x62   :  { %1939 = vmatprep.subr.bf16.mxu0 %v3014_v44  ;;  %2204 = vmatprep.subr.bf16.mxu1 %v3016_v45  ;;  %v3104_v44 = vld [vmem:[#allocation5 + $0x328] ss:$16 sps:$4 sm:$0xff]   ;;  %v3109_v45 = vld [vmem:[#allocation5 + $0x344] ss:$16 sps:$4 sm:$0xff]  }
  0x65   :  { %1940 = vmatpush1.bf16.msra.mxu0 %v3018_v46  ;;  %2205 = vmatpush1.bf16.msra.mxu1 %v3019_v47  ;;  %v3112_v46 = vld [vmem:[#allocation5 + $0x34c] ss:$16 sps:$4 sm:$0xff]   ;;  %v3107_v47 = vld [vmem:[#allocation5 + $0x340] ss:$16 sps:$4 sm:$0xff]  }
  0x66   :  { %1941 = vmatprep.subr.bf16.mxu0 %v3020_v49  ;;  %2206 = vmatprep.subr.bf16.mxu1 %v3022_v50  ;;  %v3115_v49 = vld [vmem:[#allocation5 + $0x364] ss:$16 sps:$4 sm:$0xff]   ;;  %v3118_v50 = vld [vmem:[#allocation5 + $0x36c] ss:$16 sps:$4 sm:$0xff]  }
  0x69   :  { %1942 = vmatpush1.bf16.msra.mxu0 %v3024_v51  ;;  %2207 = vmatpush1.bf16.msra.mxu1 %v3025_v52  ;;  %v3113_v51 = vld [vmem:[#allocation5 + $0x360] ss:$16 sps:$4 sm:$0xff]   ;;  %v3116_v52 = vld [vmem:[#allocation5 + $0x368] ss:$16 sps:$4 sm:$0xff]  }
  0x6a   :  { %1943 = vmatprep.subr.bf16.mxu0 %v3026_v53  ;;  %2208 = vmatprep.subr.bf16.mxu1 %v3028_v54  ;;  %v3121_v53 = vld [vmem:[#allocation5 + $0x384] ss:$16 sps:$4 sm:$0xff]   ;;  %v3124_v54 = vld [vmem:[#allocation5 + $0x38c] ss:$16 sps:$4 sm:$0xff]  }
  0x6d   :  { %1944 = vmatpush1.bf16.msra.mxu0 %v3030_v55  ;;  %2209 = vmatpush1.bf16.msra.mxu1 %v3031_v56  ;;  %v3119_v55 = vld [vmem:[#allocation5 + $0x380] ss:$16 sps:$4 sm:$0xff]   ;;  %v3122_v56 = vld [vmem:[#allocation5 + $0x388] ss:$16 sps:$4 sm:$0xff]  }
  0x6e   :  { %1945 = vmatprep.subr.bf16.mxu0 %v3032_v57  ;;  %2210 = vmatprep.subr.bf16.mxu1 %v3034_v58  ;;  %v3127_v57 = vld [vmem:[#allocation5 + $0x3a4] ss:$16 sps:$4 sm:$0xff]   ;;  %v3130_v58 = vld [vmem:[#allocation5 + $0x3ac] ss:$16 sps:$4 sm:$0xff]  }
  0x71   :  { %1946 = vmatpush1.bf16.msra.mxu0 %v3036_v59  ;;  %2211 = vmatpush1.bf16.msra.mxu1 %v3037_v60  ;;  %v3125_v59 = vld [vmem:[#allocation5 + $0x3a0] ss:$16 sps:$4 sm:$0xff]   ;;  %v3128_v60 = vld [vmem:[#allocation5 + $0x3a8] ss:$16 sps:$4 sm:$0xff]  }
  0x72   :  { %1947 = vmatprep.subr.bf16.mxu0 %v3038_v61  ;;  %2212 = vmatprep.subr.bf16.mxu1 %v3040_v62  ;;  %v3135_v61 = vld [vmem:[#allocation5 + $0x3c4] ss:$16 sps:$4 sm:$0xff]   ;;  %v3138_v62 = vld [vmem:[#allocation5 + $0x3cc] ss:$16 sps:$4 sm:$0xff]  }
  0x75   :  { %1948 = vmatpush1.bf16.msra.mxu0 %v3042_v63  ;;  %2213 = vmatpush1.bf16.msra.mxu1 %v3043_v0  ;;  %v3133_v63 = vld [vmem:[#allocation5 + $0x3c0] ss:$16 sps:$4 sm:$0xff]   ;;  %v3136_v0 = vld [vmem:[#allocation5 + $0x3c8] ss:$16 sps:$4 sm:$0xff]  }
  0x76   :  { %1970 = vmatprep.subr.bf16.mxu0 %v3049_v1  ;;  %2235 = vmatprep.subr.bf16.mxu1 %v3052_v2  ;;  %v3142_v1 = vld [vmem:[#allocation5 + $0x3e4] ss:$16 sps:$4 sm:$0xff]   ;;  %v3145_v2 = vld [vmem:[#allocation5 + $0x3ec] ss:$16 sps:$4 sm:$0xff]  }
  0x78   :  { %1950 = vmatmul.mubr.bf16.vlgmr.msra.gmra.mrb[0].mxu0 %v3044_v3  ;;  %2215 = vmatmul.mubr.bf16.vlgmr.msra.gmra.mrb[0].mxu1 %v3044_v3  ;;  %v3140_v3 = vld [vmem:[#allocation5 + $0x3e0] ss:$16 sps:$4 sm:$0xff]  }
  0x79   :  { %1971 = vmatpush1.bf16.msra.mxu0 %v3047_v4  ;;  %2236 = vmatpush1.bf16.msra.mxu1 %v3050_v5  ;;  %v3143_v4 = vld [vmem:[#allocation5 + $0x3e8] ss:$16 sps:$4 sm:$0xff]   ;;  %v3151_v5 = vld [vmem:[#allocation5 + $0x404] ss:$16 sps:$4 sm:$0xff]  }
  0x7a   :  { %1972 = vmatprep.subr.bf16.mxu0 %v3055_v6  ;;  %2237 = vmatprep.subr.bf16.mxu1 %v3058_v7  ;;  %v3154_v6 = vld [vmem:[#allocation5 + $0x40c] ss:$16 sps:$4 sm:$0xff]  }
  0x7b   :  { %1959 = vmatprep.mubr.bf16.mxu0 %v3131_v24  ;;  %2224 = vmatprep.mubr.bf16.mxu1 %v3131_v24  ;;  %v3146_v7 = vld [vmem:[#allocation2 + $0x8] ss:$36 sps:$4 sm:$0xff]  }
  0x7c   :  { %v3170_v24 = vld [vmem:[#allocation5 + $0x468] ss:$16 sps:$4 sm:$0xff]  }
  0x7d   :  { %1973 = vmatpush1.bf16.msra.mxu0 %v3053_v8  ;;  %2238 = vmatpush1.bf16.msra.mxu1 %v3056_v9  ;;  %v3149_v8 = vld [vmem:[#allocation5 + $0x400] ss:$16 sps:$4 sm:$0xff]   ;;  %v3152_v9 = vld [vmem:[#allocation5 + $0x408] ss:$16 sps:$4 sm:$0xff]  }
  0x7e   :  { %1974 = vmatprep.subr.bf16.mxu0 %v3061_v10  ;;  %2239 = vmatprep.subr.bf16.mxu1 %v3064_v11  ;;  %v3157_v10 = vld [vmem:[#allocation5 + $0x424] ss:$16 sps:$4 sm:$0xff]   ;;  %v3160_v11 = vld [vmem:[#allocation5 + $0x42c] ss:$16 sps:$4 sm:$0xff]  }
  0x80   :  { %1960 = vmatmul.mubr.bf16.gmra.mrb[4].mxu0 %v3139_v29  ;;  %2225 = vmatmul.mubr.bf16.gmra.mrb[4].mxu1 %v3139_v29  ;;  %v3181_v29 = vld [vmem:[#allocation5 + $0x4a4] ss:$16 sps:$4 sm:$0xff]  }
  0x81   :  { %1975 = vmatpush1.bf16.msra.mxu0 %v3059_v12  ;;  %2240 = vmatpush1.bf16.msra.mxu1 %v3062_v13  ;;  %v3233_v12 = vld [vmem:[#allocation2 + $0x54] ss:$36 sps:$4 sm:$0xff]   ;;  %v3155_v13 = vld [vmem:[#allocation5 + $0x420] ss:$16 sps:$4 sm:$0xff]  }
  0x82   :  { %1976 = vmatprep.subr.bf16.mxu0 %v3067_v14  ;;  %2241 = vmatprep.subr.bf16.mxu1 %v3070_v15  ;;  %v3158_v14 = vld [vmem:[#allocation5 + $0x428] ss:$16 sps:$4 sm:$0xff]   ;;  %v3163_v15 = vld [vmem:[#allocation5 + $0x444] ss:$16 sps:$4 sm:$0xff]  }
  0x83   :  { %2002 = vmatprep.mubr.bf16.mxu0 %v3148_v34  ;;  %2267 = vmatprep.mubr.bf16.mxu1 %v3148_v34  ;;  %v3190_v34 = vld [vmem:[#allocation5 + $0x4cc] ss:$16 sps:$4 sm:$0xff]  }
  0x85   :  { %1977 = vmatpush1.bf16.msra.mxu0 %v3065_v16  ;;  %2242 = vmatpush1.bf16.msra.mxu1 %v3068_v17  ;;  %v3166_v16 = vld [vmem:[#allocation5 + $0x44c] ss:$16 sps:$4 sm:$0xff]   ;;  %v3161_v17 = vld [vmem:[#allocation5 + $0x440] ss:$16 sps:$4 sm:$0xff]  }
  0x86   :  { %1978 = vmatprep.subr.bf16.mxu0 %v3073_v18  ;;  %2243 = vmatprep.subr.bf16.mxu1 %v3076_v19  ;;  %v3164_v18 = vld [vmem:[#allocation5 + $0x448] ss:$16 sps:$4 sm:$0xff]   ;;  %v3241_v19 = vld [vmem:[#allocation2 + $0x50] ss:$36 sps:$4 sm:$0xff]  }
  0x89   :  { %1979 = vmatpush1.bf16.msra.mxu0 %v3071_v20  ;;  %2244 = vmatpush1.bf16.msra.mxu1 %v3074_v21  ;;  %v3169_v20 = vld [vmem:[#allocation5 + $0x464] ss:$16 sps:$4 sm:$0xff]   ;;  %v3172_v21 = vld [vmem:[#allocation5 + $0x46c] ss:$16 sps:$4 sm:$0xff]  }
  0x8a   :  { %1980 = vmatprep.subr.bf16.mxu0 %v3079_v22  ;;  %2245 = vmatprep.subr.bf16.mxu1 %v3082_v23  ;;  %v3250_v22 = vld [vmem:[#allocation2 + $0x14] ss:$36 sps:$4 sm:$0xff]   ;;  %v3167_v23 = vld [vmem:[#allocation5 + $0x460] ss:$16 sps:$4 sm:$0xff]  }
  0x8d   :  { %1981 = vmatpush1.bf16.msra.mxu0 %v3077_v25  ;;  %2246 = vmatpush1.bf16.msra.mxu1 %v3080_v26  ;;  %v3175_v25 = vld [vmem:[#allocation5 + $0x484] ss:$16 sps:$4 sm:$0xff]   ;;  %v3178_v26 = vld [vmem:[#allocation5 + $0x48c] ss:$16 sps:$4 sm:$0xff]  }
  0x8e   :  { %1982 = vmatprep.subr.bf16.mxu0 %v3085_v27  ;;  %2247 = vmatprep.subr.bf16.mxu1 %v3088_v28  ;;  %v3173_v27 = vld [vmem:[#allocation5 + $0x480] ss:$16 sps:$4 sm:$0xff]   ;;  %v3176_v28 = vld [vmem:[#allocation5 + $0x488] ss:$16 sps:$4 sm:$0xff]  }
  0x91   :  { %1983 = vmatpush1.bf16.msra.mxu0 %v3083_v30  ;;  %2248 = vmatpush1.bf16.msra.mxu1 %v3086_v31  ;;  %v3184_v30 = vld [vmem:[#allocation5 + $0x4ac] ss:$16 sps:$4 sm:$0xff]   ;;  %v3179_v31 = vld [vmem:[#allocation5 + $0x4a0] ss:$16 sps:$4 sm:$0xff]  }
  0x92   :  { %1984 = vmatprep.subr.bf16.mxu0 %v3091_v32  ;;  %2249 = vmatprep.subr.bf16.mxu1 %v3094_v33  ;;  %v3182_v32 = vld [vmem:[#allocation5 + $0x4a8] ss:$16 sps:$4 sm:$0xff]   ;;  %v3187_v33 = vld [vmem:[#allocation5 + $0x4c4] ss:$16 sps:$4 sm:$0xff]  }
  0x95   :  { %1985 = vmatpush1.bf16.msra.mxu0 %v3089_v35  ;;  %2250 = vmatpush1.bf16.msra.mxu1 %v3092_v36  ;;  %v3185_v35 = vld [vmem:[#allocation5 + $0x4c0] ss:$16 sps:$4 sm:$0xff]   ;;  %v3188_v36 = vld [vmem:[#allocation5 + $0x4c8] ss:$16 sps:$4 sm:$0xff]  }
  0x96   :  { %1986 = vmatprep.subr.bf16.mxu0 %v3097_v37  ;;  %2251 = vmatprep.subr.bf16.mxu1 %v3100_v38  ;;  %v3193_v37 = vld [vmem:[#allocation5 + $0x4e4] ss:$16 sps:$4 sm:$0xff]   ;;  %v3196_v38 = vld [vmem:[#allocation5 + $0x4ec] ss:$16 sps:$4 sm:$0xff]  }
  0x99   :  { %1987 = vmatpush1.bf16.msra.mxu0 %v3095_v39  ;;  %2252 = vmatpush1.bf16.msra.mxu1 %v3098_v40  ;;  %v3191_v39 = vld [vmem:[#allocation5 + $0x4e0] ss:$16 sps:$4 sm:$0xff]   ;;  %v3194_v40 = vld [vmem:[#allocation5 + $0x4e8] ss:$16 sps:$4 sm:$0xff]  }
  0x9a   :  { %1988 = vmatprep.subr.bf16.mxu0 %v3103_v41  ;;  %2253 = vmatprep.subr.bf16.mxu1 %v3106_v42  ;;  %v3199_v41 = vld [vmem:[#allocation5 + $0x504] ss:$16 sps:$4 sm:$0xff]   ;;  %v3202_v42 = vld [vmem:[#allocation5 + $0x50c] ss:$16 sps:$4 sm:$0xff]  }
  0x9d   :  { %1989 = vmatpush1.bf16.msra.mxu0 %v3101_v43  ;;  %2254 = vmatpush1.bf16.msra.mxu1 %v3104_v44  ;;  %v3197_v43 = vld [vmem:[#allocation5 + $0x500] ss:$16 sps:$4 sm:$0xff]   ;;  %v3200_v44 = vld [vmem:[#allocation5 + $0x508] ss:$16 sps:$4 sm:$0xff]  }
  0x9e   :  { %1990 = vmatprep.subr.bf16.mxu0 %v3109_v45  ;;  %2255 = vmatprep.subr.bf16.mxu1 %v3112_v46  ;;  %v3205_v45 = vld [vmem:[#allocation5 + $0x524] ss:$16 sps:$4 sm:$0xff]   ;;  %v3208_v46 = vld [vmem:[#allocation5 + $0x52c] ss:$16 sps:$4 sm:$0xff]  }
  0xa1   :  { %1991 = vmatpush1.bf16.msra.mxu0 %v3107_v47  ;;  %2256 = vmatpush1.bf16.msra.mxu1 %v3110_v48  ;;  %v3203_v47 = vld [vmem:[#allocation5 + $0x520] ss:$16 sps:$4 sm:$0xff]   ;;  %v3206_v48 = vld [vmem:[#allocation5 + $0x528] ss:$16 sps:$4 sm:$0xff]  }
  0xa2   :  { %1992 = vmatprep.subr.bf16.mxu0 %v3115_v49  ;;  %2257 = vmatprep.subr.bf16.mxu1 %v3118_v50  ;;  %v3211_v49 = vld [vmem:[#allocation5 + $0x544] ss:$16 sps:$4 sm:$0xff]   ;;  %v3214_v50 = vld [vmem:[#allocation5 + $0x54c] ss:$16 sps:$4 sm:$0xff]  }
  0xa5   :  { %1993 = vmatpush1.bf16.msra.mxu0 %v3113_v51  ;;  %2258 = vmatpush1.bf16.msra.mxu1 %v3116_v52  ;;  %v3209_v51 = vld [vmem:[#allocation5 + $0x540] ss:$16 sps:$4 sm:$0xff]   ;;  %v3212_v52 = vld [vmem:[#allocation5 + $0x548] ss:$16 sps:$4 sm:$0xff]  }
  0xa6   :  { %1994 = vmatprep.subr.bf16.mxu0 %v3121_v53  ;;  %2259 = vmatprep.subr.bf16.mxu1 %v3124_v54  ;;  %v3217_v53 = vld [vmem:[#allocation5 + $0x564] ss:$16 sps:$4 sm:$0xff]   ;;  %v3220_v54 = vld [vmem:[#allocation5 + $0x56c] ss:$16 sps:$4 sm:$0xff]  }
  0xa9   :  { %1995 = vmatpush1.bf16.msra.mxu0 %v3119_v55  ;;  %2260 = vmatpush1.bf16.msra.mxu1 %v3122_v56  ;;  %v3215_v55 = vld [vmem:[#allocation5 + $0x560] ss:$16 sps:$4 sm:$0xff]   ;;  %v3218_v56 = vld [vmem:[#allocation5 + $0x568] ss:$16 sps:$4 sm:$0xff]  }
  0xaa   :  { %1996 = vmatprep.subr.bf16.mxu0 %v3127_v57  ;;  %2261 = vmatprep.subr.bf16.mxu1 %v3130_v58  ;;  %v3223_v57 = vld [vmem:[#allocation5 + $0x584] ss:$16 sps:$4 sm:$0xff]   ;;  %v3226_v58 = vld [vmem:[#allocation5 + $0x58c] ss:$16 sps:$4 sm:$0xff]  }
  0xad   :  { %1997 = vmatpush1.bf16.msra.mxu0 %v3125_v59  ;;  %2262 = vmatpush1.bf16.msra.mxu1 %v3128_v60  ;;  %v3221_v59 = vld [vmem:[#allocation5 + $0x580] ss:$16 sps:$4 sm:$0xff]   ;;  %v3224_v60 = vld [vmem:[#allocation5 + $0x588] ss:$16 sps:$4 sm:$0xff]  }
  0xae   :  { %1998 = vmatprep.subr.bf16.mxu0 %v3135_v61  ;;  %2263 = vmatprep.subr.bf16.mxu1 %v3138_v62  ;;  %v3229_v61 = vld [vmem:[#allocation5 + $0x5a4] ss:$16 sps:$4 sm:$0xff]   ;;  %v3232_v62 = vld [vmem:[#allocation5 + $0x5ac] ss:$16 sps:$4 sm:$0xff]  }
  0xb1   :  { %1999 = vmatpush1.bf16.msra.mxu0 %v3133_v63  ;;  %2264 = vmatpush1.bf16.msra.mxu1 %v3136_v0  ;;  %v3227_v63 = vld [vmem:[#allocation5 + $0x5a0] ss:$16 sps:$4 sm:$0xff]   ;;  %v3230_v0 = vld [vmem:[#allocation5 + $0x5a8] ss:$16 sps:$4 sm:$0xff]  }
  0xb2   :  { %2000 = vmatprep.subr.bf16.mxu0 %v3142_v1  ;;  %2265 = vmatprep.subr.bf16.mxu1 %v3145_v2  ;;  %v3237_v1 = vld [vmem:[#allocation5 + $0x5c4] ss:$16 sps:$4 sm:$0xff]   ;;  %v3240_v2 = vld [vmem:[#allocation5 + $0x5cc] ss:$16 sps:$4 sm:$0xff]  }
  0xb5   :  { %2001 = vmatpush1.bf16.msra.mxu0 %v3140_v3  ;;  %2266 = vmatpush1.bf16.msra.mxu1 %v3143_v4  ;;  %v3235_v3 = vld [vmem:[#allocation5 + $0x5c0] ss:$16 sps:$4 sm:$0xff]   ;;  %v3238_v4 = vld [vmem:[#allocation5 + $0x5c8] ss:$16 sps:$4 sm:$0xff]  }
  0xb6   :  { %2023 = vmatprep.subr.bf16.mxu0 %v3151_v5  ;;  %2288 = vmatprep.subr.bf16.mxu1 %v3154_v6  ;;  %v3244_v5 = vld [vmem:[#allocation5 + $0x5e4] ss:$16 sps:$4 sm:$0xff]   ;;  %v3247_v6 = vld [vmem:[#allocation5 + $0x5ec] ss:$16 sps:$4 sm:$0xff]  }
  0xb8   :  { %2003 = vmatmul.mubr.bf16.vlgmr.msra.gmra.mrb[0].mxu0 %v3146_v7  ;;  %2268 = vmatmul.mubr.bf16.vlgmr.msra.gmra.mrb[0].mxu1 %v3146_v7  ;;  %v3242_v7 = vld [vmem:[#allocation5 + $0x5e0] ss:$16 sps:$4 sm:$0xff]  }
  0xb9   :  { %2024 = vmatpush1.bf16.msra.mxu0 %v3149_v8  ;;  %2289 = vmatpush1.bf16.msra.mxu1 %v3152_v9  ;;  %v3245_v8 = vld [vmem:[#allocation5 + $0x5e8] ss:$16 sps:$4 sm:$0xff]   ;;  %v3253_v9 = vld [vmem:[#allocation5 + $0x604] ss:$16 sps:$4 sm:$0xff]  }
  0xba   :  { %2025 = vmatprep.subr.bf16.mxu0 %v3157_v10  ;;  %2290 = vmatprep.subr.bf16.mxu1 %v3160_v11  ;;  %v3256_v10 = vld [vmem:[#allocation5 + $0x60c] ss:$16 sps:$4 sm:$0xff]   ;;  %v3248_v11 = vld [vmem:[#allocation2 + $0x10] ss:$36 sps:$4 sm:$0xff]  }
  0xbb   :  { %2012 = vmatprep.mubr.bf16.mxu0 %v3233_v12  ;;  %2277 = vmatprep.mubr.bf16.mxu1 %v3233_v12  ;;  %v3251_v12 = vld [vmem:[#allocation5 + $0x600] ss:$16 sps:$4 sm:$0xff]  }
  0xbd   :  { %2026 = vmatpush1.bf16.msra.mxu0 %v3155_v13  ;;  %2291 = vmatpush1.bf16.msra.mxu1 %v3158_v14  ;;  %v3254_v13 = vld [vmem:[#allocation5 + $0x608] ss:$16 sps:$4 sm:$0xff]   ;;  %v3259_v14 = vld [vmem:[#allocation5 + $0x624] ss:$16 sps:$4 sm:$0xff]  }
  0xbe   :  { %2027 = vmatprep.subr.bf16.mxu0 %v3163_v15  ;;  %2292 = vmatprep.subr.bf16.mxu1 %v3166_v16  ;;  %v3262_v15 = vld [vmem:[#allocation5 + $0x62c] ss:$16 sps:$4 sm:$0xff]  }
  0xbf   :  { %v3335_v16 = vld [vmem:[#allocation2 + $0x5c] ss:$36 sps:$4 sm:$0xff]  }
  0xc0   :  { %2013 = vmatmul.mubr.bf16.gmra.mrb[4].mxu0 %v3241_v19  ;;  %2278 = vmatmul.mubr.bf16.gmra.mrb[4].mxu1 %v3241_v19  ;;  %v3265_v19 = vld [vmem:[#allocation5 + $0x644] ss:$16 sps:$4 sm:$0xff]  }
  0xc1   :  { %2028 = vmatpush1.bf16.msra.mxu0 %v3161_v17  ;;  %2293 = vmatpush1.bf16.msra.mxu1 %v3164_v18  ;;  %v3257_v17 = vld [vmem:[#allocation5 + $0x620] ss:$16 sps:$4 sm:$0xff]   ;;  %v3260_v18 = vld [vmem:[#allocation5 + $0x628] ss:$16 sps:$4 sm:$0xff]  }
  0xc2   :  { %2029 = vmatprep.subr.bf16.mxu0 %v3169_v20  ;;  %2294 = vmatprep.subr.bf16.mxu1 %v3172_v21  ;;  %v3268_v20 = vld [vmem:[#allocation5 + $0x64c] ss:$16 sps:$4 sm:$0xff]   ;;  %v3263_v21 = vld [vmem:[#allocation5 + $0x640] ss:$16 sps:$4 sm:$0xff]  }
  0xc3   :  { %2055 = vmatprep.mubr.bf16.mxu0 %v3250_v22  ;;  %2320 = vmatprep.mubr.bf16.mxu1 %v3250_v22  ;;  %v3266_v22 = vld [vmem:[#allocation5 + $0x648] ss:$16 sps:$4 sm:$0xff]  }
  0xc5   :  { %2030 = vmatpush1.bf16.msra.mxu0 %v3167_v23  ;;  %2295 = vmatpush1.bf16.msra.mxu1 %v3170_v24  ;;  %v3343_v23 = vld [vmem:[#allocation2 + $0x58] ss:$36 sps:$4 sm:$0xff]   ;;  %v3271_v24 = vld [vmem:[#allocation5 + $0x664] ss:$16 sps:$4 sm:$0xff]  }
  0xc6   :  { %2031 = vmatprep.subr.bf16.mxu0 %v3175_v25  ;;  %2296 = vmatprep.subr.bf16.mxu1 %v3178_v26  ;;  %v3274_v25 = vld [vmem:[#allocation5 + $0x66c] ss:$16 sps:$4 sm:$0xff]  }
  0xc7   :  { %v3352_v26 = vld [vmem:[#allocation2 + $0x1c] ss:$36 sps:$4 sm:$0xff]  }
  0xc9   :  { %2032 = vmatpush1.bf16.msra.mxu0 %v3173_v27  ;;  %2297 = vmatpush1.bf16.msra.mxu1 %v3176_v28  ;;  %v3269_v27 = vld [vmem:[#allocation5 + $0x660] ss:$16 sps:$4 sm:$0xff]   ;;  %v3272_v28 = vld [vmem:[#allocation5 + $0x668] ss:$16 sps:$4 sm:$0xff]  }
  0xca   :  { %2033 = vmatprep.subr.bf16.mxu0 %v3181_v29  ;;  %2298 = vmatprep.subr.bf16.mxu1 %v3184_v30  ;;  %v3277_v29 = vld [vmem:[#allocation5 + $0x684] ss:$16 sps:$4 sm:$0xff]   ;;  %v3280_v30 = vld [vmem:[#allocation5 + $0x68c] ss:$16 sps:$4 sm:$0xff]  }
  0xcd   :  { %2034 = vmatpush1.bf16.msra.mxu0 %v3179_v31  ;;  %2299 = vmatpush1.bf16.msra.mxu1 %v3182_v32  ;;  %v3275_v31 = vld [vmem:[#allocation5 + $0x680] ss:$16 sps:$4 sm:$0xff]   ;;  %v3278_v32 = vld [vmem:[#allocation5 + $0x688] ss:$16 sps:$4 sm:$0xff]  }
  0xce   :  { %2035 = vmatprep.subr.bf16.mxu0 %v3187_v33  ;;  %2300 = vmatprep.subr.bf16.mxu1 %v3190_v34  ;;  %v3283_v33 = vld [vmem:[#allocation5 + $0x6a4] ss:$16 sps:$4 sm:$0xff]   ;;  %v3286_v34 = vld [vmem:[#allocation5 + $0x6ac] ss:$16 sps:$4 sm:$0xff]  }
  0xd1   :  { %2036 = vmatpush1.bf16.msra.mxu0 %v3185_v35  ;;  %2301 = vmatpush1.bf16.msra.mxu1 %v3188_v36  ;;  %v3281_v35 = vld [vmem:[#allocation5 + $0x6a0] ss:$16 sps:$4 sm:$0xff]   ;;  %v3284_v36 = vld [vmem:[#allocation5 + $0x6a8] ss:$16 sps:$4 sm:$0xff]  }
  0xd2   :  { %2037 = vmatprep.subr.bf16.mxu0 %v3193_v37  ;;  %2302 = vmatprep.subr.bf16.mxu1 %v3196_v38  ;;  %v3289_v37 = vld [vmem:[#allocation5 + $0x6c4] ss:$16 sps:$4 sm:$0xff]   ;;  %v3292_v38 = vld [vmem:[#allocation5 + $0x6cc] ss:$16 sps:$4 sm:$0xff]  }
  0xd5   :  { %2038 = vmatpush1.bf16.msra.mxu0 %v3191_v39  ;;  %2303 = vmatpush1.bf16.msra.mxu1 %v3194_v40  ;;  %v3287_v39 = vld [vmem:[#allocation5 + $0x6c0] ss:$16 sps:$4 sm:$0xff]   ;;  %v3290_v40 = vld [vmem:[#allocation5 + $0x6c8] ss:$16 sps:$4 sm:$0xff]  }
  0xd6   :  { %2039 = vmatprep.subr.bf16.mxu0 %v3199_v41  ;;  %2304 = vmatprep.subr.bf16.mxu1 %v3202_v42  ;;  %v3295_v41 = vld [vmem:[#allocation5 + $0x6e4] ss:$16 sps:$4 sm:$0xff]   ;;  %v3298_v42 = vld [vmem:[#allocation5 + $0x6ec] ss:$16 sps:$4 sm:$0xff]  }
  0xd9   :  { %2040 = vmatpush1.bf16.msra.mxu0 %v3197_v43  ;;  %2305 = vmatpush1.bf16.msra.mxu1 %v3200_v44  ;;  %v3293_v43 = vld [vmem:[#allocation5 + $0x6e0] ss:$16 sps:$4 sm:$0xff]   ;;  %v3296_v44 = vld [vmem:[#allocation5 + $0x6e8] ss:$16 sps:$4 sm:$0xff]  }
  0xda   :  { %2041 = vmatprep.subr.bf16.mxu0 %v3205_v45  ;;  %2306 = vmatprep.subr.bf16.mxu1 %v3208_v46  ;;  %v3301_v45 = vld [vmem:[#allocation5 + $0x704] ss:$16 sps:$4 sm:$0xff]   ;;  %v3304_v46 = vld [vmem:[#allocation5 + $0x70c] ss:$16 sps:$4 sm:$0xff]  }
  0xdd   :  { %2042 = vmatpush1.bf16.msra.mxu0 %v3203_v47  ;;  %2307 = vmatpush1.bf16.msra.mxu1 %v3206_v48  ;;  %v3299_v47 = vld [vmem:[#allocation5 + $0x700] ss:$16 sps:$4 sm:$0xff]   ;;  %v3302_v48 = vld [vmem:[#allocation5 + $0x708] ss:$16 sps:$4 sm:$0xff]  }
  0xde   :  { %2043 = vmatprep.subr.bf16.mxu0 %v3211_v49  ;;  %2308 = vmatprep.subr.bf16.mxu1 %v3214_v50  ;;  %v3307_v49 = vld [vmem:[#allocation5 + $0x724] ss:$16 sps:$4 sm:$0xff]   ;;  %v3310_v50 = vld [vmem:[#allocation5 + $0x72c] ss:$16 sps:$4 sm:$0xff]  }
  0xe1   :  { %2044 = vmatpush1.bf16.msra.mxu0 %v3209_v51  ;;  %2309 = vmatpush1.bf16.msra.mxu1 %v3212_v52  ;;  %v3305_v51 = vld [vmem:[#allocation5 + $0x720] ss:$16 sps:$4 sm:$0xff]   ;;  %v3308_v52 = vld [vmem:[#allocation5 + $0x728] ss:$16 sps:$4 sm:$0xff]  }
  0xe2   :  { %2045 = vmatprep.subr.bf16.mxu0 %v3217_v53  ;;  %2310 = vmatprep.subr.bf16.mxu1 %v3220_v54  ;;  %v3313_v53 = vld [vmem:[#allocation5 + $0x744] ss:$16 sps:$4 sm:$0xff]   ;;  %v3316_v54 = vld [vmem:[#allocation5 + $0x74c] ss:$16 sps:$4 sm:$0xff]  }
  0xe5   :  { %2046 = vmatpush1.bf16.msra.mxu0 %v3215_v55  ;;  %2311 = vmatpush1.bf16.msra.mxu1 %v3218_v56  ;;  %v3311_v55 = vld [vmem:[#allocation5 + $0x740] ss:$16 sps:$4 sm:$0xff]   ;;  %v3314_v56 = vld [vmem:[#allocation5 + $0x748] ss:$16 sps:$4 sm:$0xff]  }
  0xe6   :  { %2047 = vmatprep.subr.bf16.mxu0 %v3223_v57  ;;  %2312 = vmatprep.subr.bf16.mxu1 %v3226_v58  ;;  %v3319_v57 = vld [vmem:[#allocation5 + $0x764] ss:$16 sps:$4 sm:$0xff]   ;;  %v3322_v58 = vld [vmem:[#allocation5 + $0x76c] ss:$16 sps:$4 sm:$0xff]  }
  0xe9   :  { %2048 = vmatpush1.bf16.msra.mxu0 %v3221_v59  ;;  %2313 = vmatpush1.bf16.msra.mxu1 %v3224_v60  ;;  %v3317_v59 = vld [vmem:[#allocation5 + $0x760] ss:$16 sps:$4 sm:$0xff]   ;;  %v3320_v60 = vld [vmem:[#allocation5 + $0x768] ss:$16 sps:$4 sm:$0xff]  }
  0xea   :  { %2049 = vmatprep.subr.bf16.mxu0 %v3229_v61  ;;  %2314 = vmatprep.subr.bf16.mxu1 %v3232_v62  ;;  %v3325_v61 = vld [vmem:[#allocation5 + $0x784] ss:$16 sps:$4 sm:$0xff]   ;;  %v3328_v62 = vld [vmem:[#allocation5 + $0x78c] ss:$16 sps:$4 sm:$0xff]  }
  0xed   :  { %2050 = vmatpush1.bf16.msra.mxu0 %v3227_v63  ;;  %2315 = vmatpush1.bf16.msra.mxu1 %v3230_v0  ;;  %v3323_v63 = vld [vmem:[#allocation5 + $0x780] ss:$16 sps:$4 sm:$0xff]   ;;  %v3326_v0 = vld [vmem:[#allocation5 + $0x788] ss:$16 sps:$4 sm:$0xff]  }
  0xee   :  { %2051 = vmatprep.subr.bf16.mxu0 %v3237_v1  ;;  %2316 = vmatprep.subr.bf16.mxu1 %v3240_v2  ;;  %v3331_v1 = vld [vmem:[#allocation5 + $0x7a4] ss:$16 sps:$4 sm:$0xff]   ;;  %v3334_v2 = vld [vmem:[#allocation5 + $0x7ac] ss:$16 sps:$4 sm:$0xff]  }
  0xf1   :  { %2052 = vmatpush1.bf16.msra.mxu0 %v3235_v3  ;;  %2317 = vmatpush1.bf16.msra.mxu1 %v3238_v4  ;;  %v3329_v3 = vld [vmem:[#allocation5 + $0x7a0] ss:$16 sps:$4 sm:$0xff]   ;;  %v3332_v4 = vld [vmem:[#allocation5 + $0x7a8] ss:$16 sps:$4 sm:$0xff]  }
  0xf2   :  { %2053 = vmatprep.subr.bf16.mxu0 %v3244_v5  ;;  %2318 = vmatprep.subr.bf16.mxu1 %v3247_v6  ;;  %v3339_v5 = vld [vmem:[#allocation5 + $0x7c4] ss:$16 sps:$4 sm:$0xff]   ;;  %v3342_v6 = vld [vmem:[#allocation5 + $0x7cc] ss:$16 sps:$4 sm:$0xff]  }
  0xf5   :  { %2054 = vmatpush1.bf16.msra.mxu0 %v3242_v7  ;;  %2319 = vmatpush1.bf16.msra.mxu1 %v3245_v8  ;;  %v3337_v7 = vld [vmem:[#allocation5 + $0x7c0] ss:$16 sps:$4 sm:$0xff]   ;;  %v3340_v8 = vld [vmem:[#allocation5 + $0x7c8] ss:$16 sps:$4 sm:$0xff]  }
  0xf6   :  { %2076 = vmatprep.subr.bf16.mxu0 %v3253_v9  ;;  %2341 = vmatprep.subr.bf16.mxu1 %v3256_v10  ;;  %v3346_v9 = vld [vmem:[#allocation5 + $0x7e4] ss:$16 sps:$4 sm:$0xff]   ;;  %v3349_v10 = vld [vmem:[#allocation5 + $0x7ec] ss:$16 sps:$4 sm:$0xff]  }
  0xf8   :  { %2056 = vmatmul.mubr.bf16.vlgmr.msra.gmra.mrb[0].mxu0 %v3248_v11  ;;  %2321 = vmatmul.mubr.bf16.vlgmr.msra.gmra.mrb[0].mxu1 %v3248_v11  ;;  %v3344_v11 = vld [vmem:[#allocation5 + $0x7e0] ss:$16 sps:$4 sm:$0xff]  }
  0xf9   :  { %2077 = vmatpush1.bf16.msra.mxu0 %v3251_v12  ;;  %2342 = vmatpush1.bf16.msra.mxu1 %v3254_v13  ;;  %v3347_v12 = vld [vmem:[#allocation5 + $0x7e8] ss:$16 sps:$4 sm:$0xff]   ;;  %v3355_v13 = vld [vmem:[#allocation5 + $0x804] ss:$16 sps:$4 sm:$0xff]  }
  0xfa   :  { %2078 = vmatprep.subr.bf16.mxu0 %v3259_v14  ;;  %2343 = vmatprep.subr.bf16.mxu1 %v3262_v15  ;;  %v3358_v14 = vld [vmem:[#allocation5 + $0x80c] ss:$16 sps:$4 sm:$0xff]  }
  0xfb   :  { %2065 = vmatprep.mubr.bf16.mxu0 %v3335_v16  ;;  %2330 = vmatprep.mubr.bf16.mxu1 %v3335_v16  ;;  %v3350_v15 = vld [vmem:[#allocation2 + $0x18] ss:$36 sps:$4 sm:$0xff]   ;;  %v3353_v16 = vld [vmem:[#allocation5 + $0x800] ss:$16 sps:$4 sm:$0xff]  }
  0xfd   :  { %2079 = vmatpush1.bf16.msra.mxu0 %v3257_v17  ;;  %2344 = vmatpush1.bf16.msra.mxu1 %v3260_v18  ;;  %v3356_v17 = vld [vmem:[#allocation5 + $0x808] ss:$16 sps:$4 sm:$0xff]   ;;  %v3361_v18 = vld [vmem:[#allocation5 + $0x824] ss:$16 sps:$4 sm:$0xff]  }
  0xfe   :  { %2080 = vmatprep.subr.bf16.mxu0 %v3265_v19  ;;  %2345 = vmatprep.subr.bf16.mxu1 %v3268_v20  ;;  %v3364_v19 = vld [vmem:[#allocation5 + $0x82c] ss:$16 sps:$4 sm:$0xff]   ;;  %v3389_v20 = vld [vmem:[#allocation2 + $0x64] ss:$36 sps:$4 sm:$0xff]  }
 0x100   :  { %2066 = vmatmul.mubr.bf16.gmra.mrb[4].mxu0 %v3343_v23  ;;  %2331 = vmatmul.mubr.bf16.gmra.mrb[4].mxu1 %v3343_v23  ;;  %v3367_v23 = vld [vmem:[#allocation5 + $0x844] ss:$16 sps:$4 sm:$0xff]  }
 0x101   :  { %2081 = vmatpush1.bf16.msra.mxu0 %v3263_v21  ;;  %2346 = vmatpush1.bf16.msra.mxu1 %v3266_v22  ;;  %v3359_v21 = vld [vmem:[#allocation5 + $0x820] ss:$16 sps:$4 sm:$0xff]   ;;  %v3362_v22 = vld [vmem:[#allocation5 + $0x828] ss:$16 sps:$4 sm:$0xff]  }
 0x102   :  { %2082 = vmatprep.subr.bf16.mxu0 %v3271_v24  ;;  %2347 = vmatprep.subr.bf16.mxu1 %v3274_v25  ;;  %v3370_v24 = vld [vmem:[#allocation5 + $0x84c] ss:$16 sps:$4 sm:$0xff]   ;;  %v3391_v25 = vld [vmem:[#allocation2 + $0x60] ss:$36 sps:$4 sm:$0xff]  }
 0x103   :  { %2108 = vmatprep.mubr.bf16.mxu0 %v3352_v26  ;;  %2373 = vmatprep.mubr.bf16.mxu1 %v3352_v26  ;;  %v3365_v26 = vld [vmem:[#allocation5 + $0x840] ss:$16 sps:$4 sm:$0xff]  }
 0x105   :  { %2083 = vmatpush1.bf16.msra.mxu0 %v3269_v27  ;;  %2348 = vmatpush1.bf16.msra.mxu1 %v3272_v28  ;;  %v3368_v27 = vld [vmem:[#allocation5 + $0x848] ss:$16 sps:$4 sm:$0xff]   ;;  %v3373_v28 = vld [vmem:[#allocation5 + $0x864] ss:$16 sps:$4 sm:$0xff]  }
 0x106   :  { %2084 = vmatprep.subr.bf16.mxu0 %v3277_v29  ;;  %2349 = vmatprep.subr.bf16.mxu1 %v3280_v30  ;;  %v3376_v29 = vld [vmem:[#allocation5 + $0x86c] ss:$16 sps:$4 sm:$0xff]   ;;  %v3371_v30 = vld [vmem:[#allocation5 + $0x860] ss:$16 sps:$4 sm:$0xff]  }
 0x109   :  { %2085 = vmatpush1.bf16.msra.mxu0 %v3275_v31  ;;  %2350 = vmatpush1.bf16.msra.mxu1 %v3278_v32  ;;  %v3374_v31 = vld [vmem:[#allocation5 + $0x868] ss:$16 sps:$4 sm:$0xff]   ;;  %v3379_v32 = vld [vmem:[#allocation5 + $0x884] ss:$16 sps:$4 sm:$0xff]  }
 0x10a   :  { %2086 = vmatprep.subr.bf16.mxu0 %v3283_v33  ;;  %2351 = vmatprep.subr.bf16.mxu1 %v3286_v34  ;;  %v3382_v33 = vld [vmem:[#allocation5 + $0x88c] ss:$16 sps:$4 sm:$0xff]   ;;  %v3507_v34 = vmov 0  }
 0x10d   :  { %2087 = vmatpush1.bf16.msra.mxu0 %v3281_v35  ;;  %2352 = vmatpush1.bf16.msra.mxu1 %v3284_v36  ;;  %v3377_v35 = vld [vmem:[#allocation5 + $0x880] ss:$16 sps:$4 sm:$0xff]   ;;  %v3380_v36 = vld [vmem:[#allocation5 + $0x888] ss:$16 sps:$4 sm:$0xff]  }
 0x10e   :  { %2088 = vmatprep.subr.bf16.mxu0 %v3289_v37  ;;  %2353 = vmatprep.subr.bf16.mxu1 %v3292_v38  ;;  %v3385_v37 = vld [vmem:[#allocation5 + $0x8a4] ss:$16 sps:$4 sm:$0xff]   ;;  %v3388_v38 = vld [vmem:[#allocation5 + $0x8ac] ss:$16 sps:$4 sm:$0xff]  }
 0x111   :  { %2089 = vmatpush1.bf16.msra.mxu0 %v3287_v39  ;;  %2354 = vmatpush1.bf16.msra.mxu1 %v3290_v40  ;;  %v3383_v39 = vld [vmem:[#allocation5 + $0x8a0] ss:$16 sps:$4 sm:$0xff]   ;;  %v3386_v40 = vld [vmem:[#allocation5 + $0x8a8] ss:$16 sps:$4 sm:$0xff]  }
 0x112   :  { %2090 = vmatprep.subr.bf16.mxu0 %v3295_v41  ;;  %2355 = vmatprep.subr.bf16.mxu1 %v3298_v42  ;;  %v3394_v41 = vld [vmem:[#allocation5 + $0x8c4] ss:$16 sps:$4 sm:$0xff]   ;;  %v3397_v42 = vld [vmem:[#allocation5 + $0x8cc] ss:$16 sps:$4 sm:$0xff]  }
 0x115   :  { %2091 = vmatpush1.bf16.msra.mxu0 %v3293_v43  ;;  %2356 = vmatpush1.bf16.msra.mxu1 %v3296_v44  ;;  %v3392_v43 = vld [vmem:[#allocation5 + $0x8c0] ss:$16 sps:$4 sm:$0xff]   ;;  %v3395_v44 = vld [vmem:[#allocation5 + $0x8c8] ss:$16 sps:$4 sm:$0xff]  }
 0x116   :  { %2092 = vmatprep.subr.bf16.mxu0 %v3301_v45  ;;  %2357 = vmatprep.subr.bf16.mxu1 %v3304_v46  ;;  %v3400_v45 = vld [vmem:[#allocation5 + $0x8e4] ss:$16 sps:$4 sm:$0xff]   ;;  %v3403_v46 = vld [vmem:[#allocation5 + $0x8ec] ss:$16 sps:$4 sm:$0xff]  }
 0x119   :  { %2093 = vmatpush1.bf16.msra.mxu0 %v3299_v47  ;;  %2358 = vmatpush1.bf16.msra.mxu1 %v3302_v48  ;;  %v3398_v47 = vld [vmem:[#allocation5 + $0x8e0] ss:$16 sps:$4 sm:$0xff]   ;;  %v3401_v48 = vld [vmem:[#allocation5 + $0x8e8] ss:$16 sps:$4 sm:$0xff]  }
 0x11a   :  { %2094 = vmatprep.subr.bf16.mxu0 %v3307_v49  ;;  %2359 = vmatprep.subr.bf16.mxu1 %v3310_v50  ;;  %v3404_v49 = vld [vmem:[#allocation2 + $0x20] ss:$36 sps:$4 sm:$0xff]   ;;  %v3405_v50 = vld [vmem:[#allocation2 + $0x68] ss:$36 sps:$4 sm:$0xff]  }
 0x11d   :  { %2095 = vmatpush1.bf16.msra.mxu0 %v3305_v51  ;;  %2360 = vmatpush1.bf16.msra.mxu1 %v3308_v52  ;;  %v365_v51 = vlaneseq }
 0x11e   :  { %2096 = vmatprep.subr.bf16.mxu0 %v3313_v53  ;;  %2361 = vmatprep.subr.bf16.mxu1 %v3316_v54 }
 0x11f   :  { %v366_v52 = vshrl.u32 %v365_v51, 7 }
 0x121   :  { %2097 = vmatpush1.bf16.msra.mxu0 %v3311_v55  ;;  %2362 = vmatpush1.bf16.msra.mxu1 %v3314_v56  ;;  %v367_v53 = vsub.s32 0, %v366_v52  ;;  %v375_v54 = vsub.s32 2, %v366_v52  ;;  %v363_v55 = vld [vmem:[#allocation7] sm:$0xf]  ;;  %v371_v56 = vsub.s32 1, %v366_v52 }
 0x122   :  { %2098 = vmatprep.subr.bf16.mxu0 %v3319_v57  ;;  %2363 = vmatprep.subr.bf16.mxu1 %v3322_v58  ;;  %v379_v57 = vsub.s32 3, %v366_v52 }
 0x123   :  { %v368_v58 = vrot.slane %v363_v55, %v367_v53 }
 0x125   :  { %2099 = vmatpush1.bf16.msra.mxu0 %v3317_v59  ;;  %2364 = vmatpush1.bf16.msra.mxu1 %v3320_v60  ;;  %v376_v59 = vrot.slane %v363_v55, %v375_v54  ;;  %v372_v60 = vrot.slane %v363_v55, %v371_v56 }
 0x126   :  { %2100 = vmatprep.subr.bf16.mxu0 %v3325_v61  ;;  %2365 = vmatprep.subr.bf16.mxu1 %v3328_v62  ;;  %v380_v61 = vrot.slane %v363_v55, %v379_v57 }
 0x129   :  { %2101 = vmatpush1.bf16.msra.mxu0 %v3323_v63  ;;  %2366 = vmatpush1.bf16.msra.mxu1 %v3326_v0 }
 0x12a   :  { %2102 = vmatprep.subr.bf16.mxu0 %v3331_v1  ;;  %2367 = vmatprep.subr.bf16.mxu1 %v3334_v2 }
 0x12d   :  { %2103 = vmatpush1.bf16.msra.mxu0 %v3329_v3  ;;  %2368 = vmatpush1.bf16.msra.mxu1 %v3332_v4 }
 0x12e   :  { %2104 = vmatprep.subr.bf16.mxu0 %v3339_v5  ;;  %2369 = vmatprep.subr.bf16.mxu1 %v3342_v6 }
 0x131   :  { %2105 = vmatpush1.bf16.msra.mxu0 %v3337_v7  ;;  %2370 = vmatpush1.bf16.msra.mxu1 %v3340_v8 }
 0x132   :  { %2106 = vmatprep.subr.bf16.mxu0 %v3346_v9  ;;  %2371 = vmatprep.subr.bf16.mxu1 %v3349_v10 }
 0x135   :  { %2107 = vmatpush1.bf16.msra.mxu0 %v3344_v11  ;;  %2372 = vmatpush1.bf16.msra.mxu1 %v3347_v12 }
 0x136   :  { %2129 = vmatprep.subr.bf16.mxu0 %v3355_v13  ;;  %2394 = vmatprep.subr.bf16.mxu1 %v3358_v14 }
 0x138   :  { %2109 = vmatmul.mubr.bf16.vlgmr.msra.gmra.mrb[0].mxu0 %v3350_v15  ;;  %2374 = vmatmul.mubr.bf16.vlgmr.msra.gmra.mrb[0].mxu1 %v3350_v15 }
 0x139   :  { %2130 = vmatpush1.bf16.msra.mxu0 %v3353_v16  ;;  %2395 = vmatpush1.bf16.msra.mxu1 %v3356_v17 }
 0x13a   :  { %2131 = vmatprep.subr.bf16.mxu0 %v3361_v18  ;;  %2396 = vmatprep.subr.bf16.mxu1 %v3364_v19 }
 0x13b   :  { %2118 = vmatprep.mubr.bf16.mxu0 %v3389_v20  ;;  %2383 = vmatprep.mubr.bf16.mxu1 %v3389_v20 }
 0x13d   :  { %2132 = vmatpush1.bf16.msra.mxu0 %v3359_v21  ;;  %2397 = vmatpush1.bf16.msra.mxu1 %v3362_v22 }
 0x13e   :  { %2133 = vmatprep.subr.bf16.mxu0 %v3367_v23  ;;  %2398 = vmatprep.subr.bf16.mxu1 %v3370_v24 }
 0x140   :  { %2119 = vmatmul.mubr.bf16.gmra.mrb[4].mxu0 %v3391_v25  ;;  %2384 = vmatmul.mubr.bf16.gmra.mrb[4].mxu1 %v3391_v25 }
 0x141   :  { %2134 = vmatpush1.bf16.msra.mxu0 %v3365_v26  ;;  %2399 = vmatpush1.bf16.msra.mxu1 %v3368_v27 }
 0x142   :  { %2135 = vmatprep.subr.bf16.mxu0 %v3373_v28  ;;  %2400 = vmatprep.subr.bf16.mxu1 %v3376_v29 }
 0x143   :  { %2161 = vmatprep.mubr.bf16.mxu0 %v3507_v34  ;;  %2426 = vmatprep.mubr.bf16.mxu1 %v3507_v34 }
 0x145   :  { %2136 = vmatpush1.bf16.msra.mxu0 %v3371_v30  ;;  %2401 = vmatpush1.bf16.msra.mxu1 %v3374_v31 }
 0x146   :  { %2137 = vmatprep.subr.bf16.mxu0 %v3379_v32  ;;  %2402 = vmatprep.subr.bf16.mxu1 %v3382_v33 }
 0x149   :  { %2138 = vmatpush1.bf16.msra.mxu0 %v3377_v35  ;;  %2403 = vmatpush1.bf16.msra.mxu1 %v3380_v36 }
 0x14a   :  { %2139 = vmatprep.subr.bf16.mxu0 %v3385_v37  ;;  %2404 = vmatprep.subr.bf16.mxu1 %v3388_v38 }
 0x14d   :  { %2140 = vmatpush1.bf16.msra.mxu0 %v3383_v39  ;;  %2405 = vmatpush1.bf16.msra.mxu1 %v3386_v40 }
 0x14e   :  { %2141 = vmatprep.subr.bf16.mxu0 %v3394_v41  ;;  %2406 = vmatprep.subr.bf16.mxu1 %v3397_v42 }
 0x151   :  { %2142 = vmatpush1.bf16.msra.mxu0 %v3392_v43  ;;  %2407 = vmatpush1.bf16.msra.mxu1 %v3395_v44 }
 0x152   :  { %2143 = vmatprep.subr.bf16.mxu0 %v3400_v45  ;;  %2408 = vmatprep.subr.bf16.mxu1 %v3403_v46 }
 0x155   :  { %2144 = vmatpush1.bf16.msra.mxu0 %v3398_v47  ;;  %2409 = vmatpush1.bf16.msra.mxu1 %v3401_v48 }
 0x158   :  { %2162 = vmatmul.mubr.bf16.vlgmr.msra.gmra.mrb[0].mxu0 %v3404_v49  ;;  %2427 = vmatmul.mubr.bf16.vlgmr.msra.gmra.mrb[0].mxu1 %v3404_v49 }
 0x159   :  { %2171 = vmatprep.mubr.bf16.mxu0 %v3507_v34  ;;  %2436 = vmatprep.mubr.bf16.mxu1 %v3507_v34 }
 0x160   :  { %2172 = vmatmul.mubr.bf16.gmra.mrb[4].mxu0 %v3405_v50  ;;  %2437 = vmatmul.mubr.bf16.gmra.mrb[4].mxu1 %v3405_v50 }
 0x22b   :  { %v2163_v62 = vpop.f32.mrb[0].mxu0  ;;  %v2428_v63 = vpop.f32.mrb[0].mxu1 }
 0x22c   :  { %v2859_v0 = vadd.f32 %v2163_v62, %v368_v58  ;;  %v2867_v1 = vadd.f32 %v2428_v63, %v376_v59  ;;  %v2165_v2 = vpop.f32.mrb[1].mxu0  ;;  %v2430_v3 = vpop.f32.mrb[1].mxu1 }
 0x22d   :  { %v2860_v4 = vadd.f32 %v2165_v2, %v372_v60  ;;  %v2868_v5 = vadd.f32 %v2430_v3, %v380_v61  ;;  %v2167_v6 = vpop.f32.mrb[2].mxu0  ;;  %v2432_v7 = vpop.f32.mrb[2].mxu1 }
 0x22e   :  { %v2447_v8 = vmax.f32 %v2859_v0, 0.0  ;;  %v2449_v9 = vmax.f32 %v2867_v1, 0.0  ;;  %v2861_v10 = vadd.f32 %v2167_v6, %v368_v58  ;;  %v2869_v11 = vadd.f32 %v2432_v7, %v376_v59  ;;  %v2169_v12 = vpop.f32.mrb[3].mxu0  ;;  %v2434_v13 = vpop.f32.mrb[3].mxu1 }
 0x22f   :  { %v2448_v14 = vmax.f32 %v2860_v4, 0.0  ;;  %v2450_v15 = vmax.f32 %v2868_v5, 0.0  ;;  %v2862_v16 = vadd.f32 %v2169_v12, %v372_v60  ;;  %v2870_v17 = vadd.f32 %v2434_v13, %v380_v61 }
 0x230   :  { %v2451_v18 = vmax.f32 %v2861_v10, 0.0  ;;  %v2453_v19 = vmax.f32 %v2869_v11, 0.0 }
 0x231   :  { %v2851_v20 = vpack.c.bf16 %v2448_v14, %v2447_v8  ;;  %v2852_v21 = vpack.c.bf16 %v2450_v15, %v2449_v9  ;;  %v2452_v22 = vmax.f32 %v2862_v16, 0.0  ;;  %v2454_v23 = vmax.f32 %v2870_v17, 0.0 }
 0x233   :  { %2511 = vst [vmem:[#allocation8] sm:$0xff] %v2851_v20  ;;  %2512 = vst [vmem:[#allocation8 + $0x8] sm:$0xff] %v2852_v21  ;;  %v2853_v24 = vpack.c.bf16 %v2452_v22, %v2451_v18  ;;  %v2854_v25 = vpack.c.bf16 %v2454_v23, %v2453_v19  ;;  %v2173_v26 = vpop.f32.mrb[4].mxu0  ;;  %v2438_v27 = vpop.f32.mrb[4].mxu1 }
 0x234   :  { %v2863_v28 = vadd.f32 %v2173_v26, %v368_v58  ;;  %v2871_v29 = vadd.f32 %v2438_v27, %v376_v59  ;;  %v2175_v30 = vpop.f32.mrb[5].mxu0  ;;  %v2440_v31 = vpop.f32.mrb[5].mxu1 }
 0x235   :  { %2513 = vst [vmem:[#allocation8 + $0x10] sm:$0xff] %v2853_v24  ;;  %2514 = vst [vmem:[#allocation8 + $0x18] sm:$0xff] %v2854_v25  ;;  %v2864_v32 = vadd.f32 %v2175_v30, %v372_v60  ;;  %v2872_v33 = vadd.f32 %v2440_v31, %v380_v61  ;;  %v2177_v34 = vpop.f32.mrb[6].mxu0  ;;  %v2442_v35 = vpop.f32.mrb[6].mxu1 }
 0x236   :  { %v2455_v36 = vmax.f32 %v2863_v28, 0.0  ;;  %v2457_v37 = vmax.f32 %v2871_v29, 0.0  ;;  %v2865_v38 = vadd.f32 %v2177_v34, %v368_v58  ;;  %v2873_v39 = vadd.f32 %v2442_v35, %v376_v59  ;;  %v2179_v40 = vpop.f32.mrb[7].mxu0  ;;  %v2444_v41 = vpop.f32.mrb[7].mxu1 }
 0x237   :  { %v2456_v42 = vmax.f32 %v2864_v32, 0.0  ;;  %v2458_v43 = vmax.f32 %v2872_v33, 0.0  ;;  %v2866_v44 = vadd.f32 %v2179_v40, %v372_v60  ;;  %v2874_v45 = vadd.f32 %v2444_v41, %v380_v61 }
 0x238   :  { %v2459_v46 = vmax.f32 %v2865_v38, 0.0  ;;  %v2461_v47 = vmax.f32 %v2873_v39, 0.0 }
 0x239   :  { %v2855_v48 = vpack.c.bf16 %v2456_v42, %v2455_v36  ;;  %v2856_v49 = vpack.c.bf16 %v2458_v43, %v2457_v37  ;;  %v2460_v50 = vmax.f32 %v2866_v44, 0.0  ;;  %v2462_v51 = vmax.f32 %v2874_v45, 0.0 }
 0x23b   :  { %2515 = vst [vmem:[#allocation8 + $0x20] sm:$0xff] %v2855_v48  ;;  %2516 = vst [vmem:[#allocation8 + $0x28] sm:$0xff] %v2856_v49  ;;  %v2857_v52 = vpack.c.bf16 %v2460_v50, %v2459_v46  ;;  %v2858_v53 = vpack.c.bf16 %v2462_v51, %v2461_v47 }
 0x23d   :  { %2517 = vst [vmem:[#allocation8 + $0x30] sm:$0xff] %v2857_v52  ;;  %2518 = vst [vmem:[#allocation8 + $0x38] sm:$0xff] %v2858_v53 }
 0x23e   :  { %3483 = shalt.err (!%p3480_p0)
}
 0x23f   :  { %s3484_s29 = scalar_lea.hbm %s3586_s3, 1024 }
 0x240   :  { %p3485_p1 = scmp.ne.s32.totalorder %s3586_s3, %s3484_s29  ;;  %p3488_p2 = scmp.lt.u32.totalorder %s3484_s29, %s3586_s3 }
 0x242   :  { %p3490_p3 = pnand %p3488_p2, %p3485_p1 }
 0x244   :  { %3493 = shalt.err (!%p3490_p3)
}
 0x245   :  { %2530 = dma.vmem_to_hbm [thread:$0]  %s2525_s25, 1024, %s3586_s3, [#allocation4], %s3501_s22, %s3501_s22, %s3502_s23  }
 0x246   :  { %3498 = dma.done.wait [#allocation4], 1024  }
 0x247   :  { %3499 = vsyncadd [#allocation4], 4294966272 }
 0x248   :  { %2534 = vsyncpa [#allocation3], 1 }
 0x249   :  { %2535 = vsyncpa [#allocation6], 1 }
 0x24a   :  { %2536 = vsyncpa [#allocation4], 1 }

// kernel: vqvae1_forward.21
= control target key start
LH: loop header
LB: loop body
LE: loop exit
PB: predicated region body
PF: predicated region fallthrough
CT: control target
= control target key end

     0   :  { %8 = vsyncpa [#allocation3], 0  ;;  %s2524_s0 = inlined_call_operand.hbm [shape: bf16[128,1152], index: 0, kind: input, shape index: {}]   ;;  %s2525_s1 = inlined_call_operand.hbm [shape: bf16[1152,128], index: 1, kind: input, shape index: {}]   ;;  %s2526_s2 = inlined_call_operand.hbm [shape: f32[1,128], index: 2, kind: input, shape index: {}]   ;;  %s2527_s3 = inlined_call_operand.hbm [shape: f32[128,128], index: 3, kind: output, shape index: {}]  }
   0x1   :  { %9 = vsyncpa [#allocation6], 0 }
   0x2   :  { %10 = vsyncpa [#allocation4], 0  ;;  %s2350_s12 = smov [#allocation5]   ;;  %s2256_s16 = scalar_lea.hbm %s2525_s1, 9216 }
   0x3   :  { %s28_s13 = sshll.u32 %s2350_s12, 4  ;;  %p2257_p0 = scmp.ne.s32.totalorder %s2525_s1, %s2256_s16  ;;  %s29_s13 = int_to_ptr.vmem [resolvable:$true] %s28_s13 }
   0x4   :  { %p2260_p1 = scmp.lt.u32.totalorder %s2256_s16, %s2525_s1 }
   0x6   :  { %p2262_p2 = pnand %p2260_p1, %p2257_p0 }
   0x8   :  { %2265 = shalt.err (!%p2262_p2)
}
   0x9   :  { %s2266_s21 = scalar_lea.vmem %s29_s13, 9216  ;;  %p2271_p4 = scmp.lt.s32.totalorder %s29_s13, %s29_s13 }
   0xa   :  { %p2267_p3 = scmp.ne.s32.totalorder %s29_s13, %s2266_s21  ;;  %p2272_p5 = scmp.lt.s32.totalorder %s2266_s21, %s2266_s21 }
   0xc   :  { %p2273_p6 = por %p2272_p5, %p2271_p4 }
   0xe   :  { %p2274_p7 = pnand %p2273_p6, %p2267_p3 }
  0x10   :  { %2277 = shalt.err (!%p2274_p7)
}
  0x11   :  { %s2351_s22 = smov 64   ;;  %s2352_s23 = smov 4  }
  0x12   :  { %34 = dma.hbm_to_vmem [thread:$0]  %s2525_s1, 9216, %s29_s13, [#allocation6], %s2351_s22, %s2351_s22, %s2352_s23  }
  0x13   :  { %s2353_s26 = smov [#allocation2]   ;;  %s2278_s30 = scalar_lea.hbm %s2524_s0, 9216 }
  0x14   :  { %s16_s27 = sshll.u32 %s2353_s26, 4  ;;  %p2279_p8 = scmp.ne.s32.totalorder %s2524_s0, %s2278_s30  ;;  %s17_s27 = int_to_ptr.vmem [resolvable:$true] %s16_s27 }
  0x15   :  { %p2282_p9 = scmp.lt.u32.totalorder %s2278_s30, %s2524_s0 }
  0x17   :  { %p2284_p10 = pnand %p2282_p9, %p2279_p8 }
  0x19   :  { %2287 = shalt.err (!%p2284_p10)
}
  0x1a   :  { %s2288_s8 = scalar_lea.vmem %s17_s27, 9216  ;;  %p2293_p12 = scmp.lt.s32.totalorder %s17_s27, %s17_s27 }
  0x1b   :  { %p2289_p11 = scmp.ne.s32.totalorder %s17_s27, %s2288_s8  ;;  %p2294_p13 = scmp.lt.s32.totalorder %s2288_s8, %s2288_s8 }
  0x1d   :  { %p2295_p0 = por %p2294_p13, %p2293_p12 }
  0x1f   :  { %p2296_p1 = pnand %p2295_p0, %p2289_p11 }
  0x21   :  { %2299 = shalt.err (!%p2296_p1)
}
  0x22   :  { %s2354_s1 = smov 576   ;;  %s2355_s9 = smov 36  }
  0x23   :  { %22 = dma.hbm_to_vmem [thread:$0]  %s2524_s0, 9216, %s17_s27, [#allocation3], %s2354_s1, %s2354_s1, %s2355_s9  }
  0x24   :  { %s2356_s12 = smov [#allocation7]   ;;  %s2300_s16 = scalar_lea.hbm %s2526_s2, 16 }
  0x25   :  { %s41_s13 = sshll.u32 %s2356_s12, 4  ;;  %p2301_p2 = scmp.ne.s32.totalorder %s2526_s2, %s2300_s16  ;;  %s42_s13 = int_to_ptr.vmem [resolvable:$true] %s41_s13 }
  0x26   :  { %p2304_p3 = scmp.lt.u32.totalorder %s2300_s16, %s2526_s2 }
  0x28   :  { %p2306_p4 = pnand %p2304_p3, %p2301_p2 }
  0x2a   :  { %2309 = shalt.err (!%p2306_p4)
}
  0x2b   :  { %s2310_s21 = scalar_lea.vmem %s42_s13, 16  ;;  %s2314_s0 = scalar_lea.vmem %s42_s13, 32 }
  0x2c   :  { %p2311_p5 = scmp.ne.s32.totalorder %s42_s13, %s2310_s21  ;;  %p2315_p6 = scmp.lt.s32.totalorder %s42_s13, %s42_s13 }
  0x2d   :  { %p2316_p7 = scmp.lt.s32.totalorder %s2314_s0, %s2310_s21 }
  0x2f   :  { %p2317_p8 = por %p2316_p7, %p2315_p6 }
  0x31   :  { %p2318_p9 = pnand %p2317_p8, %p2311_p5 }
  0x33   :  { %2321 = shalt.err (!%p2318_p9)
}
  0x34   :  { %44 = dma.hbm_to_vmem [thread:$0]  %s2526_s2, 16, %s42_s13, [#allocation6]  }
  0x35   :  { %2344 = dma.done.wait [#allocation3], 9216  }
  0x36   :  { %2345 = vsyncadd [#allocation3], 4294958080 }
  0x37   :  { %2346 = dma.done.wait [#allocation6], 9232  }
  0x38   :  { %2347 = vsyncadd [#allocation6], 4294958064  ;;  %v2080_v0 = vld [vmem:[#allocation5 + $0x40] sm:$0xff]   ;;  %v2084_v4 = vld [vmem:[#allocation5 + $0x48] sm:$0xff]   ;;  %s2357_s2 = smov [#allocation8]  }
  0x39   :  { %v2081_v1 = vld [vmem:[#allocation5 + $0xc0] sm:$0xff]   ;;  %1750 = vmatprep.subr.bf16.mxu0 %v2080_v0  ;;  %v2085_v5 = vld [vmem:[#allocation5 + $0xc8] sm:$0xff]   ;;  %v2088_v8 = vld [vmem:[#allocation5 + $0x50] sm:$0xff]   ;;  %s1592_s24 = sshll.u32 %s2357_s2, 4  ;;  %s1593_s24 = int_to_ptr.vmem [resolvable:$true] %s1592_s24 }
  0x3a   :  { %v2082_v2 = vld [vmem:[#allocation5] sm:$0xff]   ;;  %1814 = vmatprep.subr.bf16.mxu1 %v2081_v1  ;;  %v2086_v6 = vld [vmem:[#allocation5 + $0x8] sm:$0xff]   ;;  %v2089_v9 = vld [vmem:[#allocation5 + $0xd0] sm:$0xff]   ;;  %s2322_s25 = scalar_lea.vmem %s1593_s24, 2048  ;;  %p2327_p11 = scmp.lt.s32.totalorder %s1593_s24, %s1593_s24 }
  0x3b   :  { %v2083_v3 = vld [vmem:[#allocation5 + $0x80] sm:$0xff]   ;;  %1751 = vmatpush3.bf16.msra.mxu0 %v2082_v2  ;;  %v2087_v7 = vld [vmem:[#allocation5 + $0x88] sm:$0xff]   ;;  %v2090_v10 = vld [vmem:[#allocation5 + $0x10] sm:$0xff]   ;;  %p2323_p10 = scmp.ne.s32.totalorder %s1593_s24, %s2322_s25  ;;  %p2328_p12 = scmp.lt.s32.totalorder %s2322_s25, %s2322_s25 }
  0x3c   :  { %1815 = vmatpush3.bf16.msra.mxu1 %v2083_v3  ;;  %1752 = vmatprep.subr.bf16.mxu0 %v2084_v4  ;;  %v2091_v11 = vld [vmem:[#allocation5 + $0x90] sm:$0xff]   ;;  %v2092_v12 = vld [vmem:[#allocation5 + $0x58] sm:$0xff]   ;;  %v2096_v16 = vld [vmem:[#allocation5 + $0x60] sm:$0xff]  }
  0x3d   :  { %1816 = vmatprep.subr.bf16.mxu1 %v2085_v5  ;;  %v2093_v13 = vld [vmem:[#allocation5 + $0xd8] sm:$0xff]   ;;  %v2097_v17 = vld [vmem:[#allocation5 + $0xe0] sm:$0xff]   ;;  %v2100_v20 = vld [vmem:[#allocation5 + $0x68] sm:$0xff]   ;;  %p2329_p13 = por %p2328_p12, %p2327_p11 }
  0x3e   :  { %v2094_v14 = vld [vmem:[#allocation5 + $0x18] sm:$0xff]   ;;  %v2098_v18 = vld [vmem:[#allocation5 + $0x20] sm:$0xff]   ;;  %v2101_v21 = vld [vmem:[#allocation5 + $0xe8] sm:$0xff]  }
  0x3f   :  { %1753 = vmatpush3.bf16.msra.mxu0 %v2086_v6  ;;  %v2095_v15 = vld [vmem:[#allocation5 + $0x98] sm:$0xff]   ;;  %v2099_v19 = vld [vmem:[#allocation5 + $0xa0] sm:$0xff]   ;;  %v2102_v22 = vld [vmem:[#allocation5 + $0x28] sm:$0xff]   ;;  %p2330_p0 = pnand %p2329_p13, %p2323_p10 }
  0x40   :  { %1817 = vmatpush3.bf16.msra.mxu1 %v2087_v7  ;;  %1754 = vmatprep.subr.bf16.mxu0 %v2088_v8  ;;  %v2103_v23 = vld [vmem:[#allocation5 + $0xa8] sm:$0xff]   ;;  %v2104_v24 = vld [vmem:[#allocation5 + $0x70] sm:$0xff]   ;;  %v2108_v28 = vld [vmem:[#allocation5 + $0x78] sm:$0xff]  }
  0x41   :  { %1818 = vmatprep.subr.bf16.mxu1 %v2089_v9  ;;  %v2105_v25 = vld [vmem:[#allocation5 + $0xf0] sm:$0xff]   ;;  %v2109_v29 = vld [vmem:[#allocation5 + $0xf8] sm:$0xff]   ;;  %v2112_v32 = vld [vmem:[#allocation2] ss:$36 sps:$4 sm:$0xff]  }
  0x42   :  { %v2106_v26 = vld [vmem:[#allocation5 + $0x30] sm:$0xff]   ;;  %v2110_v30 = vld [vmem:[#allocation5 + $0x38] sm:$0xff]   ;;  %v2114_v33 = vld [vmem:[#allocation2 + $0x4] ss:$36 sps:$4 sm:$0xff]  }
  0x43   :  { %1755 = vmatpush3.bf16.msra.mxu0 %v2090_v10  ;;  %v2107_v27 = vld [vmem:[#allocation5 + $0xb0] sm:$0xff]   ;;  %v2111_v31 = vld [vmem:[#allocation5 + $0xb8] sm:$0xff]   ;;  %v2115_v34 = vld [vmem:[#allocation2 + $0x8] ss:$36 sps:$4 sm:$0xff]   ;;  %1118 = vmatprep.mubr.bf16.mxu0 %v2114_v33 }
  0x44   :  { %1819 = vmatpush3.bf16.msra.mxu1 %v2091_v11  ;;  %1756 = vmatprep.subr.bf16.mxu0 %v2092_v12  ;;  %v2117_v35 = vld [vmem:[#allocation2 + $0xc] ss:$36 sps:$4 sm:$0xff]   ;;  %v2118_v36 = vld [vmem:[#allocation5 + $0x140] sm:$0xff]   ;;  %v2124_v41 = vld [vmem:[#allocation2 + $0x54] ss:$36 sps:$4 sm:$0xff]  }
  0x45   :  { %1820 = vmatprep.subr.bf16.mxu1 %v2093_v13  ;;  %1215 = vmatprep.mubr.bf16.mxu1 %v2117_v35  ;;  %v2119_v37 = vld [vmem:[#allocation5 + $0x1c0] sm:$0xff]   ;;  %v2122_v40 = vld [vmem:[#allocation2 + $0x4c] ss:$36 sps:$4 sm:$0xff]   ;;  %v2132_v48 = vld [vmem:[#allocation2 + $0x94] ss:$36 sps:$4 sm:$0xff]  }
  0x46   :  { %v2120_v38 = vld [vmem:[#allocation5 + $0x100] sm:$0xff]   ;;  %v2126_v42 = vld [vmem:[#allocation2 + $0x48] ss:$36 sps:$4 sm:$0xff]   ;;  %v2127_v43 = vld [vmem:[#allocation2 + $0x50] ss:$36 sps:$4 sm:$0xff]  }
  0x47   :  { %1757 = vmatpush3.bf16.msra.mxu0 %v2094_v14  ;;  %v2121_v39 = vld [vmem:[#allocation5 + $0x180] sm:$0xff]   ;;  %v2128_v44 = vld [vmem:[#allocation5 + $0x148] sm:$0xff]   ;;  %v2136_v50 = vld [vmem:[#allocation2 + $0x90] ss:$36 sps:$4 sm:$0xff]  }
  0x48   :  { %1821 = vmatpush3.bf16.msra.mxu1 %v2095_v15  ;;  %1758 = vmatprep.subr.bf16.mxu0 %v2096_v16  ;;  %v2129_v45 = vld [vmem:[#allocation5 + $0x1c8] sm:$0xff]   ;;  %v2134_v49 = vld [vmem:[#allocation2 + $0x9c] ss:$36 sps:$4 sm:$0xff]   ;;  %v2138_v52 = vld [vmem:[#allocation5 + $0x150] sm:$0xff]  }
  0x49   :  { %1822 = vmatprep.subr.bf16.mxu1 %v2097_v17  ;;  %v2130_v46 = vld [vmem:[#allocation5 + $0x108] sm:$0xff]   ;;  %v2137_v51 = vld [vmem:[#allocation2 + $0x98] ss:$36 sps:$4 sm:$0xff]   ;;  %v2139_v53 = vld [vmem:[#allocation5 + $0x1d0] sm:$0xff]  }
  0x4a   :  { %v2131_v47 = vld [vmem:[#allocation5 + $0x188] sm:$0xff]   ;;  %v2140_v54 = vld [vmem:[#allocation5 + $0x110] sm:$0xff]   ;;  %v2142_v56 = vld [vmem:[#allocation2 + $0xdc] ss:$36 sps:$4 sm:$0xff]  }
  0x4b   :  { %1759 = vmatpush3.bf16.msra.mxu0 %v2098_v18  ;;  %v2141_v55 = vld [vmem:[#allocation5 + $0x190] sm:$0xff]   ;;  %v2144_v57 = vld [vmem:[#allocation2 + $0xe4] ss:$36 sps:$4 sm:$0xff]   ;;  %v2146_v58 = vld [vmem:[#allocation2 + $0xd8] ss:$36 sps:$4 sm:$0xff]  }
  0x4c   :  { %1823 = vmatpush3.bf16.msra.mxu1 %v2099_v19  ;;  %1760 = vmatprep.subr.bf16.mxu0 %v2100_v20  ;;  %v2147_v59 = vld [vmem:[#allocation2 + $0xe0] ss:$36 sps:$4 sm:$0xff]   ;;  %v2148_v60 = vld [vmem:[#allocation5 + $0x158] sm:$0xff]   ;;  %v2154_v1 = vld [vmem:[#allocation2 + $0x12c] ss:$36 sps:$4 sm:$0xff]  }
  0x4d   :  { %1824 = vmatprep.subr.bf16.mxu1 %v2101_v21  ;;  %v2149_v61 = vld [vmem:[#allocation5 + $0x1d8] sm:$0xff]   ;;  %v2152_v0 = vld [vmem:[#allocation2 + $0x124] ss:$36 sps:$4 sm:$0xff]   ;;  %v2162_v8 = vld [vmem:[#allocation2 + $0x16c] ss:$36 sps:$4 sm:$0xff]  }
  0x4e   :  { %v2150_v62 = vld [vmem:[#allocation5 + $0x118] sm:$0xff]   ;;  %v2156_v2 = vld [vmem:[#allocation2 + $0x120] ss:$36 sps:$4 sm:$0xff]   ;;  %v2157_v4 = vld [vmem:[#allocation2 + $0x128] ss:$36 sps:$4 sm:$0xff]  }
  0x4f   :  { %1761 = vmatpush3.bf16.msra.mxu0 %v2102_v22  ;;  %v2151_v63 = vld [vmem:[#allocation5 + $0x198] sm:$0xff]   ;;  %v2158_v3 = vld [vmem:[#allocation5 + $0x160] sm:$0xff]   ;;  %v2168_v10 = vld [vmem:[#allocation5 + $0x168] sm:$0xff]  }
  0x50   :  { %1825 = vmatpush3.bf16.msra.mxu1 %v2103_v23  ;;  %1762 = vmatprep.subr.bf16.mxu0 %v2104_v24  ;;  %v2159_v5 = vld [vmem:[#allocation5 + $0x1e0] sm:$0xff]   ;;  %v2164_v9 = vld [vmem:[#allocation2 + $0x174] ss:$36 sps:$4 sm:$0xff]   ;;  %v2169_v11 = vld [vmem:[#allocation5 + $0x1e8] sm:$0xff]  }
  0x51   :  { %1826 = vmatprep.subr.bf16.mxu1 %v2105_v25  ;;  %v2160_v6 = vld [vmem:[#allocation5 + $0x120] sm:$0xff]   ;;  %v2166_v12 = vld [vmem:[#allocation2 + $0x168] ss:$36 sps:$4 sm:$0xff]   ;;  %v2167_v15 = vld [vmem:[#allocation2 + $0x170] ss:$36 sps:$4 sm:$0xff]  }
  0x52   :  { %v2161_v7 = vld [vmem:[#allocation5 + $0x1a0] sm:$0xff]   ;;  %v2170_v13 = vld [vmem:[#allocation5 + $0x128] sm:$0xff]   ;;  %v2172_v16 = vld [vmem:[#allocation2 + $0x1b4] ss:$36 sps:$4 sm:$0xff]  }
  0x53   :  { %1763 = vmatpush3.bf16.msra.mxu0 %v2106_v26  ;;  %v2171_v14 = vld [vmem:[#allocation5 + $0x1a8] sm:$0xff]   ;;  %v2174_v17 = vld [vmem:[#allocation2 + $0x1bc] ss:$36 sps:$4 sm:$0xff]   ;;  %v2178_v18 = vld [vmem:[#allocation5 + $0x170] sm:$0xff]  }
  0x54   :  { %1827 = vmatpush3.bf16.msra.mxu1 %v2107_v27  ;;  %1764 = vmatprep.subr.bf16.mxu0 %v2108_v28  ;;  %v2179_v19 = vld [vmem:[#allocation5 + $0x1f0] sm:$0xff]   ;;  %v2177_v23 = vld [vmem:[#allocation2 + $0x1b8] ss:$36 sps:$4 sm:$0xff]   ;;  %v2184_v25 = vld [vmem:[#allocation2 + $0x204] ss:$36 sps:$4 sm:$0xff]  }
  0x55   :  { %1828 = vmatprep.subr.bf16.mxu1 %v2109_v29  ;;  %v2180_v20 = vld [vmem:[#allocation5 + $0x130] sm:$0xff]   ;;  %v2182_v24 = vld [vmem:[#allocation2 + $0x1fc] ss:$36 sps:$4 sm:$0xff]  }
  0x56   :  { %v2181_v21 = vld [vmem:[#allocation5 + $0x1b0] sm:$0xff]   ;;  %v2188_v26 = vld [vmem:[#allocation5 + $0x178] sm:$0xff]  }
  0x57   :  { %1765 = vmatpush3.bf16.msra.mxu0 %v2110_v30  ;;  %v2176_v22 = vld [vmem:[#allocation2 + $0x1b0] ss:$36 sps:$4 sm:$0xff]   ;;  %v2189_v27 = vld [vmem:[#allocation5 + $0x1f8] sm:$0xff]  }
  0x58   :  { %1829 = vmatpush3.bf16.msra.mxu1 %v2111_v31  ;;  %1878 = vmatprep.subr.bf16.mxu0 %v2118_v36  ;;  %v2190_v28 = vld [vmem:[#allocation5 + $0x138] sm:$0xff]   ;;  %v2187_v31 = vld [vmem:[#allocation2 + $0x200] ss:$36 sps:$4 sm:$0xff]   ;;  %v2192_v35 = vld [vmem:[#allocation2 + $0x10] ss:$36 sps:$4 sm:$0xff]  }
  0x59   :  { %1942 = vmatprep.subr.bf16.mxu1 %v2119_v37  ;;  %v2191_v29 = vld [vmem:[#allocation5 + $0x1b8] sm:$0xff]  }
  0x5a   :  { %1119 = vmatmul.mubr.bf16.vlgmr.msra.gmra.mrb[0].mxu0 %v2112_v32  ;;  %v2186_v30 = vld [vmem:[#allocation2 + $0x1f8] ss:$36 sps:$4 sm:$0xff]   ;;  %v2198_v32 = vld [vmem:[#allocation5 + $0x200] sm:$0xff]  }
  0x5b   :  { %1216 = vmatmul.mubr.bf16.vlgmr.msra.gmra.mrb[0].mxu1 %v2115_v34  ;;  %1879 = vmatpush3.bf16.msra.mxu0 %v2120_v38  ;;  %v2194_v33 = vld [vmem:[#allocation2 + $0x14] ss:$36 sps:$4 sm:$0xff]   ;;  %v2197_v34 = vld [vmem:[#allocation2 + $0x1c] ss:$36 sps:$4 sm:$0xff]   ;;  %v2201_v38 = vld [vmem:[#allocation2 + $0x64] ss:$36 sps:$4 sm:$0xff]  }
  0x5c   :  { %1943 = vmatpush3.bf16.msra.mxu1 %v2121_v39  ;;  %1126 = vmatprep.mubr.bf16.mxu0 %v2122_v40  ;;  %v2195_v36 = vld [vmem:[#allocation2 + $0x18] ss:$36 sps:$4 sm:$0xff]   ;;  %v2205_v39 = vld [vmem:[#allocation5 + $0x208] sm:$0xff]   ;;  %v2212_v40 = vld [vmem:[#allocation5 + $0x210] sm:$0xff]  }
  0x5d   :  { %1223 = vmatprep.mubr.bf16.mxu1 %v2124_v41  ;;  %1880 = vmatprep.subr.bf16.mxu0 %v2128_v44  ;;  %v2199_v37 = vld [vmem:[#allocation2 + $0x5c] ss:$36 sps:$4 sm:$0xff]   ;;  %v2208_v44 = vld [vmem:[#allocation2 + $0xac] ss:$36 sps:$4 sm:$0xff]  }
  0x5e   :  { %1944 = vmatprep.subr.bf16.mxu1 %v2129_v45  ;;  %v2203_v41 = vld [vmem:[#allocation2 + $0x58] ss:$36 sps:$4 sm:$0xff]  }
  0x5f   :  { %1881 = vmatpush3.bf16.msra.mxu0 %v2130_v46  ;;  %v2219_v45 = vld [vmem:[#allocation5 + $0x218] sm:$0xff]   ;;  %v2226_v46 = vld [vmem:[#allocation5 + $0x220] sm:$0xff]  }
  0x60   :  { %1945 = vmatpush3.bf16.msra.mxu1 %v2131_v47  ;;  %1882 = vmatprep.subr.bf16.mxu0 %v2138_v52  ;;  %v2210_v47 = vld [vmem:[#allocation2 + $0xa0] ss:$36 sps:$4 sm:$0xff]   ;;  %v2217_v52 = vld [vmem:[#allocation2 + $0xe8] ss:$36 sps:$4 sm:$0xff]  }
  0x61   :  { %1946 = vmatprep.subr.bf16.mxu1 %v2139_v53  ;;  %v2240_v53 = vld [vmem:[#allocation5 + $0x230] sm:$0xff]  }
  0x62   :  { %1127 = vmatmul.mubr.bf16.gmra.mrb[4].mxu0 %v2126_v42  ;;  %v2204_v42 = vld [vmem:[#allocation2 + $0x60] ss:$36 sps:$4 sm:$0xff]  }
  0x63   :  { %1224 = vmatmul.mubr.bf16.gmra.mrb[4].mxu1 %v2127_v43  ;;  %1134 = vmatprep.mubr.bf16.mxu0 %v2132_v48  ;;  %v2206_v43 = vld [vmem:[#allocation2 + $0xa4] ss:$36 sps:$4 sm:$0xff]  }
  0x64   :  { %1231 = vmatprep.mubr.bf16.mxu1 %v2134_v49  ;;  %1883 = vmatpush3.bf16.msra.mxu0 %v2140_v54  ;;  %v2211_v48 = vld [vmem:[#allocation2 + $0xa8] ss:$36 sps:$4 sm:$0xff]   ;;  %v2218_v54 = vld [vmem:[#allocation2 + $0xf0] ss:$36 sps:$4 sm:$0xff]  }
  0x65   :  { %1947 = vmatpush3.bf16.msra.mxu1 %v2141_v55  ;;  %1884 = vmatprep.subr.bf16.mxu0 %v2148_v60  ;;  %v2213_v49 = vld [vmem:[#allocation2 + $0xec] ss:$36 sps:$4 sm:$0xff]   ;;  %v2220_v55 = vld [vmem:[#allocation2 + $0x134] ss:$36 sps:$4 sm:$0xff]   ;;  %v2227_v60 = vld [vmem:[#allocation2 + $0x17c] ss:$36 sps:$4 sm:$0xff]  }
  0x66   :  { %1948 = vmatprep.subr.bf16.mxu1 %v2149_v61  ;;  %v2229_v61 = vld [vmem:[#allocation2 + $0x184] ss:$36 sps:$4 sm:$0xff]  }
  0x68   :  { %1885 = vmatpush3.bf16.msra.mxu0 %v2150_v62  ;;  %v2231_v62 = vld [vmem:[#allocation2 + $0x178] ss:$36 sps:$4 sm:$0xff]  }
  0x69   :  { %1949 = vmatpush3.bf16.msra.mxu1 %v2151_v63  ;;  %1886 = vmatprep.subr.bf16.mxu0 %v2158_v3  ;;  %v2232_v63 = vld [vmem:[#allocation2 + $0x180] ss:$36 sps:$4 sm:$0xff]   ;;  %v2239_v3 = vld [vmem:[#allocation2 + $0x1c8] ss:$36 sps:$4 sm:$0xff]  }
  0x6a   :  { %1135 = vmatmul.mubr.bf16.gmra.mrb[8].mxu0 %v2136_v50  ;;  %1950 = vmatprep.subr.bf16.mxu1 %v2159_v5  ;;  %v2215_v50 = vld [vmem:[#allocation2 + $0xf4] ss:$36 sps:$4 sm:$0xff]  }
  0x6b   :  { %1232 = vmatmul.mubr.bf16.gmra.mrb[8].mxu1 %v2137_v51  ;;  %1142 = vmatprep.mubr.bf16.mxu0 %v2142_v56  ;;  %v2233_v51 = vld [vmem:[#allocation5 + $0x228] sm:$0xff]   ;;  %v2222_v56 = vld [vmem:[#allocation2 + $0x13c] ss:$36 sps:$4 sm:$0xff]   ;;  %v2243_v5 = vld [vmem:[#allocation2 + $0x214] ss:$36 sps:$4 sm:$0xff]  }
  0x6c   :  { %1239 = vmatprep.mubr.bf16.mxu1 %v2144_v57  ;;  %1887 = vmatpush3.bf16.msra.mxu0 %v2160_v6  ;;  %v2247_v57 = vld [vmem:[#allocation5 + $0x238] sm:$0xff]   ;;  %v2245_v6 = vld [vmem:[#allocation2 + $0x208] ss:$36 sps:$4 sm:$0xff]  }
  0x6d   :  { %1951 = vmatpush3.bf16.msra.mxu1 %v2161_v7  ;;  %1888 = vmatprep.subr.bf16.mxu0 %v2168_v10  ;;  %v2246_v7 = vld [vmem:[#allocation2 + $0x210] ss:$36 sps:$4 sm:$0xff]   ;;  %v2250_v10 = vld [vmem:[#allocation2 + $0x68] ss:$36 sps:$4 sm:$0xff]  }
  0x6e   :  { %1952 = vmatprep.subr.bf16.mxu1 %v2169_v11  ;;  %v2251_v11 = vld [vmem:[#allocation2 + $0x188] ss:$36 sps:$4 sm:$0xff]  }
  0x70   :  { %1889 = vmatpush3.bf16.msra.mxu0 %v2170_v13  ;;  %v2253_v13 = vld [vmem:[#allocation2 + $0x1d0] ss:$36 sps:$4 sm:$0xff]  }
  0x71   :  { %1953 = vmatpush3.bf16.msra.mxu1 %v2171_v14  ;;  %1890 = vmatprep.subr.bf16.mxu0 %v2178_v18  ;;  %v2254_v14 = vld [vmem:[#allocation2 + $0xf8] ss:$36 sps:$4 sm:$0xff]   ;;  %v2416_v18 = vld [vmem:[#allocation7] ss:$0 sm:$0xff] }
  0x72   :  { %1143 = vmatmul.mubr.bf16.gmra.mrb[12].mxu0 %v2146_v58  ;;  %1954 = vmatprep.subr.bf16.mxu1 %v2179_v19  ;;  %v2224_v58 = vld [vmem:[#allocation2 + $0x130] ss:$36 sps:$4 sm:$0xff]  }
  0x73   :  { %1240 = vmatmul.mubr.bf16.gmra.mrb[12].mxu1 %v2147_v59  ;;  %1150 = vmatprep.mubr.bf16.mxu0 %v2152_v0  ;;  %v2225_v59 = vld [vmem:[#allocation2 + $0x138] ss:$36 sps:$4 sm:$0xff]   ;;  %v2234_v0 = vld [vmem:[#allocation2 + $0x1c4] ss:$36 sps:$4 sm:$0xff]  }
  0x74   :  { %1247 = vmatprep.mubr.bf16.mxu1 %v2154_v1  ;;  %1891 = vmatpush3.bf16.msra.mxu0 %v2180_v20  ;;  %v2236_v1 = vld [vmem:[#allocation2 + $0x1cc] ss:$36 sps:$4 sm:$0xff]  }
  0x75   :  { %1955 = vmatpush3.bf16.msra.mxu1 %v2181_v21  ;;  %1892 = vmatprep.subr.bf16.mxu0 %v2188_v26 }
  0x76   :  { %1956 = vmatprep.subr.bf16.mxu1 %v2189_v27 }
  0x78   :  { %1893 = vmatpush3.bf16.msra.mxu0 %v2190_v28 }
  0x79   :  { %1957 = vmatpush3.bf16.msra.mxu1 %v2191_v29  ;;  %2022 = vmatprep.subr.bf16.mxu0 %v2198_v32 }
  0x7a   :  { %1151 = vmatmul.mubr.bf16.gmra.mrb[16].mxu0 %v2156_v2  ;;  %2054 = vmatprep.subr.bf16.mxu1 %v2198_v32  ;;  %v2238_v2 = vld [vmem:[#allocation2 + $0x1c0] ss:$36 sps:$4 sm:$0xff]  }
  0x7b   :  { %1248 = vmatmul.mubr.bf16.gmra.mrb[16].mxu1 %v2157_v4  ;;  %1158 = vmatprep.mubr.bf16.mxu0 %v2162_v8  ;;  %v2241_v4 = vld [vmem:[#allocation2 + $0x20c] ss:$36 sps:$4 sm:$0xff]   ;;  %v2248_v8 = vld [vmem:[#allocation2 + $0x20] ss:$36 sps:$4 sm:$0xff]  }
  0x7c   :  { %1255 = vmatprep.mubr.bf16.mxu1 %v2164_v9  ;;  %v2249_v9 = vld [vmem:[#allocation2 + $0x140] ss:$36 sps:$4 sm:$0xff]  }
  0x82   :  { %1159 = vmatmul.mubr.bf16.gmra.mrb[20].mxu0 %v2166_v12  ;;  %v2252_v12 = vld [vmem:[#allocation2 + $0xb0] ss:$36 sps:$4 sm:$0xff]  }
  0x83   :  { %1256 = vmatmul.mubr.bf16.gmra.mrb[20].mxu1 %v2167_v15  ;;  %1166 = vmatprep.mubr.bf16.mxu0 %v2172_v16  ;;  %v2255_v15 = vld [vmem:[#allocation2 + $0x218] ss:$36 sps:$4 sm:$0xff]  }
  0x84   :  { %1263 = vmatprep.mubr.bf16.mxu1 %v2174_v17 }
  0x8a   :  { %1167 = vmatmul.mubr.bf16.gmra.mrb[24].mxu0 %v2176_v22 }
  0x8b   :  { %1264 = vmatmul.mubr.bf16.gmra.mrb[24].mxu1 %v2177_v23  ;;  %1174 = vmatprep.mubr.bf16.mxu0 %v2182_v24 }
  0x8c   :  { %1271 = vmatprep.mubr.bf16.mxu1 %v2184_v25 }
  0x92   :  { %1175 = vmatmul.mubr.bf16.gmra.mrb[28].mxu0 %v2186_v30 }
  0x93   :  { %1272 = vmatmul.mubr.bf16.gmra.mrb[28].mxu1 %v2187_v31  ;;  %1312 = vmatprep.mubr.bf16.mxu0 %v2194_v33 }
  0x94   :  { %1409 = vmatprep.mubr.bf16.mxu1 %v2197_v34 }
  0x9a   :  { %1313 = vmatmul.mubr.bf16.vlgmr.msra.gmra.mrb[32].mxu0 %v2192_v35 }
  0x9b   :  { %1410 = vmatmul.mubr.bf16.vlgmr.msra.gmra.mrb[32].mxu1 %v2195_v36  ;;  %2023 = vmatpush3.bf16.msra.mxu0 %v2198_v32 }
  0x9c   :  { %2062 = vmatpush3.bf16.msra.mxu1 %v2198_v32  ;;  %1320 = vmatprep.mubr.bf16.mxu0 %v2199_v37 }
  0x9d   :  { %1417 = vmatprep.mubr.bf16.mxu1 %v2201_v38  ;;  %2024 = vmatprep.subr.bf16.mxu0 %v2205_v39 }
  0x9e   :  { %2055 = vmatprep.subr.bf16.mxu1 %v2205_v39 }
  0x9f   :  { %2025 = vmatpush3.bf16.msra.mxu0 %v2205_v39 }
  0xa0   :  { %2063 = vmatpush3.bf16.msra.mxu1 %v2205_v39  ;;  %2026 = vmatprep.subr.bf16.mxu0 %v2212_v40 }
  0xa1   :  { %2056 = vmatprep.subr.bf16.mxu1 %v2212_v40 }
  0xa2   :  { %1321 = vmatmul.mubr.bf16.gmra.mrb[36].mxu0 %v2203_v41 }
  0xa3   :  { %1418 = vmatmul.mubr.bf16.gmra.mrb[36].mxu1 %v2204_v42  ;;  %1328 = vmatprep.mubr.bf16.mxu0 %v2206_v43 }
  0xa4   :  { %1425 = vmatprep.mubr.bf16.mxu1 %v2208_v44  ;;  %2027 = vmatpush3.bf16.msra.mxu0 %v2212_v40 }
  0xa5   :  { %2064 = vmatpush3.bf16.msra.mxu1 %v2212_v40  ;;  %2028 = vmatprep.subr.bf16.mxu0 %v2219_v45 }
  0xa6   :  { %2057 = vmatprep.subr.bf16.mxu1 %v2219_v45 }
  0xa8   :  { %2029 = vmatpush3.bf16.msra.mxu0 %v2219_v45 }
  0xa9   :  { %2065 = vmatpush3.bf16.msra.mxu1 %v2219_v45  ;;  %2030 = vmatprep.subr.bf16.mxu0 %v2226_v46 }
  0xaa   :  { %1329 = vmatmul.mubr.bf16.gmra.mrb[40].mxu0 %v2210_v47  ;;  %2058 = vmatprep.subr.bf16.mxu1 %v2226_v46 }
  0xab   :  { %1426 = vmatmul.mubr.bf16.gmra.mrb[40].mxu1 %v2211_v48  ;;  %1336 = vmatprep.mubr.bf16.mxu0 %v2213_v49 }
  0xac   :  { %1433 = vmatprep.mubr.bf16.mxu1 %v2215_v50  ;;  %2031 = vmatpush3.bf16.msra.mxu0 %v2226_v46 }
  0xad   :  { %2066 = vmatpush3.bf16.msra.mxu1 %v2226_v46  ;;  %2032 = vmatprep.subr.bf16.mxu0 %v2233_v51 }
  0xae   :  { %2059 = vmatprep.subr.bf16.mxu1 %v2233_v51 }
  0xb0   :  { %2033 = vmatpush3.bf16.msra.mxu0 %v2233_v51 }
  0xb1   :  { %2067 = vmatpush3.bf16.msra.mxu1 %v2233_v51  ;;  %2034 = vmatprep.subr.bf16.mxu0 %v2240_v53 }
  0xb2   :  { %1337 = vmatmul.mubr.bf16.gmra.mrb[44].mxu0 %v2217_v52  ;;  %2060 = vmatprep.subr.bf16.mxu1 %v2240_v53 }
  0xb3   :  { %1434 = vmatmul.mubr.bf16.gmra.mrb[44].mxu1 %v2218_v54  ;;  %1344 = vmatprep.mubr.bf16.mxu0 %v2220_v55 }
  0xb4   :  { %1441 = vmatprep.mubr.bf16.mxu1 %v2222_v56  ;;  %2035 = vmatpush3.bf16.msra.mxu0 %v2240_v53 }
  0xb5   :  { %2068 = vmatpush3.bf16.msra.mxu1 %v2240_v53  ;;  %2036 = vmatprep.subr.bf16.mxu0 %v2247_v57 }
  0xb6   :  { %2061 = vmatprep.subr.bf16.mxu1 %v2247_v57 }
  0xb8   :  { %2037 = vmatpush3.bf16.msra.mxu0 %v2247_v57 }
  0xb9   :  { %2069 = vmatpush3.bf16.msra.mxu1 %v2247_v57 }
  0xba   :  { %1345 = vmatmul.mubr.bf16.gmra.mrb[48].mxu0 %v2224_v58 }
  0xbb   :  { %1442 = vmatmul.mubr.bf16.gmra.mrb[48].mxu1 %v2225_v59  ;;  %1352 = vmatprep.mubr.bf16.mxu0 %v2227_v60 }
  0xbc   :  { %1449 = vmatprep.mubr.bf16.mxu1 %v2229_v61 }
  0xc2   :  { %1353 = vmatmul.mubr.bf16.gmra.mrb[52].mxu0 %v2231_v62 }
  0xc3   :  { %1450 = vmatmul.mubr.bf16.gmra.mrb[52].mxu1 %v2232_v63  ;;  %1360 = vmatprep.mubr.bf16.mxu0 %v2234_v0 }
  0xc4   :  { %1457 = vmatprep.mubr.bf16.mxu1 %v2236_v1 }
  0xca   :  { %1361 = vmatmul.mubr.bf16.gmra.mrb[56].mxu0 %v2238_v2 }
  0xcb   :  { %1458 = vmatmul.mubr.bf16.gmra.mrb[56].mxu1 %v2239_v3  ;;  %1368 = vmatprep.mubr.bf16.mxu0 %v2241_v4 }
  0xcc   :  { %1465 = vmatprep.mubr.bf16.mxu1 %v2243_v5 }
  0xd2   :  { %1369 = vmatmul.mubr.bf16.gmra.mrb[60].mxu0 %v2245_v6 }
  0xd3   :  { %1466 = vmatmul.mubr.bf16.gmra.mrb[60].mxu1 %v2246_v7  ;;  %2038 = vmatprep.mubr.bf16.mxu0 %v2248_v8 }
  0xd4   :  { %2046 = vmatprep.mubr.bf16.mxu1 %v2249_v9 }
  0xda   :  { %2039 = vmatmul.mubr.bf16.vlgmr.msra.gmra.mrb[64].mxu0 %v2250_v10 }
  0xdb   :  { %2047 = vmatmul.mubr.bf16.vlgmr.msra.gmra.mrb[64].mxu1 %v2251_v11  ;;  %2042 = vmatprep.mubr.bf16.mxu0 %v2252_v12 }
  0xdc   :  { %2050 = vmatprep.mubr.bf16.mxu1 %v2253_v13 }
  0xe2   :  { %2043 = vmatmul.mubr.bf16.gmra.mrb[68].mxu0 %v2254_v14 }
  0xe3   :  { %2051 = vmatmul.mubr.bf16.gmra.mrb[68].mxu1 %v2255_v15 }
 0x12d   :  { %v1766_v16 = vpop.f32.mrb[0].mxu0 }
 0x12e   :  { %v1830_v17 = vpop.f32.mrb[0].mxu1  ;;  %v1767_v19 = vpop.f32.mrb[1].mxu0 }
 0x12f   :  { %v1768_v20 = vadd.f32 %v1767_v19, %v1766_v16  ;;  %v1831_v21 = vpop.f32.mrb[1].mxu1  ;;  %v1769_v22 = vpop.f32.mrb[2].mxu0 }
 0x130   :  { %v1832_v23 = vadd.f32 %v1831_v21, %v1830_v17  ;;  %v1833_v24 = vpop.f32.mrb[2].mxu1  ;;  %v1770_v25 = vpop.f32.mrb[3].mxu0 }
 0x131   :  { %v1121_v26 = vadd.f32 %v1768_v20, %v2416_v18  ;;  %v1771_v27 = vadd.f32 %v1770_v25, %v1769_v22  ;;  %v1834_v28 = vpop.f32.mrb[3].mxu1 }
 0x132   :  { %v1835_v29 = vadd.f32 %v1834_v28, %v1833_v24 }
 0x133   :  { %v2419_v30 = vadd.f32 %v1832_v23, %v1121_v26  ;;  %v1124_v31 = vadd.f32 %v1771_v27, %v2416_v18 }
 0x135   :  { %v2422_v32 = vadd.f32 %v1835_v29, %v1124_v31  ;;  %v1772_v33 = vpop.f32.mrb[4].mxu0 }
 0x136   :  { %v1836_v34 = vpop.f32.mrb[4].mxu1  ;;  %v1773_v35 = vpop.f32.mrb[5].mxu0 }
 0x137   :  { %v1774_v36 = vadd.f32 %v1773_v35, %v1772_v33  ;;  %v1837_v37 = vpop.f32.mrb[5].mxu1  ;;  %v1775_v38 = vpop.f32.mrb[6].mxu0 }
 0x138   :  { %v1838_v39 = vadd.f32 %v1837_v37, %v1836_v34  ;;  %v1839_v40 = vpop.f32.mrb[6].mxu1  ;;  %v1776_v41 = vpop.f32.mrb[7].mxu0 }
 0x139   :  { %v1129_v42 = vadd.f32 %v1774_v36, %v2416_v18  ;;  %v1777_v43 = vadd.f32 %v1776_v41, %v1775_v38  ;;  %v1840_v44 = vpop.f32.mrb[7].mxu1 }
 0x13a   :  { %v1841_v45 = vadd.f32 %v1840_v44, %v1839_v40 }
 0x13b   :  { %v2425_v46 = vadd.f32 %v1838_v39, %v1129_v42  ;;  %v1132_v47 = vadd.f32 %v1777_v43, %v2416_v18 }
 0x13d   :  { %v2428_v48 = vadd.f32 %v1841_v45, %v1132_v47  ;;  %v1778_v49 = vpop.f32.mrb[8].mxu0 }
 0x13e   :  { %v1842_v50 = vpop.f32.mrb[8].mxu1  ;;  %v1779_v51 = vpop.f32.mrb[9].mxu0 }
 0x13f   :  { %v1780_v52 = vadd.f32 %v1779_v51, %v1778_v49  ;;  %v1843_v53 = vpop.f32.mrb[9].mxu1  ;;  %v1781_v54 = vpop.f32.mrb[10].mxu0 }
 0x140   :  { %v1844_v55 = vadd.f32 %v1843_v53, %v1842_v50  ;;  %v1845_v56 = vpop.f32.mrb[10].mxu1  ;;  %v1782_v57 = vpop.f32.mrb[11].mxu0 }
 0x141   :  { %v1137_v58 = vadd.f32 %v1780_v52, %v2416_v18  ;;  %v1783_v59 = vadd.f32 %v1782_v57, %v1781_v54  ;;  %v1846_v60 = vpop.f32.mrb[11].mxu1 }
 0x142   :  { %v1847_v61 = vadd.f32 %v1846_v60, %v1845_v56 }
 0x143   :  { %v2431_v62 = vadd.f32 %v1844_v55, %v1137_v58  ;;  %v1140_v63 = vadd.f32 %v1783_v59, %v2416_v18 }
 0x145   :  { %v2434_v0 = vadd.f32 %v1847_v61, %v1140_v63  ;;  %v1784_v1 = vpop.f32.mrb[12].mxu0 }
 0x146   :  { %v1848_v2 = vpop.f32.mrb[12].mxu1  ;;  %v1785_v3 = vpop.f32.mrb[13].mxu0 }
 0x147   :  { %v1786_v4 = vadd.f32 %v1785_v3, %v1784_v1  ;;  %v1849_v5 = vpop.f32.mrb[13].mxu1  ;;  %v1787_v6 = vpop.f32.mrb[14].mxu0 }
 0x148   :  { %v1850_v7 = vadd.f32 %v1849_v5, %v1848_v2  ;;  %v1851_v8 = vpop.f32.mrb[14].mxu1  ;;  %v1788_v9 = vpop.f32.mrb[15].mxu0 }
 0x149   :  { %v1145_v10 = vadd.f32 %v1786_v4, %v2416_v18  ;;  %v1789_v11 = vadd.f32 %v1788_v9, %v1787_v6  ;;  %v1852_v12 = vpop.f32.mrb[15].mxu1 }
 0x14a   :  { %v1853_v13 = vadd.f32 %v1852_v12, %v1851_v8 }
 0x14b   :  { %v2437_v14 = vadd.f32 %v1850_v7, %v1145_v10  ;;  %v1148_v15 = vadd.f32 %v1789_v11, %v2416_v18 }
 0x14d   :  { %v2440_v16 = vadd.f32 %v1853_v13, %v1148_v15  ;;  %v1790_v17 = vpop.f32.mrb[16].mxu0 }
 0x14e   :  { %v1854_v19 = vpop.f32.mrb[16].mxu1  ;;  %v1791_v20 = vpop.f32.mrb[17].mxu0 }
 0x14f   :  { %v1792_v21 = vadd.f32 %v1791_v20, %v1790_v17  ;;  %v1855_v22 = vpop.f32.mrb[17].mxu1  ;;  %v1793_v23 = vpop.f32.mrb[18].mxu0 }
 0x150   :  { %v1856_v24 = vadd.f32 %v1855_v22, %v1854_v19  ;;  %v1857_v25 = vpop.f32.mrb[18].mxu1  ;;  %v1794_v26 = vpop.f32.mrb[19].mxu0 }
 0x151   :  { %v1153_v27 = vadd.f32 %v1792_v21, %v2416_v18  ;;  %v1795_v28 = vadd.f32 %v1794_v26, %v1793_v23  ;;  %v1858_v29 = vpop.f32.mrb[19].mxu1 }
 0x152   :  { %v1859_v31 = vadd.f32 %v1858_v29, %v1857_v25 }
 0x153   :  { %v2443_v33 = vadd.f32 %v1856_v24, %v1153_v27  ;;  %v1156_v34 = vadd.f32 %v1795_v28, %v2416_v18 }
 0x155   :  { %v2446_v35 = vadd.f32 %v1859_v31, %v1156_v34  ;;  %v1796_v36 = vpop.f32.mrb[20].mxu0 }
 0x156   :  { %v1860_v37 = vpop.f32.mrb[20].mxu1  ;;  %v1797_v38 = vpop.f32.mrb[21].mxu0 }
 0x157   :  { %v1798_v39 = vadd.f32 %v1797_v38, %v1796_v36  ;;  %v1861_v40 = vpop.f32.mrb[21].mxu1  ;;  %v1799_v41 = vpop.f32.mrb[22].mxu0 }
 0x158   :  { %v1862_v42 = vadd.f32 %v1861_v40, %v1860_v37  ;;  %v1863_v43 = vpop.f32.mrb[22].mxu1  ;;  %v1800_v44 = vpop.f32.mrb[23].mxu0 }
 0x159   :  { %v1161_v45 = vadd.f32 %v1798_v39, %v2416_v18  ;;  %v1801_v47 = vadd.f32 %v1800_v44, %v1799_v41  ;;  %v1864_v49 = vpop.f32.mrb[23].mxu1 }
 0x15a   :  { %v1865_v50 = vadd.f32 %v1864_v49, %v1863_v43 }
 0x15b   :  { %v2449_v51 = vadd.f32 %v1862_v42, %v1161_v45  ;;  %v1164_v52 = vadd.f32 %v1801_v47, %v2416_v18 }
 0x15d   :  { %v2452_v53 = vadd.f32 %v1865_v50, %v1164_v52  ;;  %v1802_v54 = vpop.f32.mrb[24].mxu0 }
 0x15e   :  { %v1866_v55 = vpop.f32.mrb[24].mxu1  ;;  %v1803_v56 = vpop.f32.mrb[25].mxu0 }
 0x15f   :  { %v1804_v57 = vadd.f32 %v1803_v56, %v1802_v54  ;;  %v1867_v58 = vpop.f32.mrb[25].mxu1  ;;  %v1805_v59 = vpop.f32.mrb[26].mxu0 }
 0x160   :  { %v1868_v60 = vadd.f32 %v1867_v58, %v1866_v55  ;;  %v1869_v61 = vpop.f32.mrb[26].mxu1  ;;  %v1806_v63 = vpop.f32.mrb[27].mxu0 }
 0x161   :  { %v1169_v1 = vadd.f32 %v1804_v57, %v2416_v18  ;;  %v1807_v2 = vadd.f32 %v1806_v63, %v1805_v59  ;;  %v1870_v3 = vpop.f32.mrb[27].mxu1 }
 0x162   :  { %v1871_v4 = vadd.f32 %v1870_v3, %v1869_v61 }
 0x163   :  { %v2455_v5 = vadd.f32 %v1868_v60, %v1169_v1  ;;  %v1172_v6 = vadd.f32 %v1807_v2, %v2416_v18 }
 0x165   :  { %v2458_v7 = vadd.f32 %v1871_v4, %v1172_v6  ;;  %v1808_v8 = vpop.f32.mrb[28].mxu0 }
 0x166   :  { %v1872_v9 = vpop.f32.mrb[28].mxu1  ;;  %v1809_v10 = vpop.f32.mrb[29].mxu0 }
 0x167   :  { %v1810_v11 = vadd.f32 %v1809_v10, %v1808_v8  ;;  %v1873_v12 = vpop.f32.mrb[29].mxu1  ;;  %v1811_v13 = vpop.f32.mrb[30].mxu0 }
 0x168   :  { %v1874_v15 = vadd.f32 %v1873_v12, %v1872_v9  ;;  %v1875_v17 = vpop.f32.mrb[30].mxu1  ;;  %v1812_v19 = vpop.f32.mrb[31].mxu0 }
 0x169   :  { %v1177_v20 = vadd.f32 %v1810_v11, %v2416_v18  ;;  %v1813_v21 = vadd.f32 %v1812_v19, %v1811_v13  ;;  %v1876_v22 = vpop.f32.mrb[31].mxu1 }
 0x16a   :  { %v1877_v23 = vadd.f32 %v1876_v22, %v1875_v17 }
 0x16b   :  { %v2461_v24 = vadd.f32 %v1874_v15, %v1177_v20  ;;  %v1180_v25 = vadd.f32 %v1813_v21, %v2416_v18 }
 0x16d   :  { %v2464_v26 = vadd.f32 %v1877_v23, %v1180_v25  ;;  %v1894_v27 = vpop.f32.mrb[32].mxu0 }
 0x16e   :  { %v1958_v28 = vpop.f32.mrb[32].mxu1  ;;  %v1895_v29 = vpop.f32.mrb[33].mxu0 }
 0x16f   :  { %v1896_v31 = vadd.f32 %v1895_v29, %v1894_v27  ;;  %v1959_v34 = vpop.f32.mrb[33].mxu1  ;;  %v1897_v36 = vpop.f32.mrb[34].mxu0 }
 0x170   :  { %v1960_v37 = vadd.f32 %v1959_v34, %v1958_v28  ;;  %v1961_v38 = vpop.f32.mrb[34].mxu1  ;;  %v1898_v39 = vpop.f32.mrb[35].mxu0 }
 0x171   :  { %v1315_v40 = vadd.f32 %v1896_v31, %v2419_v30  ;;  %v1899_v41 = vadd.f32 %v1898_v39, %v1897_v36  ;;  %v1962_v42 = vpop.f32.mrb[35].mxu1 }
 0x172   :  { %v1963_v43 = vadd.f32 %v1962_v42, %v1961_v38 }
 0x173   :  { %v1318_v44 = vadd.f32 %v1899_v41, %v2422_v32  ;;  %v2468_v45 = vadd.f32 %v1960_v37, %v1315_v40 }
 0x175   :  { %v1900_v18 = vpop.f32.mrb[36].mxu0  ;;  %v2470_v47 = vadd.f32 %v1963_v43, %v1318_v44 }
 0x176   :  { %v1964_v49 = vpop.f32.mrb[36].mxu1  ;;  %v1901_v50 = vpop.f32.mrb[37].mxu0 }
 0x177   :  { %v1902_v52 = vadd.f32 %v1901_v50, %v1900_v18  ;;  %v1965_v54 = vpop.f32.mrb[37].mxu1  ;;  %v1903_v55 = vpop.f32.mrb[38].mxu0 }
 0x178   :  { %v1966_v56 = vadd.f32 %v1965_v54, %v1964_v49  ;;  %v1967_v57 = vpop.f32.mrb[38].mxu1  ;;  %v1904_v58 = vpop.f32.mrb[39].mxu0 }
 0x179   :  { %v1323_v30 = vadd.f32 %v1902_v52, %v2425_v46  ;;  %v1905_v59 = vadd.f32 %v1904_v58, %v1903_v55  ;;  %v1968_v60 = vpop.f32.mrb[39].mxu1 }
 0x17a   :  { %v1969_v61 = vadd.f32 %v1968_v60, %v1967_v57 }
 0x17b   :  { %v1326_v32 = vadd.f32 %v1905_v59, %v2428_v48  ;;  %v2474_v63 = vadd.f32 %v1966_v56, %v1323_v30 }
 0x17d   :  { %v1906_v1 = vpop.f32.mrb[40].mxu0  ;;  %v2476_v2 = vadd.f32 %v1969_v61, %v1326_v32 }
 0x17e   :  { %v1970_v3 = vpop.f32.mrb[40].mxu1  ;;  %v1907_v4 = vpop.f32.mrb[41].mxu0 }
 0x17f   :  { %v1908_v6 = vadd.f32 %v1907_v4, %v1906_v1  ;;  %v1971_v8 = vpop.f32.mrb[41].mxu1  ;;  %v1909_v9 = vpop.f32.mrb[42].mxu0 }
 0x180   :  { %v1972_v10 = vadd.f32 %v1971_v8, %v1970_v3  ;;  %v1973_v11 = vpop.f32.mrb[42].mxu1  ;;  %v1910_v12 = vpop.f32.mrb[43].mxu0 }
 0x181   :  { %v1331_v46 = vadd.f32 %v1908_v6, %v2431_v62  ;;  %v1911_v13 = vadd.f32 %v1910_v12, %v1909_v9  ;;  %v1974_v15 = vpop.f32.mrb[43].mxu1 }
 0x182   :  { %v1975_v17 = vadd.f32 %v1974_v15, %v1973_v11 }
 0x183   :  { %v1334_v48 = vadd.f32 %v1911_v13, %v2434_v0  ;;  %v2480_v19 = vadd.f32 %v1972_v10, %v1331_v46 }
 0x185   :  { %v1912_v20 = vpop.f32.mrb[44].mxu0  ;;  %v2482_v21 = vadd.f32 %v1975_v17, %v1334_v48 }
 0x186   :  { %v1976_v22 = vpop.f32.mrb[44].mxu1  ;;  %v1913_v23 = vpop.f32.mrb[45].mxu0 }
 0x187   :  { %v1914_v25 = vadd.f32 %v1913_v23, %v1912_v20  ;;  %v1977_v27 = vpop.f32.mrb[45].mxu1  ;;  %v1915_v28 = vpop.f32.mrb[46].mxu0 }
 0x188   :  { %v1978_v29 = vadd.f32 %v1977_v27, %v1976_v22  ;;  %v1979_v31 = vpop.f32.mrb[46].mxu1  ;;  %v1916_v34 = vpop.f32.mrb[47].mxu0 }
 0x189   :  { %v1339_v62 = vadd.f32 %v1914_v25, %v2437_v14  ;;  %v1917_v36 = vadd.f32 %v1916_v34, %v1915_v28  ;;  %v1980_v37 = vpop.f32.mrb[47].mxu1 }
 0x18a   :  { %v1981_v38 = vadd.f32 %v1980_v37, %v1979_v31 }
 0x18b   :  { %v1342_v0 = vadd.f32 %v1917_v36, %v2440_v16  ;;  %v2486_v39 = vadd.f32 %v1978_v29, %v1339_v62 }
 0x18d   :  { %v1918_v40 = vpop.f32.mrb[48].mxu0  ;;  %v2488_v41 = vadd.f32 %v1981_v38, %v1342_v0 }
 0x18e   :  { %v1982_v42 = vpop.f32.mrb[48].mxu1  ;;  %v1919_v43 = vpop.f32.mrb[49].mxu0 }
 0x18f   :  { %v1920_v44 = vadd.f32 %v1919_v43, %v1918_v40  ;;  %v1983_v18 = vpop.f32.mrb[49].mxu1  ;;  %v1921_v49 = vpop.f32.mrb[50].mxu0 }
 0x190   :  { %v1984_v50 = vadd.f32 %v1983_v18, %v1982_v42  ;;  %v1985_v52 = vpop.f32.mrb[50].mxu1  ;;  %v1922_v54 = vpop.f32.mrb[51].mxu0 }
 0x191   :  { %v1347_v14 = vadd.f32 %v1920_v44, %v2443_v33  ;;  %v1923_v55 = vadd.f32 %v1922_v54, %v1921_v49  ;;  %v1986_v56 = vpop.f32.mrb[51].mxu1 }
 0x192   :  { %v1987_v57 = vadd.f32 %v1986_v56, %v1985_v52 }
 0x193   :  { %v1350_v16 = vadd.f32 %v1923_v55, %v2446_v35  ;;  %v1444_v58 = vadd.f32 %v1984_v50, %v1347_v14 }
 0x195   :  { %v1924_v30 = vpop.f32.mrb[52].mxu0  ;;  %v2492_v59 = vadd.f32 %v1987_v57, %v1350_v16 }
 0x196   :  { %v1988_v60 = vpop.f32.mrb[52].mxu1  ;;  %v1925_v61 = vpop.f32.mrb[53].mxu0 }
 0x197   :  { %v1926_v32 = vadd.f32 %v1925_v61, %v1924_v30  ;;  %v1989_v1 = vpop.f32.mrb[53].mxu1  ;;  %v1927_v3 = vpop.f32.mrb[54].mxu0 }
 0x198   :  { %v1990_v4 = vadd.f32 %v1989_v1, %v1988_v60  ;;  %v1991_v6 = vpop.f32.mrb[54].mxu1  ;;  %v1928_v8 = vpop.f32.mrb[55].mxu0 }
 0x199   :  { %v1355_v9 = vadd.f32 %v1926_v32, %v2449_v51  ;;  %v1929_v33 = vadd.f32 %v1928_v8, %v1927_v3  ;;  %v1992_v10 = vpop.f32.mrb[55].mxu1 }
 0x19a   :  { %v1993_v11 = vadd.f32 %v1992_v10, %v1991_v6 }
 0x19b   :  { %v1358_v12 = vadd.f32 %v1929_v33, %v2452_v53  ;;  %v1452_v35 = vadd.f32 %v1990_v4, %v1355_v9 }
 0x19d   :  { %v1930_v46 = vpop.f32.mrb[56].mxu0  ;;  %v1455_v13 = vadd.f32 %v1993_v11, %v1358_v12 }
 0x19e   :  { %v1994_v15 = vpop.f32.mrb[56].mxu1  ;;  %v1931_v17 = vpop.f32.mrb[57].mxu0 }
 0x19f   :  { %v1932_v48 = vadd.f32 %v1931_v17, %v1930_v46  ;;  %v1995_v20 = vpop.f32.mrb[57].mxu1  ;;  %v1933_v22 = vpop.f32.mrb[58].mxu0 }
 0x1a0   :  { %v1996_v23 = vadd.f32 %v1995_v20, %v1994_v15  ;;  %v1997_v25 = vpop.f32.mrb[58].mxu1  ;;  %v1934_v27 = vpop.f32.mrb[59].mxu0 }
 0x1a1   :  { %v1363_v28 = vadd.f32 %v1932_v48, %v2455_v5  ;;  %v1935_v29 = vadd.f32 %v1934_v27, %v1933_v22  ;;  %v1998_v51 = vpop.f32.mrb[59].mxu1 }
 0x1a2   :  { %v1999_v31 = vadd.f32 %v1998_v51, %v1997_v25 }
 0x1a3   :  { %v1366_v34 = vadd.f32 %v1935_v29, %v2458_v7  ;;  %v1460_v62 = vadd.f32 %v1996_v23, %v1363_v28 }
 0x1a5   :  { %v1936_v53 = vpop.f32.mrb[60].mxu0  ;;  %v2498_v36 = vadd.f32 %v1999_v31, %v1366_v34 }
 0x1a6   :  { %v2000_v37 = vpop.f32.mrb[60].mxu1  ;;  %v1937_v38 = vpop.f32.mrb[61].mxu0 }
 0x1a7   :  { %v1938_v0 = vadd.f32 %v1937_v38, %v1936_v53  ;;  %v2001_v40 = vpop.f32.mrb[61].mxu1  ;;  %v1939_v42 = vpop.f32.mrb[62].mxu0 }
 0x1a8   :  { %v2002_v43 = vadd.f32 %v2001_v40, %v2000_v37  ;;  %v2003_v44 = vpop.f32.mrb[62].mxu1  ;;  %v1940_v18 = vpop.f32.mrb[63].mxu0 }
 0x1a9   :  { %v1371_v49 = vadd.f32 %v1938_v0, %v2461_v24  ;;  %v1941_v5 = vadd.f32 %v1940_v18, %v1939_v42  ;;  %v2004_v50 = vpop.f32.mrb[63].mxu1 }
 0x1aa   :  { %v2005_v52 = vadd.f32 %v2004_v50, %v2003_v44 }
 0x1ab   :  { %v1374_v54 = vadd.f32 %v1941_v5, %v2464_v26  ;;  %v1468_v7 = vadd.f32 %v2002_v43, %v1371_v49 }
 0x1ad   :  { %v2040_v14 = vpop.f32.mrb[64].mxu0  ;;  %v1471_v55 = vadd.f32 %v2005_v52, %v1374_v54 }
 0x1ae   :  { %v1517_v56 = vadd.f32 %v2040_v14, %v2474_v63  ;;  %v2048_v57 = vpop.f32.mrb[64].mxu1  ;;  %v1508_v16 = vpop.f32.mrb[65].mxu0 }
 0x1af   :  { %v1549_v30 = vadd.f32 %v2048_v57, %v1452_v35  ;;  %v1509_v60 = vadd.f32 %v1508_v16, %v2468_v45  ;;  %v1540_v61 = vpop.f32.mrb[65].mxu1  ;;  %v2041_v32 = vpop.f32.mrb[66].mxu0 }
 0x1b0   :  { %1573 = vst [vmem:[#allocation8 + $0x10] sm:$0xff] %v1517_v56  ;;  %v1541_v1 = vadd.f32 %v1540_v61, %v1444_v58  ;;  %v1520_v24 = vadd.f32 %v2041_v32, %v2476_v2  ;;  %v2049_v3 = vpop.f32.mrb[66].mxu1  ;;  %v1511_v4 = vpop.f32.mrb[67].mxu0 }
 0x1b1   :  { %1581 = vst [vmem:[#allocation8 + $0x50] sm:$0xff] %v1549_v30  ;;  %1571 = vst [vmem:[#allocation8] sm:$0xff] %v1509_v60  ;;  %v1552_v26 = vadd.f32 %v2049_v3, %v1455_v13  ;;  %v1512_v6 = vadd.f32 %v1511_v4, %v2470_v47  ;;  %v1543_v8 = vpop.f32.mrb[67].mxu1 }
 0x1b2   :  { %1579 = vst [vmem:[#allocation8 + $0x40] sm:$0xff] %v1541_v1  ;;  %1574 = vst [vmem:[#allocation8 + $0x18] sm:$0xff] %v1520_v24  ;;  %v1544_v63 = vadd.f32 %v1543_v8, %v2492_v59 }
 0x1b3   :  { %1582 = vst [vmem:[#allocation8 + $0x58] sm:$0xff] %v1552_v26  ;;  %1572 = vst [vmem:[#allocation8 + $0x8] sm:$0xff] %v1512_v6 }
 0x1b4   :  { %1580 = vst [vmem:[#allocation8 + $0x48] sm:$0xff] %v1544_v63 }
 0x1b5   :  { %v2044_v45 = vpop.f32.mrb[68].mxu0 }
 0x1b6   :  { %v1533_v58 = vadd.f32 %v2044_v45, %v2486_v39  ;;  %v2052_v9 = vpop.f32.mrb[68].mxu1  ;;  %v1524_v2 = vpop.f32.mrb[69].mxu0 }
 0x1b7   :  { %v1565_v33 = vadd.f32 %v2052_v9, %v1468_v7  ;;  %v1525_v10 = vadd.f32 %v1524_v2, %v2480_v19  ;;  %v1556_v11 = vpop.f32.mrb[69].mxu1  ;;  %v2045_v47 = vpop.f32.mrb[70].mxu0 }
 0x1b8   :  { %1577 = vst [vmem:[#allocation8 + $0x30] sm:$0xff] %v1533_v58  ;;  %v1557_v12 = vadd.f32 %v1556_v11, %v1460_v62  ;;  %v1536_v35 = vadd.f32 %v2045_v47, %v2488_v41  ;;  %v2053_v59 = vpop.f32.mrb[70].mxu1  ;;  %v1527_v46 = vpop.f32.mrb[71].mxu0 }
 0x1b9   :  { %1585 = vst [vmem:[#allocation8 + $0x70] sm:$0xff] %v1565_v33  ;;  %1575 = vst [vmem:[#allocation8 + $0x20] sm:$0xff] %v1525_v10  ;;  %v1568_v13 = vadd.f32 %v2053_v59, %v1471_v55  ;;  %v1528_v39 = vadd.f32 %v1527_v46, %v2482_v21  ;;  %v1559_v15 = vpop.f32.mrb[71].mxu1 }
 0x1ba   :  { %1583 = vst [vmem:[#allocation8 + $0x60] sm:$0xff] %v1557_v12  ;;  %1578 = vst [vmem:[#allocation8 + $0x38] sm:$0xff] %v1536_v35  ;;  %v1560_v17 = vadd.f32 %v1559_v15, %v2498_v36 }
 0x1bb   :  { %1586 = vst [vmem:[#allocation8 + $0x78] sm:$0xff] %v1568_v13  ;;  %1576 = vst [vmem:[#allocation8 + $0x28] sm:$0xff] %v1528_v39 }
 0x1bc   :  { %1584 = vst [vmem:[#allocation8 + $0x68] sm:$0xff] %v1560_v17 }
 0x1bd   :  { %2333 = shalt.err (!%p2330_p0)
}
 0x1be   :  { %s2334_s28 = scalar_lea.hbm %s2527_s3, 2048 }
 0x1bf   :  { %p2335_p1 = scmp.ne.s32.totalorder %s2527_s3, %s2334_s28  ;;  %p2338_p2 = scmp.lt.u32.totalorder %s2334_s28, %s2527_s3 }
 0x1c1   :  { %p2340_p3 = pnand %p2338_p2, %p2335_p1 }
 0x1c3   :  { %2343 = shalt.err (!%p2340_p3)
}
 0x1c4   :  { %s2358_s6 = smov 128   ;;  %s2359_s7 = smov 8  }
 0x1c5   :  { %1598 = dma.vmem_to_hbm [thread:$0]  %s1593_s24, 2048, %s2527_s3, [#allocation4], %s2358_s6, %s2358_s6, %s2359_s7  }
 0x1c6   :  { %2348 = dma.done.wait [#allocation4], 2048  }
 0x1c7   :  { %2349 = vsyncadd [#allocation4], 4294965248 }
 0x1c8   :  { %1602 = vsyncpa [#allocation3], 1 }
 0x1c9   :  { %1603 = vsyncpa [#allocation6], 1 }
 0x1ca   :  { %1604 = vsyncpa [#allocation4], 1 }

</bundles_post_ra>
